<compile_context>
chip_gen: v7x
topology: tpu7x:2x2x1
jax: 0.10.0
libtpu: 0.0.40
codegen_flags: <defaults>
</compile_context>

<pallas_src>
import functools
import math

import jax
import jax.numpy as jnp
from jax.experimental import pallas as pl
from jax.experimental.pallas import tpu as pltpu

# Make the pure-JAX reference use full f32 matmuls (matches in-kernel MXU f32).
jax.config.update("jax_default_matmul_precision", "highest")


# ---------------------------------------------------------------------------
# Kernels
# ---------------------------------------------------------------------------

def _embed_scale_pe_kernel(ids_ref, table_ref, pe_ref, o_ref, *, scale):
    """Fused embedding lookup * sqrt(d_model) + positional-encoding add.

    ids_ref:   [M, 1] int32 token ids (M = batch*seq, row-major)
    table_ref: [V, D] embedding table
    pe_ref:    [M, D] positional-encoding rows, already laid out per token row
    o_ref:     [M, D]
    """
    # TODO(synk): one-hot-matmul gather is fine for this demo-sized vocab; a
    # real vocab should use a scalar-prefetch index_map / DMA gather instead.
    ids = ids_ref[...]                                            # [M, 1] int32
    m = ids_ref.shape[0]
    v = table_ref.shape[0]
    onehot = (jax.lax.broadcasted_iota(jnp.int32, (m, v), 1) == ids)
    emb = jnp.dot(onehot.astype(jnp.float32), table_ref[...],
                  preferred_element_type=jnp.float32)             # [M, D]
    # TODO(synk): training-mode dropout (pltpu.prng_seed/prng_random_bits)
    # intentionally not applied — eval semantics.
    o_ref[...] = emb * scale + pe_ref[...]


def _mha_kernel(xq_ref, xkv_ref, wq_ref, bq_ref, wk_ref, bk_ref,
                wv_ref, bv_ref, wo_ref, bo_ref, mask_ref, o_ref,
                *, num_heads, scale):
    """Fused multi-head attention for one batch element (grid over batch).

    q/k/v projections, per-head scaled-dot-product attention with the module's
    `masked_fill(mask == 0, -1e9)` + softmax, and the output projection —
    without round-tripping any intermediate through HBM.
    """
    xq = xq_ref[0]                                                # [Sq, D]
    xkv = xkv_ref[0]                                              # [Sk, D]
    mask = mask_ref[0]                                            # [Sq, Sk] int32

    q = jnp.dot(xq, wq_ref[...], preferred_element_type=jnp.float32) + bq_ref[...]
    k = jnp.dot(xkv, wk_ref[...], preferred_element_type=jnp.float32) + bk_ref[...]
    v = jnp.dot(xkv, wv_ref[...], preferred_element_type=jnp.float32) + bv_ref[...]

    d_model = wq_ref.shape[1]
    d_k = d_model // num_heads
    out = jnp.zeros((xq.shape[0], d_model), jnp.float32)
    for h in range(num_heads):                                    # static unrolled
        sl = slice(h * d_k, (h + 1) * d_k)
        qh, kh, vh = q[:, sl], k[:, sl], v[:, sl]
        s = jax.lax.dot_general(qh, kh, (((1,), (1,)), ((), ())),
                                preferred_element_type=jnp.float32) * scale
        s = jnp.where(mask == 0, -1e9, s)
        s = s - jnp.max(s, axis=-1, keepdims=True)
        p = jnp.exp(s)
        p = p / jnp.sum(p, axis=-1, keepdims=True)
        # TODO(synk): attention-prob dropout omitted (eval semantics).
        ctx_h = jnp.dot(p, vh, preferred_element_type=jnp.float32)          # [Sq, d_k]
        # concat-over-heads followed by @wo  ==  sum_h ctx_h @ wo[h*dk:(h+1)*dk, :]
        out = out + jnp.dot(ctx_h, wo_ref[sl, :], preferred_element_type=jnp.float32)
    o_ref[0] = out + bo_ref[...]


def _add_norm_kernel(x_ref, r_ref, gamma_ref, beta_ref, o_ref, *, eps, denom):
    """Residual add + the module's LayerNorm: a_2*(y-mean)/(std+eps)+b_2,
    where std is the unbiased (N-1) standard deviation (torch.Tensor.std)."""
    y = x_ref[...] + r_ref[...]                                   # [M, D]
    mean = jnp.mean(y, axis=-1, keepdims=True)
    diff = y - mean
    std = jnp.sqrt(jnp.sum(diff * diff, axis=-1, keepdims=True) / denom)
    o_ref[...] = gamma_ref[...] * diff / (std + eps) + beta_ref[...]


def _ffn_kernel(x_ref, w1_ref, b1_ref, w2_ref, b2_ref, o_ref):
    """Fused FeedForward: linear1 -> relu -> (dropout: identity) -> linear2."""
    h = jnp.dot(x_ref[...], w1_ref[...], preferred_element_type=jnp.float32) + b1_ref[...]
    h = jnp.maximum(h, 0.0)
    o_ref[...] = jnp.dot(h, w2_ref[...], preferred_element_type=jnp.float32) + b2_ref[...]


def _linear_kernel(x_ref, w_ref, b_ref, o_ref):
    """Generator head: x @ w + b."""
    o_ref[...] = jnp.dot(x_ref[...], w_ref[...],
                         preferred_element_type=jnp.float32) + b_ref[...]


# ---------------------------------------------------------------------------
# pallas_call wrappers
# ---------------------------------------------------------------------------

_VMEM = functools.partial(pl.BlockSpec, memory_space=pltpu.MemorySpace.VMEM)


def _single_block_call(kernel, out_shape, *args):
    """Gridless call: every operand is one full block resident in VMEM."""
    return pl.pallas_call(
        kernel,
        out_shape=out_shape,
        in_specs=[_VMEM() for _ in args],
        out_specs=_VMEM(),
    )(*args)


def embed_scale_pe(ids_flat, table, pe_rows, d_model):
    m = ids_flat.shape[0]
    kern = functools.partial(_embed_scale_pe_kernel, scale=math.sqrt(d_model))
    return _single_block_call(kern, jax.ShapeDtypeStruct((m, d_model), jnp.float32),
                              ids_flat, table, pe_rows)


def mha_forward(x_q, x_kv, p, mask, num_heads):
    b, s_q, d = x_q.shape
    s_k = x_kv.shape[1]
    kern = functools.partial(_mha_kernel, num_heads=num_heads,
                             scale=1.0 / math.sqrt(d // num_heads))
    batched = lambda s1, s2: pl.BlockSpec((1, s1, s2), lambda i: (i, 0, 0))
    shared = lambda shp: pl.BlockSpec(shp, lambda i: (0,) * len(shp))
    return pl.pallas_call(
        kern,
        out_shape=jax.ShapeDtypeStruct((b, s_q, d), jnp.float32),
        grid=(b,),
        in_specs=[
            batched(s_q, d), batched(s_k, d),
            shared((d, d)), shared((1, d)),
            shared((d, d)), shared((1, d)),
            shared((d, d)), shared((1, d)),
            shared((d, d)), shared((1, d)),
            batched(s_q, s_k),
        ],
        out_specs=batched(s_q, d),
        # Tiny grid: keep it on one core. For production shapes use "parallel"
        # so v7x's two TensorCores split the batch axis.
        compiler_params=pltpu.CompilerParams(dimension_semantics=("arbitrary",)),
    )(x_q, x_kv, p["wq"], p["bq"], p["wk"], p["bk"], p["wv"], p["bv"],
      p["wo"], p["bo"], mask)


def add_norm(x2d, r2d, norm_p, eps=1e-6):
    m, d = x2d.shape
    kern = functools.partial(_add_norm_kernel, eps=eps, denom=float(d - 1))
    return _single_block_call(kern, jax.ShapeDtypeStruct((m, d), jnp.float32),
                              x2d, r2d, norm_p["g"], norm_p["b"])


def ffn_forward(x2d, p):
    m, d = x2d.shape
    return _single_block_call(_ffn_kernel, jax.ShapeDtypeStruct((m, d), jnp.float32),
                              x2d, p["w1"], p["b1"], p["w2"], p["b2"])


def linear_forward(x2d, w, bias):
    m, n = x2d.shape[0], w.shape[1]
    return _single_block_call(_linear_kernel, jax.ShapeDtypeStruct((m, n), jnp.float32),
                              x2d, w, bias)


# ---------------------------------------------------------------------------
# Layer / model composition (wrapper glue mirroring the PyTorch module)
# ---------------------------------------------------------------------------

def encoder_layer_forward(x, p, self_mask, num_heads):
    b, s, d = x.shape
    attn = mha_forward(x, x, p["self_attn"], self_mask, num_heads)
    x = add_norm(x.reshape(b * s, d), attn.reshape(b * s, d), p["norm1"])
    ff = ffn_forward(x, p["ff"])
    x = add_norm(x, ff, p["norm2"])
    return x.reshape(b, s, d)


def decoder_layer_forward(x, memory, p, cross_mask, self_mask, num_heads):
    b, s, d = x.shape
    attn = mha_forward(x, x, p["self_attn"], self_mask, num_heads)
    x2 = add_norm(x.reshape(b * s, d), attn.reshape(b * s, d),
                  p["norm1"]).reshape(b, s, d)
    cross = mha_forward(x2, memory, p["cross_attn"], cross_mask, num_heads)
    x3 = add_norm(x2.reshape(b * s, d), cross.reshape(b * s, d), p["norm2"])
    ff = ffn_forward(x3, p["ff"])
    x4 = add_norm(x3, ff, p["norm3"])
    return x4.reshape(b, s, d)


def transformer_forward(params, src, tgt, src_mask, tgt_mask, *, num_heads):
    b, s_src = src.shape
    s_tgt = tgt.shape[1]
    d = params["src_emb"].shape[1]
    pe = params["pe"]

    # NOTE: the original module registers pe with shape [max_len, 1, d_model]
    # and adds pe[:x.size(0)]; with batch-first activations (as its
    # MultiHeadAttention requires) that indexes the PE table by *batch*
    # position and broadcasts over the sequence. Reproduced faithfully.
    pe_src = jnp.repeat(pe[:b], s_src, axis=0)                    # [b*s_src, d]
    pe_tgt = jnp.repeat(pe[:b], s_tgt, axis=0)                    # [b*s_tgt, d]

    # ---- encode ----
    x = embed_scale_pe(src.reshape(b * s_src, 1), params["src_emb"], pe_src, d)
    x = x.reshape(b, s_src, d)
    enc_mask = jnp.broadcast_to(src_mask, (b, s_src, s_src)).astype(jnp.int32)
    for lp in params["enc_layers"]:
        x = encoder_layer_forward(x, lp, enc_mask, num_heads)
    memory = x

    # ---- decode ----
    y = embed_scale_pe(tgt.reshape(b * s_tgt, 1), params["tgt_emb"], pe_tgt, d)
    y = y.reshape(b, s_tgt, d)
    self_mask = jnp.broadcast_to(tgt_mask, (b, s_tgt, s_tgt)).astype(jnp.int32)
    cross_mask = jnp.broadcast_to(src_mask, (b, s_tgt, s_src)).astype(jnp.int32)
    for lp in params["dec_layers"]:
        y = decoder_layer_forward(y, memory, lp, cross_mask, self_mask, num_heads)

    # ---- generator ----
    logits = linear_forward(y.reshape(b * s_tgt, d), params["gen_w"], params["gen_b"])
    return logits.reshape(b, s_tgt, params["gen_w"].shape[1])


# ---------------------------------------------------------------------------
# Parameter / table construction (host-side setup, not kernels)
# ---------------------------------------------------------------------------

def make_pe_table(d_model, max_len, dtype=jnp.float32):
    """Sinusoidal positional-encoding table [max_len, d_model] (even d_model)."""
    position = jnp.arange(max_len, dtype=jnp.float32)[:, None]
    div_term = jnp.exp(jnp.arange(0, d_model, 2, dtype=jnp.float32)
                       * (-math.log(10000.0) / d_model))
    pe = jnp.zeros((max_len, d_model), jnp.float32)
    pe = pe.at[:, 0::2].set(jnp.sin(position * div_term))
    pe = pe.at[:, 1::2].set(jnp.cos(position * div_term))
    return pe.astype(dtype)


def init_params(key, src_vocab, tgt_vocab, d_model, num_heads, d_ff,
                n_enc, n_dec, max_len):
    keys = iter(jax.random.split(key, 256))

    def xavier(shape):
        limit = math.sqrt(6.0 / (shape[0] + shape[1]))
        return jax.random.uniform(next(keys), shape, jnp.float32, -limit, limit)

    def vec(n, base=0.0):
        return base + 0.02 * jax.random.normal(next(keys), (1, n), jnp.float32)

    def mha_p():
        return {"wq": xavier((d_model, d_model)), "bq": vec(d_model),
                "wk": xavier((d_model, d_model)), "bk": vec(d_model),
                "wv": xavier((d_model, d_model)), "bv": vec(d_model),
                "wo": xavier((d_model, d_model)), "bo": vec(d_model)}

    def norm_p():
        return {"g": vec(d_model, base=1.0), "b": vec(d_model)}

    def ff_p():
        return {"w1": xavier((d_model, d_ff)), "b1": vec(d_ff),
                "w2": xavier((d_ff, d_model)), "b2": vec(d_model)}

    return {
        "src_emb": xavier((src_vocab, d_model)),
        "tgt_emb": xavier((tgt_vocab, d_model)),
        "pe": make_pe_table(d_model, max_len),
        "enc_layers": [{"self_attn": mha_p(), "ff": ff_p(),
                        "norm1": norm_p(), "norm2": norm_p()}
                       for _ in range(n_enc)],
        "dec_layers": [{"self_attn": mha_p(), "cross_attn": mha_p(), "ff": ff_p(),
                        "norm1": norm_p(), "norm2": norm_p(), "norm3": norm_p()}
                       for _ in range(n_dec)],
        "gen_w": xavier((d_model, tgt_vocab)),
        "gen_b": vec(tgt_vocab),
    }


# ---------------------------------------------------------------------------
# Pure-JAX reference of the same forward (for the in-script sanity check)
# ---------------------------------------------------------------------------

def ref_transformer_forward(params, src, tgt, src_mask, tgt_mask, *, num_heads):
    d = params["src_emb"].shape[1]
    b, s_src = src.shape
    s_tgt = tgt.shape[1]

    def layer_norm(x, p, eps=1e-6):
        mean = x.mean(-1, keepdims=True)
        var = jnp.sum((x - mean) ** 2, -1, keepdims=True) / (x.shape[-1] - 1)
        return p["g"] * (x - mean) / (jnp.sqrt(var) + eps) + p["b"]

    def mha(xq, xkv, p, mask):
        bb, sq, _ = xq.shape
        sk = xkv.shape[1]
        dk = d // num_heads
        q = (xq @ p["wq"] + p["bq"]).reshape(bb, sq, num_heads, dk).transpose(0, 2, 1, 3)
        k = (xkv @ p["wk"] + p["bk"]).reshape(bb, sk, num_heads, dk).transpose(0, 2, 1, 3)
        v = (xkv @ p["wv"] + p["bv"]).reshape(bb, sk, num_heads, dk).transpose(0, 2, 1, 3)
        s = jnp.einsum("bhqd,bhkd->bhqk", q, k) / math.sqrt(dk)
        s = jnp.where(mask[:, None] == 0, -1e9, s)
        a = jax.nn.softmax(s, axis=-1)
        ctx = jnp.einsum("bhqk,bhkd->bhqd", a, v).transpose(0, 2, 1, 3).reshape(bb, sq, d)
        return ctx @ p["wo"] + p["bo"]

    def ff(x, p):
        return jnp.maximum(x @ p["w1"] + p["b1"], 0.0) @ p["w2"] + p["b2"]

    pe = params["pe"]
    enc_mask = jnp.broadcast_to(src_mask, (b, s_src, s_src)).astype(jnp.int32)
    x = params["src_emb"][src] * math.sqrt(d) + pe[:b][:, None, :]
    for lp in params["enc_layers"]:
        x = layer_norm(x + mha(x, x, lp["self_attn"], enc_mask), lp["norm1"])
        x = layer_norm(x + ff(x, lp["ff"]), lp["norm2"])
    memory = x

    self_mask = jnp.broadcast_to(tgt_mask, (b, s_tgt, s_tgt)).astype(jnp.int32)
    cross_mask = jnp.broadcast_to(src_mask, (b, s_tgt, s_src)).astype(jnp.int32)
    y = params["tgt_emb"][tgt] * math.sqrt(d) + pe[:b][:, None, :]
    for lp in params["dec_layers"]:
        y = layer_norm(y + mha(y, y, lp["self_attn"], self_mask), lp["norm1"])
        y = layer_norm(y + mha(y, memory, lp["cross_attn"], cross_mask), lp["norm2"])
        y = layer_norm(y + ff(y, lp["ff"]), lp["norm3"])
    return y @ params["gen_w"] + params["gen_b"]


# ---------------------------------------------------------------------------
# Demo
# ---------------------------------------------------------------------------

if __name__ == "__main__":
    B, S, D, H, D_FF, VOCAB = 2, 16, 128, 4, 256, 128
    N_ENC, N_DEC = 2, 2

    root = jax.random.PRNGKey(0)
    k_src, k_tgt, k_par = jax.random.split(root, 3)
    src = jax.random.randint(k_src, (B, S), 0, VOCAB, dtype=jnp.int32)
    tgt = jax.random.randint(k_tgt, (B, S), 0, VOCAB, dtype=jnp.int32)
    params = init_params(k_par, VOCAB, VOCAB, D, H, D_FF, N_ENC, N_DEC, max_len=64)

    src_mask = jnp.ones((B, 1, S), jnp.int32)                    # no padding mask
    tgt_mask = jnp.tril(jnp.ones((S, S), jnp.int32))[None]       # causal [1, S, S]

    fwd = jax.jit(functools.partial(transformer_forward, num_heads=H))
    logits = jax.block_until_ready(fwd(params, src, tgt, src_mask, tgt_mask))

    ref = ref_transformer_forward(params, src, tgt, src_mask, tgt_mask, num_heads=H)
    assert logits.shape == (B, S, VOCAB)
    assert bool(jnp.all(jnp.isfinite(logits)))
    err = float(jnp.max(jnp.abs(logits - ref)))
    assert jnp.allclose(logits, ref, rtol=2e-3, atol=2e-3), f"max abs err {err}"

    print("KERNEL_OK")
</pallas_src>

<mosaic_0001>
module attributes {stable_mosaic.version = 11 : i64} {
  func.func @_add_norm_kernel(%arg0: memref<32x128xf32, #tpu.memory_space<vmem>>, %arg1: memref<32x128xf32, #tpu.memory_space<vmem>>, %arg2: memref<1x128xf32, #tpu.memory_space<vmem>>, %arg3: memref<1x128xf32, #tpu.memory_space<vmem>>, %arg4: memref<32x128xf32, #tpu.memory_space<vmem>>) attributes {dimension_semantics = [], scalar_prefetch = 0 : i64, scratch_operands = 0 : i64, tpu.core_type = #tpu.core_type<tc>} {
    %c0 = arith.constant 0 : index
    %c0_0 = arith.constant 0 : index
    %0 = vector.load %arg0[%c0, %c0_0] : memref<32x128xf32, #tpu.memory_space<vmem>>, vector<32x128xf32>
    %c0_1 = arith.constant 0 : index
    %c0_2 = arith.constant 0 : index
    %1 = vector.load %arg1[%c0_1, %c0_2] : memref<32x128xf32, #tpu.memory_space<vmem>>, vector<32x128xf32>
    %2 = arith.addf %0, %1 : vector<32x128xf32>
    %cst = arith.constant dense<0.000000e+00> : vector<32xf32>
    %3 = vector.multi_reduction <add>, %2, %cst [1] : vector<32x128xf32> to vector<32xf32>
    %4 = vector.shape_cast %3 : vector<32xf32> to vector<32x1xf32>
    %cst_3 = arith.constant 1.280000e+02 : f32
    %5 = vector.broadcast %cst_3 : f32 to vector<32x1xf32>
    %6 = arith.divf %4, %5 : vector<32x1xf32>
    %7 = vector.broadcast %6 : vector<32x1xf32> to vector<32x128xf32>
    %8 = arith.subf %2, %7 : vector<32x128xf32>
    %9 = arith.mulf %8, %8 : vector<32x128xf32>
    %cst_4 = arith.constant dense<0.000000e+00> : vector<32xf32>
    %10 = vector.multi_reduction <add>, %9, %cst_4 [1] : vector<32x128xf32> to vector<32xf32>
    %11 = vector.shape_cast %10 : vector<32xf32> to vector<32x1xf32>
    %cst_5 = arith.constant 1.270000e+02 : f32
    %12 = vector.broadcast %cst_5 : f32 to vector<32x1xf32>
    %13 = arith.divf %11, %12 : vector<32x1xf32>
    %14 = math.sqrt %13 : vector<32x1xf32>
    %c0_6 = arith.constant 0 : index
    %c0_7 = arith.constant 0 : index
    %15 = vector.load %arg2[%c0_6, %c0_7] : memref<1x128xf32, #tpu.memory_space<vmem>>, vector<1x128xf32>
    %16 = vector.broadcast %15 : vector<1x128xf32> to vector<32x128xf32>
    %17 = arith.mulf %16, %8 : vector<32x128xf32>
    %cst_8 = arith.constant 9.99999997E-7 : f32
    %18 = vector.broadcast %cst_8 : f32 to vector<32x1xf32>
    %19 = arith.addf %14, %18 : vector<32x1xf32>
    %20 = vector.broadcast %19 : vector<32x1xf32> to vector<32x128xf32>
    %21 = arith.divf %17, %20 : vector<32x128xf32>
    %c0_9 = arith.constant 0 : index
    %c0_10 = arith.constant 0 : index
    %22 = vector.load %arg3[%c0_9, %c0_10] : memref<1x128xf32, #tpu.memory_space<vmem>>, vector<1x128xf32>
    %23 = vector.broadcast %22 : vector<1x128xf32> to vector<32x128xf32>
    %24 = arith.addf %21, %23 : vector<32x128xf32>
    %c0_11 = arith.constant 0 : index
    %c0_12 = arith.constant 0 : index
    %25 = vector.load %arg4[%c0_11, %c0_12] : memref<32x128xf32, #tpu.memory_space<vmem>>, vector<32x128xf32>
    tpu.vector_store %arg4[%c0_11, %c0_12], %24 {strides = array<i32>} : memref<32x128xf32, #tpu.memory_space<vmem>>, vector<32x128xf32>,
    return
  }
}

module attributes {stable_mosaic.version = 11 : i64} {
  func.func @_mha_kernel(%arg0: i32, %arg1: memref<1x16x128xf32, #tpu.memory_space<vmem>>, %arg2: memref<1x16x128xf32, #tpu.memory_space<vmem>>, %arg3: memref<128x128xf32, #tpu.memory_space<vmem>>, %arg4: memref<1x128xf32, #tpu.memory_space<vmem>>, %arg5: memref<128x128xf32, #tpu.memory_space<vmem>>, %arg6: memref<1x128xf32, #tpu.memory_space<vmem>>, %arg7: memref<128x128xf32, #tpu.memory_space<vmem>>, %arg8: memref<1x128xf32, #tpu.memory_space<vmem>>, %arg9: memref<128x128xf32, #tpu.memory_space<vmem>>, %arg10: memref<1x128xf32, #tpu.memory_space<vmem>>, %arg11: memref<1x16x16xi32, #tpu.memory_space<vmem>>, %arg12: memref<1x16x128xf32, #tpu.memory_space<vmem>>) attributes {dimension_semantics = [#tpu.dimension_semantics<arbitrary>], iteration_bounds = array<i64: 2>, scalar_prefetch = 0 : i64, scratch_operands = 0 : i64, tpu.core_type = #tpu.core_type<tc>, window_params = [{transform_indices = @transform_0, window_bounds = array<i64: 1, 16, 128>}, {transform_indices = @transform_1, window_bounds = array<i64: 1, 16, 128>}, {pipeline_mode = #tpu.pipeline_mode<synchronous>, transform_indices = @transform_2, window_bounds = array<i64: 128, 128>}, {pipeline_mode = #tpu.pipeline_mode<synchronous>, transform_indices = @transform_3, window_bounds = array<i64: 1, 128>}, {pipeline_mode = #tpu.pipeline_mode<synchronous>, transform_indices = @transform_4, window_bounds = array<i64: 128, 128>}, {pipeline_mode = #tpu.pipeline_mode<synchronous>, transform_indices = @transform_5, window_bounds = array<i64: 1, 128>}, {pipeline_mode = #tpu.pipeline_mode<synchronous>, transform_indices = @transform_6, window_bounds = array<i64: 128, 128>}, {pipeline_mode = #tpu.pipeline_mode<synchronous>, transform_indices = @transform_7, window_bounds = array<i64: 1, 128>}, {pipeline_mode = #tpu.pipeline_mode<synchronous>, transform_indices = @transform_8, window_bounds = array<i64: 128, 128>}, {pipeline_mode = #tpu.pipeline_mode<synchronous>, transform_indices = @transform_9, window_bounds = array<i64: 1, 128>}, {transform_indices = @transform_10, window_bounds = array<i64: 1, 16, 16>}, {transform_indices = @transform_11, window_bounds = array<i64: 1, 16, 128>}]} {
    %c0 = arith.constant 0 : index
    %c0_0 = arith.constant 0 : index
    %c0_1 = arith.constant 0 : index
    %0 = vector.load %arg1[%c0, %c0_0, %c0_1] : memref<1x16x128xf32, #tpu.memory_space<vmem>>, vector<1x16x128xf32>
    %1 = vector.shape_cast %0 : vector<1x16x128xf32> to vector<16x128xf32>
    %c0_2 = arith.constant 0 : index
    %c0_3 = arith.constant 0 : index
    %c0_4 = arith.constant 0 : index
    %2 = vector.load %arg2[%c0_2, %c0_3, %c0_4] : memref<1x16x128xf32, #tpu.memory_space<vmem>>, vector<1x16x128xf32>
    %3 = vector.shape_cast %2 : vector<1x16x128xf32> to vector<16x128xf32>
    %c0_5 = arith.constant 0 : index
    %c0_6 = arith.constant 0 : index
    %c0_7 = arith.constant 0 : index
    %4 = vector.load %arg11[%c0_5, %c0_6, %c0_7] : memref<1x16x16xi32, #tpu.memory_space<vmem>>, vector<1x16x16xi32>
    %5 = vector.shape_cast %4 : vector<1x16x16xi32> to vector<16x16xi32>
    %c0_8 = arith.constant 0 : index
    %c0_9 = arith.constant 0 : index
    %6 = vector.load %arg3[%c0_8, %c0_9] : memref<128x128xf32, #tpu.memory_space<vmem>>, vector<128x128xf32>
    %cst = arith.constant dense<0.000000e+00> : vector<16x128xf32>
    %7 = tpu.matmul %1, %6, %cst {dimension_numbers = #tpu.dot_dimension_numbers<[1], [0], [0], [1], [0, 0, 1, 1], [], []>, precision = #tpu.contract_precision<fp32>} : vector<16x128xf32>, vector<128x128xf32>, vector<16x128xf32> -> vector<16x128xf32>
    %c0_10 = arith.constant 0 : index
    %c0_11 = arith.constant 0 : index
    %8 = vector.load %arg4[%c0_10, %c0_11] : memref<1x128xf32, #tpu.memory_space<vmem>>, vector<1x128xf32>
    %9 = vector.broadcast %8 : vector<1x128xf32> to vector<16x128xf32>
    %10 = arith.addf %7, %9 : vector<16x128xf32>
    %c0_12 = arith.constant 0 : index
    %c0_13 = arith.constant 0 : index
    %11 = vector.load %arg5[%c0_12, %c0_13] : memref<128x128xf32, #tpu.memory_space<vmem>>, vector<128x128xf32>
    %cst_14 = arith.constant dense<0.000000e+00> : vector<16x128xf32>
    %12 = tpu.matmul %3, %11, %cst_14 {dimension_numbers = #tpu.dot_dimension_numbers<[1], [0], [0], [1], [0, 0, 1, 1], [], []>, precision = #tpu.contract_precision<fp32>} : vector<16x128xf32>, vector<128x128xf32>, vector<16x128xf32> -> vector<16x128xf32>
    %c0_15 = arith.constant 0 : index
    %c0_16 = arith.constant 0 : index
    %13 = vector.load %arg6[%c0_15, %c0_16] : memref<1x128xf32, #tpu.memory_space<vmem>>, vector<1x128xf32>
    %14 = vector.broadcast %13 : vector<1x128xf32> to vector<16x128xf32>
    %15 = arith.addf %12, %14 : vector<16x128xf32>
    %c0_17 = arith.constant 0 : index
    %c0_18 = arith.constant 0 : index
    %16 = vector.load %arg7[%c0_17, %c0_18] : memref<128x128xf32, #tpu.memory_space<vmem>>, vector<128x128xf32>
    %cst_19 = arith.constant dense<0.000000e+00> : vector<16x128xf32>
    %17 = tpu.matmul %3, %16, %cst_19 {dimension_numbers = #tpu.dot_dimension_numbers<[1], [0], [0], [1], [0, 0, 1, 1], [], []>, precision = #tpu.contract_precision<fp32>} : vector<16x128xf32>, vector<128x128xf32>, vector<16x128xf32> -> vector<16x128xf32>
    %c0_20 = arith.constant 0 : index
    %c0_21 = arith.constant 0 : index
    %18 = vector.load %arg8[%c0_20, %c0_21] : memref<1x128xf32, #tpu.memory_space<vmem>>, vector<1x128xf32>
    %19 = vector.broadcast %18 : vector<1x128xf32> to vector<16x128xf32>
    %20 = arith.addf %17, %19 : vector<16x128xf32>
    %cst_22 = arith.constant 0.000000e+00 : f32
    %21 = vector.broadcast %cst_22 : f32 to vector<16x128xf32>
    %22 = vector.extract_strided_slice %10 {offsets = [0, 0], sizes = [16, 32], strides = [1, 1]} : vector<16x128xf32> to vector<16x32xf32>
    %23 = vector.extract_strided_slice %15 {offsets = [0, 0], sizes = [16, 32], strides = [1, 1]} : vector<16x128xf32> to vector<16x32xf32>
    %24 = vector.extract_strided_slice %20 {offsets = [0, 0], sizes = [16, 32], strides = [1, 1]} : vector<16x128xf32> to vector<16x32xf32>
    %cst_23 = arith.constant dense<0.000000e+00> : vector<16x16xf32>
    %25 = tpu.matmul %22, %23, %cst_23 {dimension_numbers = #tpu.dot_dimension_numbers<[1], [1], [0], [0], [0, 0, 1, 0], [], []>, precision = #tpu.contract_precision<fp32>} : vector<16x32xf32>, vector<16x32xf32>, vector<16x16xf32> -> vector<16x16xf32>
    %cst_24 = arith.constant 0.176776692 : f32
    %26 = vector.broadcast %cst_24 : f32 to vector<16x16xf32>
    %27 = arith.mulf %25, %26 : vector<16x16xf32>
    %c0_i32 = arith.constant 0 : i32
    %28 = vector.broadcast %c0_i32 : i32 to vector<16x16xi32>
    %29 = arith.cmpi eq, %5, %28 : vector<16x16xi32>
    %cst_25 = arith.constant -1.000000e+09 : f32
    %30 = vector.broadcast %cst_25 : f32 to vector<16x16xf32>
    %31 = arith.select %29, %30, %27 : vector<16x16xi1>, vector<16x16xf32>
    %cst_26 = arith.constant dense<0xFF800000> : vector<16xf32>
    %32 = vector.multi_reduction <maximumf>, %31, %cst_26 [1] : vector<16x16xf32> to vector<16xf32>
    %33 = vector.shape_cast %32 : vector<16xf32> to vector<16x1xf32>
    %34 = vector.broadcast %33 : vector<16x1xf32> to vector<16x16xf32>
    %35 = arith.subf %31, %34 : vector<16x16xf32>
    %36 = math.exp %35 : vector<16x16xf32>
    %cst_27 = arith.constant dense<0.000000e+00> : vector<16xf32>
    %37 = vector.multi_reduction <add>, %36, %cst_27 [1] : vector<16x16xf32> to vector<16xf32>
    %38 = vector.shape_cast %37 : vector<16xf32> to vector<16x1xf32>
    %39 = vector.broadcast %38 : vector<16x1xf32> to vector<16x16xf32>
    %40 = arith.divf %36, %39 : vector<16x16xf32>
    %cst_28 = arith.constant dense<0.000000e+00> : vector<16x32xf32>
    %41 = tpu.matmul %40, %24, %cst_28 {dimension_numbers = #tpu.dot_dimension_numbers<[1], [0], [0], [1], [0, 0, 1, 1], [], []>, precision = #tpu.contract_precision<fp32>} : vector<16x16xf32>, vector<16x32xf32>, vector<16x32xf32> -> vector<16x32xf32>
    %c0_29 = arith.constant 0 : index
    %c0_30 = arith.constant 0 : index
    %42 = vector.load %arg9[%c0_29, %c0_30] : memref<128x128xf32, #tpu.memory_space<vmem>>, vector<32x128xf32>
    %cst_31 = arith.constant dense<0.000000e+00> : vector<16x128xf32>
    %43 = tpu.matmul %41, %42, %cst_31 {dimension_numbers = #tpu.dot_dimension_numbers<[1], [0], [0], [1], [0, 0, 1, 1], [], []>, precision = #tpu.contract_precision<fp32>} : vector<16x32xf32>, vector<32x128xf32>, vector<16x128xf32> -> vector<16x128xf32>
    %44 = arith.addf %21, %43 : vector<16x128xf32>
    %45 = vector.extract_strided_slice %10 {offsets = [0, 32], sizes = [16, 32], strides = [1, 1]} : vector<16x128xf32> to vector<16x32xf32>
    %46 = vector.extract_strided_slice %15 {offsets = [0, 32], sizes = [16, 32], strides = [1, 1]} : vector<16x128xf32> to vector<16x32xf32>
    %47 = vector.extract_strided_slice %20 {offsets = [0, 32], sizes = [16, 32], strides = [1, 1]} : vector<16x128xf32> to vector<16x32xf32>
    %cst_32 = arith.constant dense<0.000000e+00> : vector<16x16xf32>
    %48 = tpu.matmul %45, %46, %cst_32 {dimension_numbers = #tpu.dot_dimension_numbers<[1], [1], [0], [0], [0, 0, 1, 0], [], []>, precision = #tpu.contract_precision<fp32>} : vector<16x32xf32>, vector<16x32xf32>, vector<16x16xf32> -> vector<16x16xf32>
    %cst_33 = arith.constant 0.176776692 : f32
    %49 = vector.broadcast %cst_33 : f32 to vector<16x16xf32>
    %50 = arith.mulf %48, %49 : vector<16x16xf32>
    %c0_i32_34 = arith.constant 0 : i32
    %51 = vector.broadcast %c0_i32_34 : i32 to vector<16x16xi32>
    %52 = arith.cmpi eq, %5, %51 : vector<16x16xi32>
    %cst_35 = arith.constant -1.000000e+09 : f32
    %53 = vector.broadcast %cst_35 : f32 to vector<16x16xf32>
    %54 = arith.select %52, %53, %50 : vector<16x16xi1>, vector<16x16xf32>
    %cst_36 = arith.constant dense<0xFF800000> : vector<16xf32>
    %55 = vector.multi_reduction <maximumf>, %54, %cst_36 [1] : vector<16x16xf32> to vector<16xf32>
    %56 = vector.shape_cast %55 : vector<16xf32> to vector<16x1xf32>
    %57 = vector.broadcast %56 : vector<16x1xf32> to vector<16x16xf32>
    %58 = arith.subf %54, %57 : vector<16x16xf32>
    %59 = math.exp %58 : vector<16x16xf32>
    %cst_37 = arith.constant dense<0.000000e+00> : vector<16xf32>
    %60 = vector.multi_reduction <add>, %59, %cst_37 [1] : vector<16x16xf32> to vector<16xf32>
    %61 = vector.shape_cast %60 : vector<16xf32> to vector<16x1xf32>
    %62 = vector.broadcast %61 : vector<16x1xf32> to vector<16x16xf32>
    %63 = arith.divf %59, %62 : vector<16x16xf32>
    %cst_38 = arith.constant dense<0.000000e+00> : vector<16x32xf32>
    %64 = tpu.matmul %63, %47, %cst_38 {dimension_numbers = #tpu.dot_dimension_numbers<[1], [0], [0], [1], [0, 0, 1, 1], [], []>, precision = #tpu.contract_precision<fp32>} : vector<16x16xf32>, vector<16x32xf32>, vector<16x32xf32> -> vector<16x32xf32>
    %c32 = arith.constant 32 : index
    %c0_39 = arith.constant 0 : index
    %65 = vector.load %arg9[%c32, %c0_39] : memref<128x128xf32, #tpu.memory_space<vmem>>, vector<32x128xf32>
    %cst_40 = arith.constant dense<0.000000e+00> : vector<16x128xf32>
    %66 = tpu.matmul %64, %65, %cst_40 {dimension_numbers = #tpu.dot_dimension_numbers<[1], [0], [0], [1], [0, 0, 1, 1], [], []>, precision = #tpu.contract_precision<fp32>} : vector<16x32xf32>, vector<32x128xf32>, vector<16x128xf32> -> vector<16x128xf32>
    %67 = arith.addf %44, %66 : vector<16x128xf32>
    %68 = vector.extract_strided_slice %10 {offsets = [0, 64], sizes = [16, 32], strides = [1, 1]} : vector<16x128xf32> to vector<16x32xf32>
    %69 = vector.extract_strided_slice %15 {offsets = [0, 64], sizes = [16, 32], strides = [1, 1]} : vector<16x128xf32> to vector<16x32xf32>
    %70 = vector.extract_strided_slice %20 {offsets = [0, 64], sizes = [16, 32], strides = [1, 1]} : vector<16x128xf32> to vector<16x32xf32>
    %cst_41 = arith.constant dense<0.000000e+00> : vector<16x16xf32>
    %71 = tpu.matmul %68, %69, %cst_41 {dimension_numbers = #tpu.dot_dimension_numbers<[1], [1], [0], [0], [0, 0, 1, 0], [], []>, precision = #tpu.contract_precision<fp32>} : vector<16x32xf32>, vector<16x32xf32>, vector<16x16xf32> -> vector<16x16xf32>
    %cst_42 = arith.constant 0.176776692 : f32
    %72 = vector.broadcast %cst_42 : f32 to vector<16x16xf32>
    %73 = arith.mulf %71, %72 : vector<16x16xf32>
    %c0_i32_43 = arith.constant 0 : i32
    %74 = vector.broadcast %c0_i32_43 : i32 to vector<16x16xi32>
    %75 = arith.cmpi eq, %5, %74 : vector<16x16xi32>
    %cst_44 = arith.constant -1.000000e+09 : f32
    %76 = vector.broadcast %cst_44 : f32 to vector<16x16xf32>
    %77 = arith.select %75, %76, %73 : vector<16x16xi1>, vector<16x16xf32>
    %cst_45 = arith.constant dense<0xFF800000> : vector<16xf32>
    %78 = vector.multi_reduction <maximumf>, %77, %cst_45 [1] : vector<16x16xf32> to vector<16xf32>
    %79 = vector.shape_cast %78 : vector<16xf32> to vector<16x1xf32>
    %80 = vector.broadcast %79 : vector<16x1xf32> to vector<16x16xf32>
    %81 = arith.subf %77, %80 : vector<16x16xf32>
    %82 = math.exp %81 : vector<16x16xf32>
    %cst_46 = arith.constant dense<0.000000e+00> : vector<16xf32>
    %83 = vector.multi_reduction <add>, %82, %cst_46 [1] : vector<16x16xf32> to vector<16xf32>
    %84 = vector.shape_cast %83 : vector<16xf32> to vector<16x1xf32>
    %85 = vector.broadcast %84 : vector<16x1xf32> to vector<16x16xf32>
    %86 = arith.divf %82, %85 : vector<16x16xf32>
    %cst_47 = arith.constant dense<0.000000e+00> : vector<16x32xf32>
    %87 = tpu.matmul %86, %70, %cst_47 {dimension_numbers = #tpu.dot_dimension_numbers<[1], [0], [0], [1], [0, 0, 1, 1], [], []>, precision = #tpu.contract_precision<fp32>} : vector<16x16xf32>, vector<16x32xf32>, vector<16x32xf32> -> vector<16x32xf32>
    %c64 = arith.constant 64 : index
    %c0_48 = arith.constant 0 : index
    %88 = vector.load %arg9[%c64, %c0_48] : memref<128x128xf32, #tpu.memory_space<vmem>>, vector<32x128xf32>
    %cst_49 = arith.constant dense<0.000000e+00> : vector<16x128xf32>
    %89 = tpu.matmul %87, %88, %cst_49 {dimension_numbers = #tpu.dot_dimension_numbers<[1], [0], [0], [1], [0, 0, 1, 1], [], []>, precision = #tpu.contract_precision<fp32>} : vector<16x32xf32>, vector<32x128xf32>, vector<16x128xf32> -> vector<16x128xf32>
    %90 = arith.addf %67, %89 : vector<16x128xf32>
    %91 = vector.extract_strided_slice %10 {offsets = [0, 96], sizes = [16, 32], strides = [1, 1]} : vector<16x128xf32> to vector<16x32xf32>
    %92 = vector.extract_strided_slice %15 {offsets = [0, 96], sizes = [16, 32], strides = [1, 1]} : vector<16x128xf32> to vector<16x32xf32>
    %93 = vector.extract_strided_slice %20 {offsets = [0, 96], sizes = [16, 32], strides = [1, 1]} : vector<16x128xf32> to vector<16x32xf32>
    %cst_50 = arith.constant dense<0.000000e+00> : vector<16x16xf32>
    %94 = tpu.matmul %91, %92, %cst_50 {dimension_numbers = #tpu.dot_dimension_numbers<[1], [1], [0], [0], [0, 0, 1, 0], [], []>, precision = #tpu.contract_precision<fp32>} : vector<16x32xf32>, vector<16x32xf32>, vector<16x16xf32> -> vector<16x16xf32>
    %cst_51 = arith.constant 0.176776692 : f32
    %95 = vector.broadcast %cst_51 : f32 to vector<16x16xf32>
    %96 = arith.mulf %94, %95 : vector<16x16xf32>
    %c0_i32_52 = arith.constant 0 : i32
    %97 = vector.broadcast %c0_i32_52 : i32 to vector<16x16xi32>
    %98 = arith.cmpi eq, %5, %97 : vector<16x16xi32>
    %cst_53 = arith.constant -1.000000e+09 : f32
    %99 = vector.broadcast %cst_53 : f32 to vector<16x16xf32>
    %100 = arith.select %98, %99, %96 : vector<16x16xi1>, vector<16x16xf32>
    %cst_54 = arith.constant dense<0xFF800000> : vector<16xf32>
    %101 = vector.multi_reduction <maximumf>, %100, %cst_54 [1] : vector<16x16xf32> to vector<16xf32>
    %102 = vector.shape_cast %101 : vector<16xf32> to vector<16x1xf32>
    %103 = vector.broadcast %102 : vector<16x1xf32> to vector<16x16xf32>
    %104 = arith.subf %100, %103 : vector<16x16xf32>
    %105 = math.exp %104 : vector<16x16xf32>
    %cst_55 = arith.constant dense<0.000000e+00> : vector<16xf32>
    %106 = vector.multi_reduction <add>, %105, %cst_55 [1] : vector<16x16xf32> to vector<16xf32>
    %107 = vector.shape_cast %106 : vector<16xf32> to vector<16x1xf32>
    %108 = vector.broadcast %107 : vector<16x1xf32> to vector<16x16xf32>
    %109 = arith.divf %105, %108 : vector<16x16xf32>
    %cst_56 = arith.constant dense<0.000000e+00> : vector<16x32xf32>
    %110 = tpu.matmul %109, %93, %cst_56 {dimension_numbers = #tpu.dot_dimension_numbers<[1], [0], [0], [1], [0, 0, 1, 1], [], []>, precision = #tpu.contract_precision<fp32>} : vector<16x16xf32>, vector<16x32xf32>, vector<16x32xf32> -> vector<16x32xf32>
    %c96 = arith.constant 96 : index
    %c0_57 = arith.constant 0 : index
    %111 = vector.load %arg9[%c96, %c0_57] : memref<128x128xf32, #tpu.memory_space<vmem>>, vector<32x128xf32>
    %cst_58 = arith.constant dense<0.000000e+00> : vector<16x128xf32>
    %112 = tpu.matmul %110, %111, %cst_58 {dimension_numbers = #tpu.dot_dimension_numbers<[1], [0], [0], [1], [0, 0, 1, 1], [], []>, precision = #tpu.contract_precision<fp32>} : vector<16x32xf32>, vector<32x128xf32>, vector<16x128xf32> -> vector<16x128xf32>
    %113 = arith.addf %90, %112 : vector<16x128xf32>
    %c0_59 = arith.constant 0 : index
    %c0_60 = arith.constant 0 : index
    %114 = vector.load %arg10[%c0_59, %c0_60] : memref<1x128xf32, #tpu.memory_space<vmem>>, vector<1x128xf32>
    %115 = vector.broadcast %114 : vector<1x128xf32> to vector<16x128xf32>
    %116 = arith.addf %113, %115 : vector<16x128xf32>
    %c0_61 = arith.constant 0 : index
    %c0_62 = arith.constant 0 : index
    %c0_63 = arith.constant 0 : index
    %117 = vector.load %arg12[%c0_61, %c0_62, %c0_63] : memref<1x16x128xf32, #tpu.memory_space<vmem>>, vector<1x16x128xf32>
    %118 = vector.shape_cast %117 : vector<1x16x128xf32> to vector<16x128xf32>
    %119 = vector.shape_cast %116 : vector<16x128xf32> to vector<1x16x128xf32>
    tpu.vector_store %arg12[%c0_61, %c0_62, %c0_63], %119 {strides = array<i32>} : memref<1x16x128xf32, #tpu.memory_space<vmem>>, vector<1x16x128xf32>,
    return
  }
  func.func @transform_0(%arg0: i32) -> (i32, i32, i32) {
    %c0_i32 = arith.constant 0 : i32
    %c0_i32_0 = arith.constant 0 : i32
    %c0_i32_1 = arith.constant 0 : i32
    return %arg0, %c0_i32, %c0_i32_0 : i32, i32, i32
  }
  func.func @transform_1(%arg0: i32) -> (i32, i32, i32) {
    %c0_i32 = arith.constant 0 : i32
    %c0_i32_0 = arith.constant 0 : i32
    %c0_i32_1 = arith.constant 0 : i32
    return %arg0, %c0_i32, %c0_i32_0 : i32, i32, i32
  }
  func.func @transform_2(%arg0: i32) -> (i32, i32) {
    %c0_i32 = arith.constant 0 : i32
    %c0_i32_0 = arith.constant 0 : i32
    %c0_i32_1 = arith.constant 0 : i32
    return %c0_i32, %c0_i32_0 : i32, i32
  }
  func.func @transform_3(%arg0: i32) -> (i32, i32) {
    %c0_i32 = arith.constant 0 : i32
    %c0_i32_0 = arith.constant 0 : i32
    %c0_i32_1 = arith.constant 0 : i32
    return %c0_i32, %c0_i32_0 : i32, i32
  }
  func.func @transform_4(%arg0: i32) -> (i32, i32) {
    %c0_i32 = arith.constant 0 : i32
    %c0_i32_0 = arith.constant 0 : i32
    %c0_i32_1 = arith.constant 0 : i32
    return %c0_i32, %c0_i32_0 : i32, i32
  }
  func.func @transform_5(%arg0: i32) -> (i32, i32) {
    %c0_i32 = arith.constant 0 : i32
    %c0_i32_0 = arith.constant 0 : i32
    %c0_i32_1 = arith.constant 0 : i32
    return %c0_i32, %c0_i32_0 : i32, i32
  }
  func.func @transform_6(%arg0: i32) -> (i32, i32) {
    %c0_i32 = arith.constant 0 : i32
    %c0_i32_0 = arith.constant 0 : i32
    %c0_i32_1 = arith.constant 0 : i32
    return %c0_i32, %c0_i32_0 : i32, i32
  }
  func.func @transform_7(%arg0: i32) -> (i32, i32) {
    %c0_i32 = arith.constant 0 : i32
    %c0_i32_0 = arith.constant 0 : i32
    %c0_i32_1 = arith.constant 0 : i32
    return %c0_i32, %c0_i32_0 : i32, i32
  }
  func.func @transform_8(%arg0: i32) -> (i32, i32) {
    %c0_i32 = arith.constant 0 : i32
    %c0_i32_0 = arith.constant 0 : i32
    %c0_i32_1 = arith.constant 0 : i32
    return %c0_i32, %c0_i32_0 : i32, i32
  }
  func.func @transform_9(%arg0: i32) -> (i32, i32) {
    %c0_i32 = arith.constant 0 : i32
    %c0_i32_0 = arith.constant 0 : i32
    %c0_i32_1 = arith.constant 0 : i32
    return %c0_i32, %c0_i32_0 : i32, i32
  }
  func.func @transform_10(%arg0: i32) -> (i32, i32, i32) {
    %c0_i32 = arith.constant 0 : i32
    %c0_i32_0 = arith.constant 0 : i32
    %c0_i32_1 = arith.constant 0 : i32
    return %arg0, %c0_i32, %c0_i32_0 : i32, i32, i32
  }
  func.func @transform_11(%arg0: i32) -> (i32, i32, i32) {
    %c0_i32 = arith.constant 0 : i32
    %c0_i32_0 = arith.constant 0 : i32
    %c0_i32_1 = arith.constant 0 : i32
    return %arg0, %c0_i32, %c0_i32_0 : i32, i32, i32
  }
}

module attributes {stable_mosaic.version = 11 : i64} {
  func.func @_embed_scale_pe_kernel(%arg0: memref<32x1xi32, #tpu.memory_space<vmem>>, %arg1: memref<128x128xf32, #tpu.memory_space<vmem>>, %arg2: memref<32x128xf32, #tpu.memory_space<vmem>>, %arg3: memref<32x128xf32, #tpu.memory_space<vmem>>) attributes {dimension_semantics = [], scalar_prefetch = 0 : i64, scratch_operands = 0 : i64, tpu.core_type = #tpu.core_type<tc>} {
    %c0 = arith.constant 0 : index
    %c0_0 = arith.constant 0 : index
    %0 = vector.load %arg0[%c0, %c0_0] : memref<32x1xi32, #tpu.memory_space<vmem>>, vector<32x1xi32>
    %1 = tpu.iota {dimensions = array<i32: 1>} : vector<32x128xi32>
    %2 = vector.broadcast %0 : vector<32x1xi32> to vector<32x128xi32>
    %3 = arith.cmpi eq, %1, %2 : vector<32x128xi32>
    %4 = arith.extui %3 : vector<32x128xi1> to vector<32x128xi32>
    %5 = arith.sitofp %4 : vector<32x128xi32> to vector<32x128xf32>
    %c0_1 = arith.constant 0 : index
    %c0_2 = arith.constant 0 : index
    %6 = vector.load %arg1[%c0_1, %c0_2] : memref<128x128xf32, #tpu.memory_space<vmem>>, vector<128x128xf32>
    %cst = arith.constant dense<0.000000e+00> : vector<32x128xf32>
    %7 = tpu.matmul %5, %6, %cst {dimension_numbers = #tpu.dot_dimension_numbers<[1], [0], [0], [1], [0, 0, 1, 1], [], []>, precision = #tpu.contract_precision<fp32>} : vector<32x128xf32>, vector<128x128xf32>, vector<32x128xf32> -> vector<32x128xf32>
    %cst_3 = arith.constant 11.3137083 : f32
    %8 = vector.broadcast %cst_3 : f32 to vector<32x128xf32>
    %9 = arith.mulf %7, %8 : vector<32x128xf32>
    %c0_4 = arith.constant 0 : index
    %c0_5 = arith.constant 0 : index
    %10 = vector.load %arg2[%c0_4, %c0_5] : memref<32x128xf32, #tpu.memory_space<vmem>>, vector<32x128xf32>
    %11 = arith.addf %9, %10 : vector<32x128xf32>
    %c0_6 = arith.constant 0 : index
    %c0_7 = arith.constant 0 : index
    %12 = vector.load %arg3[%c0_6, %c0_7] : memref<32x128xf32, #tpu.memory_space<vmem>>, vector<32x128xf32>
    tpu.vector_store %arg3[%c0_6, %c0_7], %11 {strides = array<i32>} : memref<32x128xf32, #tpu.memory_space<vmem>>, vector<32x128xf32>,
    return
  }
}

module attributes {stable_mosaic.version = 11 : i64} {
  func.func @_ffn_kernel(%arg0: memref<32x128xf32, #tpu.memory_space<vmem>>, %arg1: memref<128x256xf32, #tpu.memory_space<vmem>>, %arg2: memref<1x256xf32, #tpu.memory_space<vmem>>, %arg3: memref<256x128xf32, #tpu.memory_space<vmem>>, %arg4: memref<1x128xf32, #tpu.memory_space<vmem>>, %arg5: memref<32x128xf32, #tpu.memory_space<vmem>>) attributes {dimension_semantics = [], scalar_prefetch = 0 : i64, scratch_operands = 0 : i64, tpu.core_type = #tpu.core_type<tc>} {
    %c0 = arith.constant 0 : index
    %c0_0 = arith.constant 0 : index
    %0 = vector.load %arg0[%c0, %c0_0] : memref<32x128xf32, #tpu.memory_space<vmem>>, vector<32x128xf32>
    %c0_1 = arith.constant 0 : index
    %c0_2 = arith.constant 0 : index
    %1 = vector.load %arg1[%c0_1, %c0_2] : memref<128x256xf32, #tpu.memory_space<vmem>>, vector<128x256xf32>
    %cst = arith.constant dense<0.000000e+00> : vector<32x256xf32>
    %2 = tpu.matmul %0, %1, %cst {dimension_numbers = #tpu.dot_dimension_numbers<[1], [0], [0], [1], [0, 0, 1, 1], [], []>, precision = #tpu.contract_precision<fp32>} : vector<32x128xf32>, vector<128x256xf32>, vector<32x256xf32> -> vector<32x256xf32>
    %c0_3 = arith.constant 0 : index
    %c0_4 = arith.constant 0 : index
    %3 = vector.load %arg2[%c0_3, %c0_4] : memref<1x256xf32, #tpu.memory_space<vmem>>, vector<1x256xf32>
    %4 = vector.broadcast %3 : vector<1x256xf32> to vector<32x256xf32>
    %5 = arith.addf %2, %4 : vector<32x256xf32>
    %cst_5 = arith.constant 0.000000e+00 : f32
    %6 = vector.broadcast %cst_5 : f32 to vector<32x256xf32>
    %7 = arith.maximumf %5, %6 : vector<32x256xf32>
    %c0_6 = arith.constant 0 : index
    %c0_7 = arith.constant 0 : index
    %8 = vector.load %arg3[%c0_6, %c0_7] : memref<256x128xf32, #tpu.memory_space<vmem>>, vector<256x128xf32>
    %cst_8 = arith.constant dense<0.000000e+00> : vector<32x128xf32>
    %9 = tpu.matmul %7, %8, %cst_8 {dimension_numbers = #tpu.dot_dimension_numbers<[1], [0], [0], [1], [0, 0, 1, 1], [], []>, precision = #tpu.contract_precision<fp32>} : vector<32x256xf32>, vector<256x128xf32>, vector<32x128xf32> -> vector<32x128xf32>
    %c0_9 = arith.constant 0 : index
    %c0_10 = arith.constant 0 : index
    %10 = vector.load %arg4[%c0_9, %c0_10] : memref<1x128xf32, #tpu.memory_space<vmem>>, vector<1x128xf32>
    %11 = vector.broadcast %10 : vector<1x128xf32> to vector<32x128xf32>
    %12 = arith.addf %9, %11 : vector<32x128xf32>
    %c0_11 = arith.constant 0 : index
    %c0_12 = arith.constant 0 : index
    %13 = vector.load %arg5[%c0_11, %c0_12] : memref<32x128xf32, #tpu.memory_space<vmem>>, vector<32x128xf32>
    tpu.vector_store %arg5[%c0_11, %c0_12], %12 {strides = array<i32>} : memref<32x128xf32, #tpu.memory_space<vmem>>, vector<32x128xf32>,
    return
  }
}

module attributes {stable_mosaic.version = 11 : i64} {
  func.func @_mha_kernel(%arg0: i32, %arg1: memref<1x16x128xf32, #tpu.memory_space<vmem>>, %arg2: memref<1x16x128xf32, #tpu.memory_space<vmem>>, %arg3: memref<128x128xf32, #tpu.memory_space<vmem>>, %arg4: memref<1x128xf32, #tpu.memory_space<vmem>>, %arg5: memref<128x128xf32, #tpu.memory_space<vmem>>, %arg6: memref<1x128xf32, #tpu.memory_space<vmem>>, %arg7: memref<128x128xf32, #tpu.memory_space<vmem>>, %arg8: memref<1x128xf32, #tpu.memory_space<vmem>>, %arg9: memref<128x128xf32, #tpu.memory_space<vmem>>, %arg10: memref<1x128xf32, #tpu.memory_space<vmem>>, %arg11: memref<1x16x16xi32, #tpu.memory_space<vmem>>, %arg12: memref<1x16x128xf32, #tpu.memory_space<vmem>>) attributes {dimension_semantics = [#tpu.dimension_semantics<arbitrary>], iteration_bounds = array<i64: 2>, scalar_prefetch = 0 : i64, scratch_operands = 0 : i64, tpu.core_type = #tpu.core_type<tc>, window_params = [{transform_indices = @transform_0, window_bounds = array<i64: 1, 16, 128>}, {transform_indices = @transform_1, window_bounds = array<i64: 1, 16, 128>}, {pipeline_mode = #tpu.pipeline_mode<synchronous>, transform_indices = @transform_2, window_bounds = array<i64: 128, 128>}, {pipeline_mode = #tpu.pipeline_mode<synchronous>, transform_indices = @transform_3, window_bounds = array<i64: 1, 128>}, {pipeline_mode = #tpu.pipeline_mode<synchronous>, transform_indices = @transform_4, window_bounds = array<i64: 128, 128>}, {pipeline_mode = #tpu.pipeline_mode<synchronous>, transform_indices = @transform_5, window_bounds = array<i64: 1, 128>}, {pipeline_mode = #tpu.pipeline_mode<synchronous>, transform_indices = @transform_6, window_bounds = array<i64: 128, 128>}, {pipeline_mode = #tpu.pipeline_mode<synchronous>, transform_indices = @transform_7, window_bounds = array<i64: 1, 128>}, {pipeline_mode = #tpu.pipeline_mode<synchronous>, transform_indices = @transform_8, window_bounds = array<i64: 128, 128>}, {pipeline_mode = #tpu.pipeline_mode<synchronous>, transform_indices = @transform_9, window_bounds = array<i64: 1, 128>}, {transform_indices = @transform_10, window_bounds = array<i64: 1, 16, 16>}, {transform_indices = @transform_11, window_bounds = array<i64: 1, 16, 128>}]} {
    %c0 = arith.constant 0 : index
    %c0_0 = arith.constant 0 : index
    %c0_1 = arith.constant 0 : index
    %0 = vector.load %arg1[%c0, %c0_0, %c0_1] : memref<1x16x128xf32, #tpu.memory_space<vmem>>, vector<1x16x128xf32>
    %1 = vector.shape_cast %0 : vector<1x16x128xf32> to vector<16x128xf32>
    %c0_2 = arith.constant 0 : index
    %c0_3 = arith.constant 0 : index
    %c0_4 = arith.constant 0 : index
    %2 = vector.load %arg2[%c0_2, %c0_3, %c0_4] : memref<1x16x128xf32, #tpu.memory_space<vmem>>, vector<1x16x128xf32>
    %3 = vector.shape_cast %2 : vector<1x16x128xf32> to vector<16x128xf32>
    %c0_5 = arith.constant 0 : index
    %c0_6 = arith.constant 0 : index
    %c0_7 = arith.constant 0 : index
    %4 = vector.load %arg11[%c0_5, %c0_6, %c0_7] : memref<1x16x16xi32, #tpu.memory_space<vmem>>, vector<1x16x16xi32>
    %5 = vector.shape_cast %4 : vector<1x16x16xi32> to vector<16x16xi32>
    %c0_8 = arith.constant 0 : index
    %c0_9 = arith.constant 0 : index
    %6 = vector.load %arg3[%c0_8, %c0_9] : memref<128x128xf32, #tpu.memory_space<vmem>>, vector<128x128xf32>
    %cst = arith.constant dense<0.000000e+00> : vector<16x128xf32>
    %7 = tpu.matmul %1, %6, %cst {dimension_numbers = #tpu.dot_dimension_numbers<[1], [0], [0], [1], [0, 0, 1, 1], [], []>, precision = #tpu.contract_precision<fp32>} : vector<16x128xf32>, vector<128x128xf32>, vector<16x128xf32> -> vector<16x128xf32>
    %c0_10 = arith.constant 0 : index
    %c0_11 = arith.constant 0 : index
    %8 = vector.load %arg4[%c0_10, %c0_11] : memref<1x128xf32, #tpu.memory_space<vmem>>, vector<1x128xf32>
    %9 = vector.broadcast %8 : vector<1x128xf32> to vector<16x128xf32>
    %10 = arith.addf %7, %9 : vector<16x128xf32>
    %c0_12 = arith.constant 0 : index
    %c0_13 = arith.constant 0 : index
    %11 = vector.load %arg5[%c0_12, %c0_13] : memref<128x128xf32, #tpu.memory_space<vmem>>, vector<128x128xf32>
    %cst_14 = arith.constant dense<0.000000e+00> : vector<16x128xf32>
    %12 = tpu.matmul %3, %11, %cst_14 {dimension_numbers = #tpu.dot_dimension_numbers<[1], [0], [0], [1], [0, 0, 1, 1], [], []>, precision = #tpu.contract_precision<fp32>} : vector<16x128xf32>, vector<128x128xf32>, vector<16x128xf32> -> vector<16x128xf32>
    %c0_15 = arith.constant 0 : index
    %c0_16 = arith.constant 0 : index
    %13 = vector.load %arg6[%c0_15, %c0_16] : memref<1x128xf32, #tpu.memory_space<vmem>>, vector<1x128xf32>
    %14 = vector.broadcast %13 : vector<1x128xf32> to vector<16x128xf32>
    %15 = arith.addf %12, %14 : vector<16x128xf32>
    %c0_17 = arith.constant 0 : index
    %c0_18 = arith.constant 0 : index
    %16 = vector.load %arg7[%c0_17, %c0_18] : memref<128x128xf32, #tpu.memory_space<vmem>>, vector<128x128xf32>
    %cst_19 = arith.constant dense<0.000000e+00> : vector<16x128xf32>
    %17 = tpu.matmul %3, %16, %cst_19 {dimension_numbers = #tpu.dot_dimension_numbers<[1], [0], [0], [1], [0, 0, 1, 1], [], []>, precision = #tpu.contract_precision<fp32>} : vector<16x128xf32>, vector<128x128xf32>, vector<16x128xf32> -> vector<16x128xf32>
    %c0_20 = arith.constant 0 : index
    %c0_21 = arith.constant 0 : index
    %18 = vector.load %arg8[%c0_20, %c0_21] : memref<1x128xf32, #tpu.memory_space<vmem>>, vector<1x128xf32>
    %19 = vector.broadcast %18 : vector<1x128xf32> to vector<16x128xf32>
    %20 = arith.addf %17, %19 : vector<16x128xf32>
    %cst_22 = arith.constant 0.000000e+00 : f32
    %21 = vector.broadcast %cst_22 : f32 to vector<16x128xf32>
    %22 = vector.extract_strided_slice %10 {offsets = [0, 0], sizes = [16, 32], strides = [1, 1]} : vector<16x128xf32> to vector<16x32xf32>
    %23 = vector.extract_strided_slice %15 {offsets = [0, 0], sizes = [16, 32], strides = [1, 1]} : vector<16x128xf32> to vector<16x32xf32>
    %24 = vector.extract_strided_slice %20 {offsets = [0, 0], sizes = [16, 32], strides = [1, 1]} : vector<16x128xf32> to vector<16x32xf32>
    %cst_23 = arith.constant dense<0.000000e+00> : vector<16x16xf32>
    %25 = tpu.matmul %22, %23, %cst_23 {dimension_numbers = #tpu.dot_dimension_numbers<[1], [1], [0], [0], [0, 0, 1, 0], [], []>, precision = #tpu.contract_precision<fp32>} : vector<16x32xf32>, vector<16x32xf32>, vector<16x16xf32> -> vector<16x16xf32>
    %cst_24 = arith.constant 0.176776692 : f32
    %26 = vector.broadcast %cst_24 : f32 to vector<16x16xf32>
    %27 = arith.mulf %25, %26 : vector<16x16xf32>
    %c0_i32 = arith.constant 0 : i32
    %28 = vector.broadcast %c0_i32 : i32 to vector<16x16xi32>
    %29 = arith.cmpi eq, %5, %28 : vector<16x16xi32>
    %cst_25 = arith.constant -1.000000e+09 : f32
    %30 = vector.broadcast %cst_25 : f32 to vector<16x16xf32>
    %31 = arith.select %29, %30, %27 : vector<16x16xi1>, vector<16x16xf32>
    %cst_26 = arith.constant dense<0xFF800000> : vector<16xf32>
    %32 = vector.multi_reduction <maximumf>, %31, %cst_26 [1] : vector<16x16xf32> to vector<16xf32>
    %33 = vector.shape_cast %32 : vector<16xf32> to vector<16x1xf32>
    %34 = vector.broadcast %33 : vector<16x1xf32> to vector<16x16xf32>
    %35 = arith.subf %31, %34 : vector<16x16xf32>
    %36 = math.exp %35 : vector<16x16xf32>
    %cst_27 = arith.constant dense<0.000000e+00> : vector<16xf32>
    %37 = vector.multi_reduction <add>, %36, %cst_27 [1] : vector<16x16xf32> to vector<16xf32>
    %38 = vector.shape_cast %37 : vector<16xf32> to vector<16x1xf32>
    %39 = vector.broadcast %38 : vector<16x1xf32> to vector<16x16xf32>
    %40 = arith.divf %36, %39 : vector<16x16xf32>
    %cst_28 = arith.constant dense<0.000000e+00> : vector<16x32xf32>
    %41 = tpu.matmul %40, %24, %cst_28 {dimension_numbers = #tpu.dot_dimension_numbers<[1], [0], [0], [1], [0, 0, 1, 1], [], []>, precision = #tpu.contract_precision<fp32>} : vector<16x16xf32>, vector<16x32xf32>, vector<16x32xf32> -> vector<16x32xf32>
    %c0_29 = arith.constant 0 : index
    %c0_30 = arith.constant 0 : index
    %42 = vector.load %arg9[%c0_29, %c0_30] : memref<128x128xf32, #tpu.memory_space<vmem>>, vector<32x128xf32>
    %cst_31 = arith.constant dense<0.000000e+00> : vector<16x128xf32>
    %43 = tpu.matmul %41, %42, %cst_31 {dimension_numbers = #tpu.dot_dimension_numbers<[1], [0], [0], [1], [0, 0, 1, 1], [], []>, precision = #tpu.contract_precision<fp32>} : vector<16x32xf32>, vector<32x128xf32>, vector<16x128xf32> -> vector<16x128xf32>
    %44 = arith.addf %21, %43 : vector<16x128xf32>
    %45 = vector.extract_strided_slice %10 {offsets = [0, 32], sizes = [16, 32], strides = [1, 1]} : vector<16x128xf32> to vector<16x32xf32>
    %46 = vector.extract_strided_slice %15 {offsets = [0, 32], sizes = [16, 32], strides = [1, 1]} : vector<16x128xf32> to vector<16x32xf32>
    %47 = vector.extract_strided_slice %20 {offsets = [0, 32], sizes = [16, 32], strides = [1, 1]} : vector<16x128xf32> to vector<16x32xf32>
    %cst_32 = arith.constant dense<0.000000e+00> : vector<16x16xf32>
    %48 = tpu.matmul %45, %46, %cst_32 {dimension_numbers = #tpu.dot_dimension_numbers<[1], [1], [0], [0], [0, 0, 1, 0], [], []>, precision = #tpu.contract_precision<fp32>} : vector<16x32xf32>, vector<16x32xf32>, vector<16x16xf32> -> vector<16x16xf32>
    %cst_33 = arith.constant 0.176776692 : f32
    %49 = vector.broadcast %cst_33 : f32 to vector<16x16xf32>
    %50 = arith.mulf %48, %49 : vector<16x16xf32>
    %c0_i32_34 = arith.constant 0 : i32
    %51 = vector.broadcast %c0_i32_34 : i32 to vector<16x16xi32>
    %52 = arith.cmpi eq, %5, %51 : vector<16x16xi32>
    %cst_35 = arith.constant -1.000000e+09 : f32
    %53 = vector.broadcast %cst_35 : f32 to vector<16x16xf32>
    %54 = arith.select %52, %53, %50 : vector<16x16xi1>, vector<16x16xf32>
    %cst_36 = arith.constant dense<0xFF800000> : vector<16xf32>
    %55 = vector.multi_reduction <maximumf>, %54, %cst_36 [1] : vector<16x16xf32> to vector<16xf32>
    %56 = vector.shape_cast %55 : vector<16xf32> to vector<16x1xf32>
    %57 = vector.broadcast %56 : vector<16x1xf32> to vector<16x16xf32>
    %58 = arith.subf %54, %57 : vector<16x16xf32>
    %59 = math.exp %58 : vector<16x16xf32>
    %cst_37 = arith.constant dense<0.000000e+00> : vector<16xf32>
    %60 = vector.multi_reduction <add>, %59, %cst_37 [1] : vector<16x16xf32> to vector<16xf32>
    %61 = vector.shape_cast %60 : vector<16xf32> to vector<16x1xf32>
    %62 = vector.broadcast %61 : vector<16x1xf32> to vector<16x16xf32>
    %63 = arith.divf %59, %62 : vector<16x16xf32>
    %cst_38 = arith.constant dense<0.000000e+00> : vector<16x32xf32>
    %64 = tpu.matmul %63, %47, %cst_38 {dimension_numbers = #tpu.dot_dimension_numbers<[1], [0], [0], [1], [0, 0, 1, 1], [], []>, precision = #tpu.contract_precision<fp32>} : vector<16x16xf32>, vector<16x32xf32>, vector<16x32xf32> -> vector<16x32xf32>
    %c32 = arith.constant 32 : index
    %c0_39 = arith.constant 0 : index
    %65 = vector.load %arg9[%c32, %c0_39] : memref<128x128xf32, #tpu.memory_space<vmem>>, vector<32x128xf32>
    %cst_40 = arith.constant dense<0.000000e+00> : vector<16x128xf32>
    %66 = tpu.matmul %64, %65, %cst_40 {dimension_numbers = #tpu.dot_dimension_numbers<[1], [0], [0], [1], [0, 0, 1, 1], [], []>, precision = #tpu.contract_precision<fp32>} : vector<16x32xf32>, vector<32x128xf32>, vector<16x128xf32> -> vector<16x128xf32>
    %67 = arith.addf %44, %66 : vector<16x128xf32>
    %68 = vector.extract_strided_slice %10 {offsets = [0, 64], sizes = [16, 32], strides = [1, 1]} : vector<16x128xf32> to vector<16x32xf32>
    %69 = vector.extract_strided_slice %15 {offsets = [0, 64], sizes = [16, 32], strides = [1, 1]} : vector<16x128xf32> to vector<16x32xf32>
    %70 = vector.extract_strided_slice %20 {offsets = [0, 64], sizes = [16, 32], strides = [1, 1]} : vector<16x128xf32> to vector<16x32xf32>
    %cst_41 = arith.constant dense<0.000000e+00> : vector<16x16xf32>
    %71 = tpu.matmul %68, %69, %cst_41 {dimension_numbers = #tpu.dot_dimension_numbers<[1], [1], [0], [0], [0, 0, 1, 0], [], []>, precision = #tpu.contract_precision<fp32>} : vector<16x32xf32>, vector<16x32xf32>, vector<16x16xf32> -> vector<16x16xf32>
    %cst_42 = arith.constant 0.176776692 : f32
    %72 = vector.broadcast %cst_42 : f32 to vector<16x16xf32>
    %73 = arith.mulf %71, %72 : vector<16x16xf32>
    %c0_i32_43 = arith.constant 0 : i32
    %74 = vector.broadcast %c0_i32_43 : i32 to vector<16x16xi32>
    %75 = arith.cmpi eq, %5, %74 : vector<16x16xi32>
    %cst_44 = arith.constant -1.000000e+09 : f32
    %76 = vector.broadcast %cst_44 : f32 to vector<16x16xf32>
    %77 = arith.select %75, %76, %73 : vector<16x16xi1>, vector<16x16xf32>
    %cst_45 = arith.constant dense<0xFF800000> : vector<16xf32>
    %78 = vector.multi_reduction <maximumf>, %77, %cst_45 [1] : vector<16x16xf32> to vector<16xf32>
    %79 = vector.shape_cast %78 : vector<16xf32> to vector<16x1xf32>
    %80 = vector.broadcast %79 : vector<16x1xf32> to vector<16x16xf32>
    %81 = arith.subf %77, %80 : vector<16x16xf32>
    %82 = math.exp %81 : vector<16x16xf32>
    %cst_46 = arith.constant dense<0.000000e+00> : vector<16xf32>
    %83 = vector.multi_reduction <add>, %82, %cst_46 [1] : vector<16x16xf32> to vector<16xf32>
    %84 = vector.shape_cast %83 : vector<16xf32> to vector<16x1xf32>
    %85 = vector.broadcast %84 : vector<16x1xf32> to vector<16x16xf32>
    %86 = arith.divf %82, %85 : vector<16x16xf32>
    %cst_47 = arith.constant dense<0.000000e+00> : vector<16x32xf32>
    %87 = tpu.matmul %86, %70, %cst_47 {dimension_numbers = #tpu.dot_dimension_numbers<[1], [0], [0], [1], [0, 0, 1, 1], [], []>, precision = #tpu.contract_precision<fp32>} : vector<16x16xf32>, vector<16x32xf32>, vector<16x32xf32> -> vector<16x32xf32>
    %c64 = arith.constant 64 : index
    %c0_48 = arith.constant 0 : index
    %88 = vector.load %arg9[%c64, %c0_48] : memref<128x128xf32, #tpu.memory_space<vmem>>, vector<32x128xf32>
    %cst_49 = arith.constant dense<0.000000e+00> : vector<16x128xf32>
    %89 = tpu.matmul %87, %88, %cst_49 {dimension_numbers = #tpu.dot_dimension_numbers<[1], [0], [0], [1], [0, 0, 1, 1], [], []>, precision = #tpu.contract_precision<fp32>} : vector<16x32xf32>, vector<32x128xf32>, vector<16x128xf32> -> vector<16x128xf32>
    %90 = arith.addf %67, %89 : vector<16x128xf32>
    %91 = vector.extract_strided_slice %10 {offsets = [0, 96], sizes = [16, 32], strides = [1, 1]} : vector<16x128xf32> to vector<16x32xf32>
    %92 = vector.extract_strided_slice %15 {offsets = [0, 96], sizes = [16, 32], strides = [1, 1]} : vector<16x128xf32> to vector<16x32xf32>
    %93 = vector.extract_strided_slice %20 {offsets = [0, 96], sizes = [16, 32], strides = [1, 1]} : vector<16x128xf32> to vector<16x32xf32>
    %cst_50 = arith.constant dense<0.000000e+00> : vector<16x16xf32>
    %94 = tpu.matmul %91, %92, %cst_50 {dimension_numbers = #tpu.dot_dimension_numbers<[1], [1], [0], [0], [0, 0, 1, 0], [], []>, precision = #tpu.contract_precision<fp32>} : vector<16x32xf32>, vector<16x32xf32>, vector<16x16xf32> -> vector<16x16xf32>
    %cst_51 = arith.constant 0.176776692 : f32
    %95 = vector.broadcast %cst_51 : f32 to vector<16x16xf32>
    %96 = arith.mulf %94, %95 : vector<16x16xf32>
    %c0_i32_52 = arith.constant 0 : i32
    %97 = vector.broadcast %c0_i32_52 : i32 to vector<16x16xi32>
    %98 = arith.cmpi eq, %5, %97 : vector<16x16xi32>
    %cst_53 = arith.constant -1.000000e+09 : f32
    %99 = vector.broadcast %cst_53 : f32 to vector<16x16xf32>
    %100 = arith.select %98, %99, %96 : vector<16x16xi1>, vector<16x16xf32>
    %cst_54 = arith.constant dense<0xFF800000> : vector<16xf32>
    %101 = vector.multi_reduction <maximumf>, %100, %cst_54 [1] : vector<16x16xf32> to vector<16xf32>
    %102 = vector.shape_cast %101 : vector<16xf32> to vector<16x1xf32>
    %103 = vector.broadcast %102 : vector<16x1xf32> to vector<16x16xf32>
    %104 = arith.subf %100, %103 : vector<16x16xf32>
    %105 = math.exp %104 : vector<16x16xf32>
    %cst_55 = arith.constant dense<0.000000e+00> : vector<16xf32>
    %106 = vector.multi_reduction <add>, %105, %cst_55 [1] : vector<16x16xf32> to vector<16xf32>
    %107 = vector.shape_cast %106 : vector<16xf32> to vector<16x1xf32>
    %108 = vector.broadcast %107 : vector<16x1xf32> to vector<16x16xf32>
    %109 = arith.divf %105, %108 : vector<16x16xf32>
    %cst_56 = arith.constant dense<0.000000e+00> : vector<16x32xf32>
    %110 = tpu.matmul %109, %93, %cst_56 {dimension_numbers = #tpu.dot_dimension_numbers<[1], [0], [0], [1], [0, 0, 1, 1], [], []>, precision = #tpu.contract_precision<fp32>} : vector<16x16xf32>, vector<16x32xf32>, vector<16x32xf32> -> vector<16x32xf32>
    %c96 = arith.constant 96 : index
    %c0_57 = arith.constant 0 : index
    %111 = vector.load %arg9[%c96, %c0_57] : memref<128x128xf32, #tpu.memory_space<vmem>>, vector<32x128xf32>
    %cst_58 = arith.constant dense<0.000000e+00> : vector<16x128xf32>
    %112 = tpu.matmul %110, %111, %cst_58 {dimension_numbers = #tpu.dot_dimension_numbers<[1], [0], [0], [1], [0, 0, 1, 1], [], []>, precision = #tpu.contract_precision<fp32>} : vector<16x32xf32>, vector<32x128xf32>, vector<16x128xf32> -> vector<16x128xf32>
    %113 = arith.addf %90, %112 : vector<16x128xf32>
    %c0_59 = arith.constant 0 : index
    %c0_60 = arith.constant 0 : index
    %114 = vector.load %arg10[%c0_59, %c0_60] : memref<1x128xf32, #tpu.memory_space<vmem>>, vector<1x128xf32>
    %115 = vector.broadcast %114 : vector<1x128xf32> to vector<16x128xf32>
    %116 = arith.addf %113, %115 : vector<16x128xf32>
    %c0_61 = arith.constant 0 : index
    %c0_62 = arith.constant 0 : index
    %c0_63 = arith.constant 0 : index
    %117 = vector.load %arg12[%c0_61, %c0_62, %c0_63] : memref<1x16x128xf32, #tpu.memory_space<vmem>>, vector<1x16x128xf32>
    %118 = vector.shape_cast %117 : vector<1x16x128xf32> to vector<16x128xf32>
    %119 = vector.shape_cast %116 : vector<16x128xf32> to vector<1x16x128xf32>
    tpu.vector_store %arg12[%c0_61, %c0_62, %c0_63], %119 {strides = array<i32>} : memref<1x16x128xf32, #tpu.memory_space<vmem>>, vector<1x16x128xf32>,
    return
  }
  func.func @transform_0(%arg0: i32) -> (i32, i32, i32) {
    %c0_i32 = arith.constant 0 : i32
    %c0_i32_0 = arith.constant 0 : i32
    %c0_i32_1 = arith.constant 0 : i32
    return %arg0, %c0_i32, %c0_i32_0 : i32, i32, i32
  }
  func.func @transform_1(%arg0: i32) -> (i32, i32, i32) {
    %c0_i32 = arith.constant 0 : i32
    %c0_i32_0 = arith.constant 0 : i32
    %c0_i32_1 = arith.constant 0 : i32
    return %arg0, %c0_i32, %c0_i32_0 : i32, i32, i32
  }
  func.func @transform_2(%arg0: i32) -> (i32, i32) {
    %c0_i32 = arith.constant 0 : i32
    %c0_i32_0 = arith.constant 0 : i32
    %c0_i32_1 = arith.constant 0 : i32
    return %c0_i32, %c0_i32_0 : i32, i32
  }
  func.func @transform_3(%arg0: i32) -> (i32, i32) {
    %c0_i32 = arith.constant 0 : i32
    %c0_i32_0 = arith.constant 0 : i32
    %c0_i32_1 = arith.constant 0 : i32
    return %c0_i32, %c0_i32_0 : i32, i32
  }
  func.func @transform_4(%arg0: i32) -> (i32, i32) {
    %c0_i32 = arith.constant 0 : i32
    %c0_i32_0 = arith.constant 0 : i32
    %c0_i32_1 = arith.constant 0 : i32
    return %c0_i32, %c0_i32_0 : i32, i32
  }
  func.func @transform_5(%arg0: i32) -> (i32, i32) {
    %c0_i32 = arith.constant 0 : i32
    %c0_i32_0 = arith.constant 0 : i32
    %c0_i32_1 = arith.constant 0 : i32
    return %c0_i32, %c0_i32_0 : i32, i32
  }
  func.func @transform_6(%arg0: i32) -> (i32, i32) {
    %c0_i32 = arith.constant 0 : i32
    %c0_i32_0 = arith.constant 0 : i32
    %c0_i32_1 = arith.constant 0 : i32
    return %c0_i32, %c0_i32_0 : i32, i32
  }
  func.func @transform_7(%arg0: i32) -> (i32, i32) {
    %c0_i32 = arith.constant 0 : i32
    %c0_i32_0 = arith.constant 0 : i32
    %c0_i32_1 = arith.constant 0 : i32
    return %c0_i32, %c0_i32_0 : i32, i32
  }
  func.func @transform_8(%arg0: i32) -> (i32, i32) {
    %c0_i32 = arith.constant 0 : i32
    %c0_i32_0 = arith.constant 0 : i32
    %c0_i32_1 = arith.constant 0 : i32
    return %c0_i32, %c0_i32_0 : i32, i32
  }
  func.func @transform_9(%arg0: i32) -> (i32, i32) {
    %c0_i32 = arith.constant 0 : i32
    %c0_i32_0 = arith.constant 0 : i32
    %c0_i32_1 = arith.constant 0 : i32
    return %c0_i32, %c0_i32_0 : i32, i32
  }
  func.func @transform_10(%arg0: i32) -> (i32, i32, i32) {
    %c0_i32 = arith.constant 0 : i32
    %c0_i32_0 = arith.constant 0 : i32
    %c0_i32_1 = arith.constant 0 : i32
    return %arg0, %c0_i32, %c0_i32_0 : i32, i32, i32
  }
  func.func @transform_11(%arg0: i32) -> (i32, i32, i32) {
    %c0_i32 = arith.constant 0 : i32
    %c0_i32_0 = arith.constant 0 : i32
    %c0_i32_1 = arith.constant 0 : i32
    return %arg0, %c0_i32, %c0_i32_0 : i32, i32, i32
  }
}

module attributes {stable_mosaic.version = 11 : i64} {
  func.func @_linear_kernel(%arg0: memref<32x128xf32, #tpu.memory_space<vmem>>, %arg1: memref<128x128xf32, #tpu.memory_space<vmem>>, %arg2: memref<1x128xf32, #tpu.memory_space<vmem>>, %arg3: memref<32x128xf32, #tpu.memory_space<vmem>>) attributes {dimension_semantics = [], scalar_prefetch = 0 : i64, scratch_operands = 0 : i64, tpu.core_type = #tpu.core_type<tc>} {
    %c0 = arith.constant 0 : index
    %c0_0 = arith.constant 0 : index
    %0 = vector.load %arg0[%c0, %c0_0] : memref<32x128xf32, #tpu.memory_space<vmem>>, vector<32x128xf32>
    %c0_1 = arith.constant 0 : index
    %c0_2 = arith.constant 0 : index
    %1 = vector.load %arg1[%c0_1, %c0_2] : memref<128x128xf32, #tpu.memory_space<vmem>>, vector<128x128xf32>
    %cst = arith.constant dense<0.000000e+00> : vector<32x128xf32>
    %2 = tpu.matmul %0, %1, %cst {dimension_numbers = #tpu.dot_dimension_numbers<[1], [0], [0], [1], [0, 0, 1, 1], [], []>, precision = #tpu.contract_precision<fp32>} : vector<32x128xf32>, vector<128x128xf32>, vector<32x128xf32> -> vector<32x128xf32>
    %c0_3 = arith.constant 0 : index
    %c0_4 = arith.constant 0 : index
    %3 = vector.load %arg2[%c0_3, %c0_4] : memref<1x128xf32, #tpu.memory_space<vmem>>, vector<1x128xf32>
    %4 = vector.broadcast %3 : vector<1x128xf32> to vector<32x128xf32>
    %5 = arith.addf %2, %4 : vector<32x128xf32>
    %c0_5 = arith.constant 0 : index
    %c0_6 = arith.constant 0 : index
    %6 = vector.load %arg3[%c0_5, %c0_6] : memref<32x128xf32, #tpu.memory_space<vmem>>, vector<32x128xf32>
    tpu.vector_store %arg3[%c0_5, %c0_6], %5 {strides = array<i32>} : memref<32x128xf32, #tpu.memory_space<vmem>>, vector<32x128xf32>,
    return
  }
}

</mosaic_0001>

<bundles_post_ra>
// kernel: transformer_forward.25
= control target key start
LH: loop header
LB: loop body
LE: loop exit
PB: predicated region body
PF: predicated region fallthrough
CT: control target
= control target key end

     0   :  { %s238_s0 = inlined_call_operand.vmem [shape: f32[32,128], index: 0, kind: input, shape index: {}]   ;;  %s239_s1 = inlined_call_operand.vmem [shape: f32[32,128], index: 1, kind: input, shape index: {}]   ;;  %s240_s2 = inlined_call_operand.vmem [shape: f32[1,128], index: 2, kind: input, shape index: {}]   ;;  %s241_s3 = inlined_call_operand.vmem [shape: f32[1,128], index: 3, kind: input, shape index: {}]   ;;  %s242_s4 = inlined_call_operand.vmem [shape: f32[32,128], index: 4, kind: output, shape index: {}]  }
   0x1   :  { %v17_v0 = vld [vmem:[%s238_s0] sm:$0xff]  ;;  %v19_v2 = vld [vmem:[%s238_s0 + $0x10] sm:$0xff]  ;;  %v18_v5 = vld [vmem:[%s238_s0 + $0x8] sm:$0xff] }
   0x2   :  { %v21_v1 = vld [vmem:[%s239_s1] sm:$0xff]  ;;  %v23_v4 = vld [vmem:[%s239_s1 + $0x10] sm:$0xff]  ;;  %v22_v6 = vld [vmem:[%s239_s1 + $0x8] sm:$0xff] }
   0x3   :  { %v25_v3 = vadd.f32 %v21_v1, %v17_v0  ;;  %v27_v7 = vadd.f32 %v23_v4, %v19_v2  ;;  %v20_v8 = vld [vmem:[%s238_s0 + $0x18] sm:$0xff]  ;;  %v26_v10 = vadd.f32 %v22_v6, %v18_v5  ;;  %v133_v59 = vld [vmem:[%s240_s2] ss:$0 sm:$0xff] }
   0x4   :  { %v24_v9 = vld [vmem:[%s239_s1 + $0x18] sm:$0xff]  ;;  %v134_v63 = vld [vmem:[%s241_s3] ss:$0 sm:$0xff] }
   0x5   :  { %29 = vadd.xlane.f32.xlu0 %v25_v3  ;;  %33 = vadd.xlane.f32.xlu1 %v27_v7  ;;  %v28_v11 = vadd.f32 %v24_v9, %v20_v8 }
   0x9   :  { %31 = vadd.xlane.f32.xlu0 %v26_v10  ;;  %35 = vadd.xlane.f32.xlu1 %v28_v11 }
  0x92   :  { %v30_v12 = vpop.xlane.xlu0 %29  ;;  %v34_v14 = vpop.xlane.xlu1 %33 }
  0x93   :  { %v38_v13 = vmul.f32 0.0078125, %v30_v12  ;;  %v40_v15 = vmul.f32 0.0078125, %v34_v14 }
  0x95   :  { %v200_v16 = vsub.f32 %v25_v3, %v38_v13  ;;  %v202_v17 = vsub.f32 %v27_v7, %v40_v15 }
  0x96   :  { %v32_v18 = vpop.xlane.xlu0 %31  ;;  %v36_v21 = vpop.xlane.xlu1 %35 }
  0x97   :  { %v39_v19 = vmul.f32 0.0078125, %v32_v18  ;;  %v46_v20 = vmul.f32 %v200_v16, %v200_v16  ;;  %v41_v22 = vmul.f32 0.0078125, %v36_v21  ;;  %v48_v24 = vmul.f32 %v202_v17, %v202_v17 }
  0x98   :  { %v98_v61 = vmul.f32 %v133_v59, %v200_v16  ;;  %v100_v4 = vmul.f32 %v133_v59, %v202_v17 }
  0x99   :  { %v206_v23 = vsub.f32 %v26_v10, %v39_v19  ;;  %50 = vadd.xlane.f32.xlu0 %v46_v20  ;;  %v210_v25 = vsub.f32 %v28_v11, %v41_v22 }
  0x9b   :  { %v47_v26 = vmul.f32 %v206_v23, %v206_v23  ;;  %v49_v27 = vmul.f32 %v210_v25, %v210_v25  ;;  %v99_v1 = vmul.f32 %v133_v59, %v206_v23  ;;  %v101_v8 = vmul.f32 %v133_v59, %v210_v25 }
  0x9d   :  { %54 = vadd.xlane.f32.xlu0 %v48_v24  ;;  %52 = vadd.xlane.f32.xlu1 %v47_v26 }
  0xa1   :  { %56 = vadd.xlane.f32.xlu1 %v49_v27 }
 0x126   :  { %v51_v28 = vpop.xlane.xlu0 %50 }
 0x127   :  { %v59_v29 = vmul.f32 0.007874016, %v51_v28 }
 0x129   :  { %135 = vrsqrt.f32 %v59_v29  ;;  %vm65_vm0 = vcmp.eq.f32.partialorder %v59_v29, inf  ;;  %v68_v38 = vand.u32 2147483648, %v59_v29  ;;  %vm67_vm1 = vcmp.eq.f32.partialorder %v59_v29, 0.0 }
 0x12a   :  { %v53_v30 = vpop.xlane.xlu1 %52  ;;  %v55_v31 = vpop.xlane.xlu0 %54 }
 0x12b   :  { %v60_v32 = vmul.f32 0.007874016, %v53_v30  ;;  %v61_v33 = vmul.f32 0.007874016, %v55_v31 }
 0x12d   :  { %137 = vrsqrt.f32 %v60_v32  ;;  %vm72_vm2 = vcmp.eq.f32.partialorder %v60_v32, inf  ;;  %vm74_vm3 = vcmp.eq.f32.partialorder %v60_v32, 0.0  ;;  %v75_v45 = vand.u32 2147483648, %v60_v32 }
 0x12e   :  { %139 = vrsqrt.f32 %v61_v33  ;;  %v57_v34 = vpop.xlane.xlu1 %56  ;;  %vm79_vm4 = vcmp.eq.f32.partialorder %v61_v33, inf  ;;  %v82_v48 = vand.u32 2147483648, %v61_v33  ;;  %vm81_vm5 = vcmp.eq.f32.partialorder %v61_v33, 0.0 }
 0x12f   :  { %v62_v35 = vmul.f32 0.007874016, %v57_v34 }
 0x131   :  { %141 = vrsqrt.f32 %v62_v35  ;;  %vm86_vm6 = vcmp.eq.f32.partialorder %v62_v35, inf  ;;  %v89_v56 = vand.u32 2147483648, %v62_v35  ;;  %vm88_vm7 = vcmp.eq.f32.partialorder %v62_v35, 0.0 }
 0x133   :  { %v136_v36 = vpop.eup %135 }
 0x134   :  { %v64_v37 = vmul.f32 %v136_v36, %v59_v29 }
 0x136   :  { %v66_v39 = vsel %vm65_vm0, %v59_v29, %v64_v37 }
 0x137   :  { %v138_v40 = vpop.eup %137  ;;  %v69_v41 = vsel %vm67_vm1, %v68_v38, %v66_v39 }
 0x138   :  { %v140_v42 = vpop.eup %139  ;;  %v102_v43 = vadd.f32 1e-06, %v69_v41  ;;  %v71_v44 = vmul.f32 %v138_v40, %v60_v32 }
 0x139   :  { %v78_v46 = vmul.f32 %v140_v42, %v61_v33 }
 0x13a   :  { %143 = vrcp.f32 %v102_v43  ;;  %v73_v47 = vsel %vm72_vm2, %v60_v32, %v71_v44 }
 0x13b   :  { %v142_v49 = vpop.eup %141  ;;  %v76_v50 = vsel %vm74_vm3, %v75_v45, %v73_v47  ;;  %v80_v51 = vsel %vm79_vm4, %v61_v33, %v78_v46 }
 0x13c   :  { %v103_v52 = vadd.f32 1e-06, %v76_v50  ;;  %v83_v53 = vsel %vm81_vm5, %v82_v48, %v80_v51  ;;  %v85_v54 = vmul.f32 %v142_v49, %v62_v35 }
 0x13d   :  { %v104_v55 = vadd.f32 1e-06, %v83_v53 }
 0x13e   :  { %145 = vrcp.f32 %v103_v52  ;;  %v87_v57 = vsel %vm86_vm6, %v62_v35, %v85_v54 }
 0x13f   :  { %147 = vrcp.f32 %v104_v55  ;;  %v90_v58 = vsel %vm88_vm7, %v89_v56, %v87_v57 }
 0x140   :  { %v105_v60 = vadd.f32 1e-06, %v90_v58 }
 0x142   :  { %149 = vrcp.f32 %v105_v60 }
 0x144   :  { %v144_v62 = vpop.eup %143 }
 0x145   :  { %v107_v0 = vmul.f32 %v144_v62, %v98_v61 }
 0x147   :  { %v121_v2 = vadd.f32 %v134_v63, %v107_v0 }
 0x148   :  { %v146_v3 = vpop.eup %145 }
 0x149   :  { %v148_v5 = vpop.eup %147  ;;  %125 = vst [vmem:[%s242_s4] sm:$0xff] %v121_v2  ;;  %v109_v6 = vmul.f32 %v146_v3, %v99_v1 }
 0x14a   :  { %v111_v7 = vmul.f32 %v148_v5, %v100_v4 }
 0x14b   :  { %v122_v9 = vadd.f32 %v134_v63, %v109_v6 }
 0x14c   :  { %v150_v10 = vpop.eup %149  ;;  %v123_v11 = vadd.f32 %v134_v63, %v111_v7 }
 0x14d   :  { %126 = vst [vmem:[%s242_s4 + $0x8] sm:$0xff] %v122_v9  ;;  %v113_v12 = vmul.f32 %v150_v10, %v101_v8 }
 0x14e   :  { %127 = vst [vmem:[%s242_s4 + $0x10] sm:$0xff] %v123_v11 }
 0x14f   :  { %v124_v13 = vadd.f32 %v134_v63, %v113_v12 }
 0x151   :  { %128 = vst [vmem:[%s242_s4 + $0x18] sm:$0xff] %v124_v13 }

// kernel: transformer_forward.23
= control target key start
LH: loop header
LB: loop body
LE: loop exit
PB: predicated region body
PF: predicated region fallthrough
CT: control target
= control target key end

     0   :  { %v1431_v0 = vmov 0   ;;  %s1866_s0 = inlined_call_operand.vmem [shape: s32[32,1], index: 0, kind: input, shape index: {}]   ;;  %s1867_s1 = inlined_call_operand.vmem [shape: f32[128,128], index: 1, kind: input, shape index: {}]   ;;  %s1868_s2 = inlined_call_operand.vmem [shape: f32[32,128], index: 2, kind: input, shape index: {}]   ;;  %s1869_s3 = inlined_call_operand.vmem [shape: f32[32,128], index: 3, kind: output, shape index: {}]  }
   0x1   :  { %1429 = vset.pattern.permute.xlu0 %v1431_v0  ;;  %v14_v1 = vld [vmem:[%s1866_s0] sm:$0xff]  ;;  %1430 = vset.pattern.permute.xlu1 %v1431_v0  ;;  %v16_v2 = vld [vmem:[%s1866_s0 + $0x10] sm:$0xff]  ;;  %v15_v3 = vld [vmem:[%s1866_s0 + $0x8] sm:$0xff] }
   0x2   :  { %21 = vperm.xlu0 %1429, %v14_v1   ;;  %27 = vperm.xlu1 %1430, %v16_v2   ;;  %v17_v4 = vld [vmem:[%s1866_s0 + $0x18] sm:$0xff]  ;;  %v44_v5 = vld [vmem:[%s1867_s1] sm:$0xff]  ;;  %v45_v6 = vld [vmem:[%s1867_s1 + $0x8] sm:$0xff] }
   0x3   :  { %v61_v7 = vand.u32 4294901760, %v44_v5  ;;  %v64_v8 = vand.u32 4294901760, %v45_v6  ;;  %v46_v9 = vld [vmem:[%s1867_s1 + $0x10] sm:$0xff]  ;;  %v47_v10 = vld [vmem:[%s1867_s1 + $0x18] sm:$0xff]  ;;  %v48_v11 = vld [vmem:[%s1867_s1 + $0x20] sm:$0xff] }
   0x4   :  { %v67_v12 = vand.u32 4294901760, %v46_v9  ;;  %v70_v13 = vand.u32 4294901760, %v47_v10  ;;  %v49_v14 = vld [vmem:[%s1867_s1 + $0x28] sm:$0xff]  ;;  %v73_v16 = vand.u32 4294901760, %v48_v11  ;;  %v50_v19 = vld [vmem:[%s1867_s1 + $0x30] sm:$0xff]  ;;  %v51_v20 = vld [vmem:[%s1867_s1 + $0x38] sm:$0xff] }
   0x5   :  { %v1484_v15 = vpack.c.bf16 %v64_v8, %v61_v7  ;;  %v76_v17 = vand.u32 4294901760, %v49_v14  ;;  %v79_v22 = vand.u32 4294901760, %v50_v19  ;;  %v82_v23 = vand.u32 4294901760, %v51_v20  ;;  %v52_v24 = vld [vmem:[%s1867_s1 + $0x40] sm:$0xff]  ;;  %v53_v25 = vld [vmem:[%s1867_s1 + $0x48] sm:$0xff]  ;;  %v1517_v28 = vld [vmem:[%s1867_s1 + $0x50] sm:$0xff] }
   0x6   :  { %24 = vperm.xlu0 %1429, %v15_v3   ;;  %30 = vperm.xlu1 %1430, %v17_v4   ;;  %v1486_v18 = vpack.c.bf16 %v70_v13, %v67_v12  ;;  %v1508_v26 = vsub.f32 %v46_v9, %v67_v12  ;;  %v1510_v27 = vsub.f32 %v47_v10, %v70_v13  ;;  %v85_v32 = vand.u32 4294901760, %v52_v24  ;;  %v1528_v34 = vld [vmem:[%s1867_s1 + $0x58] sm:$0xff]  ;;  %v1545_v42 = vld [vmem:[%s1867_s1 + $0x60] sm:$0xff]  ;;  %v1555_v47 = vld [vmem:[%s1867_s1 + $0x68] sm:$0xff] }
   0x7   :  { %1311 = vmatprep.subr.bf16.mxu0 %v1484_v15  ;;  %1215 = vmatprep.subr.bf16.mxu1 %v1484_v15  ;;  %v1500_v21 = vpack.c.bf16 %v76_v17, %v73_v16  ;;  %v1523_v31 = vpack.c.bf16 %v82_v23, %v79_v22  ;;  %v88_v33 = vand.u32 4294901760, %v53_v25  ;;  %v1534_v38 = vsub.f32 %v48_v11, %v73_v16  ;;  %v1579_v59 = vld [vmem:[%s1867_s1 + $0x70] sm:$0xff]  ;;  %v59_v0 = vld [vmem:[%s1867_s1 + $0x78] sm:$0xff] }
   0x8   :  { %1313 = vmatpush3.bf16.msra.mxu0 %v1484_v15  ;;  %1217 = vmatpush3.bf16.msra.mxu1 %v1484_v15  ;;  %v198_v29 = vand.u32 4294901760, %v1508_v26  ;;  %v205_v30 = vand.u32 4294901760, %v1510_v27  ;;  %v91_v39 = vand.u32 4294901760, %v1517_v28  ;;  %v1537_v40 = vsub.f32 %v49_v14, %v76_v17 }
   0x9   :  { %1315 = vmatprep.subr.bf16.mxu0 %v1486_v18  ;;  %1219 = vmatprep.subr.bf16.mxu1 %v1486_v18  ;;  %v94_v41 = vand.u32 4294901760, %v1528_v34  ;;  %v212_v45 = vand.u32 4294901760, %v1534_v38  ;;  %v1550_v46 = vpack.c.bf16 %v88_v33, %v85_v32  ;;  %v1557_v48 = vsub.f32 %v44_v5, %v61_v7 }
   0xa   :  { %v1530_v35 = vpack.c.bf16 %v205_v30, %v198_v29  ;;  %v199_v36 = vsub.f32 %v1508_v26, %v198_v29  ;;  %v206_v37 = vsub.f32 %v1510_v27, %v205_v30  ;;  %v1559_v49 = vsub.f32 %v45_v6, %v64_v8 }
   0xb   :  { %v219_v50 = vand.u32 4294901760, %v1537_v40  ;;  %v213_v52 = vsub.f32 %v1534_v38, %v212_v45  ;;  %v1565_v53 = vsub.f32 %v50_v19, %v79_v22  ;;  %v1567_v54 = vsub.f32 %v51_v20, %v82_v23 }
   0xc   :  { %1317 = vmatpush3.bf16.msra.mxu0 %v1486_v18  ;;  %1221 = vmatpush3.bf16.msra.mxu1 %v1486_v18  ;;  %v200_v43 = vand.u32 4294901760, %v199_v36  ;;  %v207_v44 = vand.u32 4294901760, %v206_v37  ;;  %v97_v55 = vand.u32 4294901760, %v1545_v42  ;;  %v100_v58 = vand.u32 4294901760, %v1555_v47 }
   0xd   :  { %1319 = vmatprep.subr.bf16.mxu0 %v1500_v21  ;;  %1223 = vmatprep.subr.bf16.mxu1 %v1500_v21  ;;  %v1570_v56 = vpack.c.bf16 %v219_v50, %v212_v45  ;;  %v220_v57 = vsub.f32 %v1537_v40, %v219_v50  ;;  %v214_v60 = vand.u32 4294901760, %v213_v52  ;;  %v226_v61 = vand.u32 4294901760, %v1565_v53 }
   0xe   :  { %v1562_v51 = vpack.c.bf16 %v207_v44, %v200_v43  ;;  %v233_v62 = vand.u32 4294901760, %v1567_v54  ;;  %v1585_v63 = vpack.c.bf16 %v94_v41, %v91_v39  ;;  %v184_v1 = vand.u32 4294901760, %v1557_v48 }
   0xf   :  { %v191_v2 = vand.u32 4294901760, %v1559_v49  ;;  %v221_v3 = vand.u32 4294901760, %v220_v57  ;;  %v227_v5 = vsub.f32 %v1565_v53, %v226_v61  ;;  %v1596_v7 = vsub.f32 %v52_v24, %v85_v32 }
  0x10   :  { %1321 = vmatpush3.bf16.msra.mxu0 %v1500_v21  ;;  %1225 = vmatpush3.bf16.msra.mxu1 %v1500_v21  ;;  %v1592_v4 = vpack.c.bf16 %v233_v62, %v226_v61  ;;  %v234_v6 = vsub.f32 %v1567_v54, %v233_v62  ;;  %v103_v8 = vand.u32 4294901760, %v1579_v59  ;;  %v1601_v10 = vsub.f32 %v53_v25, %v88_v33 }
  0x11   :  { %1323 = vmatprep.subr.bf16.mxu0 %v1523_v31  ;;  %1227 = vmatprep.subr.bf16.mxu1 %v1523_v31  ;;  %v1599_v9 = vpack.c.bf16 %v221_v3, %v214_v60  ;;  %v106_v11 = vand.u32 4294901760, %v59_v0  ;;  %v228_v12 = vand.u32 4294901760, %v227_v5  ;;  %v240_v14 = vand.u32 4294901760, %v1596_v7 }
  0x12   :  { %v235_v13 = vand.u32 4294901760, %v234_v6  ;;  %v1608_v16 = vpack.c.bf16 %v100_v58, %v97_v55  ;;  %v185_v17 = vsub.f32 %v1557_v48, %v184_v1  ;;  %v192_v19 = vsub.f32 %v1559_v49, %v191_v2 }
  0x13   :  { %v247_v20 = vand.u32 4294901760, %v1601_v10  ;;  %v241_v23 = vsub.f32 %v1596_v7, %v240_v14  ;;  %v253_v24 = vsub.f32 %v1517_v28, %v91_v39  ;;  %v260_v25 = vsub.f32 %v1528_v34, %v94_v41 }
  0x14   :  { %1325 = vmatpush3.bf16.msra.mxu0 %v1523_v31  ;;  %1229 = vmatpush3.bf16.msra.mxu1 %v1523_v31  ;;  %v1613_v22 = vpack.c.bf16 %v235_v13, %v228_v12  ;;  %v1625_v37 = vpack.c.bf16 %v106_v11, %v103_v8  ;;  %v186_v28 = vand.u32 4294901760, %v185_v17  ;;  %v193_v39 = vand.u32 4294901760, %v192_v19 }
  0x15   :  { %1327 = vmatprep.subr.bf16.mxu0 %v1550_v46  ;;  %1231 = vmatprep.subr.bf16.mxu1 %v1550_v46  ;;  %v1618_v29 = vpack.c.bf16 %v247_v20, %v240_v14  ;;  %v248_v30 = vsub.f32 %v1601_v10, %v247_v20  ;;  %v242_v32 = vand.u32 4294901760, %v241_v23  ;;  %v254_v33 = vand.u32 4294901760, %v253_v24 }
  0x16   :  { %v261_v36 = vand.u32 4294901760, %v260_v25  ;;  %v267_v45 = vsub.f32 %v1545_v42, %v97_v55  ;;  %v274_v52 = vsub.f32 %v1555_v47, %v100_v58  ;;  %v1637_v62 = vpack.c.bf16 %v191_v2, %v184_v1 }
  0x17   :  { %v249_v34 = vand.u32 4294901760, %v248_v30  ;;  %v255_v43 = vsub.f32 %v253_v24, %v254_v33  ;;  %v1639_v3 = vpack.c.bf16 %v193_v39, %v186_v28  ;;  %v281_v47 = vsub.f32 %v1579_v59, %v103_v8 }
  0x18   :  { %1329 = vmatpush3.bf16.msra.mxu0 %v1550_v46  ;;  %1233 = vmatpush3.bf16.msra.mxu1 %v1550_v46  ;;  %v1627_v41 = vpack.c.bf16 %v261_v36, %v254_v33  ;;  %v262_v44 = vsub.f32 %v260_v25, %v261_v36  ;;  %v268_v61 = vand.u32 4294901760, %v267_v45  ;;  %v275_v42 = vand.u32 4294901760, %v274_v52 }
  0x19   :  { %1331 = vmatprep.subr.bf16.mxu0 %v1585_v63  ;;  %1235 = vmatprep.subr.bf16.mxu1 %v1585_v63  ;;  %v1630_v50 = vpack.c.bf16 %v249_v34, %v242_v32  ;;  %v256_v57 = vand.u32 4294901760, %v255_v43  ;;  %v288_v58 = vsub.f32 %v59_v0, %v106_v11  ;;  %v282_v14 = vand.u32 4294901760, %v281_v47 }
  0x1a   :  { %v263_v60 = vand.u32 4294901760, %v262_v44  ;;  %v269_v5 = vsub.f32 %v267_v45, %v268_v61  ;;  %v1644_v6 = vpack.c.bf16 %v275_v42, %v268_v61  ;;  %v276_v12 = vsub.f32 %v274_v52, %v275_v42 }
  0x1b   :  { %v289_v1 = vand.u32 4294901760, %v288_v58  ;;  %v283_v19 = vsub.f32 %v281_v47, %v282_v14  ;;  %v1658_v23 = vpack.c.bf16 %v1559_v49, %v1557_v48  ;;  %v1662_v30 = vpack.c.bf16 %v1510_v27, %v1508_v26 }
  0x1c   :  { %1333 = vmatpush3.bf16.msra.mxu0 %v1585_v63  ;;  %1237 = vmatpush3.bf16.msra.mxu1 %v1585_v63  ;;  %v1641_v55 = vpack.c.bf16 %v263_v60, %v256_v57  ;;  %v270_v13 = vand.u32 4294901760, %v269_v5  ;;  %v277_v2 = vand.u32 4294901760, %v276_v12  ;;  %v1666_v32 = vpack.c.bf16 %v1537_v40, %v1534_v38 }
  0x1d   :  { %1335 = vmatprep.subr.bf16.mxu0 %v1608_v16  ;;  %1239 = vmatprep.subr.bf16.mxu1 %v1608_v16  ;;  %v1650_v17 = vpack.c.bf16 %v289_v1, %v282_v14  ;;  %v290_v59 = vsub.f32 %v288_v58, %v289_v1  ;;  %v284_v8 = vand.u32 4294901760, %v283_v19  ;;  %v1670_v33 = vpack.c.bf16 %v1567_v54, %v1565_v53 }
  0x1e   :  { %v1652_v0 = vpack.c.bf16 %v277_v2, %v270_v13  ;;  %v1674_v36 = vpack.c.bf16 %v1601_v10, %v1596_v7  ;;  %v1676_v28 = vpack.c.bf16 %v260_v25, %v253_v24  ;;  %v1678_v48 = vpack.c.bf16 %v274_v52, %v267_v45 }
  0x1f   :  { %v291_v11 = vand.u32 4294901760, %v290_v59  ;;  %v1680_v49 = vpack.c.bf16 %v288_v58, %v281_v47  ;;  %v18_v26 = vlaneseq  ;;  %v1432_v40 = vmov 0.0  }
  0x20   :  { %1337 = vmatpush3.bf16.msra.mxu0 %v1608_v16  ;;  %1241 = vmatpush3.bf16.msra.mxu1 %v1608_v16  ;;  %v1433_v2 = vmov 1.0  }
  0x21   :  { %1339 = vmatprep.subr.bf16.mxu0 %v1625_v37  ;;  %1243 = vmatprep.subr.bf16.mxu1 %v1625_v37  ;;  %v1654_v20 = vpack.c.bf16 %v291_v11, %v284_v8  ;;  %v1682_v27 = vand.u32 127, %v18_v26 }
  0x24   :  { %1341 = vmatpush3.bf16.msra.mxu0 %v1625_v37  ;;  %1245 = vmatpush3.bf16.msra.mxu1 %v1625_v37 }
  0x25   :  { %1343 = vmatprep.subr.bf16.mxu0 %v1637_v62  ;;  %1247 = vmatprep.subr.bf16.mxu1 %v1639_v3 }
  0x81   :  { %v1684_v39 = vpop.permute.xlu0 %21  ;;  %v1686_v38 = vpop.permute.xlu1 %27 }
  0x82   :  { %vm32_vm0 = vcmp.eq.s32.totalorder %v1682_v27, %v1684_v39  ;;  %vm34_vm1 = vcmp.eq.s32.totalorder %v1682_v27, %v1686_v38 }
  0x83   :  { %v850_v53 = vsel %vm32_vm0, 1.0, %v1432_v40  ;;  %v852_v54 = vsel %vm34_vm1, 1.0, %v1432_v40 }
  0x84   :  { %v1698_v7 = vsub.f32 %v850_v53, %v850_v53  ;;  %v1700_v10 = vsub.f32 %v852_v54, %v852_v54 }
  0x85   :  { %v1702_v24 = vpop.permute.xlu0 %24  ;;  %v1704_v25 = vpop.permute.xlu1 %30 }
  0x86   :  { %vm33_vm2 = vcmp.eq.s32.totalorder %v1682_v27, %v1702_v24  ;;  %v143_v34 = vand.u32 4294901760, %v1698_v7  ;;  %vm35_vm3 = vcmp.eq.s32.totalorder %v1682_v27, %v1704_v25  ;;  %v163_v43 = vand.u32 4294901760, %v1700_v10 }
  0x87   :  { %v851_v44 = vsel %vm33_vm2, 1.0, %v1432_v40  ;;  %v853_v45 = vsel %vm35_vm3, 1.0, %v1432_v40 }
  0x88   :  { %v1718_v52 = vsub.f32 %v851_v44, %v851_v44  ;;  %1132 = vmatprep.mubr.f32.mxu0 %v143_v34  ;;  %v1720_v57 = vsub.f32 %v853_v45, %v853_v45  ;;  %v144_v60 = vsub.f32 %v1698_v7, %v143_v34  ;;  %v164_v47 = vsub.f32 %v1700_v10, %v163_v43 }
  0x8a   :  { %v145_v61 = vand.u32 4294901760, %v144_v60  ;;  %v153_v42 = vand.u32 4294901760, %v1718_v52  ;;  %v173_v5 = vand.u32 4294901760, %v1720_v57  ;;  %v165_v14 = vand.u32 4294901760, %v164_v47 }
  0x8c   :  { %1018 = vmatprep.mubr.f32.mxu1 %v145_v61  ;;  %1133 = vmatmul.mubr.f32.vlgmr.msra.gmra.mrb[0].mxu0 %v153_v42  ;;  %v154_v58 = vsub.f32 %v1718_v52, %v153_v42  ;;  %v174_v12 = vsub.f32 %v1720_v57, %v173_v5 }
  0x8d   :  { %1345 = vmatpush3.bf16.msra.mxu0 %v1637_v62  ;;  %1135 = vmatprep.mubr.f32.mxu0 %v163_v43  ;;  %v837_v62 = vld [vmem:[%s1868_s2 + $0x18] sm:$0xff] }
  0x8e   :  { %1347 = vmatprep.subr.bf16.mxu0 %v1530_v35  ;;  %v155_v13 = vand.u32 4294901760, %v154_v58  ;;  %v175_v1 = vand.u32 4294901760, %v174_v12 }
  0x90   :  { %1019 = vmatmul.mubr.f32.vlgmr.msra.gmra.mrb[0].mxu1 %v155_v13  ;;  %1136 = vmatmul.mubr.f32.gmra.mrb[2].mxu0 %v173_v5 }
  0x91   :  { %1249 = vmatpush3.bf16.msra.mxu1 %v1639_v3  ;;  %1349 = vmatpush3.bf16.msra.mxu0 %v1530_v35 }
  0x92   :  { %1170 = vmatprep.mubr.msk.f32.mxu0 %vm32_vm0, %v1433_v2  ;;  %1021 = vmatprep.mubr.f32.mxu1 %v165_v14 }
  0x93   :  { %1251 = vmatprep.subr.bf16.mxu1 %v1562_v51  ;;  %1351 = vmatprep.subr.bf16.mxu0 %v1570_v56 }
  0x94   :  { %1022 = vmatmul.mubr.f32.gmra.mrb[2].mxu1 %v175_v1 }
  0x95   :  { %1253 = vmatpush3.bf16.msra.mxu1 %v1562_v51  ;;  %1353 = vmatpush3.bf16.msra.mxu0 %v1570_v56  ;;  %v835_v51 = vld [vmem:[%s1868_s2 + $0x8] sm:$0xff] }
  0x96   :  { %1056 = vmatprep.mubr.msk.f32.mxu1 %vm32_vm0, %v1433_v2  ;;  %1255 = vmatprep.subr.bf16.mxu1 %v1599_v9 }
  0x97   :  { %1355 = vmatprep.subr.bf16.mxu0 %v1592_v4 }
  0x99   :  { %1257 = vmatpush3.bf16.msra.mxu1 %v1599_v9  ;;  %1357 = vmatpush3.bf16.msra.mxu0 %v1592_v4  ;;  %v834_v9 = vld [vmem:[%s1868_s2] sm:$0xff] }
  0x9a   :  { %1259 = vmatprep.subr.bf16.mxu1 %v1613_v22  ;;  %1359 = vmatprep.subr.bf16.mxu0 %v1618_v29 }
  0x9d   :  { %1261 = vmatpush3.bf16.msra.mxu1 %v1613_v22  ;;  %1361 = vmatpush3.bf16.msra.mxu0 %v1618_v29 }
  0x9e   :  { %1263 = vmatprep.subr.bf16.mxu1 %v1630_v50  ;;  %1363 = vmatprep.subr.bf16.mxu0 %v1627_v41 }
  0xa1   :  { %1265 = vmatpush3.bf16.msra.mxu1 %v1630_v50  ;;  %1365 = vmatpush3.bf16.msra.mxu0 %v1627_v41 }
  0xa2   :  { %1267 = vmatprep.subr.bf16.mxu1 %v1641_v55  ;;  %1367 = vmatprep.subr.bf16.mxu0 %v1644_v6 }
  0xa5   :  { %1269 = vmatpush3.bf16.msra.mxu1 %v1641_v55  ;;  %1369 = vmatpush3.bf16.msra.mxu0 %v1644_v6  ;;  %v836_v6 = vld [vmem:[%s1868_s2 + $0x10] sm:$0xff] }
  0xa6   :  { %1271 = vmatprep.subr.bf16.mxu1 %v1652_v0  ;;  %1371 = vmatprep.subr.bf16.mxu0 %v1650_v17 }
  0xa9   :  { %1273 = vmatpush3.bf16.msra.mxu1 %v1652_v0  ;;  %1373 = vmatpush3.bf16.msra.mxu0 %v1650_v17 }
  0xaa   :  { %1275 = vmatprep.subr.bf16.mxu1 %v1654_v20  ;;  %1375 = vmatprep.subr.bf16.mxu0 %v1484_v15 }
  0xac   :  { %1171 = vmatmul.mubr.msk.f32.vlgmr.msra.gmra.mrb[0].mxu0 %vm33_vm2, %v1433_v2 }
  0xad   :  { %1277 = vmatpush3.bf16.msra.mxu1 %v1654_v20  ;;  %1173 = vmatprep.mubr.msk.f32.mxu0 %vm34_vm1, %v1433_v2 }
  0xae   :  { %1377 = vmatpush3.bf16.msra.mxu0 %v1484_v15  ;;  %1279 = vmatprep.subr.bf16.mxu1 %v1658_v23 }
  0xaf   :  { %1379 = vmatprep.subr.bf16.mxu0 %v1486_v18 }
  0xb0   :  { %1057 = vmatmul.mubr.msk.f32.vlgmr.msra.gmra.mrb[0].mxu1 %vm33_vm2, %v1433_v2  ;;  %1174 = vmatmul.mubr.msk.f32.gmra.mrb[2].mxu0 %vm35_vm3, %v1433_v2 }
  0xb1   :  { %1059 = vmatprep.mubr.msk.f32.mxu1 %vm34_vm1, %v1433_v2  ;;  %1281 = vmatpush3.bf16.msra.mxu1 %v1658_v23 }
  0xb2   :  { %1381 = vmatpush3.bf16.msra.mxu0 %v1486_v18  ;;  %1208 = vmatprep.mubr.msk.f32.mxu0 %vm32_vm0, %v1433_v2 }
  0xb3   :  { %1283 = vmatprep.subr.bf16.mxu1 %v1662_v30  ;;  %1383 = vmatprep.subr.bf16.mxu0 %v1500_v21 }
  0xb4   :  { %1060 = vmatmul.mubr.msk.f32.gmra.mrb[2].mxu1 %vm35_vm3, %v1433_v2 }
  0xb5   :  { %1285 = vmatpush3.bf16.msra.mxu1 %v1662_v30  ;;  %1094 = vmatprep.mubr.f32.mxu1 %v1698_v7 }
  0xb6   :  { %1385 = vmatpush3.bf16.msra.mxu0 %v1500_v21  ;;  %1287 = vmatprep.subr.bf16.mxu1 %v1666_v32 }
  0xb7   :  { %1387 = vmatprep.subr.bf16.mxu0 %v1523_v31 }
  0xb9   :  { %1289 = vmatpush3.bf16.msra.mxu1 %v1666_v32 }
  0xba   :  { %1389 = vmatpush3.bf16.msra.mxu0 %v1523_v31  ;;  %1291 = vmatprep.subr.bf16.mxu1 %v1670_v33 }
  0xbb   :  { %1391 = vmatprep.subr.bf16.mxu0 %v1550_v46 }
  0xbd   :  { %1293 = vmatpush3.bf16.msra.mxu1 %v1670_v33 }
  0xbe   :  { %1393 = vmatpush3.bf16.msra.mxu0 %v1550_v46  ;;  %1295 = vmatprep.subr.bf16.mxu1 %v1674_v36 }
  0xbf   :  { %1395 = vmatprep.subr.bf16.mxu0 %v1585_v63 }
  0xc1   :  { %1297 = vmatpush3.bf16.msra.mxu1 %v1674_v36 }
  0xc2   :  { %1397 = vmatpush3.bf16.msra.mxu0 %v1585_v63  ;;  %1299 = vmatprep.subr.bf16.mxu1 %v1676_v28 }
  0xc3   :  { %1399 = vmatprep.subr.bf16.mxu0 %v1608_v16 }
  0xc5   :  { %1301 = vmatpush3.bf16.msra.mxu1 %v1676_v28 }
  0xc6   :  { %1401 = vmatpush3.bf16.msra.mxu0 %v1608_v16  ;;  %1303 = vmatprep.subr.bf16.mxu1 %v1678_v48 }
  0xc7   :  { %1403 = vmatprep.subr.bf16.mxu0 %v1625_v37 }
  0xc9   :  { %1305 = vmatpush3.bf16.msra.mxu1 %v1678_v48 }
  0xca   :  { %1405 = vmatpush3.bf16.msra.mxu0 %v1625_v37  ;;  %1307 = vmatprep.subr.bf16.mxu1 %v1680_v49 }
  0xcd   :  { %1209 = vmatmul.mubr.msk.f32.vlgmr.msra.gmra.mrb[0].mxu0 %vm33_vm2, %v1433_v2  ;;  %1309 = vmatpush3.bf16.msra.mxu1 %v1680_v49 }
  0xce   :  { %1211 = vmatprep.mubr.msk.f32.mxu0 %vm34_vm1, %v1433_v2 }
  0xd0   :  { %1095 = vmatmul.mubr.f32.vlgmr.msra.gmra.mrb[0].mxu1 %v1718_v52 }
  0xd1   :  { %1212 = vmatmul.mubr.msk.f32.gmra.mrb[2].mxu0 %vm35_vm3, %v1433_v2  ;;  %1097 = vmatprep.mubr.f32.mxu1 %v1700_v10 }
  0xd4   :  { %1098 = vmatmul.mubr.f32.gmra.mrb[2].mxu1 %v1720_v57 }
 0x1a0   :  { %v1210_v15 = vpop.f32.mrb[0].mxu0 }
 0x1a1   :  { %v808_v18 = vpop.f32.mrb[1].mxu0 }
 0x1a3   :  { %v1096_v21 = vpop.f32.mrb[0].mxu1 }
 0x1a4   :  { %v1406_v31 = vadd.f32 %v1210_v15, %v1096_v21  ;;  %v1213_v35 = vpop.f32.mrb[2].mxu0  ;;  %v450_v46 = vpop.f32.mrb[1].mxu1 }
 0x1a5   :  { %v1407_v56 = vadd.f32 %v808_v18, %v450_v46  ;;  %v820_v63 = vpop.f32.mrb[3].mxu0 }
 0x1a6   :  { %v831_v4 = vmul.f32 11.313708, %v1406_v31 }
 0x1a7   :  { %v830_v16 = vmul.f32 11.313708, %v1407_v56  ;;  %v1099_v22 = vpop.f32.mrb[2].mxu1 }
 0x1a8   :  { %v839_v29 = vadd.f32 %v835_v51, %v831_v4  ;;  %v1408_v37 = vadd.f32 %v1213_v35, %v1099_v22  ;;  %v464_v41 = vpop.f32.mrb[3].mxu1 }
 0x1a9   :  { %v838_v50 = vadd.f32 %v834_v9, %v830_v16  ;;  %v1409_v3 = vadd.f32 %v820_v63, %v464_v41 }
 0x1aa   :  { %843 = vst [vmem:[%s1869_s3 + $0x8] sm:$0xff] %v839_v29  ;;  %v833_v55 = vmul.f32 11.313708, %v1408_v37 }
 0x1ab   :  { %842 = vst [vmem:[%s1869_s3] sm:$0xff] %v838_v50  ;;  %v832_v17 = vmul.f32 11.313708, %v1409_v3 }
 0x1ac   :  { %v841_v19 = vadd.f32 %v837_v62, %v833_v55 }
 0x1ad   :  { %v840_v59 = vadd.f32 %v836_v6, %v832_v17 }
 0x1ae   :  { %845 = vst [vmem:[%s1869_s3 + $0x18] sm:$0xff] %v841_v19 }
 0x1af   :  { %844 = vst [vmem:[%s1869_s3 + $0x10] sm:$0xff] %v840_v59 }

// kernel: transformer_forward.26
= control target key start
LH: loop header
LB: loop body
LE: loop exit
PB: predicated region body
PF: predicated region fallthrough
CT: control target
= control target key end

     0   :  { %v4189_v3 = vmov 0.0   ;;  %s4183_s1 = inlined_call_operand.vmem [shape: f32[128,256], index: 1, kind: input, shape index: {}]   ;;  %s4184_s0 = inlined_call_operand.vmem [shape: f32[32,128], index: 0, kind: input, shape index: {}]   ;;  %s4185_s3 = inlined_call_operand.vmem [shape: f32[256,128], index: 3, kind: input, shape index: {}]   ;;  %s4186_s2 = inlined_call_operand.vmem [shape: f32[1,256], index: 2, kind: input, shape index: {}]   ;;  %s4187_s4 = inlined_call_operand.vmem [shape: f32[1,128], index: 4, kind: input, shape index: {}]   ;;  %s4188_s5 = inlined_call_operand.vmem [shape: f32[32,128], index: 5, kind: output, shape index: {}]  }
   0x1   :  { %v25_v0 = vld [vmem:[%s4183_s1 + $0x8] sm:$0xff]  ;;  %v27_v1 = vld [vmem:[%s4183_s1 + $0x18] sm:$0xff]  ;;  %v24_v2 = vld [vmem:[%s4183_s1] sm:$0xff]  ;;  %164 = vmatprep.mubr.f32.mxu0 %v4189_v3 }
   0x2   :  { %v68_v4 = vand.u32 4294901760, %v25_v0  ;;  %v72_v5 = vand.u32 4294901760, %v27_v1  ;;  %v26_v6 = vld [vmem:[%s4183_s1 + $0x10] sm:$0xff]  ;;  %v70_v7 = vand.u32 4294901760, %v24_v2  ;;  %v29_v8 = vld [vmem:[%s4183_s1 + $0x28] sm:$0xff]  ;;  %v31_v9 = vld [vmem:[%s4183_s1 + $0x38] sm:$0xff] }
   0x3   :  { %v74_v10 = vand.u32 4294901760, %v26_v6  ;;  %v76_v11 = vand.u32 4294901760, %v29_v8  ;;  %v80_v12 = vand.u32 4294901760, %v31_v9  ;;  %v28_v13 = vld [vmem:[%s4183_s1 + $0x20] sm:$0xff]  ;;  %v30_v14 = vld [vmem:[%s4183_s1 + $0x30] sm:$0xff]  ;;  %v33_v15 = vld [vmem:[%s4183_s1 + $0x48] sm:$0xff] }
   0x4   :  { %v2912_v16 = vpack.c.bf16 %v72_v5, %v68_v4  ;;  %v35_v17 = vld [vmem:[%s4183_s1 + $0x58] sm:$0xff]  ;;  %v32_v18 = vld [vmem:[%s4183_s1 + $0x40] sm:$0xff]  ;;  %v34_v19 = vld [vmem:[%s4183_s1 + $0x50] sm:$0xff]  ;;  %v78_v23 = vand.u32 4294901760, %v28_v13  ;;  %v82_v24 = vand.u32 4294901760, %v30_v14  ;;  %v84_v25 = vand.u32 4294901760, %v33_v15 }
   0x5   :  { %v2923_v20 = vpack.c.bf16 %v74_v10, %v70_v7  ;;  %v2925_v21 = vpack.c.bf16 %v80_v12, %v76_v11  ;;  %v37_v22 = vld [vmem:[%s4183_s1 + $0x68] sm:$0xff]  ;;  %v88_v26 = vand.u32 4294901760, %v35_v17  ;;  %v86_v27 = vand.u32 4294901760, %v32_v18  ;;  %v39_v29 = vld [vmem:[%s4183_s1 + $0x78] sm:$0xff]  ;;  %v36_v30 = vld [vmem:[%s4183_s1 + $0x60] sm:$0xff] }
   0x6   :  { %4348 = vst [vmem:[#allocation2_spill] sm:$0xff] %v2912_v16  ;;  %2421 = vmatprep.subr.bf16.mxu0 %v2912_v16  ;;  %v90_v28 = vand.u32 4294901760, %v34_v19  ;;  %v2938_v31 = vsub.f32 %v25_v0, %v68_v4  ;;  %v2940_v32 = vsub.f32 %v27_v1, %v72_v5  ;;  %v2943_v33 = vpack.c.bf16 %v82_v24, %v78_v23  ;;  %v38_v35 = vld [vmem:[%s4183_s1 + $0x70] sm:$0xff]  ;;  %v41_v40 = vld [vmem:[%s4183_s1 + $0x88] sm:$0xff]  ;;  %v43_v41 = vld [vmem:[%s4183_s1 + $0x98] sm:$0xff] }
   0x7   :  { %4349 = vst [vmem:[#allocation3_spill] sm:$0xff] %v2923_v20  ;;  %4350 = vst [vmem:[#allocation4_spill] sm:$0xff] %v2925_v21  ;;  %2423 = vmatpush1.bf16.msra.mxu0 %v2923_v20  ;;  %v92_v34 = vand.u32 4294901760, %v37_v22  ;;  %v2948_v36 = vsub.f32 %v24_v2, %v70_v7  ;;  %v2950_v37 = vsub.f32 %v26_v6, %v74_v10  ;;  %v96_v44 = vand.u32 4294901760, %v39_v29  ;;  %v40_v46 = vld [vmem:[%s4183_s1 + $0x80] sm:$0xff]  ;;  %v42_v47 = vld [vmem:[%s4183_s1 + $0x90] sm:$0xff] }
   0x8   :  { %2425 = vmatprep.subr.bf16.mxu0 %v2925_v21  ;;  %4351 = vst [vmem:[#allocation5_spill] sm:$0xff] %v2943_v33  ;;  %v2952_v38 = vsub.f32 %v29_v8, %v76_v11  ;;  %v2954_v39 = vpack.c.bf16 %v88_v26, %v84_v25  ;;  %v2962_v42 = vsub.f32 %v31_v9, %v80_v12  ;;  %v94_v45 = vand.u32 4294901760, %v36_v30  ;;  %v45_v52 = vld [vmem:[%s4183_s1 + $0xa8] sm:$0xff]  ;;  %v47_v57 = vld [vmem:[%s4183_s1 + $0xb8] sm:$0xff]  ;;  %v44_v58 = vld [vmem:[%s4183_s1 + $0xa0] sm:$0xff] }
   0x9   :  { %v2964_v43 = vsub.f32 %v28_v13, %v78_v23  ;;  %v2973_v48 = vsub.f32 %v30_v14, %v82_v24  ;;  %v2975_v49 = vsub.f32 %v33_v15, %v84_v25  ;;  %v2977_v50 = vpack.c.bf16 %v90_v28, %v86_v27  ;;  %v46_v59 = vld [vmem:[%s4183_s1 + $0xb0] sm:$0xff]  ;;  %v49_v0 = vld [vmem:[%s4183_s1 + $0xc8] sm:$0xff]  ;;  %v51_v1 = vld [vmem:[%s4183_s1 + $0xd8] sm:$0xff] }
   0xa   :  { %4352 = vst [vmem:[#allocation6_spill] sm:$0xff] %v2954_v39  ;;  %v98_v51 = vand.u32 4294901760, %v38_v35  ;;  %v2983_v53 = vsub.f32 %v35_v17, %v88_v26  ;;  %v2985_v54 = vpack.c.bf16 %v96_v44, %v92_v34  ;;  %v100_v55 = vand.u32 4294901760, %v41_v40  ;;  %v48_v11 = vld [vmem:[%s4183_s1 + $0xc0] sm:$0xff]  ;;  %v50_v12 = vld [vmem:[%s4183_s1 + $0xd0] sm:$0xff] }
   0xb   :  { %2427 = vmatpush1.bf16.msra.mxu0 %v2943_v33  ;;  %4353 = vst [vmem:[#allocation7_spill] sm:$0xff] %v2977_v50  ;;  %v104_v56 = vand.u32 4294901760, %v43_v41  ;;  %v2996_v60 = vsub.f32 %v32_v18, %v86_v27  ;;  %v2998_v61 = vsub.f32 %v34_v19, %v90_v28  ;;  %v102_v62 = vand.u32 4294901760, %v40_v46  ;;  %v20_v28 = vld [vmem:[%s4184_s0] sm:$0xff] }
   0xc   :  { %2429 = vmatprep.subr.bf16.mxu0 %v2954_v39  ;;  %4354 = vst [vmem:[#allocation8_spill] sm:$0xff] %v2985_v54  ;;  %v106_v63 = vand.u32 4294901760, %v42_v47  ;;  %v3006_v2 = vsub.f32 %v37_v22, %v92_v34  ;;  %v3008_v4 = vsub.f32 %v39_v29, %v96_v44  ;;  %v3010_v5 = vpack.c.bf16 %v98_v51, %v94_v45 }
   0xd   :  { %v3012_v6 = vsub.f32 %v36_v30, %v94_v45  ;;  %v108_v7 = vand.u32 4294901760, %v45_v52  ;;  %v112_v8 = vand.u32 4294901760, %v47_v57  ;;  %v110_v9 = vand.u32 4294901760, %v44_v58 }
   0xe   :  { %4355 = vst [vmem:[#allocation9_spill] sm:$0xff] %v3010_v5  ;;  %v114_v10 = vand.u32 4294901760, %v46_v59  ;;  %v3022_v13 = vsub.f32 %v38_v35, %v98_v51  ;;  %v3024_v14 = vpack.c.bf16 %v104_v56, %v100_v55  ;;  %v116_v15 = vand.u32 4294901760, %v49_v0  ;;  %v52_v51 = vld [vmem:[%s4183_s1 + $0xe0] sm:$0xff] }
   0xf   :  { %2431 = vmatpush1.bf16.msra.mxu0 %v2977_v50  ;;  %v120_v17 = vand.u32 4294901760, %v51_v1  ;;  %v3026_v18 = vsub.f32 %v41_v40, %v100_v55  ;;  %v3028_v19 = vsub.f32 %v43_v41, %v104_v56  ;;  %v3030_v22 = vpack.c.bf16 %v106_v63, %v102_v62  ;;  %v53_v40 = vld [vmem:[%s4183_s1 + $0xe8] sm:$0xff]  ;;  %v55_v41 = vld [vmem:[%s4183_s1 + $0xf8] sm:$0xff] }
  0x10   :  { %2433 = vmatprep.subr.bf16.mxu0 %v2985_v54  ;;  %4356 = vst [vmem:[#allocation10_spill] sm:$0xff] %v3024_v14  ;;  %v3032_v23 = vsub.f32 %v40_v46, %v102_v62  ;;  %v3034_v24 = vsub.f32 %v42_v47, %v106_v63  ;;  %v3036_v25 = vpack.c.bf16 %v112_v8, %v108_v7  ;;  %v118_v26 = vand.u32 4294901760, %v48_v11 }
  0x11   :  { %4357 = vst [vmem:[#allocation11_spill] sm:$0xff] %v3030_v22  ;;  %v122_v27 = vand.u32 4294901760, %v50_v12  ;;  %v3042_v29 = vsub.f32 %v45_v52, %v108_v7  ;;  %v3044_v30 = vsub.f32 %v47_v57, %v112_v8  ;;  %v3046_v34 = vpack.c.bf16 %v114_v10, %v110_v9  ;;  %v3071_v52 = vld [vmem:[%s4183_s1 + $0xf0] sm:$0xff] }
  0x12   :  { %4358 = vst [vmem:[#allocation12_spill] sm:$0xff] %v3036_v25  ;;  %v3048_v35 = vsub.f32 %v44_v58, %v110_v9  ;;  %v3057_v44 = vsub.f32 %v46_v59, %v114_v10  ;;  %v3059_v45 = vpack.c.bf16 %v120_v17, %v116_v15  ;;  %v3061_v46 = vsub.f32 %v49_v0, %v116_v15 }
  0x13   :  { %2435 = vmatpush1.bf16.msra.mxu0 %v3010_v5  ;;  %4359 = vst [vmem:[#allocation13_spill] sm:$0xff] %v3046_v34  ;;  %v3063_v47 = vsub.f32 %v51_v1, %v120_v17  ;;  %v4191_v55 = vand.u32 4294901760, %v2938_v31  ;;  %v4192_v56 = vand.u32 4294901760, %v2940_v32  ;;  %v3075_v57 = vand.u32 4294901760, %v20_v28 }
  0x14   :  { %2437 = vmatprep.subr.bf16.mxu0 %v3024_v14  ;;  %4360 = vst [vmem:[#allocation14_spill] sm:$0xff] %v3059_v45  ;;  %v4195_v58 = vand.u32 4294901760, %v2948_v36  ;;  %v3078_v59 = vpack.c.bf16 %v122_v27, %v118_v26  ;;  %v3080_v62 = vsub.f32 %v48_v11, %v118_v26  ;;  %v124_v63 = vand.u32 4294901760, %v53_v40 }
  0x15   :  { %v128_v0 = vand.u32 4294901760, %v55_v41  ;;  %v126_v1 = vand.u32 4294901760, %v52_v51  ;;  %v212_v8 = vsub.f32 %v2938_v31, %v4191_v55  ;;  %v224_v9 = vsub.f32 %v2940_v32, %v4192_v56 }
  0x16   :  { %4361 = vst [vmem:[#allocation15_spill] sm:$0xff] %v3078_v59  ;;  %v3092_v10 = vsub.f32 %v20_v28, %v3075_v57  ;;  %v218_v11 = vsub.f32 %v2948_v36, %v4195_v58  ;;  %v4196_v15 = vand.u32 4294901760, %v2950_v37  ;;  %v4197_v17 = vand.u32 4294901760, %v2952_v38 }
  0x17   :  { %2439 = vmatpush1.bf16.msra.mxu0 %v3030_v22  ;;  %v213_v26 = vand.u32 4294901760, %v212_v8  ;;  %v225_v3 = vand.u32 4294901760, %v224_v9  ;;  %v4204_v55 = vand.u32 4294901760, %v2962_v42  ;;  %v4207_v7 = vand.u32 4294901760, %v2964_v43 }
  0x18   :  { %2441 = vmatprep.subr.bf16.mxu0 %v3036_v25  ;;  %4362 = vst [vmem:[#allocation16_spill] sm:$0xff] %v3092_v10  ;;  %v3101_v56 = vsub.f32 %v50_v12, %v122_v27  ;;  %v230_v28 = vsub.f32 %v2950_v37, %v4196_v15  ;;  %v236_v58 = vsub.f32 %v2952_v38, %v4197_v17  ;;  %v4212_v27 = vand.u32 4294901760, %v2973_v48 }
  0x19   :  { %v3111_v8 = vpack.c.bf16 %v128_v0, %v124_v63  ;;  %v248_v9 = vsub.f32 %v2962_v42, %v4204_v55  ;;  %v242_v12 = vsub.f32 %v2964_v43, %v4207_v7  ;;  %v3121_v15 = vsub.f32 %v53_v40, %v124_v63 }
  0x1a   :  { %v4364_v17 = vand.u32 4294901760, %v3071_v52  ;;  %v2452_v14 = vpack.c.bf16 %v225_v3, %v213_v26  ;;  %v4366_v55 = vand.u32 4294901760, %v3092_v10  ;;  %v254_v7 = vsub.f32 %v2973_v48, %v4212_v27 }
  0x1b   :  { %2443 = vmatpush1.bf16.msra.mxu0 %v3046_v34  ;;  %4363 = vst [vmem:[#allocation17_spill] sm:$0xff] %v3111_v8  ;;  %v219_v34 = vand.u32 4294901760, %v218_v11  ;;  %v231_v40 = vand.u32 4294901760, %v230_v28  ;;  %v237_v63 = vand.u32 4294901760, %v236_v58  ;;  %v249_v54 = vand.u32 4294901760, %v248_v9 }
  0x1c   :  { %2445 = vmatprep.subr.bf16.mxu0 %v3059_v45  ;;  %v3125_v25 = vpack.c.bf16 %v4364_v17, %v126_v1  ;;  %v168_v5 = vsub.f32 %v3092_v10, %v4366_v55  ;;  %v4217_v45 = vand.u32 4294901760, %v2983_v53  ;;  %v4218_v17 = vand.u32 4294901760, %v2996_v60 }
  0x1d   :  { %v243_v11 = vand.u32 4294901760, %v242_v12  ;;  %v255_v22 = vand.u32 4294901760, %v254_v7  ;;  %v4367_v3 = vand.u32 4294901760, %v2975_v49  ;;  %v4221_v55 = vand.u32 4294901760, %v2998_v61 }
  0x1e   :  { %4365 = vst [vmem:[#allocation18_spill] sm:$0xff] %v3125_v25  ;;  %v272_v28 = vsub.f32 %v2983_v53, %v4217_v45  ;;  %v266_v58 = vsub.f32 %v2996_v60, %v4218_v17  ;;  %v4222_v9 = vand.u32 4294901760, %v3006_v2  ;;  %v4228_v7 = vand.u32 4294901760, %v3008_v4 }
  0x1f   :  { %2447 = vmatpush1.bf16.msra.mxu0 %v3078_v59  ;;  %v260_v26 = vsub.f32 %v2975_v49, %v4367_v3  ;;  %v3150_v12 = vsub.f32 %v55_v41, %v128_v0  ;;  %v3152_v27 = vsub.f32 %v52_v51, %v126_v1  ;;  %v278_v3 = vsub.f32 %v2998_v61, %v4221_v55 }
  0x20   :  { %2449 = vmatprep.subr.bf16.mxu0 %v3111_v8  ;;  %v169_v59 = vand.u32 4294901760, %v168_v5  ;;  %v2454_v45 = vpack.c.bf16 %v231_v40, %v219_v34  ;;  %v284_v17 = vsub.f32 %v3006_v2, %v4222_v9  ;;  %v2456_v41 = vpack.c.bf16 %v249_v54, %v237_v63  ;;  %v21_v63 = vld [vmem:[%s4184_s0 + $0x8] sm:$0xff] }
  0x21   :  { %v261_v0 = vand.u32 4294901760, %v260_v26  ;;  %v296_v51 = vsub.f32 %v3008_v4, %v4228_v7  ;;  %v4225_v1 = vand.u32 4294901760, %v3026_v18  ;;  %v2458_v55 = vpack.c.bf16 %v255_v22, %v243_v11 }
  0x22   :  { %v273_v5 = vand.u32 4294901760, %v272_v28  ;;  %v267_v34 = vand.u32 4294901760, %v266_v58  ;;  %v4226_v40 = vand.u32 4294901760, %v3028_v19  ;;  %v279_v8 = vand.u32 4294901760, %v278_v3 }
  0x23   :  { %2451 = vmatpush1.bf16.msra.mxu0 %v3125_v25  ;;  %v285_v9 = vand.u32 4294901760, %v284_v17  ;;  %v4368_v50 = vand.u32 4294901760, %v3012_v6  ;;  %v4227_v54 = vand.u32 4294901760, %v3032_v23  ;;  %v308_v11 = vsub.f32 %v3026_v18, %v4225_v1 }
  0x24   :  { %2453 = vmatprep.subr.bf16.mxu0 %v2452_v14  ;;  %v4369_v14 = vand.u32 4294901760, %v3022_v13  ;;  %v320_v17 = vsub.f32 %v3028_v19, %v4226_v40  ;;  %v297_v26 = vand.u32 4294901760, %v296_v51  ;;  %v4370_v28 = vmov 0.0  }
  0x25   :  { %v290_v25 = vsub.f32 %v3012_v6, %v4368_v50  ;;  %v4231_v50 = vand.u32 4294901760, %v3034_v24  ;;  %v4234_v58 = vand.u32 4294901760, %v3042_v29  ;;  %v4237_v3 = vand.u32 4294901760, %v3044_v30 }
  0x26   :  { %170 = vmatmul.mubr.f32.vlgmr.msra.gmra.mrb[0].mxu0 %v169_v59  ;;  %v302_v22 = vsub.f32 %v3022_v13, %v4369_v14  ;;  %v314_v59 = vsub.f32 %v3032_v23, %v4227_v54  ;;  %v4371_v14 = vand.u32 4294901760, %v3071_v52  ;;  %v2460_v40 = vpack.c.bf16 %v273_v5, %v261_v0 }
  0x27   :  { %2455 = vmatpush1.bf16.msra.mxu0 %v2454_v45  ;;  %175 = vmatprep.mubr.f32.mxu0 %v4370_v28  ;;  %v326_v45 = vsub.f32 %v3034_v24, %v4231_v50  ;;  %v3199_v51 = vand.u32 4294901760, %v21_v63  ;;  %v291_v54 = vand.u32 4294901760, %v290_v25  ;;  %v332_v7 = vsub.f32 %v3042_v29, %v4234_v58  ;;  %v22_v25 = vld [vmem:[%s4184_s0 + $0x10] sm:$0xff] }
  0x28   :  { %v3194_v1 = vsub.f32 %v3071_v52, %v4371_v14  ;;  %2457 = vmatprep.subr.bf16.mxu0 %v2456_v41  ;;  %v344_v39 = vsub.f32 %v3044_v30, %v4237_v3  ;;  %v303_v14 = vand.u32 4294901760, %v302_v22  ;;  %v309_v41 = vand.u32 4294901760, %v308_v11 }
  0x29   :  { %v321_v0 = vand.u32 4294901760, %v320_v17  ;;  %v3209_v5 = vsub.f32 %v21_v63, %v3199_v51  ;;  %v2462_v50 = vpack.c.bf16 %v279_v8, %v267_v34  ;;  %v2464_v33 = vpack.c.bf16 %v297_v26, %v285_v9 }
  0x2a   :  { %v315_v58 = vand.u32 4294901760, %v314_v59  ;;  %v4247_v21 = vand.u32 4294901760, %v3057_v44  ;;  %v327_v3 = vand.u32 4294901760, %v326_v45  ;;  %v4246_v22 = vand.u32 4294901760, %v3061_v46 }
  0x2b   :  { %4372 = vst [vmem:[#allocation19_spill] sm:$0xff] %v3209_v5  ;;  %2459 = vmatpush1.bf16.msra.mxu0 %v2458_v55  ;;  %v4242_v52 = vand.u32 4294901760, %v3209_v5  ;;  %v4245_v11 = vand.u32 4294901760, %v3063_v47  ;;  %v333_v63 = vand.u32 4294901760, %v332_v7  ;;  %v345_v17 = vand.u32 4294901760, %v344_v39 }
  0x2c   :  { %2461 = vmatprep.subr.bf16.mxu0 %v2460_v40  ;;  %v4373_v20 = vand.u32 4294901760, %v3048_v35  ;;  %v3221_v55 = vand.u32 4294901760, %v22_v25  ;;  %v2466_v8 = vpack.c.bf16 %v303_v14, %v291_v54  ;;  %v2468_v9 = vpack.c.bf16 %v321_v0, %v309_v41  ;;  %v23_v54 = vld [vmem:[%s4184_s0 + $0x18] sm:$0xff] }
  0x2d   :  { %v179_v34 = vsub.f32 %v3209_v5, %v4242_v52  ;;  %v4244_v40 = vand.u32 4294901760, %v3080_v62  ;;  %v350_v7 = vsub.f32 %v3057_v44, %v4247_v21  ;;  %v4253_v26 = vand.u32 4294901760, %v3121_v15 }
  0x2e   :  { %v338_v10 = vsub.f32 %v3048_v35, %v4373_v20  ;;  %v3231_v39 = vsub.f32 %v22_v25, %v3221_v55  ;;  %v4243_v20 = vand.u32 4294901760, %v3101_v56  ;;  %v2470_v59 = vpack.c.bf16 %v327_v3, %v315_v58 }
  0x2f   :  { %2463 = vmatpush1.bf16.msra.mxu0 %v2462_v50  ;;  %v180_v45 = vand.u32 4294901760, %v179_v34  ;;  %v356_v50 = vsub.f32 %v3061_v46, %v4246_v22  ;;  %v368_v14 = vsub.f32 %v3063_v47, %v4245_v11  ;;  %v2472_v41 = vpack.c.bf16 %v345_v17, %v333_v63 }
  0x30   :  { %4374 = vst [vmem:[#allocation20_spill] sm:$0xff] %v3231_v39  ;;  %2465 = vmatprep.subr.bf16.mxu0 %v2464_v33  ;;  %v339_v0 = vand.u32 4294901760, %v338_v10  ;;  %v4250_v25 = vand.u32 4294901760, %v3231_v39  ;;  %v391_v52 = vand.u32 4294901760, %v3150_v12  ;;  %v362_v33 = vsub.f32 %v3080_v62, %v4244_v40 }
  0x31   :  { %181 = vmatmul.mubr.f32.gmra.mrb[2].mxu0 %v180_v45  ;;  %v374_v58 = vsub.f32 %v3101_v56, %v4243_v20  ;;  %v3252_v3 = vand.u32 4294901760, %v23_v54  ;;  %v385_v34 = vand.u32 4294901760, %v3152_v27  ;;  %v351_v63 = vand.u32 4294901760, %v350_v7 }
  0x32   :  { %186 = vmatprep.mubr.f32.mxu0 %v4370_v28  ;;  %v190_v10 = vsub.f32 %v3231_v39, %v4250_v25  ;;  %v380_v17 = vsub.f32 %v3121_v15, %v4253_v26  ;;  %v392_v45 = vsub.f32 %v3150_v12, %v391_v52  ;;  %v357_v20 = vand.u32 4294901760, %v356_v50 }
  0x33   :  { %2467 = vmatpush1.bf16.msra.mxu0 %v2466_v8  ;;  %v369_v40 = vand.u32 4294901760, %v368_v14  ;;  %v3264_v11 = vsub.f32 %v23_v54, %v3252_v3  ;;  %v397_v8 = vand.u32 4294901760, %v3194_v1  ;;  %v363_v22 = vand.u32 4294901760, %v362_v33 }
  0x34   :  { %2469 = vmatprep.subr.bf16.mxu0 %v2468_v9  ;;  %v191_v7 = vand.u32 4294901760, %v190_v10  ;;  %v375_v21 = vand.u32 4294901760, %v374_v58  ;;  %v386_v25 = vsub.f32 %v3152_v27, %v385_v34  ;;  %v2474_v39 = vpack.c.bf16 %v351_v63, %v339_v0 }
  0x35   :  { %v4256_v5 = vand.u32 4294901760, %v3264_v11  ;;  %v381_v26 = vand.u32 4294901760, %v380_v17  ;;  %v393_v16 = vand.u32 4294901760, %v392_v45  ;;  %v398_v9 = vsub.f32 %v3194_v1, %v397_v8 }
  0x36   :  { %v2476_v50 = vpack.c.bf16 %v369_v40, %v357_v20  ;;  %192 = vmatmul.mubr.f32.gmra.mrb[4].mxu0 %v191_v7  ;;  %v2478_v14 = vpack.c.bf16 %v375_v21, %v363_v22  ;;  %v387_v58 = vand.u32 4294901760, %v386_v25  ;;  %v4375_v0 = vand.u32 4294901760, %v2938_v31 }
  0x37   :  { %2471 = vmatpush1.bf16.msra.mxu0 %v2470_v59  ;;  %v201_v54 = vsub.f32 %v3264_v11, %v4256_v5  ;;  %197 = vmatprep.mubr.f32.mxu0 %v4370_v28  ;;  %v2480_v10 = vpack.c.bf16 %v393_v16, %v381_v26  ;;  %v399_v59 = vand.u32 4294901760, %v398_v9  ;;  %v4376_v63 = vand.u32 4294901760, %v2940_v32 }
  0x38   :  { %2473 = vmatprep.subr.bf16.mxu0 %v2472_v41  ;;  %v4377_v40 = vand.u32 4294901760, %v2948_v36  ;;  %v4378_v20 = vand.u32 4294901760, %v2950_v37  ;;  %v4379_v21 = vand.u32 4294901760, %v2952_v38  ;;  %v4380_v22 = vand.u32 4294901760, %v2962_v42 }
  0x39   :  { %v202_v33 = vand.u32 4294901760, %v201_v54  ;;  %v3278_v17 = vpack.c.bf16 %v4376_v63, %v4375_v0  ;;  %v4382_v26 = vand.u32 4294901760, %v2973_v48  ;;  %v4383_v45 = vand.u32 4294901760, %v2975_v49 }
  0x3a   :  { %v3284_v41 = vpack.c.bf16 %v4378_v20, %v4377_v40  ;;  %v3290_v16 = vpack.c.bf16 %v4380_v22, %v4379_v21  ;;  %v4384_v7 = vand.u32 4294901760, %v2983_v53  ;;  %v4386_v54 = vand.u32 4294901760, %v2998_v61 }
  0x3b   :  { %2475 = vmatpush1.bf16.msra.mxu0 %v2474_v39  ;;  %v4381_v39 = vand.u32 4294901760, %v2964_v43  ;;  %v4387_v0 = vand.u32 4294901760, %v3006_v2  ;;  %v4388_v63 = vand.u32 4294901760, %v3008_v4  ;;  %v4389_v20 = vand.u32 4294901760, %v3012_v6 }
  0x3c   :  { %2477 = vmatprep.subr.bf16.mxu0 %v2476_v50  ;;  %203 = vmatmul.mubr.f32.gmra.mrb[6].mxu0 %v202_v33  ;;  %v3302_v9 = vpack.c.bf16 %v4384_v7, %v4383_v45  ;;  %v4385_v50 = vand.u32 4294901760, %v2996_v60  ;;  %v4390_v21 = vand.u32 4294901760, %v3022_v13  ;;  %v4395_v7 = vand.u32 4294901760, %v3032_v23 }
  0x3d   :  { %v3296_v25 = vpack.c.bf16 %v4382_v26, %v4381_v39  ;;  %433 = vmatprep.mubr.f32.mxu0 %v4370_v28  ;;  %v3315_v40 = vpack.c.bf16 %v4388_v63, %v4387_v0  ;;  %v4392_v39 = vand.u32 4294901760, %v3026_v18  ;;  %v4393_v26 = vand.u32 4294901760, %v3028_v19 }
  0x3e   :  { %v3309_v33 = vpack.c.bf16 %v4386_v54, %v4385_v50  ;;  %v3321_v22 = vpack.c.bf16 %v4390_v21, %v4389_v20  ;;  %v4396_v50 = vand.u32 4294901760, %v3034_v24  ;;  %v4398_v0 = vand.u32 4294901760, %v3042_v29 }
  0x3f   :  { %v3327_v45 = vpack.c.bf16 %v4393_v26, %v4392_v39  ;;  %v4399_v63 = vand.u32 4294901760, %v3044_v30  ;;  %v4401_v20 = vand.u32 4294901760, %v3048_v35  ;;  %v4402_v21 = vand.u32 4294901760, %v3057_v44  ;;  %2479 = vmatpush1.bf16.msra.mxu0 %v2478_v14 }
  0x40   :  { %4391 = vst [vmem:[#allocation21_spill] sm:$0xff] %v3321_v22  ;;  %v3333_v54 = vpack.c.bf16 %v4396_v50, %v4395_v7  ;;  %v4403_v39 = vand.u32 4294901760, %v3061_v46  ;;  %v4404_v26 = vand.u32 4294901760, %v3063_v47  ;;  %v2482_v7 = vpack.c.bf16 %v399_v59, %v387_v58  ;;  %2481 = vmatprep.subr.bf16.mxu0 %v2480_v10  ;;  %v1082_v10 = vld [vmem:[%s4185_s3 + $0x20] sm:$0xff]  ;;  %v1083_v59 = vld [vmem:[%s4185_s3 + $0x28] sm:$0xff] }
  0x41   :  { %4394 = vst [vmem:[#allocation22_spill] sm:$0xff] %v3327_v45  ;;  %v3339_v5 = vpack.c.bf16 %v4399_v63, %v4398_v0  ;;  %v3345_v22 = vpack.c.bf16 %v4402_v21, %v4401_v20  ;;  %v4405_v50 = vand.u32 4294901760, %v3080_v62  ;;  %v4407_v63 = vand.u32 4294901760, %v3121_v15 }
  0x42   :  { %4397 = vst [vmem:[#allocation23_spill] sm:$0xff] %v3333_v54  ;;  %v3351_v45 = vpack.c.bf16 %v4404_v26, %v4403_v39  ;;  %v4406_v54 = vand.u32 4294901760, %v3101_v56  ;;  %v3363_v20 = vpack.c.bf16 %v397_v8, %v385_v34  ;;  %v2484_v21 = vpack.c.bf16 %v2940_v32, %v2938_v31  ;;  %v1099_v8 = vld [vmem:[%s4185_s3 + $0xa8] sm:$0xff] }
  0x43   :  { %4400 = vst [vmem:[#allocation24_spill] sm:$0xff] %v3339_v5  ;;  %v3361_v5 = vpack.c.bf16 %v391_v52, %v4407_v63  ;;  %2483 = vmatpush1.bf16.msra.mxu0 %v2482_v7  ;;  %v2486_v14 = vpack.c.bf16 %v2950_v37, %v2948_v36  ;;  %v2488_v58 = vpack.c.bf16 %v2962_v42, %v2952_v38 }
  0x44   :  { %v3357_v0 = vpack.c.bf16 %v4406_v54, %v4405_v50  ;;  %2485 = vmatprep.subr.bf16.mxu0 %v2484_v21  ;;  %v2490_v52 = vpack.c.bf16 %v2973_v48, %v2964_v43  ;;  %v2492_v31 = vpack.c.bf16 %v2983_v53, %v2975_v49  ;;  %v2494_v32 = vpack.c.bf16 %v2998_v61, %v2996_v60  ;;  %v1094_v49 = vld [vmem:[%s4185_s3 + $0x80] sm:$0xff]  ;;  %v1095_v53 = vld [vmem:[%s4185_s3 + $0x88] sm:$0xff]  ;;  %v1100_v50 = vld [vmem:[%s4185_s3 + $0xb0] sm:$0xff] }
  0x45   :  { %v2496_v36 = vpack.c.bf16 %v3008_v4, %v3006_v2  ;;  %v2498_v37 = vpack.c.bf16 %v3022_v13, %v3012_v6  ;;  %v2500_v38 = vpack.c.bf16 %v3028_v19, %v3026_v18  ;;  %v2502_v42 = vpack.c.bf16 %v3034_v24, %v3032_v23  ;;  %v1078_v60 = vld [vmem:[%s4185_s3] sm:$0xff]  ;;  %v1079_v6 = vld [vmem:[%s4185_s3 + $0x8] sm:$0xff]  ;;  %v1096_v18 = vld [vmem:[%s4185_s3 + $0x90] sm:$0xff] }
  0x46   :  { %435 = vmatmul.mubr.f32.vlgmr.msra.gmra.mrb[0].mxu0 %v3075_v57  ;;  %v2504_v43 = vpack.c.bf16 %v3044_v30, %v3042_v29  ;;  %v2506_v48 = vpack.c.bf16 %v3057_v44, %v3048_v35  ;;  %v2508_v61 = vpack.c.bf16 %v3063_v47, %v3061_v46  ;;  %v1166_v2 = vand.u32 4294901760, %v1094_v49  ;;  %v1097_v19 = vld [vmem:[%s4185_s3 + $0x98] sm:$0xff]  ;;  %v1080_v35 = vld [vmem:[%s4185_s3 + $0x10] sm:$0xff]  ;;  %v1098_v46 = vld [vmem:[%s4185_s3 + $0xa0] sm:$0xff] }
  0x47   :  { %2487 = vmatpush1.bf16.msra.mxu0 %v2486_v14  ;;  %440 = vmatprep.mubr.f32.mxu0 %v4370_v28  ;;  %v1169_v4 = vand.u32 4294901760, %v1095_v53  ;;  %v1118_v13 = vand.u32 4294901760, %v1078_v60  ;;  %v2510_v23 = vpack.c.bf16 %v3101_v56, %v3080_v62  ;;  %v1121_v24 = vand.u32 4294901760, %v1079_v6  ;;  %v1081_v44 = vld [vmem:[%s4185_s3 + $0x18] sm:$0xff] }
  0x48   :  { %2489 = vmatprep.subr.bf16.mxu0 %v2488_v58  ;;  %v1172_v29 = vand.u32 4294901760, %v1096_v18  ;;  %v1175_v30 = vand.u32 4294901760, %v1097_v19  ;;  %v3430_v34 = vsub.f32 %v1094_v49, %v1166_v2  ;;  %v1124_v21 = vand.u32 4294901760, %v1080_v35 }
  0x49   :  { %v3428_v47 = vpack.c.bf16 %v1169_v4, %v1166_v2  ;;  %v3432_v56 = vsub.f32 %v1095_v53, %v1169_v4  ;;  %v3434_v62 = vsub.f32 %v1078_v60, %v1118_v13  ;;  %v3445_v54 = vpack.c.bf16 %v1121_v24, %v1118_v13  ;;  %v1085_v60 = vld [vmem:[%s4185_s3 + $0x38] sm:$0xff] }
  0x4a   :  { %442 = vmatmul.mubr.f32.gmra.mrb[2].mxu0 %v3199_v51  ;;  %v3447_v39 = vsub.f32 %v1079_v6, %v1121_v24  ;;  %v3449_v26 = vpack.c.bf16 %v1175_v30, %v1172_v29  ;;  %v3451_v7 = vsub.f32 %v1096_v18, %v1172_v29  ;;  %v3457_v63 = vsub.f32 %v1097_v19, %v1175_v30 }
  0x4b   :  { %2491 = vmatpush1.bf16.msra.mxu0 %v2490_v52  ;;  %447 = vmatprep.mubr.f32.mxu0 %v4370_v28  ;;  %4408 = vst [vmem:[#allocation25_spill] sm:$0xff] %v3428_v47  ;;  %4409 = vst [vmem:[#allocation26_spill] sm:$0xff] %v3445_v54  ;;  %v1127_v14 = vand.u32 4294901760, %v1081_v44  ;;  %v1178_v58 = vand.u32 4294901760, %v1098_v46  ;;  %v1181_v52 = vand.u32 4294901760, %v1099_v8  ;;  %v2512_v2 = vpack.c.bf16 %v3150_v12, %v3121_v15 }
  0x4c   :  { %2493 = vmatprep.subr.bf16.mxu0 %v2492_v31  ;;  %4410 = vst [vmem:[#allocation27_spill] sm:$0xff] %v3449_v26  ;;  %2613 = vmatprep.subr.bf16.mxu1 %v3428_v47  ;;  %v1130_v31 = vand.u32 4294901760, %v1082_v10 }
  0x4d   :  { %2615 = vmatpush3.bf16.msra.mxu1 %v3445_v54  ;;  %v3471_v49 = vsub.f32 %v1081_v44, %v1127_v14  ;;  %v3473_v53 = vsub.f32 %v1098_v46, %v1178_v58  ;;  %v3480_v4 = vpack.c.bf16 %v1181_v52, %v1178_v58  ;;  %v3482_v6 = vsub.f32 %v1099_v8, %v1181_v52  ;;  %v4416_v8 = vld [vmem:[#allocation2_spill] sm:$0xff]  ;;  %v4425_v58 = vld [vmem:[#allocation8_spill] sm:$0xff]  ;;  %v4426_v52 = vld [vmem:[#allocation9_spill] sm:$0xff] }
  0x4e   :  { %449 = vmatmul.mubr.f32.gmra.mrb[4].mxu0 %v3221_v55  ;;  %2617 = vmatprep.subr.bf16.mxu1 %v3449_v26  ;;  %v3484_v13 = vsub.f32 %v1082_v10, %v1130_v31  ;;  %v4417_v10 = vld [vmem:[#allocation16_spill] sm:$0xff] }
  0x4f   :  { %2495 = vmatpush1.bf16.msra.mxu0 %v2494_v32  ;;  %454 = vmatprep.mubr.f32.mxu0 %v4370_v28  ;;  %v1133_v32 = vand.u32 4294901760, %v1083_v59  ;;  %4412 = vst [vmem:[#allocation29_spill] sm:$0xff] %v3480_v4 }
  0x50   :  { %2497 = vmatprep.subr.bf16.mxu0 %v2496_v36  ;;  %v1101_v36 = vld [vmem:[%s4185_s3 + $0xb8] sm:$0xff] }
  0x51   :  { %v3486_v18 = vsub.f32 %v1083_v59, %v1133_v32  ;;  %v1187_v19 = vand.u32 4294901760, %v1101_v36  ;;  %v3491_v30 = vpack.c.bf16 %v1133_v32, %v1130_v31  ;;  %v4421_v59 = vld [vmem:[#allocation5_spill] sm:$0xff]  ;;  %v4427_v31 = vld [vmem:[#allocation10_spill] sm:$0xff]  ;;  %v4428_v32 = vld [vmem:[#allocation11_spill] sm:$0xff] }
  0x52   :  { %456 = vmatmul.mubr.f32.gmra.mrb[6].mxu0 %v3252_v3 }
  0x53   :  { %2499 = vmatpush1.bf16.msra.mxu0 %v2498_v37  ;;  %590 = vmatprep.mubr.f32.mxu0 %v4370_v28  ;;  %v1184_v37 = vand.u32 4294901760, %v1100_v50  ;;  %4413 = vst [vmem:[#allocation30_spill] sm:$0xff] %v3491_v30  ;;  %v3496_v12 = vsub.f32 %v1101_v36, %v1187_v19  ;;  %v4429_v36 = vld [vmem:[#allocation12_spill] sm:$0xff] }
  0x54   :  { %2501 = vmatprep.subr.bf16.mxu0 %v2500_v38  ;;  %v1084_v38 = vld [vmem:[%s4185_s3 + $0x30] sm:$0xff] }
  0x55   :  { %v3488_v24 = vsub.f32 %v1100_v50, %v1184_v37  ;;  %v1136_v29 = vand.u32 4294901760, %v1084_v38  ;;  %v3494_v15 = vpack.c.bf16 %v1187_v19, %v1184_v37  ;;  %v4422_v50 = vld [vmem:[#allocation6_spill] sm:$0xff]  ;;  %v4430_v37 = vld [vmem:[#allocation13_spill] sm:$0xff] }
  0x56   :  { %v4434_v19 = vld [vmem:[#allocation18_spill] sm:$0xff] }
  0x57   :  { %2503 = vmatpush1.bf16.msra.mxu0 %v2502_v42  ;;  %v3467_v42 = vpack.c.bf16 %v1127_v14, %v1124_v21  ;;  %4414 = vst [vmem:[#allocation31_spill] sm:$0xff] %v3494_v15  ;;  %v4424_v14 = vld [vmem:[#allocation7_spill] sm:$0xff] }
  0x58   :  { %2505 = vmatprep.subr.bf16.mxu0 %v2504_v43  ;;  %v3469_v43 = vsub.f32 %v1080_v35, %v1124_v21  ;;  %v3498_v35 = vsub.f32 %v1084_v38, %v1136_v29  ;;  %v4423_v21 = vld [vmem:[#allocation20_spill] sm:$0xff]  ;;  %v4431_v38 = vld [vmem:[#allocation14_spill] sm:$0xff] }
  0x59   :  { %4411 = vst [vmem:[#allocation28_spill] sm:$0xff] %v3467_v42  ;;  %2619 = vmatpush3.bf16.msra.mxu1 %v3467_v42 }
  0x5a   :  { %2621 = vmatprep.subr.bf16.mxu1 %v3480_v4 }
  0x5b   :  { %2507 = vmatpush1.bf16.msra.mxu0 %v2506_v48  ;;  %v1139_v48 = vand.u32 4294901760, %v1085_v60 }
  0x5c   :  { %2509 = vmatprep.subr.bf16.mxu0 %v2508_v61  ;;  %v2514_v61 = vpack.c.bf16 %v3194_v1, %v3152_v27  ;;  %v4419_v27 = vld [vmem:[#allocation4_spill] sm:$0xff]  ;;  %v4420_v1 = vld [vmem:[#allocation19_spill] sm:$0xff] }
  0x5d   :  { %v3502_v44 = vsub.f32 %v1085_v60, %v1139_v48  ;;  %2623 = vmatpush3.bf16.msra.mxu1 %v3491_v30  ;;  %v3505_v46 = vpack.c.bf16 %v1139_v48, %v1136_v29  ;;  %v4432_v60 = vld [vmem:[#allocation15_spill] sm:$0xff]  ;;  %v4435_v29 = vand.u32 4294901760, %v4417_v10  ;;  %v4436_v48 = vand.u32 4294901760, %v4420_v1 }
  0x5e   :  { %2625 = vmatprep.subr.bf16.mxu1 %v3494_v15 }
  0x5f   :  { %2511 = vmatpush1.bf16.msra.mxu0 %v2510_v23  ;;  %4415 = vst [vmem:[#allocation32_spill] sm:$0xff] %v3505_v46  ;;  %v4418_v23 = vld [vmem:[#allocation3_spill] sm:$0xff] }
  0x60   :  { %2513 = vmatprep.subr.bf16.mxu0 %v2512_v2  ;;  %v4433_v2 = vld [vmem:[#allocation17_spill] sm:$0xff] }
  0x61   :  { %2627 = vmatpush3.bf16.msra.mxu1 %v3505_v46 }
  0x63   :  { %2515 = vmatpush1.bf16.msra.mxu0 %v2514_v61  ;;  %v4441_v61 = vld [vmem:[#allocation23_spill] sm:$0xff] }
  0x64   :  { %2517 = vmatprep.subr.bf16.mxu0 %v4416_v8 }
  0x66   :  { %593 = vmatmul.mubr.f32.vlgmr.msra.gmra.mrb[0].mxu0 %v4417_v10  ;;  %v1088_v10 = vld [vmem:[%s4185_s3 + $0x50] sm:$0xff] }
  0x67   :  { %2519 = vmatpush1.bf16.msra.mxu0 %v4418_v23  ;;  %598 = vmatprep.mubr.f32.mxu0 %v4370_v28 }
  0x68   :  { %2521 = vmatprep.subr.bf16.mxu0 %v4419_v27 }
  0x6a   :  { %601 = vmatmul.mubr.f32.gmra.mrb[2].mxu0 %v4420_v1 }
  0x6b   :  { %2523 = vmatpush1.bf16.msra.mxu0 %v4421_v59  ;;  %606 = vmatprep.mubr.f32.mxu0 %v4370_v28 }
  0x6c   :  { %2525 = vmatprep.subr.bf16.mxu0 %v4422_v50 }
  0x6e   :  { %609 = vmatmul.mubr.f32.gmra.mrb[4].mxu0 %v4423_v21 }
  0x6f   :  { %2527 = vmatpush1.bf16.msra.mxu0 %v4424_v14  ;;  %614 = vmatprep.mubr.f32.mxu0 %v4370_v28 }
  0x70   :  { %2529 = vmatprep.subr.bf16.mxu0 %v4425_v58 }
  0x72   :  { %617 = vmatmul.mubr.f32.gmra.mrb[6].mxu0 %v3264_v11 }
  0x73   :  { %2531 = vmatpush1.bf16.msra.mxu0 %v4426_v52  ;;  %719 = vmatprep.mubr.f32.mxu0 %v4370_v28 }
  0x74   :  { %2533 = vmatprep.subr.bf16.mxu0 %v4427_v31 }
  0x77   :  { %2535 = vmatpush1.bf16.msra.mxu0 %v4428_v32 }
  0x78   :  { %2537 = vmatprep.subr.bf16.mxu0 %v4429_v36 }
  0x7b   :  { %2539 = vmatpush1.bf16.msra.mxu0 %v4430_v37 }
  0x7c   :  { %2541 = vmatprep.subr.bf16.mxu0 %v4431_v38 }
  0x7f   :  { %2543 = vmatpush1.bf16.msra.mxu0 %v4432_v60 }
  0x80   :  { %2545 = vmatprep.subr.bf16.mxu0 %v4433_v2 }
  0x83   :  { %2547 = vmatpush1.bf16.msra.mxu0 %v4434_v19 }
  0x84   :  { %2549 = vmatprep.subr.bf16.mxu0 %v3278_v17  ;;  %v4437_v17 = vand.u32 4294901760, %v4423_v21  ;;  %v1106_v21 = vld [vmem:[%s4185_s3 + $0xe0] sm:$0xff] }
  0x86   :  { %723 = vmatmul.mubr.f32.vlgmr.msra.gmra.mrb[0].mxu0 %v4435_v29  ;;  %v1108_v29 = vld [vmem:[%s4185_s3 + $0xf0] sm:$0xff] }
  0x87   :  { %2551 = vmatpush1.bf16.msra.mxu0 %v3284_v41  ;;  %728 = vmatprep.mubr.f32.mxu0 %v4370_v28  ;;  %v4438_v41 = vand.u32 4294901760, %v3264_v11 }
  0x88   :  { %2553 = vmatprep.subr.bf16.mxu0 %v3290_v16  ;;  %v4439_v16 = vld [vmem:[#allocation21_spill] sm:$0xff] }
  0x8a   :  { %732 = vmatmul.mubr.f32.gmra.mrb[2].mxu0 %v4436_v48  ;;  %v1109_v48 = vld [vmem:[%s4185_s3 + $0xf8] sm:$0xff] }
  0x8b   :  { %2555 = vmatpush1.bf16.msra.mxu0 %v3296_v25  ;;  %737 = vmatprep.mubr.f32.mxu0 %v4370_v28  ;;  %v4440_v25 = vld [vmem:[#allocation22_spill] sm:$0xff] }
  0x8c   :  { %2557 = vmatprep.subr.bf16.mxu0 %v3302_v9  ;;  %v4442_v9 = vld [vmem:[#allocation24_spill] sm:$0xff] }
  0x8e   :  { %741 = vmatmul.mubr.f32.gmra.mrb[4].mxu0 %v4437_v17 }
  0x8f   :  { %2559 = vmatpush1.bf16.msra.mxu0 %v3309_v33  ;;  %746 = vmatprep.mubr.f32.mxu0 %v4370_v28 }
  0x90   :  { %2561 = vmatprep.subr.bf16.mxu0 %v3315_v40 }
  0x92   :  { %750 = vmatmul.mubr.f32.gmra.mrb[6].mxu0 %v4438_v41 }
  0x93   :  { %2563 = vmatpush1.bf16.msra.mxu0 %v4439_v16  ;;  %916 = vmatprep.mubr.f32.mxu0 %v4370_v28  ;;  %v1208_v16 = vand.u32 4294901760, %v1108_v29 }
  0x94   :  { %2565 = vmatprep.subr.bf16.mxu0 %v4440_v25  ;;  %v1211_v25 = vand.u32 4294901760, %v1109_v48 }
  0x97   :  { %2567 = vmatpush1.bf16.msra.mxu0 %v4441_v61  ;;  %v1092_v61 = vld [vmem:[%s4185_s3 + $0x70] sm:$0xff] }
  0x98   :  { %2569 = vmatprep.subr.bf16.mxu0 %v4442_v9  ;;  %v1093_v9 = vld [vmem:[%s4185_s3 + $0x78] sm:$0xff] }
  0x9b   :  { %2571 = vmatpush1.bf16.msra.mxu0 %v3345_v22 }
  0x9c   :  { %2573 = vmatprep.subr.bf16.mxu0 %v3351_v45  ;;  %v1104_v45 = vld [vmem:[%s4185_s3 + $0xd0] sm:$0xff] }
  0x9f   :  { %2575 = vmatpush1.bf16.msra.mxu0 %v3357_v0  ;;  %v1105_v0 = vld [vmem:[%s4185_s3 + $0xd8] sm:$0xff] }
  0xa0   :  { %2577 = vmatprep.subr.bf16.mxu0 %v3361_v5  ;;  %v1102_v5 = vld [vmem:[%s4185_s3 + $0xc0] sm:$0xff] }
  0xa1   :  { %v1190_v11 = vand.u32 4294901760, %v1102_v5 }
  0xa3   :  { %2579 = vmatpush1.bf16.msra.mxu0 %v3363_v20  ;;  %v1196_v20 = vand.u32 4294901760, %v1104_v45 }
  0xa4   :  { %2581 = vmatprep.subr.bf16.mxu0 %v4416_v8  ;;  %v1199_v8 = vand.u32 4294901760, %v1105_v0 }
  0xa6   :  { %918 = vmatmul.mubr.f32.vlgmr.msra.gmra.mrb[0].mxu0 %v3075_v57 }
  0xa7   :  { %2583 = vmatpush1.bf16.msra.mxu0 %v4418_v23  ;;  %923 = vmatprep.mubr.f32.mxu0 %v4370_v28  ;;  %v1089_v23 = vld [vmem:[%s4185_s3 + $0x58] sm:$0xff] }
  0xa8   :  { %2585 = vmatprep.subr.bf16.mxu0 %v4419_v27  ;;  %v1148_v27 = vand.u32 4294901760, %v1088_v10  ;;  %v1151_v1 = vand.u32 4294901760, %v1089_v23 }
  0xaa   :  { %925 = vmatmul.mubr.f32.gmra.mrb[2].mxu0 %v3199_v51 }
  0xab   :  { %2587 = vmatpush1.bf16.msra.mxu0 %v4421_v59  ;;  %930 = vmatprep.mubr.f32.mxu0 %v4370_v28  ;;  %v3622_v59 = vpack.c.bf16 %v1199_v8, %v1196_v20 }
  0xac   :  { %2589 = vmatprep.subr.bf16.mxu0 %v4422_v50  ;;  %v3624_v50 = vpack.c.bf16 %v1151_v1, %v1148_v27 }
  0xad   :  { %4445 = vst [vmem:[#allocation3_spill] sm:$0xff] %v3622_v59 }
  0xae   :  { %932 = vmatmul.mubr.f32.gmra.mrb[4].mxu0 %v3221_v55  ;;  %4446 = vst [vmem:[#allocation4_spill] sm:$0xff] %v3624_v50 }
  0xaf   :  { %2591 = vmatpush1.bf16.msra.mxu0 %v4424_v14  ;;  %937 = vmatprep.mubr.f32.mxu0 %v4370_v28  ;;  %v1107_v14 = vld [vmem:[%s4185_s3 + $0xe8] sm:$0xff] }
  0xb0   :  { %2593 = vmatprep.subr.bf16.mxu0 %v4425_v58  ;;  %v1202_v58 = vand.u32 4294901760, %v1106_v21 }
  0xb2   :  { %939 = vmatmul.mubr.f32.gmra.mrb[6].mxu0 %v3252_v3 }
  0xb3   :  { %2595 = vmatpush1.bf16.msra.mxu0 %v4426_v52  ;;  %1041 = vmatprep.mubr.f32.mxu0 %v4370_v28  ;;  %v1205_v52 = vand.u32 4294901760, %v1107_v14 }
  0xb4   :  { %2597 = vmatprep.subr.bf16.mxu0 %v4427_v31  ;;  %v1090_v31 = vld [vmem:[%s4185_s3 + $0x60] sm:$0xff] }
  0xb7   :  { %2599 = vmatpush1.bf16.msra.mxu0 %v4428_v32  ;;  %v1091_v32 = vld [vmem:[%s4185_s3 + $0x68] sm:$0xff] }
  0xb8   :  { %2601 = vmatprep.subr.bf16.mxu0 %v4429_v36  ;;  %v1154_v36 = vand.u32 4294901760, %v1090_v31 }
  0xbb   :  { %2603 = vmatpush1.bf16.msra.mxu0 %v4430_v37  ;;  %v1157_v37 = vand.u32 4294901760, %v1091_v32 }
  0xbc   :  { %2605 = vmatprep.subr.bf16.mxu0 %v4431_v38  ;;  %v3640_v38 = vpack.c.bf16 %v1205_v52, %v1202_v58 }
  0xbe   :  { %4447 = vst [vmem:[#allocation19_spill] sm:$0xff] %v3640_v38 }
  0xbf   :  { %2607 = vmatpush1.bf16.msra.mxu0 %v4432_v60  ;;  %v3642_v60 = vsub.f32 %v1102_v5, %v1190_v11  ;;  %v1160_v5 = vand.u32 4294901760, %v1092_v61 }
  0xc0   :  { %2609 = vmatprep.subr.bf16.mxu0 %v4433_v2 }
  0xc3   :  { %2611 = vmatpush1.bf16.msra.mxu0 %v4434_v19  ;;  %v3646_v19 = vpack.c.bf16 %v1157_v37, %v1154_v36 }
  0xc5   :  { %4448 = vst [vmem:[#allocation5_spill] sm:$0xff] %v3646_v19 }
  0xc6   :  { %1043 = vmatmul.mubr.f32.vlgmr.msra.gmra.mrb[0].mxu0 %v3075_v57  ;;  %v1103_v57 = vld [vmem:[%s4185_s3 + $0xc8] sm:$0xff] }
  0xc7   :  { %1048 = vmatprep.mubr.f32.mxu0 %v4370_v28  ;;  %v1193_v33 = vand.u32 4294901760, %v1103_v57 }
  0xc9   :  { %v3604_v40 = vpack.c.bf16 %v1193_v33, %v1190_v11  ;;  %v3644_v2 = vsub.f32 %v1103_v57, %v1193_v33  ;;  %v1163_v57 = vand.u32 4294901760, %v1093_v9  ;;  %v4267_v11 = vand.u32 4294901760, %v3430_v34 }
  0xca   :  { %1050 = vmatmul.mubr.f32.gmra.mrb[2].mxu0 %v3199_v51  ;;  %v1086_v51 = vld [vmem:[%s4185_s3 + $0x40] sm:$0xff]  ;;  %v4268_v33 = vand.u32 4294901760, %v3432_v56 }
  0xcb   :  { %1055 = vmatprep.mubr.f32.mxu0 %v4370_v28  ;;  %4443 = vst [vmem:[#allocation2_spill] sm:$0xff] %v3604_v40  ;;  %2629 = vmatprep.subr.bf16.mxu1 %v3604_v40  ;;  %v3709_v40 = vsub.f32 %v1091_v32, %v1157_v37  ;;  %v4280_v32 = vand.u32 4294901760, %v3473_v53  ;;  %v4277_v37 = vand.u32 4294901760, %v3484_v13 }
  0xcd   :  { %4456 = vst [vmem:[#allocation11_spill] sm:$0xff] %v3709_v40 }
  0xce   :  { %1057 = vmatmul.mubr.f32.gmra.mrb[4].mxu0 %v3221_v55  ;;  %v1142_v55 = vand.u32 4294901760, %v1086_v51 }
  0xcf   :  { %1062 = vmatprep.mubr.f32.mxu0 %v4370_v28  ;;  %v1087_v28 = vld [vmem:[%s4185_s3 + $0x48] sm:$0xff] }
  0xd0   :  { %v3654_v17 = vsub.f32 %v1086_v51, %v1142_v55  ;;  %v3668_v51 = vpack.c.bf16 %v1211_v25, %v1208_v16 }
  0xd2   :  { %1064 = vmatmul.mubr.f32.gmra.mrb[6].mxu0 %v3252_v3  ;;  %v1145_v3 = vand.u32 4294901760, %v1087_v28  ;;  %4449 = vst [vmem:[#allocation6_spill] sm:$0xff] %v3668_v51 }
  0xd4   :  { %v3606_v22 = vpack.c.bf16 %v1145_v3, %v1142_v55  ;;  %v3656_v41 = vsub.f32 %v1087_v28, %v1145_v3  ;;  %v4271_v28 = vand.u32 4294901760, %v3434_v62  ;;  %v3672_v3 = vsub.f32 %v1104_v45, %v1196_v20 }
  0xd5   :  { %v1397_v55 = vsub.f32 %v3432_v56, %v4268_v33  ;;  %v4452_v20 = vand.u32 4294901760, %v3447_v39  ;;  %v4289_v33 = vand.u32 4294901760, %v3471_v49 }
  0xd6   :  { %4444 = vst [vmem:[#allocation16_spill] sm:$0xff] %v3606_v22  ;;  %2631 = vmatpush3.bf16.msra.mxu1 %v3606_v22  ;;  %v3683_v22 = vsub.f32 %v1089_v23, %v1151_v1  ;;  %v1278_v45 = vsub.f32 %v3434_v62, %v4271_v28  ;;  %v3702_v28 = vsub.f32 %v1107_v14, %v1205_v52  ;;  %v4458_v14 = vand.u32 4294901760, %v3469_v43 }
  0xd7   :  { %2633 = vmatprep.subr.bf16.mxu1 %v3622_v59  ;;  %v3681_v59 = vsub.f32 %v1088_v10, %v1148_v27  ;;  %v4290_v10 = vand.u32 4294901760, %v3451_v7  ;;  %v1398_v27 = vand.u32 4294901760, %v1397_v55  ;;  %v4457_v55 = vand.u32 4294901760, %v3457_v63 }
  0xd8   :  { %v1279_v1 = vand.u32 4294901760, %v1278_v45  ;;  %4454 = vst [vmem:[#allocation9_spill] sm:$0xff] %v3702_v28  ;;  %v1299_v52 = vsub.f32 %v3471_v49, %v4289_v33  ;;  %v4299_v33 = vand.u32 4294901760, %v3702_v28 }
  0xd9   :  { %4451 = vst [vmem:[#allocation7_spill] sm:$0xff] %v3681_v59  ;;  %v1411_v45 = vsub.f32 %v3457_v63, %v4457_v55 }
  0xda   :  { %2635 = vmatpush3.bf16.msra.mxu1 %v3624_v50  ;;  %v3676_v50 = vpack.c.bf16 %v1163_v57, %v1160_v5 }
  0xdb   :  { %2637 = vmatprep.subr.bf16.mxu1 %v3640_v38  ;;  %v3674_v38 = vsub.f32 %v1105_v0, %v1199_v8  ;;  %v1285_v8 = vsub.f32 %v3447_v39, %v4452_v20  ;;  %v3707_v20 = vsub.f32 %v1090_v31, %v1154_v36  ;;  %v1412_v31 = vand.u32 4294901760, %v1411_v45 }
  0xdc   :  { %4450 = vst [vmem:[#allocation20_spill] sm:$0xff] %v3676_v50  ;;  %v4279_v36 = vand.u32 4294901760, %v3482_v6 }
  0xdd   :  { %4455 = vst [vmem:[#allocation10_spill] sm:$0xff] %v3707_v20 }
  0xde   :  { %2639 = vmatpush3.bf16.msra.mxu1 %v3646_v19  ;;  %v1390_v19 = vsub.f32 %v3430_v34, %v4267_v11 }
  0xdf   :  { %2641 = vmatprep.subr.bf16.mxu1 %v3668_v51  ;;  %v3700_v51 = vsub.f32 %v1106_v21, %v1202_v58  ;;  %v1292_v58 = vsub.f32 %v3469_v43, %v4458_v14 }
  0xe0   :  { %v1391_v0 = vand.u32 4294901760, %v1390_v19  ;;  %v1404_v19 = vsub.f32 %v3451_v7, %v4290_v10  ;;  %v4302_v10 = vand.u32 4294901760, %v3707_v20 }
  0xe1   :  { %4453 = vst [vmem:[#allocation8_spill] sm:$0xff] %v3700_v51 }
  0xe2   :  { %2643 = vmatpush3.bf16.msra.mxu1 %v3676_v50  ;;  %v1286_v50 = vand.u32 4294901760, %v1285_v8  ;;  %v2644_v23 = vpack.c.bf16 %v1398_v27, %v1391_v0  ;;  %v1405_v21 = vand.u32 4294901760, %v1404_v19  ;;  %v3725_v0 = vsub.f32 %v1108_v29, %v1208_v16 }
  0xe3   :  { %v1293_v8 = vand.u32 4294901760, %v1292_v58  ;;  %v1300_v27 = vand.u32 4294901760, %v1299_v52  ;;  %v3731_v19 = vsub.f32 %v1093_v9, %v1163_v57  ;;  %v1425_v29 = vsub.f32 %v3482_v6, %v4279_v36 }
  0xe4   :  { %v3714_v11 = vpack.c.bf16 %v1286_v50, %v1279_v1  ;;  %2645 = vmatprep.subr.bf16.mxu1 %v2644_v23  ;;  %4459 = vst [vmem:[#allocation12_spill] sm:$0xff] %v3725_v0  ;;  %v3727_v50 = vsub.f32 %v1109_v48, %v1211_v25  ;;  %v3729_v1 = vsub.f32 %v1092_v61, %v1160_v5  ;;  %v4276_v16 = vand.u32 4294901760, %v3486_v18 }
  0xe5   :  { %4462 = vst [vmem:[#allocation15_spill] sm:$0xff] %v3731_v19  ;;  %v3733_v55 = vpack.c.bf16 %v1412_v31, %v1405_v21  ;;  %v1418_v23 = vsub.f32 %v3473_v53, %v4280_v32  ;;  %v3738_v45 = vpack.c.bf16 %v1300_v27, %v1293_v8  ;;  %v1306_v48 = vsub.f32 %v3484_v13, %v4277_v37 }
  0xe6   :  { %4460 = vst [vmem:[#allocation13_spill] sm:$0xff] %v3727_v50  ;;  %4461 = vst [vmem:[#allocation14_spill] sm:$0xff] %v3729_v1  ;;  %v4278_v61 = vand.u32 4294901760, %v3488_v24  ;;  %v4281_v9 = vand.u32 4294901760, %v3496_v12  ;;  %v4287_v5 = vand.u32 4294901760, %v3498_v35  ;;  %v1426_v57 = vand.u32 4294901760, %v1425_v29 }
  0xe7   :  { %v1419_v25 = vand.u32 4294901760, %v1418_v23  ;;  %v1307_v21 = vand.u32 4294901760, %v1306_v48  ;;  %v1313_v14 = vsub.f32 %v3486_v18, %v4276_v16  ;;  %v4282_v58 = vand.u32 4294901760, %v3502_v44 }
  0xe8   :  { %v1432_v52 = vsub.f32 %v3488_v24, %v4278_v61  ;;  %v1439_v31 = vsub.f32 %v3496_v12, %v4281_v9  ;;  %v1320_v8 = vsub.f32 %v3498_v35, %v4287_v5  ;;  %v4284_v48 = vand.u32 4294901760, %v3642_v60 }
  0xe9   :  { %v3763_v27 = vpack.c.bf16 %v1426_v57, %v1419_v25  ;;  %v1314_v23 = vand.u32 4294901760, %v1313_v14  ;;  %v1327_v29 = vsub.f32 %v3502_v44, %v4282_v58  ;;  %v4283_v36 = vand.u32 4294901760, %v3644_v2 }
  0xea   :  { %v1433_v16 = vand.u32 4294901760, %v1432_v52  ;;  %v1440_v37 = vand.u32 4294901760, %v1439_v31  ;;  %v1321_v61 = vand.u32 4294901760, %v1320_v8  ;;  %v1446_v25 = vsub.f32 %v3642_v60, %v4284_v48 }
  0xeb   :  { %v3770_v32 = vpack.c.bf16 %v1314_v23, %v1307_v21  ;;  %v1328_v9 = vand.u32 4294901760, %v1327_v29  ;;  %v4285_v57 = vand.u32 4294901760, %v3654_v17  ;;  %v1453_v58 = vsub.f32 %v3644_v2, %v4283_v36 }
  0xec   :  { %v3776_v14 = vpack.c.bf16 %v1440_v37, %v1433_v16  ;;  %v4286_v52 = vand.u32 4294901760, %v3656_v41  ;;  %v1447_v8 = vand.u32 4294901760, %v1446_v25  ;;  %v4288_v23 = vand.u32 4294901760, %v3672_v3 }
  0xed   :  { %v3782_v31 = vpack.c.bf16 %v1328_v9, %v1321_v61  ;;  %v1334_v21 = vsub.f32 %v3654_v17, %v4285_v57  ;;  %v1454_v29 = vand.u32 4294901760, %v1453_v58  ;;  %v4291_v16 = vand.u32 4294901760, %v3674_v38 }
  0xee   :  { %v1341_v37 = vsub.f32 %v3656_v41, %v4286_v52  ;;  %v4292_v36 = vand.u32 4294901760, %v3681_v59  ;;  %v1460_v61 = vsub.f32 %v3672_v3, %v4288_v23  ;;  %v4293_v9 = vand.u32 4294901760, %v3683_v22 }
  0xef   :  { %v1335_v48 = vand.u32 4294901760, %v1334_v21  ;;  %v3797_v25 = vpack.c.bf16 %v1454_v29, %v1447_v8  ;;  %v1467_v58 = vsub.f32 %v3674_v38, %v4291_v16  ;;  %v4296_v23 = vand.u32 4294901760, %v3700_v51 }
  0xf0   :  { %v1342_v57 = vand.u32 4294901760, %v1341_v37  ;;  %v1348_v52 = vsub.f32 %v3681_v59, %v4292_v36  ;;  %v1461_v5 = vand.u32 4294901760, %v1460_v61  ;;  %v1355_v21 = vsub.f32 %v3683_v22, %v4293_v9 }
  0xf1   :  { %v1468_v29 = vand.u32 4294901760, %v1467_v58  ;;  %v1474_v36 = vsub.f32 %v3700_v51, %v4296_v23  ;;  %v1481_v61 = vsub.f32 %v3702_v28, %v4299_v33  ;;  %v4303_v9 = vand.u32 4294901760, %v3709_v40 }
  0xf2   :  { %v3810_v8 = vpack.c.bf16 %v1342_v57, %v1335_v48  ;;  %v1349_v37 = vand.u32 4294901760, %v1348_v52  ;;  %v1356_v16 = vand.u32 4294901760, %v1355_v21  ;;  %v1362_v48 = vsub.f32 %v3707_v20, %v4302_v10 }
  0xf3   :  { %v3820_v46 = vpack.c.bf16 %v1468_v29, %v1461_v5  ;;  %v1475_v52 = vand.u32 4294901760, %v1474_v36  ;;  %v1482_v58 = vand.u32 4294901760, %v1481_v61  ;;  %v1369_v21 = vsub.f32 %v3709_v40, %v4303_v9 }
  0xf4   :  { %v3825_v57 = vpack.c.bf16 %v1356_v16, %v1349_v37  ;;  %v1363_v23 = vand.u32 4294901760, %v1362_v48  ;;  %v4306_v15 = vand.u32 4294901760, %v3725_v0  ;;  %v4307_v33 = vand.u32 4294901760, %v3727_v50 }
  0xf5   :  { %v4308_v5 = vand.u32 4294901760, %v3729_v1  ;;  %v3833_v29 = vpack.c.bf16 %v1482_v58, %v1475_v52  ;;  %v1370_v30 = vand.u32 4294901760, %v1369_v21  ;;  %v4309_v10 = vand.u32 4294901760, %v3731_v19 }
  0xf6   :  { %v1488_v36 = vsub.f32 %v3725_v0, %v4306_v15  ;;  %v1495_v16 = vsub.f32 %v3727_v50, %v4307_v33 }
  0xf7   :  { %v1376_v37 = vsub.f32 %v3729_v1, %v4308_v5  ;;  %v3845_v61 = vpack.c.bf16 %v1370_v30, %v1363_v23  ;;  %v1383_v48 = vsub.f32 %v3731_v19, %v4309_v10 }
  0xf8   :  { %v1489_v52 = vand.u32 4294901760, %v1488_v36  ;;  %v1496_v58 = vand.u32 4294901760, %v1495_v16  ;;  %v58_v16 = vlaneseq }
  0xf9   :  { %v1377_v21 = vand.u32 4294901760, %v1376_v37  ;;  %v1384_v9 = vand.u32 4294901760, %v1383_v48 }
  0xfa   :  { %v3850_v4 = vpack.c.bf16 %v1496_v58, %v1489_v52  ;;  %v59_v52 = vshrl.u32 %v58_v16, 7  ;;  %v56_v58 = vld [vmem:[%s4186_s2] sm:$0x3] }
  0xfb   :  { %v3852_v15 = vpack.c.bf16 %v1384_v9, %v1377_v21 }
  0xfc   :  { %v60_v36 = vsub.s32 0, %v59_v52  ;;  %v64_v21 = vsub.s32 1, %v59_v52 }
  0xfe   :  { %v61_v23 = vrot.slane %v56_v58, %v60_v36  ;;  %v65_v30 = vrot.slane %v56_v58, %v64_v21 }
 0x199   :  { %v1044_v10 = vpop.f32.mrb[0].mxu0 }
 0x19a   :  { %v2804_v5 = vadd.f32 %v1044_v10, %v61_v23  ;;  %v1046_v33 = vpop.f32.mrb[1].mxu0 }
 0x19b   :  { %v2805_v9 = vadd.f32 %v1046_v33, %v65_v30 }
 0x19c   :  { %v1070_v42 = vmax.f32 %v2804_v5, 0.0 }
 0x19d   :  { %v1071_v26 = vmax.f32 %v2805_v9, 0.0  ;;  %v1051_v37 = vpop.f32.mrb[2].mxu0 }
 0x19e   :  { %v3889_v54 = vand.u32 4294901760, %v1070_v42  ;;  %v2806_v48 = vadd.f32 %v1051_v37, %v61_v23  ;;  %v1053_v47 = vpop.f32.mrb[3].mxu0 }
 0x19f   :  { %v3891_v16 = vand.u32 4294901760, %v1071_v26  ;;  %v2807_v1 = vadd.f32 %v1053_v47, %v65_v30 }
 0x1a0   :  { %v3894_v19 = vsub.f32 %v1070_v42, %v3889_v54  ;;  %v1072_v52 = vmax.f32 %v2806_v48, 0.0 }
 0x1a1   :  { %v3897_v36 = vsub.f32 %v1071_v26, %v3891_v16  ;;  %v1073_v10 = vmax.f32 %v2807_v1, 0.0  ;;  %v1058_v58 = vpop.f32.mrb[4].mxu0 }
 0x1a2   :  { %4463 = vst [vmem:[#allocation17_spill] sm:$0xff] %v3894_v19  ;;  %v3899_v33 = vand.u32 4294901760, %v1072_v52  ;;  %v2808_v5 = vadd.f32 %v1058_v58, %v61_v23  ;;  %v1060_v9 = vpop.f32.mrb[5].mxu0  ;;  %v4336_v21 = vand.u32 4294901760, %v3894_v19 }
 0x1a3   :  { %v3902_v37 = vand.u32 4294901760, %v1073_v10  ;;  %v2809_v0 = vadd.f32 %v1060_v9, %v65_v30  ;;  %v4339_v47 = vand.u32 4294901760, %v3897_v36 }
 0x1a4   :  { %v3906_v42 = vsub.f32 %v1072_v52, %v3899_v33  ;;  %v1074_v48 = vmax.f32 %v2808_v5, 0.0  ;;  %v1222_v26 = vsub.f32 %v3894_v19, %v4336_v21 }
 0x1a5   :  { %v3912_v1 = vsub.f32 %v1073_v10, %v3902_v37  ;;  %v1075_v58 = vmax.f32 %v2809_v0, 0.0  ;;  %v1065_v50 = vpop.f32.mrb[6].mxu0  ;;  %v1216_v20 = vsub.f32 %v3897_v36, %v4339_v47 }
 0x1a6   :  { %v3917_v9 = vand.u32 4294901760, %v1074_v48  ;;  %v2810_v40 = vadd.f32 %v1065_v50, %v61_v23  ;;  %v1067_v51 = vpop.f32.mrb[7].mxu0  ;;  %v4344_v52 = vand.u32 4294901760, %v3906_v42  ;;  %v1223_v19 = vand.u32 4294901760, %v1222_v26 }
 0x1a7   :  { %v3920_v5 = vand.u32 4294901760, %v1075_v58  ;;  %v2811_v28 = vadd.f32 %v1067_v51, %v65_v30  ;;  %v1217_v59 = vand.u32 4294901760, %v1216_v20  ;;  %v4345_v21 = vand.u32 4294901760, %v3912_v1 }
 0x1a8   :  { %v3924_v10 = vsub.f32 %v1074_v48, %v3917_v9  ;;  %v1076_v0 = vmax.f32 %v2810_v40, 0.0  ;;  %v1237_v47 = vsub.f32 %v3906_v42, %v4344_v52  ;;  %v4505_v52 = vld [vmem:[#allocation5_spill] sm:$0xff] }
 0x1a9   :  { %v3930_v50 = vsub.f32 %v1075_v58, %v3920_v5  ;;  %v1077_v23 = vmax.f32 %v2811_v28, 0.0  ;;  %1218 = vmatprep.mubr.f32.mxu1 %v1217_v59  ;;  %v1231_v51 = vsub.f32 %v3912_v1, %v4345_v21  ;;  %v4506_v21 = vld [vmem:[#allocation6_spill] sm:$0xff] }
 0x1aa   :  { %v3935_v20 = vand.u32 4294901760, %v1076_v0  ;;  %1224 = vmatmul.mubr.f32.vlgmr.msra.gmra.mrb[0].mxu1 %v1223_v19  ;;  %v4342_v30 = vand.u32 4294901760, %v3924_v10  ;;  %v1238_v59 = vand.u32 4294901760, %v1237_v47 }
 0x1ab   :  { %v3938_v40 = vand.u32 4294901760, %v1077_v23  ;;  %2647 = vmatpush3.bf16.msra.mxu1 %v3714_v11  ;;  %v1232_v48 = vand.u32 4294901760, %v1231_v51  ;;  %v4343_v26 = vand.u32 4294901760, %v3930_v50 }
 0x1ac   :  { %4464 = vst [vmem:[#allocation18_spill] sm:$0xff] %v3935_v20  ;;  %v3943_v58 = vsub.f32 %v1076_v0, %v3935_v20  ;;  %2649 = vmatprep.subr.bf16.mxu1 %v3733_v55  ;;  %v1252_v28 = vsub.f32 %v3924_v10, %v4342_v30  ;;  %v4503_v30 = vld [vmem:[#allocation4_spill] sm:$0xff] }
 0x1ad   :  { %v3950_v19 = vsub.f32 %v1077_v23, %v3938_v40  ;;  %1233 = vmatprep.mubr.f32.mxu1 %v1232_v48  ;;  %v1246_v11 = vsub.f32 %v3930_v50, %v4343_v26  ;;  %v4504_v26 = vld [vmem:[#allocation19_spill] sm:$0xff] }
 0x1ae   :  { %1239 = vmatmul.mubr.f32.gmra.mrb[2].mxu1 %v1238_v59  ;;  %v4340_v51 = vand.u32 4294901760, %v3943_v58  ;;  %v1253_v47 = vand.u32 4294901760, %v1252_v28 }
 0x1af   :  { %2651 = vmatpush3.bf16.msra.mxu1 %v3738_v45  ;;  %v1247_v0 = vand.u32 4294901760, %v1246_v11  ;;  %v4341_v55 = vand.u32 4294901760, %v3950_v19  ;;  %v4478_v11 = vld [vmem:[#allocation9_spill] sm:$0xff] }
 0x1b0   :  { %2653 = vmatprep.subr.bf16.mxu1 %v3763_v27  ;;  %v1267_v23 = vsub.f32 %v3943_v58, %v4340_v51  ;;  %v4467_v27 = vpack.c.bf16 %v3457_v63, %v3451_v7  ;;  %v4501_v51 = vld [vmem:[#allocation16_spill] sm:$0xff] }
 0x1b1   :  { %1248 = vmatprep.mubr.f32.mxu1 %v1247_v0  ;;  %v1261_v48 = vsub.f32 %v3950_v19, %v4341_v55  ;;  %v4479_v0 = vld [vmem:[#allocation8_spill] sm:$0xff]  ;;  %v4502_v55 = vld [vmem:[#allocation3_spill] sm:$0xff] }
 0x1b2   :  { %1254 = vmatmul.mubr.f32.gmra.mrb[4].mxu1 %v1253_v47  ;;  %v1268_v45 = vand.u32 4294901760, %v1267_v23  ;;  %v4480_v47 = vpack.c.bf16 %v4478_v11, %v4479_v0  ;;  %v4481_v23 = vld [vmem:[#allocation11_spill] sm:$0xff] }
 0x1b3   :  { %2655 = vmatpush3.bf16.msra.mxu1 %v3770_v32  ;;  %v1262_v59 = vand.u32 4294901760, %v1261_v48  ;;  %v4465_v32 = vpack.c.bf16 %v3432_v56, %v3430_v34  ;;  %v4482_v48 = vld [vmem:[#allocation10_spill] sm:$0xff] }
 0x1b4   :  { %2657 = vmatprep.subr.bf16.mxu1 %v3776_v14  ;;  %v4470_v14 = vpack.c.bf16 %v3486_v18, %v3484_v13 }
 0x1b5   :  { %1263 = vmatprep.mubr.f32.mxu1 %v1262_v59  ;;  %v4483_v59 = vpack.c.bf16 %v4481_v23, %v4482_v48 }
 0x1b6   :  { %1269 = vmatmul.mubr.f32.gmra.mrb[6].mxu1 %v1268_v45  ;;  %v4484_v45 = vld [vmem:[#allocation13_spill] sm:$0xff] }
 0x1b7   :  { %2659 = vmatpush3.bf16.msra.mxu1 %v3782_v31  ;;  %1499 = vmatprep.mubr.f32.mxu1 %v3891_v16  ;;  %v4471_v31 = vpack.c.bf16 %v3496_v12, %v3488_v24 }
 0x1b8   :  { %2661 = vmatprep.subr.bf16.mxu1 %v3797_v25  ;;  %v4472_v25 = vpack.c.bf16 %v3502_v44, %v3498_v35 }
 0x1bb   :  { %2663 = vmatpush3.bf16.msra.mxu1 %v3810_v8  ;;  %v4473_v8 = vpack.c.bf16 %v3644_v2, %v3642_v60 }
 0x1bc   :  { %2665 = vmatprep.subr.bf16.mxu1 %v3820_v46  ;;  %v4466_v46 = vpack.c.bf16 %v3447_v39, %v3434_v62 }
 0x1bf   :  { %2667 = vmatpush3.bf16.msra.mxu1 %v3825_v57  ;;  %v4474_v57 = vpack.c.bf16 %v3656_v41, %v3654_v17 }
 0x1c0   :  { %2669 = vmatprep.subr.bf16.mxu1 %v3833_v29  ;;  %v4475_v29 = vpack.c.bf16 %v3674_v38, %v3672_v3 }
 0x1c3   :  { %2671 = vmatpush3.bf16.msra.mxu1 %v3845_v61  ;;  %v4476_v61 = vld [vmem:[#allocation7_spill] sm:$0xff] }
 0x1c4   :  { %2673 = vmatprep.subr.bf16.mxu1 %v3850_v4  ;;  %v4468_v4 = vpack.c.bf16 %v3471_v49, %v3469_v43  ;;  %v4477_v28 = vpack.c.bf16 %v3683_v22, %v4476_v61 }
 0x1c7   :  { %2675 = vmatpush3.bf16.msra.mxu1 %v3852_v15  ;;  %v4469_v15 = vpack.c.bf16 %v3482_v6, %v3473_v53 }
 0x1c8   :  { %2677 = vmatprep.subr.bf16.mxu1 %v4465_v32  ;;  %v4485_v32 = vld [vmem:[#allocation12_spill] sm:$0xff] }
 0x1ca   :  { %1501 = vmatmul.mubr.f32.vlgmr.msra.gmra.mrb[8].mxu1 %v3889_v54 }
 0x1cb   :  { %1506 = vmatprep.mubr.f32.mxu1 %v3902_v37  ;;  %2679 = vmatpush3.bf16.msra.mxu1 %v4466_v46  ;;  %v4486_v46 = vpack.c.bf16 %v4484_v45, %v4485_v32 }
 0x1cc   :  { %2681 = vmatprep.subr.bf16.mxu1 %v4467_v27  ;;  %v4487_v27 = vld [vmem:[#allocation15_spill] sm:$0xff] }
 0x1ce   :  { %1508 = vmatmul.mubr.f32.gmra.mrb[10].mxu1 %v3899_v33 }
 0x1cf   :  { %1513 = vmatprep.mubr.f32.mxu1 %v3920_v5  ;;  %2683 = vmatpush3.bf16.msra.mxu1 %v4468_v4  ;;  %v4488_v4 = vld [vmem:[#allocation14_spill] sm:$0xff] }
 0x1d0   :  { %2685 = vmatprep.subr.bf16.mxu1 %v4469_v15  ;;  %v4489_v15 = vpack.c.bf16 %v4487_v27, %v4488_v4 }
 0x1d2   :  { %1515 = vmatmul.mubr.f32.gmra.mrb[12].mxu1 %v3917_v9 }
 0x1d3   :  { %1520 = vmatprep.mubr.f32.mxu1 %v3938_v40  ;;  %2687 = vmatpush3.bf16.msra.mxu1 %v4470_v14  ;;  %v4490_v14 = vld [vmem:[#allocation25_spill] sm:$0xff] }
 0x1d4   :  { %2689 = vmatprep.subr.bf16.mxu1 %v4471_v31  ;;  %v4491_v31 = vld [vmem:[#allocation17_spill] sm:$0xff] }
 0x1d6   :  { %1522 = vmatmul.mubr.f32.gmra.mrb[14].mxu1 %v3935_v20  ;;  %v4507_v20 = vand.u32 4294901760, %v3430_v34  ;;  %v4515_v34 = vand.u32 4294901760, %v3912_v1 }
 0x1d7   :  { %2691 = vmatpush3.bf16.msra.mxu1 %v4472_v25  ;;  %1657 = vmatprep.mubr.f32.mxu1 %v3897_v36  ;;  %v4492_v25 = vld [vmem:[#allocation26_spill] sm:$0xff] }
 0x1d8   :  { %2693 = vmatprep.subr.bf16.mxu1 %v4473_v8  ;;  %v4493_v8 = vld [vmem:[#allocation27_spill] sm:$0xff] }
 0x1db   :  { %2695 = vmatpush3.bf16.msra.mxu1 %v4474_v57  ;;  %v4494_v57 = vld [vmem:[#allocation28_spill] sm:$0xff] }
 0x1dc   :  { %2697 = vmatprep.subr.bf16.mxu1 %v4475_v29  ;;  %v4495_v29 = vld [vmem:[#allocation29_spill] sm:$0xff] }
 0x1df   :  { %2699 = vmatpush3.bf16.msra.mxu1 %v4477_v28  ;;  %v4496_v28 = vld [vmem:[#allocation30_spill] sm:$0xff] }
 0x1e0   :  { %2701 = vmatprep.subr.bf16.mxu1 %v4480_v47  ;;  %v4497_v47 = vld [vmem:[#allocation31_spill] sm:$0xff] }
 0x1e3   :  { %2703 = vmatpush3.bf16.msra.mxu1 %v4483_v59  ;;  %v4498_v59 = vld [vmem:[#allocation32_spill] sm:$0xff] }
 0x1e4   :  { %2705 = vmatprep.subr.bf16.mxu1 %v4486_v46  ;;  %v4499_v46 = vand.u32 4294901760, %v3897_v36 }
 0x1e7   :  { %2707 = vmatpush3.bf16.msra.mxu1 %v4489_v15  ;;  %v4500_v15 = vld [vmem:[#allocation2_spill] sm:$0xff] }
 0x1e8   :  { %2709 = vmatprep.subr.bf16.mxu1 %v4490_v14 }
 0x1ea   :  { %1660 = vmatmul.mubr.f32.vlgmr.msra.gmra.mrb[16].mxu1 %v4491_v31 }
 0x1eb   :  { %1666 = vmatprep.mubr.f32.mxu1 %v3912_v1  ;;  %2711 = vmatpush3.bf16.msra.mxu1 %v4492_v25  ;;  %v4522_v1 = vand.u32 4294901760, %v3484_v13  ;;  %v4529_v13 = vand.u32 4294901760, %v3502_v44  ;;  %v4535_v44 = vand.u32 4294901760, %v3672_v3  ;;  %v4542_v3 = vand.u32 4294901760, %v4481_v23  ;;  %v4548_v23 = vld [vmem:[#allocation32_spill] sm:$0xff] }
 0x1ec   :  { %2713 = vmatprep.subr.bf16.mxu1 %v4493_v8 }
 0x1ee   :  { %1669 = vmatmul.mubr.f32.gmra.mrb[18].mxu1 %v3906_v42 }
 0x1ef   :  { %1675 = vmatprep.mubr.f32.mxu1 %v3930_v50  ;;  %2715 = vmatpush3.bf16.msra.mxu1 %v4494_v57 }
 0x1f0   :  { %2717 = vmatprep.subr.bf16.mxu1 %v4495_v29 }
 0x1f2   :  { %1678 = vmatmul.mubr.f32.gmra.mrb[20].mxu1 %v3924_v10 }
 0x1f3   :  { %1684 = vmatprep.mubr.f32.mxu1 %v3950_v19  ;;  %2719 = vmatpush3.bf16.msra.mxu1 %v4496_v28 }
 0x1f4   :  { %2721 = vmatprep.subr.bf16.mxu1 %v4497_v47 }
 0x1f6   :  { %1687 = vmatmul.mubr.f32.gmra.mrb[22].mxu1 %v3943_v58 }
 0x1f7   :  { %2723 = vmatpush3.bf16.msra.mxu1 %v4498_v59  ;;  %1791 = vmatprep.mubr.f32.mxu1 %v4499_v46  ;;  %v4508_v59 = vand.u32 4294901760, %v3432_v56  ;;  %v4509_v46 = vld [vmem:[#allocation20_spill] sm:$0xff]  ;;  %v4516_v56 = vand.u32 4294901760, %v3469_v43  ;;  %v4523_v43 = vand.u32 4294901760, %v3486_v18  ;;  %v4530_v18 = vand.u32 4294901760, %v3642_v60 }
 0x1f8   :  { %2725 = vmatprep.subr.bf16.mxu1 %v4500_v15  ;;  %v4510_v15 = vand.u32 4294901760, %v3434_v62  ;;  %v4517_v62 = vand.u32 4294901760, %v3471_v49  ;;  %v4524_v49 = vand.u32 4294901760, %v3488_v24  ;;  %v4531_v24 = vand.u32 4294901760, %v3644_v2 }
 0x1f9   :  { %v2740_v36 = vpack.c.bf16 %v4508_v59, %v4507_v20  ;;  %v4537_v2 = vand.u32 4294901760, %v4476_v61  ;;  %v4544_v61 = vand.u32 4294901760, %v4484_v45  ;;  %v4550_v45 = vld [vmem:[#allocation16_spill] sm:$0xff] }
 0x1fa   :  { %v2746_v20 = vpack.c.bf16 %v4517_v62, %v4516_v56 }
 0x1fb   :  { %2727 = vmatpush3.bf16.msra.mxu1 %v4501_v51  ;;  %v4511_v51 = vand.u32 4294901760, %v3447_v39  ;;  %v4518_v39 = vand.u32 4294901760, %v3473_v53  ;;  %v4525_v53 = vand.u32 4294901760, %v3496_v12  ;;  %v4532_v12 = vand.u32 4294901760, %v3943_v58 }
 0x1fc   :  { %2729 = vmatprep.subr.bf16.mxu1 %v4502_v55  ;;  %v4538_v58 = vand.u32 4294901760, %v3683_v22  ;;  %v4545_v22 = vand.u32 4294901760, %v4488_v4  ;;  %v4553_v4 = vld [vmem:[#allocation19_spill] sm:$0xff] }
 0x1fd   :  { %v2742_v55 = vpack.c.bf16 %v4511_v51, %v4510_v15  ;;  %v4539_v15 = vand.u32 4294901760, %v4479_v0  ;;  %v4546_v0 = vand.u32 4294901760, %v4487_v27  ;;  %v4552_v27 = vld [vmem:[#allocation4_spill] sm:$0xff] }
 0x1fe   :  { %v2762_v59 = vpack.c.bf16 %v4538_v58, %v4537_v2 }
 0x1ff   :  { %2731 = vmatpush3.bf16.msra.mxu1 %v4503_v30  ;;  %v4512_v30 = vand.u32 4294901760, %v3451_v7  ;;  %v4519_v7 = vand.u32 4294901760, %v3482_v6  ;;  %v4526_v6 = vand.u32 4294901760, %v3924_v10  ;;  %v4533_v10 = vand.u32 4294901760, %v3654_v17 }
 0x200   :  { %2733 = vmatprep.subr.bf16.mxu1 %v4504_v26  ;;  %v4513_v26 = vand.u32 4294901760, %v3457_v63  ;;  %v4520_v63 = vand.u32 4294901760, %v3906_v42  ;;  %v4527_v42 = vand.u32 4294901760, %v3950_v19  ;;  %v4534_v19 = vand.u32 4294901760, %v3656_v41 }
 0x201   :  { %v2748_v51 = vpack.c.bf16 %v4519_v7, %v4518_v39  ;;  %v4540_v17 = vand.u32 4294901760, %v4478_v11  ;;  %v4541_v41 = vand.u32 4294901760, %v4482_v48  ;;  %v2770_v62 = vpack.c.bf16 %v4546_v0, %v4545_v22  ;;  %v4547_v11 = vld [vmem:[#allocation18_spill] sm:$0xff] }
 0x202   :  { %v4549_v48 = vld [vmem:[#allocation2_spill] sm:$0xff] }
 0x203   :  { %2735 = vmatpush3.bf16.msra.mxu1 %v4505_v52  ;;  %v2744_v52 = vpack.c.bf16 %v4513_v26, %v4512_v30  ;;  %v2750_v30 = vpack.c.bf16 %v4523_v43, %v4522_v1 }
 0x204   :  { %2737 = vmatprep.subr.bf16.mxu1 %v4506_v21  ;;  %v4514_v21 = vand.u32 4294901760, %v4491_v31  ;;  %v4536_v31 = vand.u32 4294901760, %v3674_v38  ;;  %v4543_v38 = vand.u32 4294901760, %v4485_v32  ;;  %v4551_v32 = vld [vmem:[#allocation3_spill] sm:$0xff] }
 0x206   :  { %v2760_v60 = vpack.c.bf16 %v4536_v31, %v4535_v44  ;;  %v2768_v56 = vpack.c.bf16 %v4544_v61, %v4543_v38 }
 0x207   :  { %2739 = vmatpush3.bf16.msra.mxu1 %v4509_v46 }
 0x208   :  { %2741 = vmatprep.subr.bf16.mxu1 %v2740_v36  ;;  %v2764_v36 = vpack.c.bf16 %v4540_v17, %v4539_v15 }
 0x20a   :  { %1795 = vmatmul.mubr.f32.vlgmr.msra.gmra.mrb[24].mxu1 %v4514_v21  ;;  %v4521_v21 = vand.u32 4294901760, %v3930_v50  ;;  %v4528_v50 = vand.u32 4294901760, %v3498_v35  ;;  %v2758_v35 = vpack.c.bf16 %v4534_v19, %v4533_v10 }
 0x20b   :  { %1802 = vmatprep.mubr.f32.mxu1 %v4515_v34  ;;  %2743 = vmatpush3.bf16.msra.mxu1 %v2742_v55  ;;  %v2756_v55 = vpack.c.bf16 %v4531_v24, %v4530_v18  ;;  %v2766_v34 = vpack.c.bf16 %v4542_v3, %v4541_v41 }
 0x20c   :  { %2745 = vmatprep.subr.bf16.mxu1 %v2744_v52  ;;  %v2752_v52 = vpack.c.bf16 %v4525_v53, %v4524_v49  ;;  %v2754_v26 = vpack.c.bf16 %v4529_v13, %v4528_v50 }
 0x20e   :  { %1806 = vmatmul.mubr.f32.gmra.mrb[26].mxu1 %v4520_v63 }
 0x20f   :  { %1813 = vmatprep.mubr.f32.mxu1 %v4521_v21  ;;  %2747 = vmatpush3.bf16.msra.mxu1 %v2746_v20 }
 0x210   :  { %2749 = vmatprep.subr.bf16.mxu1 %v2748_v51 }
 0x212   :  { %1817 = vmatmul.mubr.f32.gmra.mrb[28].mxu1 %v4526_v6 }
 0x213   :  { %1824 = vmatprep.mubr.f32.mxu1 %v4527_v42  ;;  %2751 = vmatpush3.bf16.msra.mxu1 %v2750_v30 }
 0x214   :  { %2753 = vmatprep.subr.bf16.mxu1 %v2752_v52 }
 0x216   :  { %1828 = vmatmul.mubr.f32.gmra.mrb[30].mxu1 %v4532_v12 }
 0x217   :  { %2755 = vmatpush3.bf16.msra.mxu1 %v2754_v26  ;;  %1994 = vmatprep.mubr.f32.mxu1 %v3891_v16 }
 0x218   :  { %2757 = vmatprep.subr.bf16.mxu1 %v2756_v55 }
 0x21b   :  { %2759 = vmatpush3.bf16.msra.mxu1 %v2758_v35 }
 0x21c   :  { %2761 = vmatprep.subr.bf16.mxu1 %v2760_v60 }
 0x21f   :  { %2763 = vmatpush3.bf16.msra.mxu1 %v2762_v59 }
 0x220   :  { %2765 = vmatprep.subr.bf16.mxu1 %v2764_v36 }
 0x223   :  { %2767 = vmatpush3.bf16.msra.mxu1 %v2766_v34 }
 0x224   :  { %2769 = vmatprep.subr.bf16.mxu1 %v2768_v56 }
 0x227   :  { %2771 = vmatpush3.bf16.msra.mxu1 %v2770_v62 }
 0x228   :  { %2773 = vmatprep.subr.bf16.mxu1 %v4490_v14  ;;  %v4554_v14 = vld [vmem:[#allocation5_spill] sm:$0xff] }
 0x22a   :  { %1996 = vmatmul.mubr.f32.vlgmr.msra.gmra.mrb[32].mxu1 %v3889_v54 }
 0x22b   :  { %2001 = vmatprep.mubr.f32.mxu1 %v3902_v37  ;;  %2775 = vmatpush3.bf16.msra.mxu1 %v4492_v25  ;;  %v4555_v25 = vld [vmem:[#allocation6_spill] sm:$0xff] }
 0x22c   :  { %2777 = vmatprep.subr.bf16.mxu1 %v4493_v8 }
 0x22e   :  { %2003 = vmatmul.mubr.f32.gmra.mrb[34].mxu1 %v3899_v33 }
 0x22f   :  { %2008 = vmatprep.mubr.f32.mxu1 %v3920_v5  ;;  %2779 = vmatpush3.bf16.msra.mxu1 %v4494_v57 }
 0x230   :  { %2781 = vmatprep.subr.bf16.mxu1 %v4495_v29 }
 0x232   :  { %2010 = vmatmul.mubr.f32.gmra.mrb[36].mxu1 %v3917_v9 }
 0x233   :  { %2015 = vmatprep.mubr.f32.mxu1 %v3938_v40  ;;  %2783 = vmatpush3.bf16.msra.mxu1 %v4496_v28 }
 0x234   :  { %2785 = vmatprep.subr.bf16.mxu1 %v4497_v47 }
 0x236   :  { %2017 = vmatmul.mubr.f32.gmra.mrb[38].mxu1 %v4547_v11 }
 0x237   :  { %2787 = vmatpush3.bf16.msra.mxu1 %v4548_v23  ;;  %2119 = vmatprep.mubr.f32.mxu1 %v3891_v16 }
 0x238   :  { %2789 = vmatprep.subr.bf16.mxu1 %v4549_v48 }
 0x23b   :  { %2791 = vmatpush3.bf16.msra.mxu1 %v4550_v45 }
 0x23c   :  { %2793 = vmatprep.subr.bf16.mxu1 %v4551_v32 }
 0x23f   :  { %2795 = vmatpush3.bf16.msra.mxu1 %v4552_v27 }
 0x240   :  { %2797 = vmatprep.subr.bf16.mxu1 %v4553_v4 }
 0x243   :  { %2799 = vmatpush3.bf16.msra.mxu1 %v4554_v14 }
 0x244   :  { %2801 = vmatprep.subr.bf16.mxu1 %v4555_v25 }
 0x247   :  { %2803 = vmatpush3.bf16.msra.mxu1 %v4509_v46 }
 0x24a   :  { %2121 = vmatmul.mubr.f32.vlgmr.msra.gmra.mrb[40].mxu1 %v3889_v54 }
 0x24b   :  { %2126 = vmatprep.mubr.f32.mxu1 %v3902_v37 }
 0x24e   :  { %2128 = vmatmul.mubr.f32.gmra.mrb[42].mxu1 %v3899_v33 }
 0x24f   :  { %2133 = vmatprep.mubr.f32.mxu1 %v3920_v5 }
 0x252   :  { %2135 = vmatmul.mubr.f32.gmra.mrb[44].mxu1 %v3917_v9  ;;  %v2155_v9 = vld [vmem:[%s4187_s4] ss:$0 sm:$0xff] }
 0x253   :  { %2140 = vmatprep.mubr.f32.mxu1 %v3938_v40 }
 0x256   :  { %2142 = vmatmul.mubr.f32.gmra.mrb[46].mxu1 %v4547_v11 }
 0x27d   :  { %v2188_v16 = vpop.f32.mrb[0].mxu1 }
 0x27e   :  { %v2189_v8 = vpop.f32.mrb[1].mxu1 }
 0x27f   :  { %v2190_v57 = vadd.f32 %v2189_v8, %v2188_v16 }
 0x281   :  { %v2191_v29 = vpop.f32.mrb[2].mxu1  ;;  %v1226_v7 = vadd.f32 %v2190_v57, %v2155_v9 }
 0x282   :  { %v2192_v28 = vpop.f32.mrb[3].mxu1 }
 0x283   :  { %v2193_v47 = vadd.f32 %v2192_v28, %v2191_v29 }
 0x285   :  { %v2194_v46 = vpop.f32.mrb[4].mxu1  ;;  %v1241_v43 = vadd.f32 %v2193_v47, %v2155_v9 }
 0x286   :  { %v2195_v54 = vpop.f32.mrb[5].mxu1 }
 0x287   :  { %v2196_v20 = vadd.f32 %v2195_v54, %v2194_v46 }
 0x289   :  { %v2197_v37 = vpop.f32.mrb[6].mxu1  ;;  %v1256_v6 = vadd.f32 %v2196_v20, %v2155_v9 }
 0x28a   :  { %v2198_v39 = vpop.f32.mrb[7].mxu1 }
 0x28b   :  { %v2199_v33 = vadd.f32 %v2198_v39, %v2197_v37 }
 0x28d   :  { %v1271_v18 = vadd.f32 %v2199_v33, %v2155_v9 }
 0x29d   :  { %v2232_v5 = vpop.f32.mrb[8].mxu1 }
 0x29e   :  { %v2233_v40 = vpop.f32.mrb[9].mxu1 }
 0x29f   :  { %v2234_v51 = vadd.f32 %v2233_v40, %v2232_v5 }
 0x2a1   :  { %v1503_v63 = vadd.f32 %v2234_v51, %v1226_v7  ;;  %v2235_v21 = vpop.f32.mrb[10].mxu1 }
 0x2a2   :  { %v2236_v1 = vpop.f32.mrb[11].mxu1 }
 0x2a3   :  { %v2237_v30 = vadd.f32 %v2236_v1, %v2235_v21 }
 0x2a5   :  { %v1510_v49 = vadd.f32 %v2237_v30, %v1241_v43  ;;  %v2238_v53 = vpop.f32.mrb[12].mxu1 }
 0x2a6   :  { %v2239_v52 = vpop.f32.mrb[13].mxu1 }
 0x2a7   :  { %v2240_v42 = vadd.f32 %v2239_v52, %v2238_v53 }
 0x2a9   :  { %v1517_v50 = vadd.f32 %v2240_v42, %v1256_v6  ;;  %v2241_v13 = vpop.f32.mrb[14].mxu1 }
 0x2aa   :  { %v2242_v26 = vpop.f32.mrb[15].mxu1 }
 0x2ab   :  { %v2243_v24 = vadd.f32 %v2242_v26, %v2241_v13 }
 0x2ad   :  { %v1524_v55 = vadd.f32 %v2243_v24, %v1271_v18 }
 0x2bd   :  { %v2276_v12 = vpop.f32.mrb[16].mxu1 }
 0x2be   :  { %v2277_v10 = vpop.f32.mrb[17].mxu1 }
 0x2bf   :  { %v2278_v19 = vadd.f32 %v2277_v10, %v2276_v12 }
 0x2c1   :  { %v1662_v35 = vadd.f32 %v2278_v19, %v1503_v63  ;;  %v2279_v44 = vpop.f32.mrb[18].mxu1 }
 0x2c2   :  { %v2280_v31 = vpop.f32.mrb[19].mxu1 }
 0x2c3   :  { %v2281_v60 = vadd.f32 %v2280_v31, %v2279_v44 }
 0x2c5   :  { %v1671_v2 = vadd.f32 %v2281_v60, %v1510_v49  ;;  %v2282_v58 = vpop.f32.mrb[20].mxu1 }
 0x2c6   :  { %v2283_v59 = vpop.f32.mrb[21].mxu1 }
 0x2c7   :  { %v2284_v15 = vadd.f32 %v2283_v59, %v2282_v58 }
 0x2c9   :  { %v1680_v17 = vadd.f32 %v2284_v15, %v1517_v50  ;;  %v2285_v36 = vpop.f32.mrb[22].mxu1 }
 0x2ca   :  { %v2286_v41 = vpop.f32.mrb[23].mxu1 }
 0x2cb   :  { %v2287_v3 = vadd.f32 %v2286_v41, %v2285_v36 }
 0x2cd   :  { %v1689_v34 = vadd.f32 %v2287_v3, %v1524_v55 }
 0x2dd   :  { %v2320_v38 = vpop.f32.mrb[24].mxu1 }
 0x2de   :  { %v2321_v61 = vpop.f32.mrb[25].mxu1 }
 0x2df   :  { %v2322_v56 = vadd.f32 %v2321_v61, %v2320_v38 }
 0x2e1   :  { %v1797_v22 = vadd.f32 %v2322_v56, %v1662_v35  ;;  %v2323_v0 = vpop.f32.mrb[26].mxu1 }
 0x2e2   :  { %v2324_v62 = vpop.f32.mrb[27].mxu1 }
 0x2e3   :  { %v2325_v11 = vadd.f32 %v2324_v62, %v2323_v0 }
 0x2e5   :  { %v1808_v23 = vadd.f32 %v2325_v11, %v1671_v2  ;;  %v2326_v48 = vpop.f32.mrb[28].mxu1 }
 0x2e6   :  { %v2327_v45 = vpop.f32.mrb[29].mxu1 }
 0x2e7   :  { %v2328_v32 = vadd.f32 %v2327_v45, %v2326_v48 }
 0x2e9   :  { %v1819_v27 = vadd.f32 %v2328_v32, %v1680_v17  ;;  %v2329_v4 = vpop.f32.mrb[30].mxu1 }
 0x2ea   :  { %v2330_v14 = vpop.f32.mrb[31].mxu1 }
 0x2eb   :  { %v2331_v25 = vadd.f32 %v2330_v14, %v2329_v4 }
 0x2ed   :  { %v1830_v16 = vadd.f32 %v2331_v25, %v1689_v34 }
 0x2fd   :  { %v2364_v8 = vpop.f32.mrb[32].mxu1 }
 0x2fe   :  { %v2365_v57 = vpop.f32.mrb[33].mxu1 }
 0x2ff   :  { %v2366_v29 = vadd.f32 %v2365_v57, %v2364_v8 }
 0x301   :  { %v1998_v28 = vadd.f32 %v2366_v29, %v1797_v22  ;;  %v2367_v47 = vpop.f32.mrb[34].mxu1 }
 0x302   :  { %v2368_v46 = vpop.f32.mrb[35].mxu1 }
 0x303   :  { %v2369_v54 = vadd.f32 %v2368_v46, %v2367_v47 }
 0x305   :  { %v2005_v20 = vadd.f32 %v2369_v54, %v1808_v23  ;;  %v2370_v37 = vpop.f32.mrb[36].mxu1 }
 0x306   :  { %v2371_v39 = vpop.f32.mrb[37].mxu1 }
 0x307   :  { %v2372_v33 = vadd.f32 %v2371_v39, %v2370_v37 }
 0x309   :  { %v2012_v9 = vadd.f32 %v2372_v33, %v1819_v27  ;;  %v2373_v5 = vpop.f32.mrb[38].mxu1 }
 0x30a   :  { %v2374_v40 = vpop.f32.mrb[39].mxu1 }
 0x30b   :  { %v2375_v7 = vadd.f32 %v2374_v40, %v2373_v5 }
 0x30d   :  { %v2019_v51 = vadd.f32 %v2375_v7, %v1830_v16 }
 0x31d   :  { %v2408_v63 = vpop.f32.mrb[40].mxu1 }
 0x31e   :  { %v2409_v21 = vpop.f32.mrb[41].mxu1 }
 0x31f   :  { %v2410_v1 = vadd.f32 %v2409_v21, %v2408_v63 }
 0x321   :  { %v2123_v43 = vadd.f32 %v2410_v1, %v1998_v28  ;;  %v2411_v30 = vpop.f32.mrb[42].mxu1 }
 0x322   :  { %v2412_v49 = vpop.f32.mrb[43].mxu1 }
 0x323   :  { %2147 = vst [vmem:[%s4188_s5] sm:$0xff] %v2123_v43  ;;  %v2413_v53 = vadd.f32 %v2412_v49, %v2411_v30 }
 0x325   :  { %v2130_v52 = vadd.f32 %v2413_v53, %v2005_v20  ;;  %v2414_v6 = vpop.f32.mrb[44].mxu1 }
 0x326   :  { %v2415_v42 = vpop.f32.mrb[45].mxu1 }
 0x327   :  { %2148 = vst [vmem:[%s4188_s5 + $0x8] sm:$0xff] %v2130_v52  ;;  %v2416_v50 = vadd.f32 %v2415_v42, %v2414_v6 }
 0x329   :  { %v2137_v13 = vadd.f32 %v2416_v50, %v2012_v9  ;;  %v2417_v26 = vpop.f32.mrb[46].mxu1 }
 0x32a   :  { %v2418_v18 = vpop.f32.mrb[47].mxu1 }
 0x32b   :  { %2149 = vst [vmem:[%s4188_s5 + $0x10] sm:$0xff] %v2137_v13  ;;  %v2419_v24 = vadd.f32 %v2418_v18, %v2417_v26 }
 0x32d   :  { %v2144_v55 = vadd.f32 %v2419_v24, %v2019_v51 }
 0x32f   :  { %2150 = vst [vmem:[%s4188_s5 + $0x18] sm:$0xff] %v2144_v55 }

// kernel: transformer_forward.45
= control target key start
LH: loop header
LB: loop body
LE: loop exit
PB: predicated region body
PF: predicated region fallthrough
CT: control target
= control target key end

     0   :  { %s1806_s0 = inlined_call_operand.vmem [shape: f32[32,128], index: 0, kind: input, shape index: {}]   ;;  %s1807_s1 = inlined_call_operand.vmem [shape: f32[128,128], index: 1, kind: input, shape index: {}]   ;;  %s1808_s2 = inlined_call_operand.vmem [shape: f32[1,128], index: 2, kind: input, shape index: {}]   ;;  %s1809_s3 = inlined_call_operand.hbm [shape: f32[32,128], index: 3, kind: output, shape index: {}]  }
   0x1   :  { %v19_v0 = vld [vmem:[%s1807_s1] sm:$0xff]  ;;  %v20_v1 = vld [vmem:[%s1807_s1 + $0x8] sm:$0xff]  ;;  %v21_v2 = vld [vmem:[%s1807_s1 + $0x10] sm:$0xff] }
   0x2   :  { %v43_v3 = vand.u32 4294901760, %v19_v0  ;;  %v46_v4 = vand.u32 4294901760, %v20_v1  ;;  %v22_v5 = vld [vmem:[%s1807_s1 + $0x18] sm:$0xff]  ;;  %v49_v6 = vand.u32 4294901760, %v21_v2  ;;  %v1462_v7 = vld [vmem:[%s1807_s1 + $0x20] sm:$0xff]  ;;  %v1467_v8 = vld [vmem:[%s1807_s1 + $0x28] sm:$0xff] }
   0x3   :  { %v52_v9 = vand.u32 4294901760, %v22_v5  ;;  %v55_v11 = vand.u32 4294901760, %v1462_v7  ;;  %v58_v12 = vand.u32 4294901760, %v1467_v8  ;;  %v1478_v14 = vld [vmem:[%s1807_s1 + $0x30] sm:$0xff]  ;;  %v1483_v15 = vld [vmem:[%s1807_s1 + $0x38] sm:$0xff]  ;;  %v15_v16 = vld [vmem:[%s1806_s0] sm:$0xff] }
   0x4   :  { %v1469_v10 = vpack.c.bf16 %v46_v4, %v43_v3  ;;  %v1492_v17 = vand.u32 4294901760, %v15_v16  ;;  %v61_v19 = vand.u32 4294901760, %v1478_v14  ;;  %v64_v20 = vand.u32 4294901760, %v1483_v15 }
   0x5   :  { %v1473_v13 = vpack.c.bf16 %v52_v9, %v49_v6  ;;  %v1500_v18 = vpack.c.bf16 %v58_v12, %v55_v11 }
   0x6   :  { %1182 = vmatprep.subr.bf16.mxu1 %v1469_v10  ;;  %1278 = vmatprep.subr.bf16.mxu0 %v1469_v10 }
   0x7   :  { %1184 = vmatpush3.bf16.msra.mxu1 %v1469_v10  ;;  %1280 = vmatpush3.bf16.msra.mxu0 %v1469_v10 }
   0x8   :  { %1186 = vmatprep.subr.bf16.mxu1 %v1473_v13  ;;  %1282 = vmatprep.subr.bf16.mxu0 %v1473_v13 }
   0x9   :  { %8 = vsyncpa [#allocation3], 0  ;;  %v1507_v21 = vld [vmem:[%s1807_s1 + $0x40] sm:$0xff]  ;;  %v1512_v22 = vld [vmem:[%s1807_s1 + $0x48] sm:$0xff]  ;;  %v1515_v23 = vsub.f32 %v15_v16, %v1492_v17  ;;  %v1526_v25 = vpack.c.bf16 %v64_v20, %v61_v19  ;;  %v1566_v38 = vsub.f32 %v19_v0, %v43_v3  ;;  %v1568_v39 = vsub.f32 %v20_v1, %v46_v4  ;;  %s1424_s25 = smov [#allocation2]  }
   0xa   :  { %v67_v26 = vand.u32 4294901760, %v1507_v21  ;;  %v70_v27 = vand.u32 4294901760, %v1512_v22  ;;  %v1533_v28 = vld [vmem:[%s1807_s1 + $0x50] sm:$0xff]  ;;  %v1538_v29 = vld [vmem:[%s1807_s1 + $0x58] sm:$0xff]  ;;  %v16_v33 = vld [vmem:[%s1806_s0 + $0x8] sm:$0xff]  ;;  %v1577_v42 = vsub.f32 %v21_v2, %v49_v6  ;;  %v1579_v43 = vsub.f32 %v22_v5, %v52_v9  ;;  %s821_s26 = sshll.u32 %s1424_s25, 4  ;;  %s822_s26 = int_to_ptr.vmem [resolvable:$true] %s821_s26 }
   0xb   :  { %1188 = vmatpush3.bf16.msra.mxu1 %v1473_v13  ;;  %1284 = vmatpush3.bf16.msra.mxu0 %v1473_v13  ;;  %v125_v24 = vand.u32 4294901760, %v1515_v23  ;;  %v73_v31 = vand.u32 4294901760, %v1533_v28  ;;  %v76_v35 = vand.u32 4294901760, %v1538_v29  ;;  %v1559_v36 = vld [vmem:[%s1807_s1 + $0x60] sm:$0xff]  ;;  %v1564_v37 = vld [vmem:[%s1807_s1 + $0x68] sm:$0xff]  ;;  %v1573_v40 = vld [vmem:[%s1807_s1 + $0x70] sm:$0xff]  ;;  %v1621_v57 = vsub.f32 %v1462_v7, %v55_v11  ;;  %p1405_p1 = scmp.lt.s32.totalorder %s822_s26, %s822_s26 }
   0xc   :  { %1190 = vmatprep.subr.bf16.mxu1 %v1500_v18  ;;  %1286 = vmatprep.subr.bf16.mxu0 %v1500_v18  ;;  %v1553_v34 = vpack.c.bf16 %v70_v27, %v67_v26  ;;  %v1575_v41 = vand.u32 4294901760, %v16_v33  ;;  %v79_v44 = vand.u32 4294901760, %v1559_v36  ;;  %v82_v45 = vand.u32 4294901760, %v1564_v37  ;;  %v1588_v46 = vld [vmem:[%s1807_s1 + $0x78] sm:$0xff]  ;;  %v17_v55 = vld [vmem:[%s1806_s0 + $0x10] sm:$0xff] }
   0xd   :  { %v126_v30 = vsub.f32 %v1515_v23, %v125_v24  ;;  %1099 = vmatprep.mubr.f32.mxu0 %v125_v24  ;;  %v1596_v47 = vpack.c.bf16 %v76_v35, %v73_v31  ;;  %v166_v48 = vand.u32 4294901760, %v1566_v38  ;;  %v173_v49 = vand.u32 4294901760, %v1568_v39  ;;  %v18_v62 = vld [vmem:[%s1806_s0 + $0x18] sm:$0xff] }
   0xe   :  { %v1811_v50 = vand.u32 4294901760, %v1573_v40  ;;  %v1810_v51 = vand.u32 4294901760, %v1588_v46  ;;  %v1603_v52 = vsub.f32 %v16_v33, %v1575_v41  ;;  %v180_v53 = vand.u32 4294901760, %v1577_v42 }
   0xf   :  { %1192 = vmatpush3.bf16.msra.mxu1 %v1500_v18  ;;  %1288 = vmatpush3.bf16.msra.mxu0 %v1500_v18  ;;  %v127_v32 = vand.u32 4294901760, %v126_v30  ;;  %v187_v54 = vand.u32 4294901760, %v1579_v43  ;;  %v1616_v56 = vpack.c.bf16 %v82_v45, %v79_v44  ;;  %v167_v58 = vsub.f32 %v1566_v38, %v166_v48 }
  0x10   :  { %1194 = vmatprep.subr.bf16.mxu1 %v1526_v25  ;;  %1290 = vmatprep.subr.bf16.mxu0 %v1526_v25  ;;  %v174_v59 = vsub.f32 %v1568_v39, %v173_v49  ;;  %v1630_v60 = vsub.f32 %v1467_v8, %v58_v12  ;;  %v1632_v61 = vand.u32 4294901760, %v17_v55  ;;  %v1641_v63 = vpack.c.bf16 %v1810_v51, %v1811_v50 }
  0x11   :  { %985 = vmatprep.mubr.f32.mxu1 %v127_v32  ;;  %v135_v0 = vand.u32 4294901760, %v1603_v52  ;;  %v181_v1 = vsub.f32 %v1577_v42, %v180_v53  ;;  %v188_v2 = vsub.f32 %v1579_v43, %v187_v54  ;;  %v194_v3 = vand.u32 4294901760, %v1621_v57 }
  0x12   :  { %v1652_v4 = vsub.f32 %v1478_v14, %v61_v19  ;;  %v1657_v5 = vsub.f32 %v1483_v15, %v64_v20  ;;  %v1660_v6 = vsub.f32 %v17_v55, %v1632_v61  ;;  %v168_v7 = vand.u32 4294901760, %v167_v58 }
  0x13   :  { %1196 = vmatpush3.bf16.msra.mxu1 %v1526_v25  ;;  %1292 = vmatpush3.bf16.msra.mxu0 %v1526_v25  ;;  %v175_v8 = vand.u32 4294901760, %v174_v59  ;;  %v201_v9 = vand.u32 4294901760, %v1630_v60  ;;  %v1665_v11 = vand.u32 4294901760, %v18_v62  ;;  %v1309_v12 = vpack.c.bf16 %v173_v49, %v166_v48 }
  0x14   :  { %1198 = vmatprep.subr.bf16.mxu1 %v1553_v34  ;;  %1294 = vmatprep.subr.bf16.mxu0 %v1553_v34  ;;  %v145_v14 = vand.u32 4294901760, %v1660_v6  ;;  %v136_v16 = vsub.f32 %v1603_v52, %v135_v0  ;;  %v182_v15 = vand.u32 4294901760, %v181_v1  ;;  %v1672_v19 = vsub.f32 %v1507_v21, %v67_v26 }
  0x15   :  { %v1675_v20 = vsub.f32 %v18_v62, %v1665_v11  ;;  %v189_v24 = vand.u32 4294901760, %v188_v2  ;;  %v195_v30 = vsub.f32 %v1621_v57, %v194_v3  ;;  %v208_v32 = vand.u32 4294901760, %v1652_v4 }
  0x16   :  { %v215_v33 = vand.u32 4294901760, %v1657_v5  ;;  %v1213_v21 = vpack.c.bf16 %v175_v8, %v168_v7  ;;  %v202_v26 = vsub.f32 %v1630_v60, %v201_v9  ;;  %v1688_v48 = vsub.f32 %v1512_v22, %v70_v27 }
  0x17   :  { %1200 = vmatpush3.bf16.msra.mxu1 %v1553_v34  ;;  %1296 = vmatpush3.bf16.msra.mxu0 %v1553_v34  ;;  %v155_v49 = vand.u32 4294901760, %v1675_v20  ;;  %v1313_v55 = vpack.c.bf16 %v187_v54, %v180_v53  ;;  %v146_v58 = vsub.f32 %v1660_v6, %v145_v14  ;;  %v137_v59 = vand.u32 4294901760, %v136_v16 }
  0x18   :  { %1202 = vmatprep.subr.bf16.mxu1 %v1596_v47  ;;  %1298 = vmatprep.subr.bf16.mxu0 %v1596_v47  ;;  %v222_v62 = vand.u32 4294901760, %v1672_v19  ;;  %v1696_v1 = vsub.f32 %v1533_v28, %v73_v31  ;;  %v209_v22 = vsub.f32 %v1652_v4, %v208_v32  ;;  %v216_v27 = vsub.f32 %v1657_v5, %v215_v33 }
  0x19   :  { %v156_v2 = vsub.f32 %v1675_v20, %v155_v49  ;;  %v1706_v53 = vsub.f32 %v1538_v29, %v76_v35  ;;  %v1217_v54 = vpack.c.bf16 %v189_v24, %v182_v15  ;;  %v196_v28 = vand.u32 4294901760, %v195_v30 }
  0x1a   :  { %v203_v31 = vand.u32 4294901760, %v202_v26  ;;  %v229_v7 = vand.u32 4294901760, %v1688_v48  ;;  %v147_v8 = vand.u32 4294901760, %v146_v58  ;;  %v1317_v16 = vpack.c.bf16 %v201_v9, %v194_v3 }
  0x1b   :  { %1204 = vmatpush3.bf16.msra.mxu1 %v1596_v47  ;;  %1300 = vmatpush3.bf16.msra.mxu0 %v1596_v47  ;;  %v223_v51 = vsub.f32 %v1672_v19, %v222_v62  ;;  %v1713_v50 = vsub.f32 %v1559_v36, %v79_v44  ;;  %v157_v29 = vand.u32 4294901760, %v156_v2  ;;  %v210_v35 = vand.u32 4294901760, %v209_v22 }
  0x1c   :  { %1206 = vmatprep.subr.bf16.mxu1 %v1616_v56  ;;  %1302 = vmatprep.subr.bf16.mxu0 %v1616_v56  ;;  %v217_v15 = vand.u32 4294901760, %v216_v27  ;;  %v236_v24 = vand.u32 4294901760, %v1696_v1  ;;  %v243_v30 = vand.u32 4294901760, %v1706_v53  ;;  %v230_v3 = vsub.f32 %v1688_v48, %v229_v7 }
  0x1d   :  { %v1721_v9 = vsub.f32 %v1564_v37, %v82_v45  ;;  %v1321_v36 = vpack.c.bf16 %v215_v33, %v208_v32  ;;  %v224_v44 = vand.u32 4294901760, %v223_v51  ;;  %v250_v58 = vand.u32 4294901760, %v1713_v50 }
  0x1e   :  { %v244_v26 = vsub.f32 %v1706_v53, %v243_v30  ;;  %v1812_v45 = vand.u32 4294901760, %v1573_v40  ;;  %v1325_v33 = vpack.c.bf16 %v229_v7, %v222_v62 }
  0x1f   :  { %1208 = vmatpush3.bf16.msra.mxu1 %v1616_v56  ;;  %1304 = vmatpush3.bf16.msra.mxu0 %v1616_v56  ;;  %v257_v37 = vand.u32 4294901760, %v1721_v9  ;;  %v251_v2 = vsub.f32 %v1713_v50, %v250_v58 }
  0x20   :  { %1210 = vmatprep.subr.bf16.mxu1 %v1641_v63  ;;  %1306 = vmatprep.subr.bf16.mxu0 %v1641_v63  ;;  %v1730_v51 = vsub.f32 %v1573_v40, %v1812_v45 }
  0x21   :  { %v258_v22 = vsub.f32 %v1721_v9, %v257_v37  ;;  %v252_v62 = vand.u32 4294901760, %v251_v2 }
  0x22   :  { %v264_v27 = vand.u32 4294901760, %v1730_v51 }
  0x23   :  { %1212 = vmatpush3.bf16.msra.mxu1 %v1641_v63  ;;  %1308 = vmatpush3.bf16.msra.mxu0 %v1641_v63 }
  0x24   :  { %1214 = vmatprep.subr.bf16.mxu1 %v1213_v21  ;;  %1310 = vmatprep.subr.bf16.mxu0 %v1309_v12  ;;  %v265_v7 = vsub.f32 %v1730_v51, %v264_v27 }
  0x26   :  { %986 = vmatmul.mubr.f32.vlgmr.msra.gmra.mrb[0].mxu1 %v137_v59  ;;  %1100 = vmatmul.mubr.f32.vlgmr.msra.gmra.mrb[0].mxu0 %v135_v0  ;;  %v1221_v0 = vpack.c.bf16 %v203_v31, %v196_v28  ;;  %v231_v59 = vand.u32 4294901760, %v230_v3  ;;  %v1329_v28 = vpack.c.bf16 %v243_v30, %v236_v24  ;;  %v259_v31 = vand.u32 4294901760, %v258_v22 }
  0x27   :  { %1216 = vmatpush3.bf16.msra.mxu1 %v1213_v21  ;;  %1312 = vmatpush3.bf16.msra.mxu0 %v1309_v12  ;;  %v1225_v12 = vpack.c.bf16 %v217_v15, %v210_v35  ;;  %v237_v21 = vsub.f32 %v1696_v1, %v236_v24  ;;  %v266_v35 = vand.u32 4294901760, %v265_v7  ;;  %v1249_v3 = vpack.c.bf16 %v1579_v43, %v1577_v42 }
  0x28   :  { %1218 = vmatprep.subr.bf16.mxu1 %v1217_v54  ;;  %1314 = vmatprep.subr.bf16.mxu0 %v1313_v55  ;;  %v1229_v40 = vpack.c.bf16 %v231_v59, %v224_v44 }
  0x29   :  { %988 = vmatprep.mubr.f32.mxu1 %v147_v8  ;;  %1102 = vmatprep.mubr.f32.mxu0 %v145_v14  ;;  %v1813_v14 = vand.u32 4294901760, %v1588_v46 }
  0x2a   :  { %989 = vmatmul.mubr.f32.gmra.mrb[2].mxu1 %v157_v29  ;;  %1103 = vmatmul.mubr.f32.gmra.mrb[2].mxu0 %v155_v49  ;;  %v238_v49 = vand.u32 4294901760, %v237_v21  ;;  %v1333_v29 = vpack.c.bf16 %v257_v37, %v250_v58 }
  0x2b   :  { %1220 = vmatpush3.bf16.msra.mxu1 %v1217_v54  ;;  %1316 = vmatpush3.bf16.msra.mxu0 %v1313_v55  ;;  %v1735_v32 = vsub.f32 %v1588_v46, %v1813_v14  ;;  %v245_v55 = vand.u32 4294901760, %v244_v26 }
  0x2c   :  { %1222 = vmatprep.subr.bf16.mxu1 %v1221_v0  ;;  %1318 = vmatprep.subr.bf16.mxu0 %v1317_v16 }
  0x2d   :  { %1023 = vmatprep.mubr.f32.mxu1 %v1492_v17  ;;  %1137 = vmatprep.mubr.f32.mxu0 %v1492_v17  ;;  %v271_v46 = vand.u32 4294901760, %v1735_v32  ;;  %v1233_v54 = vpack.c.bf16 %v245_v55, %v238_v49 }
  0x2f   :  { %1224 = vmatpush3.bf16.msra.mxu1 %v1221_v0  ;;  %1320 = vmatpush3.bf16.msra.mxu0 %v1317_v16  ;;  %v272_v8 = vsub.f32 %v1735_v32, %v271_v46  ;;  %v1237_v16 = vpack.c.bf16 %v259_v31, %v252_v62  ;;  %v1337_v30 = vpack.c.bf16 %v271_v46, %v264_v27 }
  0x30   :  { %1226 = vmatprep.subr.bf16.mxu1 %v1225_v12  ;;  %1322 = vmatprep.subr.bf16.mxu0 %v1321_v36  ;;  %v1245_v0 = vpack.c.bf16 %v1568_v39, %v1566_v38  ;;  %v1253_v38 = vpack.c.bf16 %v1630_v60, %v1621_v57  ;;  %v1261_v39 = vpack.c.bf16 %v1688_v48, %v1672_v19 }
  0x31   :  { %v273_v15 = vand.u32 4294901760, %v272_v8 }
  0x33   :  { %1228 = vmatpush3.bf16.msra.mxu1 %v1225_v12  ;;  %1324 = vmatpush3.bf16.msra.mxu0 %v1321_v36  ;;  %v1241_v24 = vpack.c.bf16 %v273_v15, %v266_v35 }
  0x34   :  { %1230 = vmatprep.subr.bf16.mxu1 %v1229_v40  ;;  %1326 = vmatprep.subr.bf16.mxu0 %v1325_v33 }
  0x37   :  { %1232 = vmatpush3.bf16.msra.mxu1 %v1229_v40  ;;  %1328 = vmatpush3.bf16.msra.mxu0 %v1325_v33 }
  0x38   :  { %1234 = vmatprep.subr.bf16.mxu1 %v1233_v54  ;;  %1330 = vmatprep.subr.bf16.mxu0 %v1329_v28 }
  0x3b   :  { %1236 = vmatpush3.bf16.msra.mxu1 %v1233_v54  ;;  %1332 = vmatpush3.bf16.msra.mxu0 %v1329_v28 }
  0x3c   :  { %1238 = vmatprep.subr.bf16.mxu1 %v1237_v16  ;;  %1334 = vmatprep.subr.bf16.mxu0 %v1333_v29 }
  0x3f   :  { %1240 = vmatpush3.bf16.msra.mxu1 %v1237_v16  ;;  %1336 = vmatpush3.bf16.msra.mxu0 %v1333_v29 }
  0x40   :  { %1242 = vmatprep.subr.bf16.mxu1 %v1241_v24  ;;  %1338 = vmatprep.subr.bf16.mxu0 %v1337_v30 }
  0x43   :  { %1244 = vmatpush3.bf16.msra.mxu1 %v1241_v24  ;;  %1340 = vmatpush3.bf16.msra.mxu0 %v1337_v30 }
  0x44   :  { %1246 = vmatprep.subr.bf16.mxu1 %v1245_v0  ;;  %1342 = vmatprep.subr.bf16.mxu0 %v1469_v10 }
  0x46   :  { %1024 = vmatmul.mubr.f32.vlgmr.msra.gmra.mrb[0].mxu1 %v1575_v41  ;;  %1138 = vmatmul.mubr.f32.vlgmr.msra.gmra.mrb[0].mxu0 %v1575_v41 }
  0x47   :  { %1248 = vmatpush3.bf16.msra.mxu1 %v1245_v0  ;;  %1344 = vmatpush3.bf16.msra.mxu0 %v1469_v10  ;;  %v1257_v10 = vpack.c.bf16 %v1657_v5, %v1652_v4 }
  0x48   :  { %1250 = vmatprep.subr.bf16.mxu1 %v1249_v3  ;;  %1346 = vmatprep.subr.bf16.mxu0 %v1473_v13 }
  0x49   :  { %1026 = vmatprep.mubr.f32.mxu1 %v1632_v61  ;;  %1140 = vmatprep.mubr.f32.mxu0 %v1632_v61 }
  0x4a   :  { %1027 = vmatmul.mubr.f32.gmra.mrb[2].mxu1 %v1665_v11  ;;  %1141 = vmatmul.mubr.f32.gmra.mrb[2].mxu0 %v1665_v11 }
  0x4b   :  { %1252 = vmatpush3.bf16.msra.mxu1 %v1249_v3  ;;  %1348 = vmatpush3.bf16.msra.mxu0 %v1473_v13  ;;  %v1265_v13 = vpack.c.bf16 %v1706_v53, %v1696_v1 }
  0x4c   :  { %1254 = vmatprep.subr.bf16.mxu1 %v1253_v38  ;;  %1350 = vmatprep.subr.bf16.mxu0 %v1500_v18 }
  0x4d   :  { %1061 = vmatprep.mubr.f32.mxu1 %v1515_v23  ;;  %1175 = vmatprep.mubr.f32.mxu0 %v1492_v17  ;;  %v1269_v17 = vpack.c.bf16 %v1721_v9, %v1713_v50  ;;  %v832_v23 = vld [vmem:[%s1808_s2] ss:$0 sm:$0xff]  ;;  %s1400_s2 = scalar_lea.vmem %s822_s26, 512 }
  0x4e   :  { %p1401_p0 = scmp.ne.s32.totalorder %s822_s26, %s1400_s2  ;;  %p1406_p2 = scmp.lt.s32.totalorder %s1400_s2, %s1400_s2 }
  0x4f   :  { %1256 = vmatpush3.bf16.msra.mxu1 %v1253_v38  ;;  %1352 = vmatpush3.bf16.msra.mxu0 %v1500_v18  ;;  %v1273_v18 = vpack.c.bf16 %v1735_v32, %v1730_v51 }
  0x50   :  { %1258 = vmatprep.subr.bf16.mxu1 %v1257_v10  ;;  %1354 = vmatprep.subr.bf16.mxu0 %v1526_v25  ;;  %p1407_p3 = por %p1406_p2, %p1405_p1 }
  0x52   :  { %p1408_p4 = pnand %p1407_p3, %p1401_p0 }
  0x53   :  { %1260 = vmatpush3.bf16.msra.mxu1 %v1257_v10  ;;  %1356 = vmatpush3.bf16.msra.mxu0 %v1526_v25 }
  0x54   :  { %1262 = vmatprep.subr.bf16.mxu1 %v1261_v39  ;;  %1358 = vmatprep.subr.bf16.mxu0 %v1553_v34 }
  0x57   :  { %1264 = vmatpush3.bf16.msra.mxu1 %v1261_v39  ;;  %1360 = vmatpush3.bf16.msra.mxu0 %v1553_v34 }
  0x58   :  { %1266 = vmatprep.subr.bf16.mxu1 %v1265_v13  ;;  %1362 = vmatprep.subr.bf16.mxu0 %v1596_v47 }
  0x5b   :  { %1268 = vmatpush3.bf16.msra.mxu1 %v1265_v13  ;;  %1364 = vmatpush3.bf16.msra.mxu0 %v1596_v47 }
  0x5c   :  { %1270 = vmatprep.subr.bf16.mxu1 %v1269_v17  ;;  %1366 = vmatprep.subr.bf16.mxu0 %v1616_v56 }
  0x5f   :  { %1272 = vmatpush3.bf16.msra.mxu1 %v1269_v17  ;;  %1368 = vmatpush3.bf16.msra.mxu0 %v1616_v56 }
  0x60   :  { %1274 = vmatprep.subr.bf16.mxu1 %v1273_v18  ;;  %1370 = vmatprep.subr.bf16.mxu0 %v1641_v63 }
  0x63   :  { %1276 = vmatpush3.bf16.msra.mxu1 %v1273_v18  ;;  %1372 = vmatpush3.bf16.msra.mxu0 %v1641_v63 }
  0x66   :  { %1062 = vmatmul.mubr.f32.vlgmr.msra.gmra.mrb[0].mxu1 %v1603_v52  ;;  %1176 = vmatmul.mubr.f32.vlgmr.msra.gmra.mrb[0].mxu0 %v1575_v41 }
  0x67   :  { %1064 = vmatprep.mubr.f32.mxu1 %v1660_v6  ;;  %1178 = vmatprep.mubr.f32.mxu0 %v1632_v61 }
  0x6a   :  { %1065 = vmatmul.mubr.f32.gmra.mrb[2].mxu1 %v1675_v20  ;;  %1179 = vmatmul.mubr.f32.gmra.mrb[2].mxu0 %v1665_v11 }
 0x139   :  { %v1063_v25 = vpop.f32.mrb[0].mxu1  ;;  %v1177_v34 = vpop.f32.mrb[0].mxu0 }
 0x13a   :  { %v1373_v42 = vadd.f32 %v1063_v25, %v832_v23  ;;  %v432_v43 = vpop.f32.mrb[1].mxu1  ;;  %v790_v47 = vpop.f32.mrb[1].mxu0 }
 0x13b   :  { %v1375_v50 = vadd.f32 %v832_v23, %v432_v43 }
 0x13c   :  { %v1374_v52 = vadd.f32 %v1373_v42, %v1177_v34 }
 0x13d   :  { %v1376_v41 = vadd.f32 %v1375_v50, %v790_v47  ;;  %v1066_v56 = vpop.f32.mrb[2].mxu1  ;;  %v1180_v57 = vpop.f32.mrb[2].mxu0 }
 0x13e   :  { %813 = vst [vmem:[#allocation2 + $0x8] sm:$0xff] %v1374_v52  ;;  %v1377_v60 = vadd.f32 %v1066_v56, %v832_v23  ;;  %v446_v61 = vpop.f32.mrb[3].mxu1  ;;  %v802_v63 = vpop.f32.mrb[3].mxu0 }
 0x13f   :  { %812 = vst [vmem:[#allocation2] sm:$0xff] %v1376_v41  ;;  %v1379_v4 = vadd.f32 %v832_v23, %v446_v61 }
 0x140   :  { %v1378_v5 = vadd.f32 %v1377_v60, %v1180_v57 }
 0x141   :  { %v1380_v6 = vadd.f32 %v1379_v4, %v802_v63 }
 0x142   :  { %815 = vst [vmem:[#allocation2 + $0x18] sm:$0xff] %v1378_v5 }
 0x143   :  { %814 = vst [vmem:[#allocation2 + $0x10] sm:$0xff] %v1380_v6 }
 0x144   :  { %1411 = shalt.err (!%p1408_p4)
}
 0x145   :  { %s1412_s29 = scalar_lea.hbm %s1809_s3, 512 }
 0x146   :  { %p1413_p5 = scmp.ne.s32.totalorder %s1809_s3, %s1412_s29  ;;  %p1416_p6 = scmp.lt.u32.totalorder %s1412_s29, %s1809_s3 }
 0x148   :  { %p1418_p7 = pnand %p1416_p6, %p1413_p5 }
 0x14a   :  { %1421 = shalt.err (!%p1418_p7)
}
 0x14b   :  { %s1425_s7 = smov 128   ;;  %s1426_s8 = smov 8  }
 0x14c   :  { %827 = dma.vmem_to_hbm [thread:$0]  %s822_s26, 512, %s1809_s3, [#allocation3], %s1425_s7, %s1425_s7, %s1426_s8  }
 0x14d   :  { %1422 = dma.done.wait [#allocation3], 512  }
 0x14e   :  { %1423 = vsyncadd [#allocation3], 4294966784 }
 0x14f   :  { %831 = vsyncpa [#allocation3], 1 }

// kernel: transformer_forward.24
= control target key start
LH: loop header
LB: loop body
LE: loop exit
PB: predicated region body
PF: predicated region fallthrough
CT: control target
= control target key end

     0   :  { %16 = vsyncpa [#allocation3], 0  ;;  %s14011_s0 = inlined_call_operand.vmem [shape: f32[2,16,128], index: 0, kind: input, shape index: {}, may-alias: {0,1}]   ;;  %s14012_s1 = inlined_call_operand.vmem [shape: f32[2,16,128], index: 1, kind: input, shape index: {}, may-alias: {0,1}]   ;;  %s14013_s2 = inlined_call_operand.vmem [shape: f32[128,128], index: 2, kind: input, shape index: {}]   ;;  %s14014_s3 = inlined_call_operand.hbm [shape: f32[1,128], index: 3, kind: input, shape index: {}]   ;;  %s14015_s4 = inlined_call_operand.vmem [shape: f32[128,128], index: 4, kind: input, shape index: {}]   ;;  %s14016_s5 = inlined_call_operand.hbm [shape: f32[1,128], index: 5, kind: input, shape index: {}]   ;;  %s14017_s6 = inlined_call_operand.vmem [shape: f32[128,128], index: 6, kind: input, shape index: {}]   ;;  %s14018_s7 = inlined_call_operand.hbm [shape: f32[1,128], index: 7, kind: input, shape index: {}]   ;;  %s14019_s8 = inlined_call_operand.vmem [shape: f32[128,128], index: 8, kind: input, shape index: {}]   ;;  %s14020_s9 = inlined_call_operand.hbm [shape: f32[1,128], index: 9, kind: input, shape index: {}]   ;;  %s14021_s10 = inlined_call_operand.vmem [shape: s32[2,16,16], index: 10, kind: input, shape index: {}]   ;;  %s14022_s11 = inlined_call_operand.vmem [shape: f32[2,16,128], index: 11, kind: output, shape index: {}]  }
   0x1   :  { %17 = vsyncpa [#allocation5], 0 }
   0x2   :  { %18 = vsyncpa [#allocation8], 0  ;;  %s12446_s17 = smov 0  }
   0x3 LB: > { %s12452_s18 = sadd.s32 4294967295, %s12377_s17   ;;  %p9122_p0 = scmp.ge.s32.totalorder %s12377_s17, 1  ;;  %s12377_s17 = sphi %s12446_s17, %s24_s17  }
   0x4   : > { %p301_p1 = scmp.lt.s32.totalorder %s12377_s17, 3  ;;  %p14023_p2 = scmp.eq.s32.totalorder %s12452_s18, 0 }
   0x5   : > { %s12379_s19 = smov [#allocation4]   ;;  %s12380_s22 = smov [#allocation2]  }
   0x6   : > { %s331_s20 = sshll.u32 %s12379_s19, 4  ;;  %p12457_p3 = pnand %p9122_p0, %p301_p1  ;;  %s332_s20 = int_to_ptr.vmem [resolvable:$true] %s331_s20 }
   0x7   : > { %s317_s23 = sshll.u32 %s12380_s22, 4  ;;  %s12381_s24 = smov [#allocation6]   ;;  %s12469_s23 = int_to_ptr.vmem [resolvable:$true] %s317_s23 }
   0x8   : > { %s14094_s21 = scalar_select %p12457_p3, 1, 0 }
   0x9   : > { %p12179_p4 = pneg %p12457_p3  ;;  %s345_s25 = sshll.u32 %s12381_s24, 4  ;;  %s12471_s25 = int_to_ptr.vmem [resolvable:$true] %s345_s25 }
   0xa   : > { %s12382_s27 = smov [#allocation7]   ;;  %s12247_s12 = scalar_lea.hbm %s14016_s5, 16 }
   0xb   : > { %p12465_p5 = pnand %p14023_p2, %p12179_p4  ;;  %s359_s28 = sshll.u32 %s12382_s27, 4  ;;  %s12473_s28 = int_to_ptr.vmem [resolvable:$true] %s359_s28 }
   0xc   : > { %p12248_p6 = scmp.ne.s32.totalorder %s14016_s5, %s12247_s12  ;;  %p12254_p10 = scmp.lt.u32.totalorder %s12247_s12, %s14016_s5 }
   0xd   : > { %p12483_p7 = pneg %p12465_p5 }
   0xf   : > { %p12250_p8 = pnand %p12483_p7, %p12248_p6 }
  0x11   : > { %p12251_p9 = pneg %p12250_p8 }
  0x13   : > { %p12256_p11 = pnand %p12254_p10, %p12251_p9 }
  0x15   : > { %12259 = shalt.err (!%p12256_p11)
}
  0x16   : > { %s12260_s22 = scalar_lea.vmem %s332_s20, 16  ;;  %s12267_s24 = scalar_lea.vmem %s332_s20, 32 }
  0x17   : > { %p12261_p12 = scmp.ne.s32.totalorder %s332_s20, %s12260_s22  ;;  %p12268_p1 = scmp.lt.s32.totalorder %s332_s20, %s332_s20 }
  0x18   : > { %p12269_p4 = scmp.lt.s32.totalorder %s12267_s24, %s12260_s22 }
  0x19   : > { %p12263_p13 = pnand %p12261_p12, %p12483_p7 }
  0x1a   : > { %p12270_p2 = por %p12269_p4, %p12268_p1 }
  0x1b   : > { %p12264_p0 = pneg %p12263_p13 }
  0x1d   : > { %p12271_p3 = pnand %p12270_p2, %p12264_p0 }
  0x1f   : > { %12274 = shalt.err (!%p12271_p3)
}
  0x20   : > { %12185 = dma.hbm_to_vmem [thread:$0]  (!%p12465_p5), %s14016_s5, 16, %s332_s20, [#allocation5]  }
  0x21   : > { %s12275_s13 = scalar_lea.hbm %s14014_s3, 16 }
  0x22   : > { %p12276_p6 = scmp.ne.s32.totalorder %s14014_s3, %s12275_s13  ;;  %p12282_p2 = scmp.lt.u32.totalorder %s12275_s13, %s14014_s3 }
  0x24   : > { %p12278_p8 = pnand %p12276_p6, %p12483_p7 }
  0x26   : > { %p12279_p9 = pneg %p12278_p8 }
  0x28   : > { %p12284_p3 = pnand %p12282_p2, %p12279_p9 }
  0x2a   : > { %12287 = shalt.err (!%p12284_p3)
}
  0x2b   : > { %s12288_s20 = scalar_lea.vmem %s12469_s23, 16  ;;  %s12295_s24 = scalar_lea.vmem %s12469_s23, 32 }
  0x2c   : > { %p12289_p10 = scmp.ne.s32.totalorder %s12469_s23, %s12288_s20  ;;  %p12296_p13 = scmp.lt.s32.totalorder %s12469_s23, %s12469_s23 }
  0x2d   : > { %p12297_p0 = scmp.lt.s32.totalorder %s12295_s24, %s12288_s20 }
  0x2e   : > { %p12291_p11 = pnand %p12289_p10, %p12483_p7 }
  0x2f   : > { %p12298_p1 = por %p12297_p0, %p12296_p13 }
  0x30   : > { %p12292_p12 = pneg %p12291_p11 }
  0x32   : > { %p12299_p4 = pnand %p12298_p1, %p12292_p12 }
  0x34   : > { %12302 = shalt.err (!%p12299_p4)
}
  0x35   : > { %12182 = dma.hbm_to_vmem [thread:$0]  (!%p12465_p5), %s14014_s3, 16, %s12469_s23, [#allocation3]  }
  0x36   : > { %s12303_s13 = scalar_lea.hbm %s14018_s7, 16 }
  0x37   : > { %p12304_p6 = scmp.ne.s32.totalorder %s14018_s7, %s12303_s13  ;;  %p12310_p2 = scmp.lt.u32.totalorder %s12303_s13, %s14018_s7 }
  0x39   : > { %p12306_p8 = pnand %p12304_p6, %p12483_p7 }
  0x3b   : > { %p12307_p9 = pneg %p12306_p8 }
  0x3d   : > { %p12312_p3 = pnand %p12310_p2, %p12307_p9 }
  0x3f   : > { %12315 = shalt.err (!%p12312_p3)
}
  0x40   : > { %s12316_s23 = scalar_lea.vmem %s12471_s25, 16  ;;  %s12323_s20 = scalar_lea.vmem %s12471_s25, 32 }
  0x41   : > { %p12317_p10 = scmp.ne.s32.totalorder %s12471_s25, %s12316_s23  ;;  %p12324_p13 = scmp.lt.s32.totalorder %s12471_s25, %s12471_s25 }
  0x42   : > { %p12325_p0 = scmp.lt.s32.totalorder %s12323_s20, %s12316_s23 }
  0x43   : > { %p12319_p11 = pnand %p12317_p10, %p12483_p7 }
  0x44   : > { %p12326_p1 = por %p12325_p0, %p12324_p13 }
  0x45   : > { %p12320_p12 = pneg %p12319_p11 }
  0x47   : > { %p12327_p4 = pnand %p12326_p1, %p12320_p12 }
  0x49   : > { %12330 = shalt.err (!%p12327_p4)
}
  0x4a   : > { %12188 = dma.hbm_to_vmem [thread:$0]  (!%p12465_p5), %s14018_s7, 16, %s12471_s25, [#allocation5]  }
  0x4b   : > { %s12331_s12 = scalar_lea.hbm %s14020_s9, 16 }
  0x4c   : > { %p12332_p6 = scmp.ne.s32.totalorder %s14020_s9, %s12331_s12  ;;  %p12338_p2 = scmp.lt.u32.totalorder %s12331_s12, %s14020_s9 }
  0x4e   : > { %p12334_p8 = pnand %p12332_p6, %p12483_p7 }
  0x50   : > { %p12335_p9 = pneg %p12334_p8 }
  0x52   : > { %p12340_p3 = pnand %p12338_p2, %p12335_p9 }
  0x54   : > { %12343 = shalt.err (!%p12340_p3)
}
  0x55   : > { %s12344_s25 = scalar_lea.vmem %s12473_s28, 16  ;;  %s12351_s22 = scalar_lea.vmem %s12473_s28, 32 }
  0x56   : > { %p12345_p10 = scmp.ne.s32.totalorder %s12473_s28, %s12344_s25  ;;  %p12352_p13 = scmp.lt.s32.totalorder %s12473_s28, %s12473_s28 }
  0x57   : > { %p12353_p0 = scmp.lt.s32.totalorder %s12351_s22, %s12344_s25 }
  0x58   : > { %p12347_p11 = pnand %p12345_p10, %p12483_p7 }
  0x59   : > { %p12354_p1 = por %p12353_p0, %p12352_p13 }
  0x5a   : > { %p12348_p12 = pneg %p12347_p11 }
  0x5c   : > { %p12355_p4 = pnand %p12354_p1, %p12348_p12 }
  0x5e   : > { %12358 = shalt.err (!%p12355_p4)
}
  0x5f   : > { %12191 = dma.hbm_to_vmem [thread:$0]  (!%p12465_p5), %s14020_s9, 16, %s12473_s28, [#allocation8]  }
  0x60   : > { %p14097_p6 = scmp.ne.s32.totalorder %s14094_s21, 0 }
  0x62   : > { %396 = sbr.rel (%p14097_p6) target bundleno = 3866 (0xf1a), region = 64 }
  0x69   : > { %p14098_p7 = scmp.eq.s32.totalorder %s12452_s18, 0 }
  0x6b   : > { %12364 = dma.done.wait (%p14098_p7), [#allocation3], 16   ;;  %p14099_p8 = pmov %p14098_p7 }
  0x6c   : > { %p14100_p9 = pmov %p14098_p7 }
  0x6d   : > { %12366 = vsyncadd (%p14099_p8), [#allocation3], 4294967280 }
  0x6e   : > { %12368 = dma.done.wait (%p14100_p9), [#allocation5], 32   ;;  %p14101_p2 = pmov %p14098_p7 }
  0x70   : > { %12370 = vsyncadd (%p14101_p2), [#allocation5], 4294967264  ;;  %p14102_p3 = pmov %p14101_p2 }
  0x71   : > { %p14103_p5 = pmov %p14101_p2 }
  0x72   : > { %12372 = dma.done.wait (%p14102_p3), [#allocation8], 16  }
  0x73   : > { %12374 = vsyncadd (%p14103_p5), [#allocation8], 4294967280  ;;  %v12588_v0 = vld [vmem:[%s14013_s2] sm:$0xff]  ;;  %v12593_v1 = vld [vmem:[%s14013_s2 + $0x8] sm:$0xff]  ;;  %p458_p10 = scmp.lt.s32.totalorder %s12452_s18, 1  ;;  %vm2605_vm0 = vcmask 261120  }
  0x74   : > { %v12598_v2 = vld [vmem:[%s14013_s2 + $0x10] sm:$0xff]  ;;  %v508_v3 = vand.u32 4294901760, %v12588_v0  ;;  %v511_v4 = vand.u32 4294901760, %v12593_v1  ;;  %v12605_v5 = vld [vmem:[%s14013_s2 + $0x18] sm:$0xff]  ;;  %v12611_v7 = vld [vmem:[%s14013_s2 + $0x20] sm:$0xff]  ;;  %vm3126_vm2 = vcmask 130048  }
  0x75   : > { %v14049_v6 = vand.u32 4294901760, %v12598_v2  ;;  %v12616_v8 = vld [vmem:[%s14013_s2 + $0x28] sm:$0xff]  ;;  %v14047_v9 = vand.u32 4294901760, %v12605_v5  ;;  %v14042_v10 = vand.u32 4294901760, %v12611_v7  ;;  %v1191_v12 = vld [vmem:[%s14015_s4] sm:$0xff]  ;;  %v12630_v14 = vld [vmem:[%s14013_s2 + $0x30] sm:$0xff] }
  0x76   : > { %v14041_v11 = vand.u32 4294901760, %v12616_v8  ;;  %v1192_v13 = vld [vmem:[%s14015_s4 + $0x8] sm:$0xff]  ;;  %v12636_v15 = vpack.c.bf16 %v511_v4, %v508_v3  ;;  %v1215_v16 = vand.u32 4294901760, %v1191_v12  ;;  %v12641_v18 = vld [vmem:[%s14013_s2 + $0x38] sm:$0xff]  ;;  %v1193_v19 = vld [vmem:[%s14015_s4 + $0x10] sm:$0xff]  ;;  %v14037_v22 = vand.u32 4294901760, %v12630_v14 }
  0x77   : > { %v1218_v17 = vand.u32 4294901760, %v1192_v13  ;;  %v1194_v20 = vld [vmem:[%s14015_s4 + $0x18] sm:$0xff]  ;;  %v12653_v21 = vpack.c.bf16 %v14047_v9, %v14049_v6  ;;  %v14036_v23 = vand.u32 4294901760, %v12641_v18  ;;  %v1221_v24 = vand.u32 4294901760, %v1193_v19  ;;  %v12660_v25 = vld [vmem:[%s14013_s2 + $0x40] sm:$0xff]  ;;  %v12665_v26 = vld [vmem:[%s14013_s2 + $0x48] sm:$0xff] }
  0x78   : > { %14104 = vst [vmem:[#allocation12_spill] sm:$0xff] %v12636_v15  ;;  %11042 = vmatprep.subr.bf16.mxu0 %v12636_v15  ;;  %v12671_v28 = vsub.f32 %v1191_v12, %v1215_v16  ;;  %v1224_v30 = vand.u32 4294901760, %v1194_v20  ;;  %v1195_v31 = vld [vmem:[%s14015_s4 + $0x20] sm:$0xff]  ;;  %v1196_v32 = vld [vmem:[%s14015_s4 + $0x28] sm:$0xff]  ;;  %v12686_v33 = vpack.c.bf16 %v14041_v11, %v14042_v10  ;;  %v14035_v35 = vand.u32 4294901760, %v12660_v25  ;;  %v12709_v45 = vld [vmem:[%s14013_s2 + $0x50] sm:$0xff] }
  0x79   : > { %14105 = vst [vmem:[#allocation13_spill] sm:$0xff] %v12653_v21  ;;  %v12669_v27 = vpack.c.bf16 %v1218_v17, %v1215_v16  ;;  %v12673_v29 = vsub.f32 %v1192_v13, %v1218_v17  ;;  %11044 = vmatpush3.bf16.msra.mxu0 %v12636_v15  ;;  %v12688_v34 = vsub.f32 %v1193_v19, %v1221_v24  ;;  %v14034_v36 = vand.u32 4294901760, %v12665_v26  ;;  %s14177_s18 = smov (!%p458_p10, %s12452_s18), 1  ;;  %v1197_v50 = vld [vmem:[%s14015_s4 + $0x30] sm:$0xff]  ;;  %v12743_v55 = vld [vmem:[%s14013_s2 + $0x58] sm:$0xff]  ;;  %v12756_v61 = vld [vmem:[%s14013_s2 + $0x60] sm:$0xff] }
  0x7a   : > { %14106 = vst [vmem:[#allocation14_spill] sm:$0xff] %v12686_v33  ;;  %11046 = vmatprep.subr.bf16.mxu0 %v12653_v21  ;;  %v14030_v37 = vand.u32 4294901760, %v12671_v28  ;;  %v12695_v39 = vpack.c.bf16 %v1224_v30, %v1221_v24  ;;  %v12697_v40 = vsub.f32 %v1194_v20, %v1224_v30  ;;  %v12703_v41 = vpack.c.bf16 %v14036_v23, %v14037_v22  ;;  %v1198_v56 = vld [vmem:[%s14015_s4 + $0x38] sm:$0xff]  ;;  %v12763_v16 = vld [vmem:[%s14013_s2 + $0x68] sm:$0xff]  ;;  %s12765_s14 = sshll.u32 %s14177_s18, 4  ;;  %v1199_v30 = vld [vmem:[%s14015_s4 + $0x40] sm:$0xff] }
  0x7b   : > { %v14029_v38 = vand.u32 4294901760, %v12673_v29  ;;  %v14028_v42 = vand.u32 4294901760, %v12688_v34  ;;  %v1227_v43 = vand.u32 4294901760, %v1195_v31  ;;  %v1230_v44 = vand.u32 4294901760, %v1196_v32  ;;  %s12804_s15 = scalar_lea.vmem %s14011_s0, %s12765_s14  ;;  %s12832_s16 = scalar_lea.vmem %s14012_s1, %s12765_s14 }
  0x7c   : > { %14107 = vst [vmem:[#allocation15_spill] sm:$0xff] %v12703_v41  ;;  %v1319_v46 = vsub.f32 %v12671_v28, %v14030_v37  ;;  %v14027_v48 = vand.u32 4294901760, %v12697_v40  ;;  %v12725_v49 = vpack.c.bf16 %v14034_v36, %v14035_v35  ;;  %v14033_v60 = vand.u32 4294901760, %v12709_v45  ;;  %s472_s28 = scalar_lea.vmem %s14021_s10, %s12765_s14  ;;  %s12384_s24 = smov 64  }
  0x7d   : > { %v1326_v47 = vsub.f32 %v12673_v29, %v14029_v38  ;;  %11048 = vmatpush3.bf16.msra.mxu0 %v12653_v21  ;;  %v1333_v51 = vsub.f32 %v12688_v34, %v14028_v42  ;;  %v12734_v52 = vpack.c.bf16 %v1230_v44, %v1227_v43  ;;  %v12736_v53 = vsub.f32 %v1195_v31, %v1227_v43  ;;  %s12385_s27 = smov 32   ;;  %s477_s29 = scalar_lea.vmem %s14022_s11, %s12765_s14 }
  0x7e   : > { %14108 = vst [vmem:[#allocation16_spill] sm:$0xff] %v12725_v49  ;;  %v12738_v54 = vsub.f32 %v1196_v32, %v1230_v44  ;;  %11050 = vmatprep.subr.bf16.mxu0 %v12686_v33  ;;  %v1320_v57 = vand.u32 4294901760, %v1319_v46  ;;  %v1340_v59 = vsub.f32 %v12697_v40, %v14027_v48  ;;  %v1233_v13 = vand.u32 4294901760, %v1197_v50  ;;  %v1200_v46 = vld [vmem:[%s14015_s4 + $0x48] sm:$0xff] }
  0x7f   : > { %v1327_v58 = vand.u32 4294901760, %v1326_v47  ;;  %v1334_v62 = vand.u32 4294901760, %v1333_v51  ;;  %v14026_v63 = vand.u32 4294901760, %v12736_v53  ;;  %v14031_v20 = vand.u32 4294901760, %v12743_v55  ;;  %v12787_v47 = vld [vmem:[%s14013_s2 + $0x70] sm:$0xff] }
  0x80   : > { %v14025_v12 = vand.u32 4294901760, %v12738_v54  ;;  %v1341_v19 = vand.u32 4294901760, %v1340_v59  ;;  %v1236_v24 = vand.u32 4294901760, %v1198_v56  ;;  %v12778_v43 = vsub.f32 %v1197_v50, %v1233_v13  ;;  %v12798_v59 = vld [vmem:[%s14013_s2 + $0x78] sm:$0xff] }
  0x81   : > { %v11265_v17 = vpack.c.bf16 %v1327_v58, %v1320_v57  ;;  %11052 = vmatpush3.bf16.msra.mxu0 %v12686_v33  ;;  %v1347_v31 = vsub.f32 %v12736_v53, %v14026_v63  ;;  %v14040_v44 = vand.u32 4294901760, %v12756_v61  ;;  %v14039_v50 = vand.u32 4294901760, %v12763_v16  ;;  %v1202_v63 = vld [vmem:[%s14015_s4 + $0x58] sm:$0xff] }
  0x82   : > { %v1354_v32 = vsub.f32 %v12738_v54, %v14025_v12  ;;  %11054 = vmatprep.subr.bf16.mxu0 %v12703_v41  ;;  %v11269_v51 = vpack.c.bf16 %v1341_v19, %v1334_v62  ;;  %v12790_v57 = vpack.c.bf16 %v1236_v24, %v1233_v13  ;;  %v12792_v58 = vsub.f32 %v1198_v56, %v1236_v24  ;;  %v1201_v19 = vld [vmem:[%s14015_s4 + $0x50] sm:$0xff] }
  0x83   : > { %11266 = vmatprep.subr.bf16.mxu1 %v11265_v17  ;;  %v1348_v12 = vand.u32 4294901760, %v1347_v31  ;;  %v14032_v56 = vand.u32 4294901760, %v12778_v43  ;;  %v1239_v13 = vand.u32 4294901760, %v1199_v30  ;;  %v12814_v24 = vpack.c.bf16 %v14031_v20, %v14033_v60  ;;  %v478_v20 = vld [vmem:[%s12804_s15] sm:$0xff] }
  0x84   : > { %11268 = vmatpush3.bf16.msra.mxu1 %v11265_v17  ;;  %v1355_v62 = vand.u32 4294901760, %v1354_v32  ;;  %v14038_v17 = vand.u32 4294901760, %v12792_v58  ;;  %v1242_v31 = vand.u32 4294901760, %v1200_v46  ;;  %v14046_v32 = vand.u32 4294901760, %v12787_v47 }
  0x85   : > { %11270 = vmatprep.subr.bf16.mxu1 %v11269_v51  ;;  %14109 = vst [vmem:[#allocation17_spill] sm:$0xff] %v12814_v24  ;;  %11056 = vmatpush3.bf16.msra.mxu0 %v12703_v41  ;;  %v1361_v42 = vsub.f32 %v12778_v43, %v14032_v56  ;;  %v12825_v38 = vsub.f32 %v1199_v30, %v1239_v13  ;;  %v14044_v37 = vand.u32 4294901760, %v12798_v59  ;;  %v1245_v56 = vand.u32 4294901760, %v1201_v19 }
  0x86   : > { %v11273_v48 = vpack.c.bf16 %v1355_v62, %v1348_v12  ;;  %11058 = vmatprep.subr.bf16.mxu0 %v12725_v49  ;;  %v1368_v12 = vsub.f32 %v12792_v58, %v14038_v17  ;;  %v12839_v62 = vpack.c.bf16 %v1242_v31, %v1239_v13  ;;  %v12841_v30 = vsub.f32 %v1200_v46, %v1242_v31  ;;  %v479_v46 = vld [vmem:[%s12804_s15 + $0x8] sm:$0xff]  ;;  %v12855_v31 = vld [vmem:[%s12832_s16] sm:$0xff]  ;;  %s12383_s15 = smov 96  }
  0x87   : > { %v1362_v60 = vand.u32 4294901760, %v1361_v42  ;;  %v12847_v36 = vpack.c.bf16 %v14039_v50, %v14040_v44  ;;  %v14043_v35 = vand.u32 4294901760, %v12825_v38  ;;  %v1248_v23 = vand.u32 4294901760, %v1202_v63 }
  0x88   : > { %11272 = vmatpush3.bf16.msra.mxu1 %v11269_v51  ;;  %v1369_v22 = vand.u32 4294901760, %v1368_v12  ;;  %v14045_v17 = vand.u32 4294901760, %v12841_v30  ;;  %v12851_v13 = vsub.f32 %v1201_v19, %v1245_v56  ;;  %v12857_v51 = vand.u32 4294901760, %v478_v20 }
  0x89   : > { %14110 = vst [vmem:[#allocation18_spill] sm:$0xff] %v12847_v36  ;;  %11274 = vmatprep.subr.bf16.mxu1 %v11273_v48  ;;  %11060 = vmatpush3.bf16.msra.mxu0 %v12725_v49  ;;  %v1375_v42 = vsub.f32 %v12825_v38, %v14043_v35  ;;  %v12867_v12 = vpack.c.bf16 %v14044_v37, %v14046_v32  ;;  %v1203_v37 = vld [vmem:[%s14015_s4 + $0x60] sm:$0xff] }
  0x8a   : > { %14111 = vst [vmem:[#allocation19_spill] sm:$0xff] %v12857_v51  ;;  %v12869_v50 = vpack.c.bf16 %v1248_v23, %v1245_v56  ;;  %v12871_v19 = vsub.f32 %v1202_v63, %v1248_v23  ;;  %11062 = vmatprep.subr.bf16.mxu0 %v12814_v24  ;;  %v11277_v44 = vpack.c.bf16 %v1369_v22, %v1362_v60  ;;  %v14048_v10 = vand.u32 4294901760, %v12851_v13  ;;  %v1204_v23 = vld [vmem:[%s14015_s4 + $0x68] sm:$0xff] }
  0x8b   : > { %14112 = vst [vmem:[#allocation20_spill] sm:$0xff] %v12867_v12  ;;  %v1382_v11 = vsub.f32 %v12841_v30, %v14045_v17  ;;  %v12879_v35 = vsub.f32 %v478_v20, %v12857_v51  ;;  %v1376_v63 = vand.u32 4294901760, %v1375_v42  ;;  %v12888_v60 = vand.u32 4294901760, %v479_v46 }
  0x8c   : > { %14113 = vst [vmem:[#allocation21_spill] sm:$0xff] %v12869_v50  ;;  %11276 = vmatpush3.bf16.msra.mxu1 %v11273_v48  ;;  %v14052_v22 = vand.u32 4294901760, %v12871_v19  ;;  %v12891_v56 = vand.u32 4294901760, %v12855_v31  ;;  %v1389_v17 = vsub.f32 %v12851_v13, %v14048_v10  ;;  %v12900_v48 = vsub.f32 %v12588_v0, %v508_v3 }
  0x8d   : > { %11278 = vmatprep.subr.bf16.mxu1 %v11277_v44  ;;  %v1383_v20 = vand.u32 4294901760, %v1382_v11  ;;  %v14057_v32 = vand.u32 4294901760, %v12879_v35  ;;  %11064 = vmatpush3.bf16.msra.mxu0 %v12814_v24  ;;  %v12909_v11 = vsub.f32 %v12593_v1, %v511_v4  ;;  %v1251_v9 = vand.u32 4294901760, %v1203_v37 }
  0x8e   : > { %14114 = vst [vmem:[#allocation22_spill] sm:$0xff] %v12891_v56  ;;  %v1396_v42 = vsub.f32 %v12871_v19, %v14052_v22  ;;  %v1254_v10 = vand.u32 4294901760, %v1204_v23  ;;  %10088 = vmatprep.mubr.f32.mxu1 %v12891_v56  ;;  %11066 = vmatprep.subr.bf16.mxu0 %v12847_v36  ;;  %v1390_v0 = vand.u32 4294901760, %v1389_v17  ;;  %v14059_v24 = vand.u32 4294901760, %v12900_v48 }
  0x8f   : > { %v11281_v6 = vpack.c.bf16 %v1383_v20, %v1376_v63  ;;  %v591_v3 = vsub.f32 %v12879_v35, %v14057_v32  ;;  %v14058_v49 = vand.u32 4294901760, %v12909_v11  ;;  %v12920_v4 = vsub.f32 %v1203_v37, %v1251_v9 }
  0x90   : > { %11280 = vmatpush3.bf16.msra.mxu1 %v11277_v44  ;;  %v1397_v22 = vand.u32 4294901760, %v1396_v42  ;;  %v12918_v1 = vpack.c.bf16 %v1254_v10, %v1251_v9  ;;  %v612_v17 = vsub.f32 %v12900_v48, %v14059_v24  ;;  %v12925_v63 = vsub.f32 %v1204_v23, %v1254_v10  ;;  %v1205_v44 = vld [vmem:[%s14015_s4 + $0x70] sm:$0xff] }
  0x91   : > { %11282 = vmatprep.subr.bf16.mxu1 %v11281_v6  ;;  %v592_v41 = vand.u32 4294901760, %v591_v3  ;;  %v12928_v20 = vsub.f32 %v479_v46, %v12888_v60  ;;  %11068 = vmatpush3.bf16.msra.mxu0 %v12847_v36  ;;  %v619_v9 = vsub.f32 %v12909_v11, %v14058_v49  ;;  %v14062_v37 = vand.u32 4294901760, %v12920_v4  ;;  %v1206_v46 = vld [vmem:[%s14015_s4 + $0x78] sm:$0xff] }
  0x92   : > { %14115 = vst [vmem:[#allocation23_spill] sm:$0xff] %v12918_v1  ;;  %v11285_v42 = vpack.c.bf16 %v1397_v22, %v1390_v0  ;;  %v14117_v3 = vand.u32 4294901760, %v12598_v2  ;;  %11070 = vmatprep.subr.bf16.mxu0 %v12867_v12  ;;  %v613_v23 = vand.u32 4294901760, %v612_v17  ;;  %v14068_v22 = vand.u32 4294901760, %v12925_v63 }
  0x93   : > { %14116 = vst [vmem:[#allocation24_spill] sm:$0xff] %v12928_v20  ;;  %9843 = vmatprep.mubr.f32.mxu0 %v592_v41  ;;  %v14069_v0 = vand.u32 4294901760, %v12928_v20  ;;  %v14118_v32 = vand.u32 4294901760, %v12605_v5  ;;  %v1257_v36 = vand.u32 4294901760, %v1205_v44 }
  0x94   : > { %v12941_v10 = vsub.f32 %v12598_v2, %v14117_v3  ;;  %11284 = vmatpush3.bf16.msra.mxu1 %v11281_v6  ;;  %v620_v2 = vand.u32 4294901760, %v619_v9  ;;  %v1403_v3 = vsub.f32 %v12920_v4, %v14062_v37  ;;  %v1410_v41 = vsub.f32 %v12925_v63, %v14068_v22 }
  0x95   : > { %v12952_v49 = vsub.f32 %v12605_v5, %v14118_v32  ;;  %11286 = vmatprep.subr.bf16.mxu1 %v11285_v42  ;;  %v601_v17 = vsub.f32 %v12928_v20, %v14069_v0  ;;  %v1260_v6 = vand.u32 4294901760, %v1206_v46  ;;  %11072 = vmatpush3.bf16.msra.mxu0 %v12867_v12  ;;  %v12969_v33 = vsub.f32 %v1205_v44, %v1257_v36 }
  0x96   : > { %v14072_v24 = vand.u32 4294901760, %v12941_v10  ;;  %v11073_v32 = vpack.c.bf16 %v620_v2, %v613_v23  ;;  %v1404_v9 = vand.u32 4294901760, %v1403_v3  ;;  %v1411_v21 = vand.u32 4294901760, %v1410_v41 }
  0x97   : > { %v14078_v5 = vand.u32 4294901760, %v12952_v49  ;;  %v602_v1 = vand.u32 4294901760, %v601_v17  ;;  %v12974_v0 = vpack.c.bf16 %v1260_v6, %v1257_v36  ;;  %v14076_v23 = vand.u32 4294901760, %v12969_v33 }
  0x98   : > { %v626_v37 = vsub.f32 %v12941_v10, %v14072_v24  ;;  %11288 = vmatpush3.bf16.msra.mxu1 %v11285_v42  ;;  %11074 = vmatprep.subr.bf16.mxu0 %v11073_v32  ;;  %v12977_v2 = vsub.f32 %v1206_v46, %v1260_v6  ;;  %v14120_v3 = vand.u32 4294901760, %v12611_v7  ;;  %v11289_v41 = vpack.c.bf16 %v1411_v21, %v1404_v9 }
  0x99   : > { %v633_v22 = vsub.f32 %v12952_v49, %v14078_v5  ;;  %14119 = vst [vmem:[#allocation25_spill] sm:$0xff] %v12974_v0  ;;  %9844 = vmatmul.mubr.f32.vlgmr.msra.gmra.mrb[0].mxu0 %v602_v1  ;;  %v14121_v24 = vand.u32 4294901760, %v12616_v8  ;;  %v1417_v42 = vsub.f32 %v12969_v33, %v14076_v23 }
  0x9a   : > { %v627_v20 = vand.u32 4294901760, %v626_v37  ;;  %v12982_v44 = vsub.f32 %v12611_v7, %v14120_v3  ;;  %11076 = vmatpush3.bf16.msra.mxu0 %v11073_v32  ;;  %v14075_v37 = vand.u32 4294901760, %v12977_v2  ;;  %v14122_v7 = vand.u32 4294901760, %v12630_v14  ;;  %9878 = vmatprep.mubr.f32.mxu0 %v12857_v51 }
  0x9b   : > { %v634_v17 = vand.u32 4294901760, %v633_v22  ;;  %v12987_v36 = vsub.f32 %v12616_v8, %v14121_v24  ;;  %11290 = vmatprep.subr.bf16.mxu1 %v11289_v41  ;;  %v14123_v24 = vand.u32 4294901760, %v12641_v18  ;;  %v1418_v6 = vand.u32 4294901760, %v1417_v42 }
  0x9c   : > { %v14073_v46 = vand.u32 4294901760, %v12982_v44  ;;  %v12997_v21 = vsub.f32 %v12630_v14, %v14122_v7  ;;  %11292 = vmatpush3.bf16.msra.mxu1 %v11289_v41  ;;  %v1424_v32 = vsub.f32 %v12977_v2, %v14075_v37  ;;  %v14124_v3 = vand.u32 4294901760, %v12660_v25  ;;  %v13033_v37 = vld [vmem:[%s12832_s16 + $0x8] sm:$0xff] }
  0x9d   : > { %v11077_v1 = vpack.c.bf16 %v634_v17, %v627_v20  ;;  %v14074_v8 = vand.u32 4294901760, %v12987_v36  ;;  %v13004_v22 = vsub.f32 %v12641_v18, %v14123_v24  ;;  %v14125_v17 = vand.u32 4294901760, %v12665_v26 }
  0x9e   : > { %v640_v14 = vsub.f32 %v12982_v44, %v14073_v46  ;;  %v14077_v20 = vand.u32 4294901760, %v12997_v21  ;;  %v13020_v41 = vsub.f32 %v12660_v25, %v14124_v3  ;;  %v1425_v7 = vand.u32 4294901760, %v1424_v32 }
  0x9f   : > { %11078 = vmatprep.subr.bf16.mxu0 %v11077_v1  ;;  %v647_v9 = vsub.f32 %v12987_v36, %v14074_v8  ;;  %v14081_v18 = vand.u32 4294901760, %v13004_v22  ;;  %v13025_v42 = vsub.f32 %v12665_v26, %v14125_v17  ;;  %v11297_v46 = vpack.c.bf16 %v12673_v29, %v12671_v28 }
  0xa0   : > { %11080 = vmatpush3.bf16.msra.mxu0 %v11077_v1  ;;  %v641_v24 = vand.u32 4294901760, %v640_v14  ;;  %v654_v8 = vsub.f32 %v12997_v21, %v14077_v20  ;;  %v14083_v26 = vand.u32 4294901760, %v13020_v41  ;;  %v11293_v1 = vpack.c.bf16 %v1425_v7, %v1418_v6 }
  0xa1   : > { %v648_v23 = vand.u32 4294901760, %v647_v9  ;;  %v661_v25 = vsub.f32 %v13004_v22, %v14081_v18  ;;  %v14082_v32 = vand.u32 4294901760, %v13025_v42  ;;  %v14126_v3 = vand.u32 4294901760, %v12709_v45 }
  0xa2   : > { %v655_v14 = vand.u32 4294901760, %v654_v8  ;;  %v14127_v20 = vand.u32 4294901760, %v12743_v55  ;;  %v668_v18 = vsub.f32 %v13020_v41, %v14083_v26  ;;  %v13057_v6 = vand.u32 4294901760, %v13033_v37  ;;  %11294 = vmatprep.subr.bf16.mxu1 %v11293_v1 }
  0xa3   : > { %v13043_v17 = vsub.f32 %v12709_v45, %v14126_v3  ;;  %v11081_v9 = vpack.c.bf16 %v648_v23, %v641_v24  ;;  %v662_v51 = vand.u32 4294901760, %v661_v25  ;;  %v675_v8 = vsub.f32 %v13025_v42, %v14082_v32  ;;  %11296 = vmatpush3.bf16.msra.mxu1 %v11293_v1 }
  0xa4   : > { %v13048_v5 = vsub.f32 %v12743_v55, %v14127_v20  ;;  %v14128_v55 = vand.u32 4294901760, %v12756_v61  ;;  %v669_v24 = vand.u32 4294901760, %v668_v18  ;;  %v14129_v3 = vand.u32 4294901760, %v12763_v16  ;;  %11298 = vmatprep.subr.bf16.mxu1 %v11297_v46 }
  0xa5   : > { %v14085_v45 = vand.u32 4294901760, %v13043_v17  ;;  %11082 = vmatprep.subr.bf16.mxu0 %v11081_v9  ;;  %v11085_v20 = vpack.c.bf16 %v662_v51, %v655_v14  ;;  %v676_v25 = vand.u32 4294901760, %v675_v8  ;;  %v11301_v26 = vpack.c.bf16 %v12697_v40, %v12688_v34 }
  0xa6   : > { %v14084_v7 = vand.u32 4294901760, %v13048_v5  ;;  %v13064_v23 = vsub.f32 %v12756_v61, %v14128_v55  ;;  %v13069_v32 = vsub.f32 %v12763_v16, %v14129_v3  ;;  %11084 = vmatpush3.bf16.msra.mxu0 %v11081_v9  ;;  %v14130_v14 = vand.u32 4294901760, %v12787_v47  ;;  %10089 = vmatmul.mubr.f32.vlgmr.msra.gmra.mrb[0].mxu1 %v13057_v6 }
  0xa7   : > { %v682_v61 = vsub.f32 %v13043_v17, %v14085_v45  ;;  %11086 = vmatprep.subr.bf16.mxu0 %v11085_v20  ;;  %v11089_v1 = vpack.c.bf16 %v676_v25, %v669_v24  ;;  %v14131_v8 = vand.u32 4294901760, %v12798_v59  ;;  %11300 = vmatpush3.bf16.msra.mxu1 %v11297_v46  ;;  %v13102_v46 = vsub.f32 %v12855_v31, %v12891_v56 }
  0xa8   : > { %v689_v51 = vsub.f32 %v13048_v5, %v14084_v7  ;;  %v695_v18 = vand.u32 4294901760, %v13064_v23  ;;  %v702_v16 = vand.u32 4294901760, %v13069_v32  ;;  %v13084_v9 = vsub.f32 %v12787_v47, %v14130_v14  ;;  %11302 = vmatprep.subr.bf16.mxu1 %v11301_v26 }
  0xa9   : > { %v13089_v55 = vsub.f32 %v12798_v59, %v14131_v8  ;;  %v683_v3 = vand.u32 4294901760, %v682_v61  ;;  %v11305_v47 = vpack.c.bf16 %v12738_v54, %v12736_v53  ;;  %10123 = vmatprep.mubr.f32.mxu1 %v13102_v46  ;;  %v14133_v31 = vand.u32 4294901760, %v12673_v29 }
  0xaa   : > { %v690_v7 = vand.u32 4294901760, %v689_v51  ;;  %v696_v45 = vsub.f32 %v13064_v23, %v695_v18  ;;  %v703_v24 = vsub.f32 %v13069_v32, %v702_v16  ;;  %v709_v25 = vand.u32 4294901760, %v13084_v9  ;;  %11088 = vmatpush3.bf16.msra.mxu0 %v11085_v20 }
  0xab   : > { %v716_v12 = vand.u32 4294901760, %v13089_v55  ;;  %11090 = vmatprep.subr.bf16.mxu0 %v11089_v1  ;;  %11304 = vmatpush3.bf16.msra.mxu1 %v11301_v26  ;;  %v11309_v20 = vpack.c.bf16 %v12792_v58, %v12778_v43  ;;  %v14134_v26 = vand.u32 4294901760, %v12688_v34  ;;  %v14140_v29 = vand.u32 4294901760, %v12825_v38 }
  0xac   : > { %v697_v59 = vand.u32 4294901760, %v696_v45  ;;  %v11093_v14 = vpack.c.bf16 %v690_v7, %v683_v3  ;;  %v704_v8 = vand.u32 4294901760, %v703_v24  ;;  %v710_v61 = vsub.f32 %v13084_v9, %v709_v25  ;;  %11306 = vmatprep.subr.bf16.mxu1 %v11305_v47 }
  0xad   : > { %v717_v51 = vsub.f32 %v13089_v55, %v716_v12  ;;  %v11313_v45 = vpack.c.bf16 %v12841_v30, %v12825_v38  ;;  %v14132_v24 = vand.u32 4294901760, %v12671_v28  ;;  %v14139_v28 = vand.u32 4294901760, %v12792_v58 }
  0xae   : > { %11092 = vmatpush3.bf16.msra.mxu0 %v11089_v1  ;;  %v11097_v0 = vpack.c.bf16 %v704_v8, %v697_v59  ;;  %v711_v7 = vand.u32 4294901760, %v710_v61  ;;  %v14135_v1 = vand.u32 4294901760, %v12697_v40  ;;  %v14136_v59 = vand.u32 4294901760, %v12736_v53 }
  0xaf   : > { %11094 = vmatprep.subr.bf16.mxu0 %v11093_v14  ;;  %v718_v3 = vand.u32 4294901760, %v717_v51  ;;  %v13113_v56 = vpack.c.bf16 %v14133_v31, %v14132_v24  ;;  %v14137_v8 = vand.u32 4294901760, %v12738_v54  ;;  %v14138_v51 = vand.u32 4294901760, %v12778_v43  ;;  %11308 = vmatpush3.bf16.msra.mxu1 %v11305_v47 }
  0xb0   : > { %v13119_v15 = vpack.c.bf16 %v14135_v1, %v14134_v26  ;;  %v14141_v34 = vand.u32 4294901760, %v12841_v30  ;;  %v14142_v40 = vand.u32 4294901760, %v12851_v13  ;;  %v14143_v53 = vand.u32 4294901760, %v12871_v19  ;;  %11310 = vmatprep.subr.bf16.mxu1 %v11309_v20 }
  0xb1   : > { %v13125_v61 = vpack.c.bf16 %v14137_v8, %v14136_v59  ;;  %v13131_v50 = vpack.c.bf16 %v14139_v28, %v14138_v51  ;;  %v14144_v54 = vand.u32 4294901760, %v12900_v48  ;;  %v14145_v43 = vand.u32 4294901760, %v12909_v11 }
  0xb2   : > { %v13137_v24 = vpack.c.bf16 %v14141_v34, %v14140_v29  ;;  %v13143_v31 = vpack.c.bf16 %v14143_v53, %v14142_v40  ;;  %v14146_v26 = vand.u32 4294901760, %v12920_v4  ;;  %v14147_v38 = vand.u32 4294901760, %v12925_v63  ;;  %11096 = vmatpush3.bf16.msra.mxu0 %v11093_v14 }
  0xb3   : > { %v13149_v58 = vpack.c.bf16 %v14145_v43, %v14144_v54  ;;  %v14148_v1 = vand.u32 4294901760, %v12941_v10  ;;  %v14149_v59 = vand.u32 4294901760, %v12952_v49  ;;  %v14150_v47 = vand.u32 4294901760, %v12969_v33  ;;  %11098 = vmatprep.subr.bf16.mxu0 %v11097_v0  ;;  %11312 = vmatpush3.bf16.msra.mxu1 %v11309_v20 }
  0xb4   : > { %v13155_v30 = vpack.c.bf16 %v14147_v38, %v14146_v26  ;;  %v14151_v51 = vand.u32 4294901760, %v12977_v2  ;;  %v14152_v29 = vand.u32 4294901760, %v12982_v44  ;;  %v14153_v34 = vand.u32 4294901760, %v12987_v36  ;;  %11314 = vmatprep.subr.bf16.mxu1 %v11313_v45 }
  0xb5   : > { %v13161_v8 = vpack.c.bf16 %v14149_v59, %v14148_v1  ;;  %v14154_v53 = vand.u32 4294901760, %v12997_v21  ;;  %v14155_v54 = vand.u32 4294901760, %v13004_v22  ;;  %v14156_v26 = vand.u32 4294901760, %v13020_v41 }
  0xb6   : > { %v13167_v28 = vpack.c.bf16 %v14151_v51, %v14150_v47  ;;  %v13173_v40 = vpack.c.bf16 %v14153_v34, %v14152_v29  ;;  %v14157_v38 = vand.u32 4294901760, %v13025_v42  ;;  %v11101_v14 = vpack.c.bf16 %v718_v3, %v711_v7  ;;  %11100 = vmatpush3.bf16.msra.mxu0 %v11097_v0  ;;  %v14160_v0 = vld [vmem:[#allocation21_spill] sm:$0xff] }
  0xb7   : > { %v13179_v43 = vpack.c.bf16 %v14155_v54, %v14154_v53  ;;  %v14158_v59 = vand.u32 4294901760, %v13043_v17  ;;  %v14159_v47 = vand.u32 4294901760, %v13048_v5  ;;  %v13193_v29 = vpack.c.bf16 %v702_v16, %v695_v18  ;;  %11316 = vmatpush3.bf16.msra.mxu1 %v11313_v45 }
  0xb8   : > { %v13185_v1 = vpack.c.bf16 %v14157_v38, %v14156_v26  ;;  %v13195_v34 = vpack.c.bf16 %v716_v12, %v709_v25  ;;  %v11317_v53 = vpack.c.bf16 %v12871_v19, %v12851_v13  ;;  %11102 = vmatprep.subr.bf16.mxu0 %v11101_v14  ;;  %v11105_v7 = vpack.c.bf16 %v12909_v11, %v12900_v48  ;;  %v1906_v38 = vld [vmem:[%s14017_s6 + $0x40] sm:$0xff] }
  0xb9   : > { %v13191_v51 = vpack.c.bf16 %v14159_v47, %v14158_v59  ;;  %v11321_v3 = vpack.c.bf16 %v12925_v63, %v12920_v4  ;;  %v11109_v12 = vpack.c.bf16 %v12952_v49, %v12941_v10  ;;  %v11325_v13 = vpack.c.bf16 %v12977_v2, %v12969_v33  ;;  %v14162_v2 = vld [vmem:[#allocation24_spill] sm:$0xff]  ;;  %v1908_v47 = vld [vmem:[%s14017_s6 + $0x50] sm:$0xff] }
  0xba   : > { %11318 = vmatprep.subr.bf16.mxu1 %v11317_v53  ;;  %11104 = vmatpush3.bf16.msra.mxu0 %v11101_v14  ;;  %v11113_v19 = vpack.c.bf16 %v12987_v36, %v12982_v44  ;;  %v11117_v49 = vpack.c.bf16 %v13004_v22, %v12997_v21  ;;  %v13215_v48 = vsub.f32 %v13033_v37, %v13057_v6  ;;  %v13218_v33 = vand.u32 4294901760, %v13102_v46  ;;  %v14163_v44 = vld [vmem:[#allocation23_spill] sm:$0xff]  ;;  %v14164_v36 = vld [vmem:[#allocation13_spill] sm:$0xff]  ;;  %v14167_v22 = vld [vmem:[#allocation14_spill] sm:$0xff] }
  0xbb   : > { %11106 = vmatprep.subr.bf16.mxu0 %v11105_v7  ;;  %11320 = vmatpush3.bf16.msra.mxu1 %v11317_v53  ;;  %v11121_v11 = vpack.c.bf16 %v13025_v42, %v13020_v41  ;;  %v11125_v4 = vpack.c.bf16 %v13048_v5, %v13043_v17  ;;  %v11129_v63 = vpack.c.bf16 %v13069_v32, %v13064_v23  ;;  %v14161_v5 = vld [vmem:[#allocation12_spill] sm:$0xff]  ;;  %v14165_v37 = vand.u32 4294901760, %v12879_v35  ;;  %v14166_v21 = vld [vmem:[#allocation25_spill] sm:$0xff]  ;;  %v14168_v42 = vld [vmem:[#allocation15_spill] sm:$0xff] }
  0xbc   : > { %11322 = vmatprep.subr.bf16.mxu1 %v11321_v3  ;;  %v11133_v10 = vpack.c.bf16 %v13089_v55, %v13084_v9  ;;  %v13254_v41 = vand.u32 4294901760, %v13215_v48  ;;  %v14170_v32 = vld [vmem:[#allocation16_spill] sm:$0xff]  ;;  %v14171_v17 = vld [vmem:[#allocation17_spill] sm:$0xff]  ;;  %v14174_v23 = vand.u32 4294901760, %v14162_v2  ;;  %v1298_v18 = vsub.f32 %v13102_v46, %v13218_v33  ;;  %v1901_v55 = vld [vmem:[%s14017_s6 + $0x18] sm:$0xff] }
  0xbd   : > { %9879 = vmatmul.mubr.f32.vlgmr.msra.gmra.mrb[0].mxu0 %v12888_v60  ;;  %v1900_v9 = vld [vmem:[%s14017_s6 + $0x10] sm:$0xff]  ;;  %v1931_v20 = vand.u32 4294901760, %v1901_v55  ;;  %v1946_v14 = vand.u32 4294901760, %v1906_v38 }
  0xbe   : > { %11108 = vmatpush3.bf16.msra.mxu0 %v11105_v7  ;;  %9913 = vmatprep.mubr.f32.mxu0 %v12879_v35  ;;  %v14169_v35 = vld [vmem:[#allocation22_spill] sm:$0xff]  ;;  %v1299_v16 = vand.u32 4294901760, %v1298_v18  ;;  %v1928_v25 = vand.u32 4294901760, %v1900_v9 }
  0xbf   : > { %11110 = vmatprep.subr.bf16.mxu0 %v11109_v12  ;;  %11324 = vmatpush3.bf16.msra.mxu1 %v11321_v3  ;;  %v13428_v3 = vld [vmem:[%s14017_s6 + $0x60] sm:$0xff] }
  0xc0   : > { %11326 = vmatprep.subr.bf16.mxu1 %v11325_v13 }
  0xc2   : > { %11112 = vmatpush3.bf16.msra.mxu0 %v11109_v12  ;;  %v13433_v12 = vld [vmem:[%s14017_s6 + $0x68] sm:$0xff] }
  0xc3   : > { %11114 = vmatprep.subr.bf16.mxu0 %v11113_v19  ;;  %11328 = vmatpush3.bf16.msra.mxu1 %v11325_v13  ;;  %v1958_v13 = vand.u32 4294901760, %v13428_v3 }
  0xc4   : > { %11330 = vmatprep.subr.bf16.mxu1 %v12669_v27 }
  0xc6   : > { %11116 = vmatpush3.bf16.msra.mxu0 %v11113_v19  ;;  %10124 = vmatmul.mubr.f32.vlgmr.msra.gmra.mrb[0].mxu1 %v13215_v48  ;;  %v1961_v19 = vand.u32 4294901760, %v13433_v12 }
  0xc7   : > { %11118 = vmatprep.subr.bf16.mxu0 %v11117_v49  ;;  %11332 = vmatpush3.bf16.msra.mxu1 %v12669_v27 }
  0xc8   : > { %10158 = vmatprep.mubr.f32.mxu1 %v13218_v33  ;;  %11334 = vmatprep.subr.bf16.mxu1 %v12695_v39 }
  0xca   : > { %11120 = vmatpush3.bf16.msra.mxu0 %v11117_v49  ;;  %v13440_v49 = vld [vmem:[%s14017_s6 + $0x70] sm:$0xff] }
  0xcb   : > { %11122 = vmatprep.subr.bf16.mxu0 %v11121_v11  ;;  %11336 = vmatpush3.bf16.msra.mxu1 %v12695_v39 }
  0xcc   : > { %11338 = vmatprep.subr.bf16.mxu1 %v12734_v52 }
  0xce   : > { %11124 = vmatpush3.bf16.msra.mxu0 %v11121_v11  ;;  %v13445_v11 = vld [vmem:[%s14017_s6 + $0x78] sm:$0xff] }
  0xcf   : > { %11126 = vmatprep.subr.bf16.mxu0 %v11125_v4  ;;  %11340 = vmatpush3.bf16.msra.mxu1 %v12734_v52 }
  0xd0   : > { %11342 = vmatprep.subr.bf16.mxu1 %v12790_v57 }
  0xd2   : > { %11128 = vmatpush3.bf16.msra.mxu0 %v11125_v4  ;;  %v1964_v4 = vand.u32 4294901760, %v13440_v49 }
  0xd3   : > { %11130 = vmatprep.subr.bf16.mxu0 %v11129_v63  ;;  %11344 = vmatpush3.bf16.msra.mxu1 %v12790_v57 }
  0xd4   : > { %11346 = vmatprep.subr.bf16.mxu1 %v12839_v62 }
  0xd6   : > { %11132 = vmatpush3.bf16.msra.mxu0 %v11129_v63  ;;  %v1967_v63 = vand.u32 4294901760, %v13445_v11 }
  0xd7   : > { %11134 = vmatprep.subr.bf16.mxu0 %v11133_v10  ;;  %11348 = vmatpush3.bf16.msra.mxu1 %v12839_v62 }
  0xd8   : > { %11350 = vmatprep.subr.bf16.mxu1 %v14160_v0 }
  0xda   : > { %11136 = vmatpush3.bf16.msra.mxu0 %v11133_v10  ;;  %v13454_v10 = vpack.c.bf16 %v1961_v19, %v1958_v13 }
  0xdb   : > { %11138 = vmatprep.subr.bf16.mxu0 %v14161_v5  ;;  %11352 = vmatpush3.bf16.msra.mxu1 %v14160_v0 }
  0xdc   : > { %11354 = vmatprep.subr.bf16.mxu1 %v14163_v44 }
  0xdd   : > { %9914 = vmatmul.mubr.f32.vlgmr.msra.gmra.mrb[0].mxu0 %v14162_v2 }
  0xde   : > { %11140 = vmatpush3.bf16.msra.mxu0 %v14161_v5  ;;  %9948 = vmatprep.mubr.f32.mxu0 %v14165_v37  ;;  %v13471_v37 = vsub.f32 %v1900_v9, %v1928_v25  ;;  %v13500_v9 = vsub.f32 %v1906_v38, %v1946_v14 }
  0xdf   : > { %11142 = vmatprep.subr.bf16.mxu0 %v14164_v36  ;;  %11356 = vmatpush3.bf16.msra.mxu1 %v14163_v44 }
  0xe0   : > { %11358 = vmatprep.subr.bf16.mxu1 %v14166_v21 }
  0xe2   : > { %11144 = vmatpush3.bf16.msra.mxu0 %v14164_v36 }
  0xe3   : > { %11146 = vmatprep.subr.bf16.mxu0 %v14167_v22  ;;  %11360 = vmatpush3.bf16.msra.mxu1 %v14166_v21 }
  0xe4   : > { %11362 = vmatprep.subr.bf16.mxu1 %v13113_v56 }
  0xe6   : > { %11148 = vmatpush3.bf16.msra.mxu0 %v14167_v22  ;;  %10159 = vmatmul.mubr.f32.vlgmr.msra.gmra.mrb[0].mxu1 %v13254_v41 }
  0xe7   : > { %11150 = vmatprep.subr.bf16.mxu0 %v14168_v42  ;;  %11364 = vmatpush3.bf16.msra.mxu1 %v13113_v56  ;;  %v14172_v56 = vld [vmem:[#allocation18_spill] sm:$0xff] }
  0xe8   : > { %10193 = vmatprep.mubr.f32.mxu1 %v14169_v35  ;;  %11366 = vmatprep.subr.bf16.mxu1 %v13119_v15 }
  0xea   : > { %11152 = vmatpush3.bf16.msra.mxu0 %v14168_v42 }
  0xeb   : > { %11154 = vmatprep.subr.bf16.mxu0 %v14170_v32  ;;  %11368 = vmatpush3.bf16.msra.mxu1 %v13119_v15  ;;  %v14173_v15 = vld [vmem:[#allocation20_spill] sm:$0xff] }
  0xec   : > { %11370 = vmatprep.subr.bf16.mxu1 %v13125_v61 }
  0xee   : > { %11156 = vmatpush3.bf16.msra.mxu0 %v14170_v32 }
  0xef   : > { %11158 = vmatprep.subr.bf16.mxu0 %v14171_v17  ;;  %11372 = vmatpush3.bf16.msra.mxu1 %v13125_v61  ;;  %v13380_v61 = vpack.c.bf16 %v1931_v20, %v1928_v25 }
  0xf0   : > { %11374 = vmatprep.subr.bf16.mxu1 %v13131_v50 }
  0xf2   : > { %11160 = vmatpush3.bf16.msra.mxu0 %v14171_v17 }
  0xf3   : > { %11162 = vmatprep.subr.bf16.mxu0 %v14172_v56  ;;  %11376 = vmatpush3.bf16.msra.mxu1 %v13131_v50  ;;  %v14175_v50 = vld [vmem:[#allocation19_spill] sm:$0xff] }
  0xf4   : > { %11378 = vmatprep.subr.bf16.mxu1 %v13137_v24 }
  0xf6   : > { %11164 = vmatpush3.bf16.msra.mxu0 %v14172_v56 }
  0xf7   : > { %11166 = vmatprep.subr.bf16.mxu0 %v14173_v15  ;;  %11380 = vmatpush3.bf16.msra.mxu1 %v13137_v24  ;;  %v1902_v24 = vld [vmem:[%s14017_s6 + $0x20] sm:$0xff] }
  0xf8   : > { %11382 = vmatprep.subr.bf16.mxu1 %v13143_v31 }
  0xfa   : > { %11168 = vmatpush3.bf16.msra.mxu0 %v14173_v15 }
  0xfb   : > { %11170 = vmatprep.subr.bf16.mxu0 %v13149_v58  ;;  %11384 = vmatpush3.bf16.msra.mxu1 %v13143_v31  ;;  %v1903_v31 = vld [vmem:[%s14017_s6 + $0x28] sm:$0xff] }
  0xfc   : > { %11386 = vmatprep.subr.bf16.mxu1 %v13155_v30 }
  0xfd   : > { %9949 = vmatmul.mubr.f32.vlgmr.msra.gmra.mrb[0].mxu0 %v14174_v23 }
  0xfe   : > { %11172 = vmatpush3.bf16.msra.mxu0 %v13149_v58  ;;  %9983 = vmatprep.mubr.f32.mxu0 %v14175_v50  ;;  %v1934_v58 = vand.u32 4294901760, %v1902_v24 }
  0xff   : > { %11174 = vmatprep.subr.bf16.mxu0 %v13161_v8  ;;  %11388 = vmatpush3.bf16.msra.mxu1 %v13155_v30  ;;  %v1937_v30 = vand.u32 4294901760, %v1903_v31 }
 0x100   : > { %11390 = vmatprep.subr.bf16.mxu1 %v13167_v28 }
 0x102   : > { %11176 = vmatpush3.bf16.msra.mxu0 %v13161_v8  ;;  %v1904_v8 = vld [vmem:[%s14017_s6 + $0x30] sm:$0xff] }
 0x103   : > { %11178 = vmatprep.subr.bf16.mxu0 %v13173_v40  ;;  %11392 = vmatpush3.bf16.msra.mxu1 %v13167_v28  ;;  %v1905_v28 = vld [vmem:[%s14017_s6 + $0x38] sm:$0xff] }
 0x104   : > { %11394 = vmatprep.subr.bf16.mxu1 %v12669_v27  ;;  %v1943_v54 = vand.u32 4294901760, %v1905_v28 }
 0x106   : > { %11180 = vmatpush3.bf16.msra.mxu0 %v13173_v40  ;;  %10194 = vmatmul.mubr.f32.vlgmr.msra.gmra.mrb[0].mxu1 %v13057_v6  ;;  %v1940_v40 = vand.u32 4294901760, %v1904_v8 }
 0x107   : > { %11182 = vmatprep.subr.bf16.mxu0 %v13179_v43  ;;  %11396 = vmatpush3.bf16.msra.mxu1 %v12669_v27 }
 0x108   : > { %10228 = vmatprep.mubr.f32.mxu1 %v14169_v35  ;;  %11398 = vmatprep.subr.bf16.mxu1 %v12695_v39  ;;  %v13400_v26 = vpack.c.bf16 %v1943_v54, %v1940_v40 }
 0x10a   : > { %11184 = vmatpush3.bf16.msra.mxu0 %v13179_v43  ;;  %v13398_v43 = vpack.c.bf16 %v1937_v30, %v1934_v58 }
 0x10b   : > { %11186 = vmatprep.subr.bf16.mxu0 %v13185_v1  ;;  %11400 = vmatpush3.bf16.msra.mxu1 %v12695_v39 }
 0x10c   : > { %11402 = vmatprep.subr.bf16.mxu1 %v12734_v52 }
 0x10e   : > { %11188 = vmatpush3.bf16.msra.mxu0 %v13185_v1  ;;  %v1907_v1 = vld [vmem:[%s14017_s6 + $0x48] sm:$0xff] }
 0x10f   : > { %11190 = vmatprep.subr.bf16.mxu0 %v13191_v51  ;;  %11404 = vmatpush3.bf16.msra.mxu1 %v12734_v52  ;;  %v1949_v59 = vand.u32 4294901760, %v1907_v1 }
 0x110   : > { %11406 = vmatprep.subr.bf16.mxu1 %v12790_v57 }
 0x111   : > { %v13418_v53 = vpack.c.bf16 %v1949_v59, %v1946_v14 }
 0x112   : > { %11192 = vmatpush3.bf16.msra.mxu0 %v13191_v51  ;;  %v1909_v51 = vld [vmem:[%s14017_s6 + $0x58] sm:$0xff] }
 0x113   : > { %11194 = vmatprep.subr.bf16.mxu0 %v13193_v29  ;;  %11408 = vmatpush3.bf16.msra.mxu1 %v12790_v57 }
 0x114   : > { %11410 = vmatprep.subr.bf16.mxu1 %v12839_v62 }
 0x116   : > { %11196 = vmatpush3.bf16.msra.mxu0 %v13193_v29  ;;  %v1952_v29 = vand.u32 4294901760, %v1908_v47 }
 0x117   : > { %11198 = vmatprep.subr.bf16.mxu0 %v13195_v34  ;;  %11412 = vmatpush3.bf16.msra.mxu1 %v12839_v62 }
 0x118   : > { %11414 = vmatprep.subr.bf16.mxu1 %v14160_v0 }
 0x11a   : > { %11200 = vmatpush3.bf16.msra.mxu0 %v13195_v34  ;;  %v1955_v34 = vand.u32 4294901760, %v1909_v51 }
 0x11b   : > { %11202 = vmatprep.subr.bf16.mxu0 %v14161_v5  ;;  %11416 = vmatpush3.bf16.msra.mxu1 %v14160_v0 }
 0x11c   : > { %11418 = vmatprep.subr.bf16.mxu1 %v14163_v44  ;;  %v13420_v7 = vpack.c.bf16 %v1955_v34, %v1952_v29 }
 0x11d   : > { %9984 = vmatmul.mubr.f32.vlgmr.msra.gmra.mrb[0].mxu0 %v12888_v60 }
 0x11e   : > { %11204 = vmatpush3.bf16.msra.mxu0 %v14161_v5  ;;  %10018 = vmatprep.mubr.f32.mxu0 %v14175_v50 }
 0x11f   : > { %11206 = vmatprep.subr.bf16.mxu0 %v14164_v36  ;;  %11420 = vmatpush3.bf16.msra.mxu1 %v14163_v44 }
 0x120   : > { %11422 = vmatprep.subr.bf16.mxu1 %v14166_v21 }
 0x122   : > { %11208 = vmatpush3.bf16.msra.mxu0 %v14164_v36 }
 0x123   : > { %11210 = vmatprep.subr.bf16.mxu0 %v14167_v22  ;;  %11424 = vmatpush3.bf16.msra.mxu1 %v14166_v21 }
 0x126   : > { %11212 = vmatpush3.bf16.msra.mxu0 %v14167_v22  ;;  %10229 = vmatmul.mubr.f32.vlgmr.msra.gmra.mrb[0].mxu1 %v13057_v6 }
 0x127   : > { %11214 = vmatprep.subr.bf16.mxu0 %v14168_v42 }
 0x12a   : > { %11216 = vmatpush3.bf16.msra.mxu0 %v14168_v42 }
 0x12b   : > { %11218 = vmatprep.subr.bf16.mxu0 %v14170_v32 }
 0x12e   : > { %11220 = vmatpush3.bf16.msra.mxu0 %v14170_v32  ;;  %v2039_v32 = vand.u32 4294901760, %v13471_v37 }
 0x12f   : > { %11222 = vmatprep.subr.bf16.mxu0 %v14171_v17 }
 0x130   : > { %v2040_v23 = vsub.f32 %v13471_v37, %v2039_v32 }
 0x132   : > { %11224 = vmatpush3.bf16.msra.mxu0 %v14171_v17 }
 0x133   : > { %11226 = vmatprep.subr.bf16.mxu0 %v14172_v56 }
 0x136   : > { %11228 = vmatpush3.bf16.msra.mxu0 %v14172_v56 }
 0x137   : > { %11230 = vmatprep.subr.bf16.mxu0 %v14173_v15 }
 0x13a   : > { %11232 = vmatpush3.bf16.msra.mxu0 %v14173_v15 }
 0x13b   : > { %11234 = vmatprep.subr.bf16.mxu0 %v12669_v27 }
 0x13d   : > { %10019 = vmatmul.mubr.f32.vlgmr.msra.gmra.mrb[0].mxu0 %v12888_v60 }
 0x13e   : > { %11236 = vmatpush3.bf16.msra.mxu0 %v12669_v27  ;;  %10053 = vmatprep.mubr.f32.mxu0 %v1299_v16  ;;  %v1308_v27 = vsub.f32 %v13215_v48, %v13254_v41 }
 0x13f   : > { %11238 = vmatprep.subr.bf16.mxu0 %v12695_v39 }
 0x142   : > { %11240 = vmatpush3.bf16.msra.mxu0 %v12695_v39  ;;  %v13362_v39 = vand.u32 4294901760, %v1308_v27 }
 0x143   : > { %11242 = vmatprep.subr.bf16.mxu0 %v12734_v52 }
 0x146   : > { %11244 = vmatpush3.bf16.msra.mxu0 %v12734_v52  ;;  %v1898_v52 = vld [vmem:[%s14017_s6] sm:$0xff] }
 0x147   : > { %11246 = vmatprep.subr.bf16.mxu0 %v12790_v57 }
 0x14a   : > { %11248 = vmatpush3.bf16.msra.mxu0 %v12790_v57  ;;  %v1899_v57 = vld [vmem:[%s14017_s6 + $0x8] sm:$0xff] }
 0x14b   : > { %11250 = vmatprep.subr.bf16.mxu0 %v12839_v62  ;;  %v1925_v60 = vand.u32 4294901760, %v1899_v57 }
 0x14d   : > { %v13466_v2 = vsub.f32 %v1899_v57, %v1925_v60  ;;  %v13494_v57 = vsub.f32 %v1903_v31, %v1937_v30  ;;  %v2081_v30 = vand.u32 4294901760, %v13500_v9 }
 0x14e   : > { %11252 = vmatpush3.bf16.msra.mxu0 %v12839_v62  ;;  %v1922_v62 = vand.u32 4294901760, %v1898_v52 }
 0x14f   : > { %11254 = vmatprep.subr.bf16.mxu0 %v14160_v0  ;;  %v2032_v36 = vand.u32 4294901760, %v13466_v2 }
 0x150   : > { %v13378_v45 = vpack.c.bf16 %v1925_v60, %v1922_v62  ;;  %v13464_v5 = vsub.f32 %v1898_v52, %v1922_v62  ;;  %v13491_v52 = vsub.f32 %v1902_v24, %v1934_v58  ;;  %v13496_v62 = vsub.f32 %v1904_v8, %v1940_v40 }
 0x151   : > { %v2033_v42 = vsub.f32 %v13466_v2, %v2032_v36  ;;  %v13498_v60 = vsub.f32 %v1905_v28, %v1943_v54  ;;  %v2060_v24 = vand.u32 4294901760, %v13494_v57  ;;  %v13514_v54 = vsub.f32 %v1909_v51, %v1955_v34 }
 0x152   : > { %11256 = vmatpush3.bf16.msra.mxu0 %v14160_v0  ;;  %v13460_v0 = vpack.c.bf16 %v1967_v63, %v1964_v4  ;;  %v2053_v25 = vand.u32 4294901760, %v13491_v52  ;;  %v2067_v31 = vand.u32 4294901760, %v13496_v62 }
 0x153   : > { %11258 = vmatprep.subr.bf16.mxu0 %v14163_v44  ;;  %v2034_v15 = vand.u32 4294901760, %v2033_v42  ;;  %v2074_v58 = vand.u32 4294901760, %v13498_v60  ;;  %v2061_v38 = vsub.f32 %v13494_v57, %v2060_v24 }
 0x154   : > { %v2054_v8 = vsub.f32 %v13491_v52, %v2053_v25 }
 0x155   : > { %v2075_v14 = vsub.f32 %v13498_v60, %v2074_v58  ;;  %v2062_v42 = vand.u32 4294901760, %v2061_v38 }
 0x156   : > { %11260 = vmatpush3.bf16.msra.mxu0 %v14163_v44  ;;  %v2025_v44 = vand.u32 4294901760, %v13464_v5 }
 0x157   : > { %11262 = vmatprep.subr.bf16.mxu0 %v14166_v21 }
 0x158   : > { %v2026_v22 = vsub.f32 %v13464_v5, %v2025_v44 }
 0x15a   : > { %11264 = vmatpush3.bf16.msra.mxu0 %v14166_v21  ;;  %v13473_v21 = vsub.f32 %v1901_v55, %v1931_v20  ;;  %v2027_v56 = vand.u32 4294901760, %v2026_v22  ;;  %v13505_v20 = vsub.f32 %v1908_v47, %v1952_v29  ;;  %v2055_v47 = vand.u32 4294901760, %v2054_v8 }
 0x15b   : > { %11426 = vmatprep.subr.bf16.mxu0 %v13378_v45  ;;  %v2102_v22 = vand.u32 4294901760, %v13514_v54  ;;  %v13537_v8 = vsub.f32 %v13440_v49, %v1964_v4 }
 0x15c   : > { %v2046_v17 = vand.u32 4294901760, %v13473_v21  ;;  %v11457_v18 = vpack.c.bf16 %v2034_v15, %v2027_v56  ;;  %v2095_v40 = vand.u32 4294901760, %v13505_v20  ;;  %v2076_v15 = vand.u32 4294901760, %v2075_v14 }
 0x15d   : > { %10054 = vmatmul.mubr.f32.vlgmr.msra.gmra.mrb[2].mxu0 %v13362_v39 }
 0x15e   : > { %10263 = vmatprep.mubr.f32.mxu0 %v1299_v16  ;;  %11428 = vmatpush3.bf16.msra.mxu0 %v13378_v45  ;;  %v2047_v50 = vsub.f32 %v13473_v21, %v2046_v17  ;;  %v2041_v16 = vand.u32 4294901760, %v2040_v23  ;;  %v2096_v51 = vsub.f32 %v13505_v20, %v2095_v40 }
 0x15f   : > { %11430 = vmatprep.subr.bf16.mxu0 %v13380_v61 }
 0x160   : > { %v2048_v27 = vand.u32 4294901760, %v2047_v50  ;;  %v2103_v50 = vsub.f32 %v13514_v54, %v2102_v22 }
 0x162   : > { %11432 = vmatpush3.bf16.msra.mxu0 %v13380_v61  ;;  %v11461_v55 = vpack.c.bf16 %v2048_v27, %v2041_v16  ;;  %v11465_v16 = vpack.c.bf16 %v2062_v42, %v2055_v47 }
 0x163   : > { %11434 = vmatprep.subr.bf16.mxu0 %v13398_v43 }
 0x166   : > { %11436 = vmatpush3.bf16.msra.mxu0 %v13398_v43 }
 0x167   : > { %11438 = vmatprep.subr.bf16.mxu0 %v13400_v26 }
 0x16a   : > { %11440 = vmatpush3.bf16.msra.mxu0 %v13400_v26 }
 0x16b   : > { %11442 = vmatprep.subr.bf16.mxu0 %v13418_v53 }
 0x16e   : > { %11444 = vmatpush3.bf16.msra.mxu0 %v13418_v53 }
 0x16f   : > { %11446 = vmatprep.subr.bf16.mxu0 %v13420_v7 }
 0x172   : > { %11448 = vmatpush3.bf16.msra.mxu0 %v13420_v7 }
 0x173   : > { %11450 = vmatprep.subr.bf16.mxu0 %v13454_v10 }
 0x176   : > { %11452 = vmatpush3.bf16.msra.mxu0 %v13454_v10 }
 0x177   : > { %11454 = vmatprep.subr.bf16.mxu0 %v13460_v0 }
 0x17a   : > { %11456 = vmatpush3.bf16.msra.mxu0 %v13460_v0 }
 0x17b   : > { %11458 = vmatprep.subr.bf16.mxu0 %v11457_v18 }
 0x17d   : > { %10264 = vmatmul.mubr.f32.vlgmr.msra.gmra.mrb[4].mxu0 %v13362_v39  ;;  %v13503_v39 = vsub.f32 %v1907_v1, %v1949_v59  ;;  %v2068_v1 = vsub.f32 %v13496_v62, %v2067_v31  ;;  %v2082_v59 = vsub.f32 %v13500_v9, %v2081_v30 }
 0x17e   : > { %10298 = vmatprep.mubr.f32.mxu0 %v14169_v35  ;;  %11460 = vmatpush3.bf16.msra.mxu0 %v11457_v18  ;;  %v13527_v18 = vsub.f32 %v13428_v3, %v1958_v13  ;;  %v2097_v3 = vand.u32 4294901760, %v2096_v51  ;;  %v2104_v13 = vand.u32 4294901760, %v2103_v50  ;;  %v13566_v51 = vpack.c.bf16 %v2074_v58, %v2067_v31 }
 0x17f   : > { %11462 = vmatprep.subr.bf16.mxu0 %v11461_v55  ;;  %v2088_v28 = vand.u32 4294901760, %v13503_v39  ;;  %v2069_v56 = vand.u32 4294901760, %v2068_v1  ;;  %v2083_v34 = vand.u32 4294901760, %v2082_v59  ;;  %v13543_v1 = vsub.f32 %v13445_v11, %v1967_v63 }
 0x180   : > { %v2109_v38 = vand.u32 4294901760, %v13527_v18  ;;  %v11477_v47 = vpack.c.bf16 %v2104_v13, %v2097_v3  ;;  %v13555_v63 = vpack.c.bf16 %v2032_v36, %v2025_v44  ;;  %v13572_v44 = vpack.c.bf16 %v2102_v22, %v2095_v40 }
 0x181   : > { %v2089_v29 = vsub.f32 %v13503_v39, %v2088_v28  ;;  %v11469_v27 = vpack.c.bf16 %v2076_v15, %v2069_v56  ;;  %v2130_v49 = vand.u32 4294901760, %v13543_v1  ;;  %v13562_v56 = vpack.c.bf16 %v2046_v17, %v2039_v32 }
 0x182   : > { %11464 = vmatpush3.bf16.msra.mxu0 %v11461_v55  ;;  %v13532_v55 = vsub.f32 %v13433_v12, %v1961_v19  ;;  %v2123_v12 = vand.u32 4294901760, %v13537_v8  ;;  %v2110_v19 = vsub.f32 %v13527_v18, %v2109_v38  ;;  %v13564_v15 = vpack.c.bf16 %v2060_v24, %v2053_v25 }
 0x183   : > { %v2090_v23 = vand.u32 4294901760, %v2089_v29  ;;  %11466 = vmatprep.subr.bf16.mxu0 %v11465_v16  ;;  %v2131_v42 = vsub.f32 %v13543_v1, %v2130_v49  ;;  %v13570_v50 = vpack.c.bf16 %v2088_v28, %v2081_v30  ;;  %v11489_v31 = vpack.c.bf16 %v13466_v2, %v13464_v5  ;;  %v9141_v30 = vld [vmem:[#allocation2] ss:$0 sm:$0xff] }
 0x184   : > { %v2116_v14 = vand.u32 4294901760, %v13532_v55  ;;  %v2111_v29 = vand.u32 4294901760, %v2110_v19  ;;  %v2124_v11 = vsub.f32 %v13537_v8, %v2123_v12  ;;  %v11493_v58 = vpack.c.bf16 %v13473_v21, %v13471_v37 }
 0x185   : > { %v11473_v4 = vpack.c.bf16 %v2090_v23, %v2083_v34  ;;  %v2132_v25 = vand.u32 4294901760, %v2131_v42  ;;  %v11497_v28 = vpack.c.bf16 %v13494_v57, %v13491_v52  ;;  %v11501_v5 = vpack.c.bf16 %v13498_v60, %v13496_v62 }
 0x186   : > { %11468 = vmatpush3.bf16.msra.mxu0 %v11465_v16  ;;  %v2117_v59 = vsub.f32 %v13532_v55, %v2116_v14  ;;  %v13574_v36 = vpack.c.bf16 %v2116_v14, %v2109_v38  ;;  %v2125_v17 = vand.u32 4294901760, %v2124_v11  ;;  %v11505_v21 = vpack.c.bf16 %v13503_v39, %v13500_v9 }
 0x187   : > { %11470 = vmatprep.subr.bf16.mxu0 %v11469_v27  ;;  %v11509_v62 = vpack.c.bf16 %v13514_v54, %v13505_v20  ;;  %v11513_v3 = vpack.c.bf16 %v13532_v55, %v13527_v18  ;;  %v11517_v9 = vpack.c.bf16 %v13543_v1, %v13537_v8  ;;  %v9142_v54 = vld [vmem:[#allocation4] ss:$0 sm:$0xff] }
 0x188   : > { %v2118_v23 = vand.u32 4294901760, %v2117_v59  ;;  %v11485_v24 = vpack.c.bf16 %v2132_v25, %v2125_v17 }
 0x18a   : > { %11472 = vmatpush3.bf16.msra.mxu0 %v11469_v27  ;;  %v13578_v27 = vpack.c.bf16 %v2130_v49, %v2123_v12  ;;  %v11481_v32 = vpack.c.bf16 %v2118_v23, %v2111_v29 }
 0x18b   : > { %11474 = vmatprep.subr.bf16.mxu0 %v11473_v4 }
 0x18e   : > { %11476 = vmatpush3.bf16.msra.mxu0 %v11473_v4 }
 0x18f   : > { %11478 = vmatprep.subr.bf16.mxu0 %v11477_v47 }
 0x192   : > { %11480 = vmatpush3.bf16.msra.mxu0 %v11477_v47 }
 0x193   : > { %11482 = vmatprep.subr.bf16.mxu0 %v11481_v32 }
 0x196   : > { %11484 = vmatpush3.bf16.msra.mxu0 %v11481_v32 }
 0x197   : > { %11486 = vmatprep.subr.bf16.mxu0 %v11485_v24 }
 0x19a   : > { %11488 = vmatpush3.bf16.msra.mxu0 %v11485_v24 }
 0x19b   : > { %11490 = vmatprep.subr.bf16.mxu0 %v11489_v31 }
 0x19d   : > { %10299 = vmatmul.mubr.f32.vlgmr.msra.gmra.mrb[4].mxu0 %v13057_v6 }
 0x19e   : > { %11492 = vmatpush3.bf16.msra.mxu0 %v11489_v31  ;;  %10333 = vmatprep.mubr.f32.mxu0 %v13102_v46 }
 0x19f   : > { %11494 = vmatprep.subr.bf16.mxu0 %v11493_v58 }
 0x1a2   : > { %11496 = vmatpush3.bf16.msra.mxu0 %v11493_v58 }
 0x1a3   : > { %11498 = vmatprep.subr.bf16.mxu0 %v11497_v28 }
 0x1a6   : > { %11500 = vmatpush3.bf16.msra.mxu0 %v11497_v28 }
 0x1a7   : > { %11502 = vmatprep.subr.bf16.mxu0 %v11501_v5 }
 0x1aa   : > { %11504 = vmatpush3.bf16.msra.mxu0 %v11501_v5 }
 0x1ab   : > { %11506 = vmatprep.subr.bf16.mxu0 %v11505_v21 }
 0x1ae   : > { %11508 = vmatpush3.bf16.msra.mxu0 %v11505_v21 }
 0x1af   : > { %11510 = vmatprep.subr.bf16.mxu0 %v11509_v62 }
 0x1b2   : > { %11512 = vmatpush3.bf16.msra.mxu0 %v11509_v62 }
 0x1b3   : > { %11514 = vmatprep.subr.bf16.mxu0 %v11513_v3 }
 0x1b6   : > { %11516 = vmatpush3.bf16.msra.mxu0 %v11513_v3 }
 0x1b7   : > { %11518 = vmatprep.subr.bf16.mxu0 %v11517_v9 }
 0x1ba   : > { %11520 = vmatpush3.bf16.msra.mxu0 %v11517_v9 }
 0x1bb   : > { %11522 = vmatprep.subr.bf16.mxu0 %v13378_v45 }
 0x1bd   : > { %10334 = vmatmul.mubr.f32.vlgmr.msra.gmra.mrb[4].mxu0 %v13215_v48 }
 0x1be   : > { %11524 = vmatpush3.bf16.msra.mxu0 %v13378_v45  ;;  %10368 = vmatprep.mubr.f32.mxu0 %v13218_v33 }
 0x1bf   : > { %11526 = vmatprep.subr.bf16.mxu0 %v13380_v61 }
 0x1c2   : > { %11528 = vmatpush3.bf16.msra.mxu0 %v13380_v61 }
 0x1c3   : > { %11530 = vmatprep.subr.bf16.mxu0 %v13398_v43 }
 0x1c6   : > { %11532 = vmatpush3.bf16.msra.mxu0 %v13398_v43 }
 0x1c7   : > { %11534 = vmatprep.subr.bf16.mxu0 %v13400_v26 }
 0x1ca   : > { %11536 = vmatpush3.bf16.msra.mxu0 %v13400_v26 }
 0x1cb   : > { %11538 = vmatprep.subr.bf16.mxu0 %v13418_v53 }
 0x1ce   : > { %11540 = vmatpush3.bf16.msra.mxu0 %v13418_v53 }
 0x1cf   : > { %11542 = vmatprep.subr.bf16.mxu0 %v13420_v7 }
 0x1d2   : > { %11544 = vmatpush3.bf16.msra.mxu0 %v13420_v7 }
 0x1d3   : > { %11546 = vmatprep.subr.bf16.mxu0 %v13454_v10 }
 0x1d6   : > { %11548 = vmatpush3.bf16.msra.mxu0 %v13454_v10 }
 0x1d7   : > { %11550 = vmatprep.subr.bf16.mxu0 %v13460_v0 }
 0x1da   : > { %11552 = vmatpush3.bf16.msra.mxu0 %v13460_v0 }
 0x1db   : > { %11554 = vmatprep.subr.bf16.mxu0 %v13555_v63 }
 0x1dd   : > { %10369 = vmatmul.mubr.f32.vlgmr.msra.gmra.mrb[4].mxu0 %v13254_v41  ;;  %v13696_v41 = vld [vmem:[%s472_s28] sm:$0xff] }
 0x1de   : > { %11556 = vmatpush3.bf16.msra.mxu0 %v13555_v63  ;;  %10403 = vmatprep.mubr.f32.mxu0 %v14169_v35  ;;  %vm3122_vm1 = vcmp.eq.s32.totalorder %v13696_v41, 0 }
 0x1df   : > { %11558 = vmatprep.subr.bf16.mxu0 %v13562_v56 }
 0x1e2   : > { %11560 = vmatpush3.bf16.msra.mxu0 %v13562_v56 }
 0x1e3   : > { %11562 = vmatprep.subr.bf16.mxu0 %v13564_v15 }
 0x1e6   : > { %11564 = vmatpush3.bf16.msra.mxu0 %v13564_v15 }
 0x1e7   : > { %11566 = vmatprep.subr.bf16.mxu0 %v13566_v51 }
 0x1ea   : > { %11568 = vmatpush3.bf16.msra.mxu0 %v13566_v51 }
 0x1eb   : > { %11570 = vmatprep.subr.bf16.mxu0 %v13570_v50 }
 0x1ee   : > { %11572 = vmatpush3.bf16.msra.mxu0 %v13570_v50 }
 0x1ef   : > { %11574 = vmatprep.subr.bf16.mxu0 %v13572_v44 }
 0x1f2   : > { %11576 = vmatpush3.bf16.msra.mxu0 %v13572_v44 }
 0x1f3   : > { %11578 = vmatprep.subr.bf16.mxu0 %v13574_v36 }
 0x1f6   : > { %11580 = vmatpush3.bf16.msra.mxu0 %v13574_v36 }
 0x1f7   : > { %11582 = vmatprep.subr.bf16.mxu0 %v13578_v27 }
 0x1f9   : > { %v13568_v34 = vpop.f32.mrb[0].mxu1 }
 0x1fa   : > { %v13576_v16 = vpop.f32.mrb[1].mxu1  ;;  %11584 = vmatpush3.bf16.msra.mxu0 %v13578_v27 }
 0x1fb   : > { %11586 = vmatprep.subr.bf16.mxu0 %v13378_v45 }
 0x1fd   : > { %10404 = vmatmul.mubr.f32.vlgmr.msra.gmra.mrb[4].mxu0 %v13057_v6 }
 0x1fe   : > { %11588 = vmatpush3.bf16.msra.mxu0 %v13378_v45  ;;  %10438 = vmatprep.mubr.f32.mxu0 %v14169_v35  ;;  %v13698_v45 = vld [vmem:[%s472_s28 + $0x8] sm:$0xff] }
 0x1ff   : > { %11590 = vmatprep.subr.bf16.mxu0 %v13380_v61  ;;  %vm3123_vm3 = vcmp.eq.s32.totalorder %v13698_v45, 0 }
 0x202   : > { %11592 = vmatpush3.bf16.msra.mxu0 %v13380_v61 }
 0x203   : > { %11594 = vmatprep.subr.bf16.mxu0 %v13398_v43 }
 0x206   : > { %11596 = vmatpush3.bf16.msra.mxu0 %v13398_v43 }
 0x207   : > { %11598 = vmatprep.subr.bf16.mxu0 %v13400_v26 }
 0x20a   : > { %11600 = vmatpush3.bf16.msra.mxu0 %v13400_v26 }
 0x20b   : > { %11602 = vmatprep.subr.bf16.mxu0 %v13418_v53 }
 0x20e   : > { %11604 = vmatpush3.bf16.msra.mxu0 %v13418_v53 }
 0x20f   : > { %11606 = vmatprep.subr.bf16.mxu0 %v13420_v7 }
 0x210   : > { %v10020_v40 = vpop.f32.mrb[0].mxu0 }
 0x211   : > { %v1181_v22 = vpop.f32.mrb[1].mxu0  ;;  %v13611_v39 = vadd.f32 %v10020_v40, %v9141_v30 }
 0x212   : > { %v13588_v38 = vadd.f32 %v9141_v30, %v1181_v22  ;;  %11608 = vmatpush3.bf16.msra.mxu0 %v13420_v7 }
 0x213   : > { %v2610_v20 = vsel %vm2605_vm0, %v13611_v39, 0  ;;  %11610 = vmatprep.subr.bf16.mxu0 %v13454_v10 }
 0x214   : > { %v2607_v2 = vsel %vm2605_vm0, %v13588_v38, 0  ;;  %v13620_v55 = vand.u32 4294901760, %v2610_v20 }
 0x215   : > { %v13594_v37 = vand.u32 4294901760, %v2607_v2 }
 0x216   : > { %v2696_v33 = vsub.f32 %v2610_v20, %v13620_v55  ;;  %11612 = vmatpush3.bf16.msra.mxu0 %v13454_v10 }
 0x217   : > { %v13597_v46 = vsub.f32 %v2607_v2, %v13594_v37  ;;  %11614 = vmatprep.subr.bf16.mxu0 %v13460_v0 }
 0x218   : > { %v2697_v29 = vand.u32 4294901760, %v2696_v33 }
 0x219   : > { %v2687_v52 = vand.u32 4294901760, %v13597_v46 }
 0x21a   : > { %11616 = vmatpush3.bf16.msra.mxu0 %v13460_v0  ;;  %v9143_v0 = vld [vmem:[#allocation6] ss:$0 sm:$0xff] }
 0x21b   : > { %v2688_v57 = vsub.f32 %v13597_v46, %v2687_v52 }
 0x21d   : > { %v2689_v60 = vand.u32 4294901760, %v2688_v57  ;;  %10439 = vmatmul.mubr.f32.vlgmr.msra.gmra.mrb[4].mxu0 %v13057_v6 }
 0x21f   : > { %10445 = vmatprep.mubr.f32.mxu1 %v2689_v60 }
 0x230   : > { %v10055_v18 = vpop.f32.mrb[2].mxu0 }
 0x231   : > { %v1312_v8 = vadd.f32 %v10055_v18, %v9142_v54  ;;  %v1301_v1 = vpop.f32.mrb[3].mxu0 }
 0x232   : > { %v1302_v13 = vadd.f32 %v9142_v54, %v1301_v1 }
 0x233   : > { %v13624_v48 = vadd.f32 %v13568_v34, %v1312_v8 }
 0x234   : > { %v13628_v14 = vadd.f32 %v13576_v16, %v1302_v13  ;;  %v2698_v16 = vsub.f32 %v2696_v33, %v2697_v29 }
 0x235   : > { %v2616_v12 = vsel %vm2605_vm0, %v13624_v48, 0 }
 0x236   : > { %v2622_v19 = vand.u32 4294901760, %v2616_v12  ;;  %v2613_v49 = vsel %vm2605_vm0, %v13628_v14, 0  ;;  %v2699_v24 = vand.u32 4294901760, %v2698_v16 }
 0x237   : > { %v2619_v4 = vand.u32 4294901760, %v2613_v49 }
 0x238   : > { %v2714_v59 = vsub.f32 %v2616_v12, %v2622_v19 }
 0x239   : > { %v11617_v47 = vpack.c.bf16 %v2622_v19, %v2619_v4  ;;  %v2707_v11 = vsub.f32 %v2613_v49, %v2619_v4 }
 0x23a   : > { %v2715_v42 = vand.u32 4294901760, %v2714_v59 }
 0x23b   : > { %11618 = vmatprep.subr.bf16.mxu1 %v11617_v47  ;;  %v2708_v34 = vand.u32 4294901760, %v2707_v11  ;;  %v11625_v58 = vpack.c.bf16 %v2714_v59, %v2707_v11 }
 0x23c   : > { %11620 = vmatpush3.bf16.xpose.msra.mxu1 %v11617_v47  ;;  %v2716_v23 = vsub.f32 %v2714_v59, %v2715_v42 }
 0x23d   : > { %v2709_v32 = vsub.f32 %v2707_v11, %v2708_v34  ;;  %v11633_v30 = vpack.c.bf16 %v2715_v42, %v2708_v34 }
 0x23e   : > { %v2717_v17 = vand.u32 4294901760, %v2716_v23 }
 0x23f   : > { %v2710_v25 = vand.u32 4294901760, %v2709_v32 }
 0x241   : > { %v11621_v31 = vpack.c.bf16 %v2717_v17, %v2710_v25 }
 0x243   : > { %10446 = vmatmul.mubr.f32.vlgmr.msra.gmra.mrb[2].mxu1 %v2699_v24  ;;  %11622 = vmatprep.subr.bf16.mxu1 %v11621_v31 }
 0x244   : > { %11624 = vmatpush3.bf16.xpose.msra.mxu1 %v11621_v31  ;;  %10452 = vmatprep.mubr.f32.mxu1 %v13594_v37 }
 0x245   : > { %11626 = vmatprep.subr.bf16.mxu1 %v11625_v58 }
 0x24b   : > { %10453 = vmatmul.mubr.f32.vlgmr.msra.gmra.mrb[2].mxu1 %v13620_v55 }
 0x24c   : > { %11628 = vmatpush3.bf16.xpose.msra.mxu1 %v11625_v58  ;;  %10459 = vmatprep.mubr.f32.mxu1 %v13597_v46 }
 0x24d   : > { %11630 = vmatprep.subr.bf16.mxu1 %v11617_v47 }
 0x253   : > { %10460 = vmatmul.mubr.f32.vlgmr.msra.gmra.mrb[2].mxu1 %v2696_v33 }
 0x254   : > { %11632 = vmatpush3.bf16.xpose.msra.mxu1 %v11617_v47  ;;  %10466 = vmatprep.mubr.f32.mxu1 %v2687_v52 }
 0x255   : > { %11634 = vmatprep.subr.bf16.mxu1 %v11633_v30 }
 0x25b   : > { %10467 = vmatmul.mubr.f32.vlgmr.msra.gmra.mrb[2].mxu1 %v2697_v29 }
 0x25c   : > { %11636 = vmatpush3.bf16.xpose.msra.mxu1 %v11633_v30  ;;  %10473 = vmatprep.mubr.f32.mxu1 %v13594_v37 }
 0x25d   : > { %11638 = vmatprep.subr.bf16.mxu1 %v11617_v47 }
 0x263   : > { %10474 = vmatmul.mubr.f32.vlgmr.msra.gmra.mrb[2].mxu1 %v13620_v55 }
 0x264   : > { %11640 = vmatpush3.bf16.xpose.msra.mxu1 %v11617_v47  ;;  %10480 = vmatprep.mubr.f32.mxu1 %v13594_v37 }
 0x26b   : > { %10481 = vmatmul.mubr.f32.vlgmr.msra.gmra.mrb[2].mxu1 %v13620_v55 }
 0x2f0   : > { %v10440_v63 = vpop.f32.mrb[4].mxu0 }
 0x2f1   : > { %v13710_v56 = vadd.f32 %v10440_v63, %v9143_v0  ;;  %v2595_v15 = vpop.f32.mrb[5].mxu0 }
 0x2f2   : > { %v13712_v51 = vadd.f32 %v9143_v0, %v2595_v15 }
 0x2f3   : > { %v3159_v50 = vand.u32 4294901760, %v13710_v56 }
 0x2f4   : > { %v3156_v44 = vand.u32 4294901760, %v13712_v51 }
 0x2f5   : > { %v3251_v36 = vsub.f32 %v13710_v56, %v3159_v50 }
 0x2f6   : > { %v13717_v27 = vpack.c.bf16 %v3159_v50, %v3156_v44  ;;  %v3244_v28 = vsub.f32 %v13712_v51, %v3156_v44 }
 0x2f7   : > { %v3252_v40 = vand.u32 4294901760, %v3251_v36 }
 0x2f8   : > { %11642 = vmatprep.subr.bf16.mxu1 %v13717_v27  ;;  %v3245_v22 = vand.u32 4294901760, %v3244_v28  ;;  %v11649_v2 = vpack.c.bf16 %v3251_v36, %v3244_v28 }
 0x2f9   : > { %11644 = vmatpush3.bf16.msra.mxu1 %v13717_v27  ;;  %v3253_v5 = vsub.f32 %v3251_v36, %v3252_v40 }
 0x2fa   : > { %v3246_v37 = vsub.f32 %v3244_v28, %v3245_v22  ;;  %v13722_v21 = vpack.c.bf16 %v3252_v40, %v3245_v22 }
 0x2fb   : > { %v3254_v46 = vand.u32 4294901760, %v3253_v5 }
 0x2fc   : > { %v3247_v52 = vand.u32 4294901760, %v3246_v37 }
 0x2fe   : > { %v11645_v57 = vpack.c.bf16 %v3254_v46, %v3247_v52 }
 0x300   : > { %11646 = vmatprep.subr.bf16.mxu1 %v11645_v57 }
 0x33e   : > { %v10482_v35 = vpop.f32.mrb[2].mxu1 }
 0x33f   : > { %v3110_v61 = vpop.f32.mrb[3].mxu1  ;;  %v3121_v43 = vmul.f32 0.17677669, %v10482_v35 }
 0x340   : > { %v3120_v26 = vmul.f32 0.17677669, %v3110_v61 }
 0x341   : > { %v3125_v7 = vsel %vm3123_vm3, -1e+09, %v3121_v43 }
 0x342   : > { %v3124_v6 = vsel %vm3122_vm1, -1e+09, %v3120_v26  ;;  %v3130_v10 = vsel %vm3126_vm2, %v3125_v7, -inf }
 0x343   : > { %v3127_v53 = vsel %vm3126_vm2, %v3124_v6, -inf }
 0x344   : > { %3128 = vmax.xlane.f32.xlu0 %v3127_v53 }
 0x348   : > { %3131 = vmax.xlane.f32.xlu0 %v3130_v10 }
 0x35e   : > { %3665 = vrot.lane.b32.xlu0 %v13628_v14, %s12383_s15 }
 0x3d1   : > { %v3129_v62 = vpop.xlane.xlu0 %3128 }
 0x3d2   : > { %v3133_v60 = vsub.f32 %v3124_v6, %v3129_v62 }
 0x3d4   : > { %v3135_v3 = vmul.f32 1.442695, %v3133_v60 }
 0x3d5   : > { %v3132_v9 = vpop.xlane.xlu0 %3131 }
 0x3d6   : > { %12215 = vpow2.f32 %v3135_v3  ;;  %v3134_v20 = vsub.f32 %v3125_v7, %v3132_v9 }
 0x3d8   : > { %v3137_v54 = vmul.f32 1.442695, %v3134_v20 }
 0x3d9   : > { %v3666_v58 = vpop.permute.xlu0 %3665 }
 0x3da   : > { %12217 = vpow2.f32 %v3137_v54  ;;  %v3673_v61 = vsel %vm2605_vm0, %v3666_v58, 0 }
 0x3db   : > { %v3678_v6 = vand.u32 4294901760, %v3673_v61 }
 0x3dd   : > { %v3766_v0 = vsub.f32 %v3673_v61, %v3678_v6 }
 0x3df   : > { %v3767_v44 = vand.u32 4294901760, %v3766_v0 }
 0x3e0   : > { %v12216_v18 = vpop.eup %12215 }
 0x3e1   : > { %v3139_v55 = vsel %vm3126_vm2, %v12216_v18, 0.0  ;;  %v3768_v5 = vsub.f32 %v3766_v0, %v3767_v44 }
 0x3e2   : > { %3140 = vadd.xlane.f32.xlu1 %v3139_v55 }
 0x3e4   : > { %v12218_v8 = vpop.eup %12217 }
 0x3e5   : > { %v3142_v1 = vsel %vm3126_vm2, %v12218_v8, 0.0 }
 0x3e6   : > { %3143 = vadd.xlane.f32.xlu1 %v3142_v1 }
 0x3f7   : > { %3667 = vrot.lane.b32.xlu1 %v13624_v48, %s12383_s15 }
 0x3fb   : > { %3661 = vrot.lane.b32.xlu1 %v13588_v38, %s12383_s15 }
 0x3ff   : > { %3663 = vrot.lane.b32.xlu1 %v13611_v39, %s12383_s15 }
 0x46f   : > { %v3141_v13 = vpop.xlane.xlu1 %3140 }
 0x470   : > { %12219 = vrcp.f32 %v3141_v13 }
 0x473   : > { %v3144_v33 = vpop.xlane.xlu1 %3143 }
 0x474   : > { %12221 = vrcp.f32 %v3144_v33 }
 0x477   : > { %v3668_v31 = vpop.permute.xlu1 %3667 }
 0x478   : > { %v3675_v35 = vsel %vm2605_vm0, %v3668_v31, 0 }
 0x479   : > { %v3681_v26 = vand.u32 4294901760, %v3675_v35 }
 0x47a   : > { %v12220_v12 = vpop.eup %12219 }
 0x47b   : > { %v3146_v19 = vmul.f32 %v12220_v12, %v12216_v18  ;;  %v3662_v30 = vpop.permute.xlu1 %3661  ;;  %v3773_v7 = vsub.f32 %v3675_v35, %v3681_v26  ;;  %v11665_v40 = vpack.c.bf16 %v3681_v26, %v3678_v6 }
 0x47c   : > { %v3669_v43 = vsel %vm2605_vm0, %v3662_v30, 0 }
 0x47d   : > { %v3150_v49 = vsel %vm3126_vm2, %v3146_v19, 0  ;;  %v3744_v53 = vand.u32 4294901760, %v3669_v43  ;;  %v3774_v50 = vand.u32 4294901760, %v3773_v7  ;;  %v11673_v9 = vpack.c.bf16 %v3773_v7, %v3766_v0 }
 0x47e   : > { %v12222_v4 = vpop.eup %12221  ;;  %v3222_v59 = vand.u32 4294901760, %v3150_v49 }
 0x47f   : > { %v3148_v47 = vmul.f32 %v12222_v4, %v12218_v8  ;;  %v3664_v10 = vpop.permute.xlu1 %3663  ;;  %v3745_v63 = vsub.f32 %v3669_v43, %v3744_v53  ;;  %v3775_v22 = vsub.f32 %v3773_v7, %v3774_v50 }
 0x480   : > { %v3223_v29 = vsub.f32 %v3150_v49, %v3222_v59  ;;  %v3671_v15 = vsel %vm2605_vm0, %v3664_v10, 0 }
 0x481   : > { %v3153_v11 = vsel %vm3126_vm2, %v3148_v47, 0  ;;  %v3746_v36 = vand.u32 4294901760, %v3745_v63  ;;  %v3754_v28 = vand.u32 4294901760, %v3671_v15  ;;  %v3776_v46 = vand.u32 4294901760, %v3775_v22 }
 0x482   : > { %v3224_v42 = vand.u32 4294901760, %v3223_v29  ;;  %v3232_v34 = vand.u32 4294901760, %v3153_v11 }
 0x483   : > { %v3747_v37 = vsub.f32 %v3745_v63, %v3746_v36 }
 0x484   : > { %v3225_v23 = vsub.f32 %v3223_v29, %v3224_v42  ;;  %v3233_v16 = vsub.f32 %v3153_v11, %v3232_v34 }
 0x485   : > { %v3748_v52 = vand.u32 4294901760, %v3747_v37 }
 0x486   : > { %v3226_v32 = vand.u32 4294901760, %v3225_v23  ;;  %v3234_v17 = vand.u32 4294901760, %v3233_v16 }
 0x488   : > { %10487 = vmatprep.mubr.f32.mxu1 %v3226_v32  ;;  %v3235_v25 = vsub.f32 %v3233_v16, %v3234_v17 }
 0x48a   : > { %v3236_v24 = vand.u32 4294901760, %v3235_v25 }
 0x48c   : > { %10488 = vmatmul.mubr.f32.vlgmr.msra.gmra.mrb[4].mxu1 %v3236_v24 }
 0x48d   : > { %11648 = vmatpush3.bf16.msra.mxu1 %v11645_v57  ;;  %10494 = vmatprep.mubr.f32.mxu1 %v3222_v59  ;;  %v3769_v57 = vand.u32 4294901760, %v3768_v5 }
 0x48e   : > { %11650 = vmatprep.subr.bf16.mxu1 %v11649_v2 }
 0x48f   : > { %v11669_v62 = vpack.c.bf16 %v3776_v46, %v3769_v57 }
 0x494   : > { %10495 = vmatmul.mubr.f32.vlgmr.msra.gmra.mrb[4].mxu1 %v3232_v34 }
 0x495   : > { %11652 = vmatpush3.bf16.msra.mxu1 %v11649_v2  ;;  %10501 = vmatprep.mubr.f32.mxu1 %v3223_v29  ;;  %v3755_v2 = vsub.f32 %v3671_v15, %v3754_v28 }
 0x496   : > { %11654 = vmatprep.subr.bf16.mxu1 %v13717_v27 }
 0x49c   : > { %10502 = vmatmul.mubr.f32.vlgmr.msra.gmra.mrb[4].mxu1 %v3233_v16 }
 0x49d   : > { %11656 = vmatpush3.bf16.msra.mxu1 %v13717_v27  ;;  %10508 = vmatprep.mubr.f32.mxu1 %v3224_v42 }
 0x49e   : > { %11658 = vmatprep.subr.bf16.mxu1 %v13722_v21 }
 0x4a4   : > { %10509 = vmatmul.mubr.f32.vlgmr.msra.gmra.mrb[4].mxu1 %v3234_v17 }
 0x4a5   : > { %11660 = vmatpush3.bf16.msra.mxu1 %v13722_v21  ;;  %10515 = vmatprep.mubr.f32.mxu1 %v3222_v59  ;;  %v3756_v21 = vand.u32 4294901760, %v3755_v2 }
 0x4a6   : > { %11662 = vmatprep.subr.bf16.mxu1 %v13717_v27 }
 0x4a7   : > { %v3757_v60 = vsub.f32 %v3755_v2, %v3756_v21 }
 0x4a9   : > { %v3758_v3 = vand.u32 4294901760, %v3757_v60 }
 0x4ac   : > { %10516 = vmatmul.mubr.f32.vlgmr.msra.gmra.mrb[4].mxu1 %v3232_v34 }
 0x4ad   : > { %11664 = vmatpush3.bf16.msra.mxu1 %v13717_v27  ;;  %10522 = vmatprep.mubr.f32.mxu1 %v3222_v59  ;;  %v11681_v27 = vpack.c.bf16 %v3774_v50, %v3767_v44 }
 0x4ae   : > { %11666 = vmatprep.subr.bf16.mxu1 %v11665_v40 }
 0x4b4   : > { %10523 = vmatmul.mubr.f32.vlgmr.msra.gmra.mrb[4].mxu1 %v3232_v34 }
 0x4b5   : > { %10529 = vmatprep.mubr.f32.mxu1 %v3748_v52 }
 0x4b6   : > { %11668 = vmatpush3.bf16.xpose.msra.mxu1 %v11665_v40 }
 0x4b7   : > { %11670 = vmatprep.subr.bf16.mxu1 %v11669_v62 }
 0x4bd   : > { %10530 = vmatmul.mubr.f32.vlgmr.msra.gmra.mrb[6].mxu1 %v3758_v3 }
 0x4be   : > { %11672 = vmatpush3.bf16.xpose.msra.mxu1 %v11669_v62  ;;  %10536 = vmatprep.mubr.f32.mxu1 %v3744_v53 }
 0x4bf   : > { %11674 = vmatprep.subr.bf16.mxu1 %v11673_v9 }
 0x4c5   : > { %10537 = vmatmul.mubr.f32.vlgmr.msra.gmra.mrb[6].mxu1 %v3754_v28 }
 0x4c6   : > { %11676 = vmatpush3.bf16.xpose.msra.mxu1 %v11673_v9  ;;  %10543 = vmatprep.mubr.f32.mxu1 %v3745_v63 }
 0x4c7   : > { %11678 = vmatprep.subr.bf16.mxu1 %v11665_v40 }
 0x4cd   : > { %10544 = vmatmul.mubr.f32.vlgmr.msra.gmra.mrb[6].mxu1 %v3755_v2 }
 0x4ce   : > { %11680 = vmatpush3.bf16.xpose.msra.mxu1 %v11665_v40  ;;  %10550 = vmatprep.mubr.f32.mxu1 %v3746_v36 }
 0x4cf   : > { %11682 = vmatprep.subr.bf16.mxu1 %v11681_v27 }
 0x4d5   : > { %10551 = vmatmul.mubr.f32.vlgmr.msra.gmra.mrb[6].mxu1 %v3756_v21 }
 0x4d6   : > { %11684 = vmatpush3.bf16.xpose.msra.mxu1 %v11681_v27  ;;  %10557 = vmatprep.mubr.f32.mxu1 %v3744_v53 }
 0x4d7   : > { %11686 = vmatprep.subr.bf16.mxu1 %v11665_v40 }
 0x4dd   : > { %10558 = vmatmul.mubr.f32.vlgmr.msra.gmra.mrb[6].mxu1 %v3754_v28 }
 0x4de   : > { %11688 = vmatpush3.bf16.xpose.msra.mxu1 %v11665_v40  ;;  %10564 = vmatprep.mubr.f32.mxu1 %v3744_v53 }
 0x4e5   : > { %10565 = vmatmul.mubr.f32.vlgmr.msra.gmra.mrb[6].mxu1 %v3754_v28 }
 0x587   : > { %v13744_v20 = vpop.f32.mrb[4].mxu1 }
 0x588   : > { %v13746_v54 = vpop.f32.mrb[5].mxu1 }
 0x5b8   : > { %v10566_v18 = vpop.f32.mrb[6].mxu1 }
 0x5b9   : > { %v4180_v55 = vmul.f32 0.17677669, %v10566_v18  ;;  %v4169_v8 = vpop.f32.mrb[7].mxu1 }
 0x5ba   : > { %v4179_v1 = vmul.f32 0.17677669, %v4169_v8 }
 0x5bb   : > { %v4182_v13 = vsel %vm3123_vm3, -1e+09, %v4180_v55 }
 0x5bc   : > { %v4186_v33 = vsel %vm3126_vm2, %v4182_v13, -inf  ;;  %v4181_v12 = vsel %vm3122_vm1, -1e+09, %v4179_v1 }
 0x5bd   : > { %4187 = vmax.xlane.f32.xlu1 %v4186_v33  ;;  %v4183_v19 = vsel %vm3126_vm2, %v4181_v12, -inf }
 0x5be   : > { %4184 = vmax.xlane.f32.xlu0 %v4183_v19 }
 0x5ce   : > { %4209 = vrot.lane.b32.xlu1 %v13710_v56, %s12383_s15 }
 0x5d2   : > { %5797 = vrot.lane.b32.xlu1 %v13628_v14, %s12384_s24 }
 0x5d6   : > { %5799 = vrot.lane.b32.xlu1 %v13624_v48, %s12384_s24 }
 0x5da   : > { %5795 = vrot.lane.b32.xlu1 %v13611_v39, %s12384_s24 }
 0x64a   : > { %v4188_v49 = vpop.xlane.xlu1 %4187 }
 0x64b   : > { %v4190_v4 = vsub.f32 %v4182_v13, %v4188_v49  ;;  %v4185_v59 = vpop.xlane.xlu0 %4184 }
 0x64c   : > { %v4189_v47 = vsub.f32 %v4181_v12, %v4185_v59 }
 0x64d   : > { %v4193_v29 = vmul.f32 1.442695, %v4190_v4 }
 0x64e   : > { %v4191_v11 = vmul.f32 1.442695, %v4189_v47  ;;  %v4210_v42 = vpop.permute.xlu1 %4209 }
 0x64f   : > { %12223 = vpow2.f32 %v4193_v29  ;;  %v4223_v36 = vand.u32 4294901760, %v4210_v42 }
 0x650   : > { %12225 = vpow2.f32 %v4191_v11 }
 0x651   : > { %v13774_v40 = vsub.f32 %v4210_v42, %v4223_v36 }
 0x652   : > { %v5798_v34 = vpop.permute.xlu1 %5797 }
 0x653   : > { %v5805_v23 = vsel %vm2605_vm0, %v5798_v34, 0  ;;  %v4316_v5 = vand.u32 4294901760, %v13774_v40 }
 0x654   : > { %v5810_v16 = vand.u32 4294901760, %v5805_v23 }
 0x655   : > { %v4317_v3 = vsub.f32 %v13774_v40, %v4316_v5 }
 0x656   : > { %v5898_v32 = vsub.f32 %v5805_v23, %v5810_v16  ;;  %v5800_v17 = vpop.permute.xlu1 %5799 }
 0x657   : > { %v5807_v25 = vsel %vm2605_vm0, %v5800_v17, 0  ;;  %v4318_v4 = vand.u32 4294901760, %v4317_v3 }
 0x658   : > { %v5899_v24 = vand.u32 4294901760, %v5898_v32  ;;  %v5813_v31 = vand.u32 4294901760, %v5807_v25 }
 0x659   : > { %v12224_v58 = vpop.eup %12223 }
 0x65a   : > { %v13764_v30 = vpack.c.bf16 %v5813_v31, %v5810_v16  ;;  %v5905_v35 = vsub.f32 %v5807_v25, %v5813_v31  ;;  %v4198_v61 = vsel %vm3126_vm2, %v12224_v58, 0.0  ;;  %v12226_v43 = vpop.eup %12225  ;;  %v5900_v26 = vsub.f32 %v5898_v32, %v5899_v24  ;;  %v5796_v2 = vpop.permute.xlu1 %5795 }
 0x65b   : > { %4199 = vadd.xlane.f32.xlu0 %v4198_v61  ;;  %v4195_v7 = vsel %vm3126_vm2, %v12226_v43, 0.0  ;;  %v5803_v57 = vsel %vm2605_vm0, %v5796_v2, 0 }
 0x65c   : > { %v5906_v6 = vand.u32 4294901760, %v5905_v35  ;;  %v5901_v0 = vand.u32 4294901760, %v5900_v26  ;;  %v11817_v50 = vpack.c.bf16 %v5905_v35, %v5898_v32  ;;  %v5886_v1 = vand.u32 4294901760, %v5803_v57  ;;  %v4721_v26 = vld [vmem:[%s14019_s8 + $0x20] sm:$0xff] }
 0x65e   : > { %v5907_v53 = vsub.f32 %v5905_v35, %v5906_v6  ;;  %v13768_v10 = vpack.c.bf16 %v5906_v6, %v5899_v24  ;;  %v13795_v32 = vsub.f32 %v5803_v57, %v5886_v1  ;;  %v4722_v6 = vld [vmem:[%s14019_s8 + $0x28] sm:$0xff] }
 0x65f   : > { %4196 = vadd.xlane.f32.xlu0 %v4195_v7  ;;  %v4735_v7 = vand.u32 4294901760, %v4722_v6 }
 0x660   : > { %v5908_v63 = vand.u32 4294901760, %v5907_v53  ;;  %v5888_v61 = vand.u32 4294901760, %v13795_v32  ;;  %v4732_v53 = vand.u32 4294901760, %v4721_v26 }
 0x662   : > { %v11813_v15 = vpack.c.bf16 %v5908_v63, %v5901_v0  ;;  %v4822_v0 = vsub.f32 %v4721_v26, %v4732_v53  ;;  %v4829_v63 = vsub.f32 %v4722_v6, %v4735_v7  ;;  %v5260_v26 = vsel %vm2605_vm0, %v13746_v54, 0 }
 0x664   : > { %11814 = vmatprep.subr.bf16.mxu0 %v11813_v15 }
 0x665   : > { %11816 = vmatpush3.bf16.xpose.msra.mxu0 %v11813_v15  ;;  %v4723_v15 = vld [vmem:[%s14019_s8 + $0x30] sm:$0xff] }
 0x666   : > { %11818 = vmatprep.subr.bf16.mxu0 %v11817_v50 }
 0x675   : > { %4207 = vrot.lane.b32.xlu0 %v13712_v51, %s12383_s15 }
 0x679   : > { %5793 = vrot.lane.b32.xlu0 %v13588_v38, %s12384_s24 }
 0x6e8   : > { %v4200_v44 = vpop.xlane.xlu0 %4199 }
 0x6e9   : > { %12227 = vrcp.f32 %v4200_v44  ;;  %v4738_v44 = vand.u32 4294901760, %v4723_v15 }
 0x6ec   : > { %v4197_v28 = vpop.xlane.xlu0 %4196 }
 0x6ed   : > { %12229 = vrcp.f32 %v4197_v28  ;;  %v4823_v28 = vand.u32 4294901760, %v4822_v0 }
 0x6f0   : > { %v4208_v22 = vpop.permute.xlu0 %4207 }
 0x6f1   : > { %v4220_v37 = vand.u32 4294901760, %v4208_v22 }
 0x6f3   : > { %v12228_v46 = vpop.eup %12227  ;;  %v13777_v21 = vpack.c.bf16 %v4223_v36, %v4220_v37  ;;  %v13779_v52 = vsub.f32 %v4208_v22, %v4220_v37  ;;  %v4836_v37 = vsub.f32 %v4723_v15, %v4738_v44  ;;  %v5263_v15 = vsel %vm2605_vm0, %v13744_v20, 0 }
 0x6f4   : > { %v4204_v62 = vmul.f32 %v12228_v46, %v12224_v58  ;;  %v5794_v60 = vpop.permute.xlu0 %5793 }
 0x6f5   : > { %v4309_v9 = vand.u32 4294901760, %v13779_v52  ;;  %v5801_v27 = vsel %vm2605_vm0, %v5794_v60, 0  ;;  %11690 = vmatprep.subr.bf16.mxu1 %v13777_v21  ;;  %v11697_v35 = vpack.c.bf16 %v13774_v40, %v13779_v52  ;;  %v4830_v40 = vand.u32 4294901760, %v4829_v63 }
 0x6f6   : > { %v5876_v18 = vand.u32 4294901760, %v5801_v27  ;;  %11692 = vmatpush3.bf16.msra.mxu1 %v13777_v21  ;;  %v4217_v55 = vsel %vm3126_vm2, %v4204_v62, 0  ;;  %v4837_v57 = vand.u32 4294901760, %v4836_v37 }
 0x6f7   : > { %v12230_v8 = vpop.eup %12229  ;;  %v4310_v13 = vsub.f32 %v13779_v52, %v4309_v9  ;;  %v4296_v33 = vand.u32 4294901760, %v4217_v55  ;;  %v4831_v2 = vsub.f32 %v4829_v63, %v4830_v40 }
 0x6f8   : > { %v4202_v12 = vmul.f32 %v12230_v8, %v12226_v43  ;;  %v5877_v19 = vsub.f32 %v5801_v27, %v5876_v18  ;;  %10752 = vmatprep.mubr.f32.mxu0 %v5876_v18  ;;  %v11705_v43 = vpack.c.bf16 %v4316_v5, %v4309_v9  ;;  %v4824_v5 = vsub.f32 %v4822_v0, %v4823_v28 }
 0x6f9   : > { %10753 = vmatmul.mubr.f32.vlgmr.msra.gmra.mrb[6].mxu0 %v5886_v1  ;;  %v4311_v49 = vand.u32 4294901760, %v4310_v13  ;;  %v4297_v59 = vsub.f32 %v4217_v55, %v4296_v33  ;;  %v4832_v52 = vand.u32 4294901760, %v4831_v2  ;;  %v4838_v3 = vsub.f32 %v4836_v37, %v4837_v57 }
 0x6fa   : > { %11820 = vmatpush3.bf16.xpose.msra.mxu0 %v11817_v50  ;;  %10759 = vmatprep.mubr.f32.mxu0 %v5877_v19  ;;  %v5878_v47 = vand.u32 4294901760, %v5877_v19  ;;  %v4214_v29 = vsel %vm3126_vm2, %v4202_v12, 0  ;;  %v4724_v50 = vld [vmem:[%s14019_s8 + $0x38] sm:$0xff]  ;;  %v11729_v8 = vpack.c.bf16 %v4829_v63, %v4822_v0  ;;  %v11745_v13 = vpack.c.bf16 %v4830_v40, %v4823_v28  ;;  %v3659_v0 = vld [vmem:[%s14019_s8 + $0x10] sm:$0xff] }
 0x6fb   : > { %11822 = vmatprep.subr.bf16.mxu0 %v13764_v30  ;;  %v11693_v11 = vpack.c.bf16 %v4318_v4, %v4311_v49  ;;  %v4286_v42 = vand.u32 4294901760, %v4214_v29  ;;  %v4298_v34 = vand.u32 4294901760, %v4297_v59  ;;  %v4741_v36 = vand.u32 4294901760, %v4724_v50  ;;  %v3660_v63 = vld [vmem:[%s14019_s8 + $0x18] sm:$0xff] }
 0x6fc   : > { %v13793_v23 = vsub.f32 %v5877_v19, %v5878_v47  ;;  %v4839_v27 = vand.u32 4294901760, %v4838_v3  ;;  %v5272_v54 = vand.u32 4294901760, %v3659_v0  ;;  %v13867_v40 = vand.u32 4294901760, %v5263_v15 }
 0x6fd   : > { %11694 = vmatprep.subr.bf16.mxu1 %v11693_v11  ;;  %v4287_v16 = vsub.f32 %v4214_v29, %v4286_v42  ;;  %v4299_v25 = vsub.f32 %v4297_v59, %v4298_v34  ;;  %v13830_v22 = vpack.c.bf16 %v4741_v36, %v4738_v44  ;;  %v4843_v46 = vsub.f32 %v4724_v50, %v4741_v36 }
 0x6fe   : > { %v5275_v50 = vand.u32 4294901760, %v3660_v63  ;;  %v5345_v20 = vsub.f32 %v5263_v15, %v13867_v40 }
 0x6ff   : > { %v4288_v17 = vand.u32 4294901760, %v4287_v16  ;;  %v4300_v58 = vand.u32 4294901760, %v4299_v25  ;;  %v4844_v62 = vand.u32 4294901760, %v4843_v46 }
 0x701   : > { %10760 = vmatmul.mubr.f32.vlgmr.msra.gmra.mrb[6].mxu0 %v13795_v32  ;;  %v4289_v24 = vsub.f32 %v4287_v16, %v4288_v17  ;;  %v4845_v9 = vsub.f32 %v4843_v46, %v4844_v62 }
 0x702   : > { %11824 = vmatpush3.bf16.xpose.msra.mxu0 %v13764_v30  ;;  %10766 = vmatprep.mubr.f32.mxu0 %v5878_v47 }
 0x703   : > { %11826 = vmatprep.subr.bf16.mxu0 %v13768_v10  ;;  %v4290_v31 = vand.u32 4294901760, %v4289_v24 }
 0x705   : > { %10571 = vmatprep.mubr.f32.mxu1 %v4290_v31 }
 0x706   : > { %10572 = vmatmul.mubr.f32.vlgmr.msra.gmra.mrb[8].mxu1 %v4300_v58 }
 0x707   : > { %11696 = vmatpush3.bf16.msra.mxu1 %v11693_v11  ;;  %10578 = vmatprep.mubr.f32.mxu1 %v4286_v42 }
 0x708   : > { %11698 = vmatprep.subr.bf16.mxu1 %v11697_v35 }
 0x709   : > { %10767 = vmatmul.mubr.f32.vlgmr.msra.gmra.mrb[6].mxu0 %v5888_v61 }
 0x70a   : > { %11828 = vmatpush3.bf16.xpose.msra.mxu0 %v13768_v10  ;;  %10773 = vmatprep.mubr.f32.mxu0 %v5876_v18  ;;  %v13820_v10 = vpack.c.bf16 %v4735_v7, %v4732_v53  ;;  %v13856_v7 = vand.u32 4294901760, %v5260_v26 }
 0x70b   : > { %11830 = vmatprep.subr.bf16.mxu0 %v13764_v30 }
 0x70c   : > { %v5335_v28 = vsub.f32 %v5260_v26, %v13856_v7 }
 0x70e   : > { %10579 = vmatmul.mubr.f32.vlgmr.msra.gmra.mrb[8].mxu1 %v4296_v33 }
 0x70f   : > { %11700 = vmatpush3.bf16.msra.mxu1 %v11697_v35  ;;  %10585 = vmatprep.mubr.f32.mxu1 %v4287_v16  ;;  %v3657_v35 = vld [vmem:[%s14019_s8] sm:$0xff] }
 0x710   : > { %11702 = vmatprep.subr.bf16.mxu1 %v13777_v21  ;;  %v5266_v6 = vand.u32 4294901760, %v3657_v35 }
 0x711   : > { %10774 = vmatmul.mubr.f32.vlgmr.msra.gmra.mrb[6].mxu0 %v5886_v1 }
 0x712   : > { %11832 = vmatpush3.bf16.xpose.msra.mxu0 %v13764_v30  ;;  %10780 = vmatprep.mubr.f32.mxu0 %v5876_v18  ;;  %v4846_v18 = vand.u32 4294901760, %v4845_v9  ;;  %v5356_v44 = vsub.f32 %v3657_v35, %v5266_v6 }
 0x714   : > { %v11725_v55 = vpack.c.bf16 %v4846_v18, %v4839_v27  ;;  %v5346_v27 = vand.u32 4294901760, %v5345_v20  ;;  %v11765_v18 = vpack.c.bf16 %v5275_v50, %v5272_v54 }
 0x716   : > { %10586 = vmatmul.mubr.f32.vlgmr.msra.gmra.mrb[8].mxu1 %v4297_v59 }
 0x717   : > { %11704 = vmatpush3.bf16.msra.mxu1 %v13777_v21  ;;  %10592 = vmatprep.mubr.f32.mxu1 %v4288_v17 }
 0x718   : > { %11706 = vmatprep.subr.bf16.mxu1 %v11705_v43 }
 0x719   : > { %10781 = vmatmul.mubr.f32.vlgmr.msra.gmra.mrb[6].mxu0 %v5886_v1  ;;  %v11733_v1 = vpack.c.bf16 %v4843_v46, %v4836_v37  ;;  %v5370_v37 = vsub.f32 %v3659_v0, %v5272_v54  ;;  %v5377_v46 = vsub.f32 %v3660_v63, %v5275_v50 }
 0x71b   : > { %v5378_v3 = vand.u32 4294901760, %v5377_v46 }
 0x71e   : > { %10593 = vmatmul.mubr.f32.vlgmr.msra.gmra.mrb[8].mxu1 %v4298_v34 }
 0x71f   : > { %11708 = vmatpush3.bf16.msra.mxu1 %v11705_v43  ;;  %10599 = vmatprep.mubr.f32.mxu1 %v4286_v42  ;;  %v3658_v43 = vld [vmem:[%s14019_s8 + $0x8] sm:$0xff] }
 0x720   : > { %11710 = vmatprep.subr.bf16.mxu1 %v13777_v21  ;;  %v5269_v53 = vand.u32 4294901760, %v3658_v43 }
 0x722   : > { %v5363_v36 = vsub.f32 %v3658_v43, %v5269_v53 }
 0x724   : > { %v5364_v2 = vand.u32 4294901760, %v5363_v36 }
 0x726   : > { %10600 = vmatmul.mubr.f32.vlgmr.msra.gmra.mrb[8].mxu1 %v4296_v33 }
 0x727   : > { %11712 = vmatpush3.bf16.msra.mxu1 %v13777_v21  ;;  %10606 = vmatprep.mubr.f32.mxu1 %v4286_v42  ;;  %v4825_v21 = vand.u32 4294901760, %v4824_v5  ;;  %v5357_v5 = vand.u32 4294901760, %v5356_v44 }
 0x728   : > { %11714 = vmatprep.subr.bf16.mxu1 %v13820_v10 }
 0x729   : > { %v11721_v60 = vpack.c.bf16 %v4832_v52, %v4825_v21  ;;  %v5336_v21 = vand.u32 4294901760, %v5335_v28  ;;  %v11761_v52 = vpack.c.bf16 %v5269_v53, %v5266_v6 }
 0x72b   : > { %v5337_v9 = vsub.f32 %v5335_v28, %v5336_v21 }
 0x72e   : > { %10607 = vmatmul.mubr.f32.vlgmr.msra.gmra.mrb[8].mxu1 %v4296_v33  ;;  %v11749_v33 = vpack.c.bf16 %v4844_v62, %v4837_v57  ;;  %v5358_v57 = vsub.f32 %v5356_v44, %v5357_v5  ;;  %v5365_v62 = vsub.f32 %v5363_v36, %v5364_v2 }
 0x72f   : > { %11716 = vmatpush3.bf16.msra.mxu1 %v13820_v10 }
 0x730   : > { %11718 = vmatprep.subr.bf16.mxu1 %v13830_v22 }
 0x733   : > { %11720 = vmatpush3.bf16.msra.mxu1 %v13830_v22 }
 0x734   : > { %11722 = vmatprep.subr.bf16.mxu1 %v11721_v60 }
 0x7ec   : > { %v13834_v12 = vpop.f32.mrb[6].mxu0 }
 0x7ed   : > { %v13836_v19 = vpop.f32.mrb[7].mxu0 }
 0x801   : > { %v10608_v49 = vpop.f32.mrb[8].mxu1 }
 0x802   : > { %v4729_v4 = vsel %vm2605_vm0, %v10608_v49, 0  ;;  %v4711_v59 = vpop.f32.mrb[9].mxu1 }
 0x803   : > { %v13839_v47 = vand.u32 4294901760, %v4729_v4  ;;  %v4726_v29 = vsel %vm2605_vm0, %v4711_v59, 0 }
 0x804   : > { %v4800_v11 = vand.u32 4294901760, %v4726_v29 }
 0x805   : > { %v4811_v42 = vsub.f32 %v4729_v4, %v13839_v47 }
 0x806   : > { %v4801_v34 = vsub.f32 %v4726_v29, %v4800_v11 }
 0x807   : > { %v4812_v16 = vand.u32 4294901760, %v4811_v42 }
 0x808   : > { %v4802_v17 = vand.u32 4294901760, %v4801_v34 }
 0x809   : > { %v4813_v25 = vsub.f32 %v4811_v42, %v4812_v16 }
 0x80a   : > { %v4803_v24 = vsub.f32 %v4801_v34, %v4802_v17 }
 0x80b   : > { %v4814_v58 = vand.u32 4294901760, %v4813_v25 }
 0x80c   : > { %v4804_v31 = vand.u32 4294901760, %v4803_v24 }
 0x80e   : > { %10617 = vmatprep.mubr.f32.mxu1 %v4804_v31 }
 0x80f   : > { %10618 = vmatmul.mubr.f32.vlgmr.msra.gmra.mrb[10].mxu1 %v4814_v58 }
 0x810   : > { %11724 = vmatpush3.bf16.msra.mxu1 %v11721_v60  ;;  %10628 = vmatprep.mubr.f32.mxu1 %v4800_v11  ;;  %v5371_v60 = vand.u32 4294901760, %v5370_v37 }
 0x811   : > { %11726 = vmatprep.subr.bf16.mxu1 %v11725_v55 }
 0x814   : > { %11728 = vmatpush3.bf16.msra.mxu1 %v11725_v55  ;;  %v5359_v55 = vand.u32 4294901760, %v5358_v57 }
 0x815   : > { %11730 = vmatprep.subr.bf16.mxu1 %v11729_v8 }
 0x817   : > { %10629 = vmatmul.mubr.f32.vlgmr.msra.gmra.mrb[10].mxu1 %v13839_v47 }
 0x818   : > { %11732 = vmatpush3.bf16.msra.mxu1 %v11729_v8  ;;  %10639 = vmatprep.mubr.f32.mxu1 %v4801_v34  ;;  %v5366_v8 = vand.u32 4294901760, %v5365_v62  ;;  %v11797_v34 = vpack.c.bf16 %v5378_v3, %v5371_v60 }
 0x819   : > { %11734 = vmatprep.subr.bf16.mxu1 %v11733_v1 }
 0x81a   : > { %v11769_v49 = vpack.c.bf16 %v5366_v8, %v5359_v55 }
 0x81c   : > { %11736 = vmatpush3.bf16.msra.mxu1 %v11733_v1  ;;  %v5372_v1 = vsub.f32 %v5370_v37, %v5371_v60 }
 0x81d   : > { %11738 = vmatprep.subr.bf16.mxu1 %v13820_v10 }
 0x81e   : > { %v5373_v4 = vand.u32 4294901760, %v5372_v1 }
 0x81f   : > { %10640 = vmatmul.mubr.f32.vlgmr.msra.gmra.mrb[10].mxu1 %v4811_v42  ;;  %v11793_v42 = vpack.c.bf16 %v5364_v2, %v5357_v5 }
 0x820   : > { %11740 = vmatpush3.bf16.msra.mxu1 %v13820_v10  ;;  %10650 = vmatprep.mubr.f32.mxu1 %v4802_v17  ;;  %v5889_v17 = vsub.f32 %v13795_v32, %v5888_v61 }
 0x821   : > { %11742 = vmatprep.subr.bf16.mxu1 %v13830_v22 }
 0x822   : > { %v5890_v25 = vand.u32 4294901760, %v5889_v17 }
 0x824   : > { %11744 = vmatpush3.bf16.msra.mxu1 %v13830_v22 }
 0x825   : > { %11746 = vmatprep.subr.bf16.mxu1 %v11745_v13 }
 0x827   : > { %10651 = vmatmul.mubr.f32.vlgmr.msra.gmra.mrb[10].mxu1 %v4812_v16  ;;  %v5880_v16 = vand.u32 4294901760, %v13793_v23 }
 0x828   : > { %11748 = vmatpush3.bf16.msra.mxu1 %v11745_v13  ;;  %10661 = vmatprep.mubr.f32.mxu1 %v4800_v11  ;;  %v5379_v13 = vsub.f32 %v5377_v46, %v5378_v3 }
 0x829   : > { %11750 = vmatprep.subr.bf16.mxu1 %v11749_v33 }
 0x82a   : > { %v5380_v59 = vand.u32 4294901760, %v5379_v13 }
 0x82c   : > { %11752 = vmatpush3.bf16.msra.mxu1 %v11749_v33  ;;  %v5338_v33 = vand.u32 4294901760, %v5337_v9 }
 0x82d   : > { %11754 = vmatprep.subr.bf16.mxu1 %v13820_v10 }
 0x82f   : > { %10662 = vmatmul.mubr.f32.vlgmr.msra.gmra.mrb[10].mxu1 %v13839_v47 }
 0x830   : > { %11756 = vmatpush3.bf16.msra.mxu1 %v13820_v10  ;;  %10672 = vmatprep.mubr.f32.mxu1 %v4800_v11  ;;  %v5347_v10 = vsub.f32 %v5345_v20, %v5346_v27  ;;  %v11777_v11 = vpack.c.bf16 %v5363_v36, %v5356_v44 }
 0x831   : > { %11758 = vmatprep.subr.bf16.mxu1 %v13830_v22 }
 0x832   : > { %v5348_v29 = vand.u32 4294901760, %v5347_v10 }
 0x834   : > { %11760 = vmatpush3.bf16.msra.mxu1 %v13830_v22  ;;  %v11773_v22 = vpack.c.bf16 %v5380_v59, %v5373_v4 }
 0x835   : > { %11762 = vmatprep.subr.bf16.mxu1 %v11761_v52 }
 0x837   : > { %10673 = vmatmul.mubr.f32.vlgmr.msra.gmra.mrb[10].mxu1 %v13839_v47  ;;  %v11781_v47 = vpack.c.bf16 %v5377_v46, %v5370_v37 }
 0x838   : > { %11764 = vmatpush3.bf16.msra.mxu1 %v11761_v52  ;;  %10683 = vmatprep.mubr.f32.mxu1 %v5338_v33 }
 0x839   : > { %11766 = vmatprep.subr.bf16.mxu1 %v11765_v18 }
 0x83c   : > { %11768 = vmatpush3.bf16.msra.mxu1 %v11765_v18 }
 0x83d   : > { %11770 = vmatprep.subr.bf16.mxu1 %v11769_v49 }
 0x83f   : > { %10684 = vmatmul.mubr.f32.vlgmr.msra.gmra.mrb[10].mxu1 %v5348_v29 }
 0x840   : > { %11772 = vmatpush3.bf16.msra.mxu1 %v11769_v49  ;;  %10694 = vmatprep.mubr.f32.mxu1 %v13856_v7 }
 0x841   : > { %11774 = vmatprep.subr.bf16.mxu1 %v11773_v22 }
 0x844   : > { %11776 = vmatpush3.bf16.msra.mxu1 %v11773_v22 }
 0x845   : > { %11778 = vmatprep.subr.bf16.mxu1 %v11777_v11 }
 0x847   : > { %10695 = vmatmul.mubr.f32.vlgmr.msra.gmra.mrb[10].mxu1 %v13867_v40 }
 0x848   : > { %11780 = vmatpush3.bf16.msra.mxu1 %v11777_v11  ;;  %10705 = vmatprep.mubr.f32.mxu1 %v5335_v28 }
 0x849   : > { %11782 = vmatprep.subr.bf16.mxu1 %v11781_v47 }
 0x84c   : > { %11784 = vmatpush3.bf16.msra.mxu1 %v11781_v47 }
 0x84d   : > { %11786 = vmatprep.subr.bf16.mxu1 %v11761_v52 }
 0x84f   : > { %10706 = vmatmul.mubr.f32.vlgmr.msra.gmra.mrb[10].mxu1 %v5345_v20 }
 0x850   : > { %11788 = vmatpush3.bf16.msra.mxu1 %v11761_v52  ;;  %10716 = vmatprep.mubr.f32.mxu1 %v5336_v21 }
 0x851   : > { %11790 = vmatprep.subr.bf16.mxu1 %v11765_v18 }
 0x854   : > { %11792 = vmatpush3.bf16.msra.mxu1 %v11765_v18 }
 0x855   : > { %11794 = vmatprep.subr.bf16.mxu1 %v11793_v42 }
 0x857   : > { %10717 = vmatmul.mubr.f32.vlgmr.msra.gmra.mrb[10].mxu1 %v5346_v27 }
 0x858   : > { %11796 = vmatpush3.bf16.msra.mxu1 %v11793_v42  ;;  %10727 = vmatprep.mubr.f32.mxu1 %v13856_v7 }
 0x859   : > { %11798 = vmatprep.subr.bf16.mxu1 %v11797_v34 }
 0x85c   : > { %11800 = vmatpush3.bf16.msra.mxu1 %v11797_v34 }
 0x85d   : > { %11802 = vmatprep.subr.bf16.mxu1 %v11761_v52 }
 0x85f   : > { %10728 = vmatmul.mubr.f32.vlgmr.msra.gmra.mrb[10].mxu1 %v13867_v40 }
 0x860   : > { %11804 = vmatpush3.bf16.msra.mxu1 %v11761_v52  ;;  %10738 = vmatprep.mubr.f32.mxu1 %v13856_v7 }
 0x861   : > { %11806 = vmatprep.subr.bf16.mxu1 %v11765_v18 }
 0x864   : > { %11808 = vmatpush3.bf16.msra.mxu1 %v11765_v18 }
 0x865   : > { %11810 = vmatprep.subr.bf16.mxu1 %v13764_v30 }
 0x867   : > { %10739 = vmatmul.mubr.f32.vlgmr.msra.gmra.mrb[10].mxu1 %v13867_v40 }
 0x868   : > { %10745 = vmatprep.mubr.f32.mxu1 %v5880_v16 }
 0x86d   : > { %11812 = vmatpush3.bf16.xpose.msra.mxu1 %v13764_v30 }
 0x874   : > { %10746 = vmatmul.mubr.f32.vlgmr.msra.gmra.mrb[12].mxu1 %v5890_v25 }
 0x947   : > { %v10747_v24 = vpop.f32.mrb[12].mxu1 }
 0x948   : > { %v12009_v31 = vadd.f32 %v13834_v12, %v10747_v24  ;;  %v5882_v58 = vpop.f32.mrb[13].mxu1 }
 0x949   : > { %v12010_v35 = vadd.f32 %v13836_v19, %v5882_v58 }
 0x94a   : > { %v6312_v43 = vmul.f32 0.17677669, %v12009_v31 }
 0x94b   : > { %v6311_v26 = vmul.f32 0.17677669, %v12010_v35 }
 0x94c   : > { %v6314_v23 = vsel %vm3123_vm3, -1e+09, %v6312_v43 }
 0x94d   : > { %v6318_v6 = vsel %vm3126_vm2, %v6314_v23, -inf  ;;  %v6313_v30 = vsel %vm3122_vm1, -1e+09, %v6311_v26 }
 0x94e   : > { %6319 = vmax.xlane.f32.xlu1 %v6318_v6  ;;  %v6315_v32 = vsel %vm3126_vm2, %v6313_v30, -inf }
 0x94f   : > { %6316 = vmax.xlane.f32.xlu0 %v6315_v32 }
 0x95f   : > { %6339 = vrot.lane.b32.xlu1 %v13710_v56, %s12384_s24 }
 0x963   : > { %7395 = vrot.lane.b32.xlu1 %v13628_v14, %s12385_s27 }
 0x967   : > { %7397 = vrot.lane.b32.xlu1 %v13624_v48, %s12385_s27 }
 0x96b   : > { %7393 = vrot.lane.b32.xlu1 %v13611_v39, %s12385_s27 }
 0x9db   : > { %v6320_v61 = vpop.xlane.xlu1 %6319 }
 0x9dc   : > { %v6322_v12 = vsub.f32 %v6314_v23, %v6320_v61  ;;  %v6317_v19 = vpop.xlane.xlu0 %6316 }
 0x9dd   : > { %v6321_v53 = vsub.f32 %v6313_v30, %v6317_v19 }
 0x9de   : > { %v6325_v7 = vmul.f32 1.442695, %v6322_v12 }
 0x9df   : > { %v6323_v0 = vmul.f32 1.442695, %v6321_v53  ;;  %v6340_v39 = vpop.permute.xlu1 %6339 }
 0x9e0   : > { %12231 = vpow2.f32 %v6325_v7  ;;  %v6353_v50 = vand.u32 4294901760, %v6340_v39 }
 0x9e1   : > { %12233 = vpow2.f32 %v6323_v0 }
 0x9e2   : > { %v6445_v36 = vsub.f32 %v6340_v39, %v6353_v50 }
 0x9e3   : > { %v7396_v11 = vpop.permute.xlu1 %7395 }
 0x9e4   : > { %v6446_v40 = vand.u32 4294901760, %v6445_v36  ;;  %v7403_v17 = vsel %vm2605_vm0, %v7396_v11, 0 }
 0x9e5   : > { %v7408_v31 = vand.u32 4294901760, %v7403_v17 }
 0x9e6   : > { %v6447_v20 = vsub.f32 %v6445_v36, %v6446_v40 }
 0x9e7   : > { %v7398_v47 = vpop.permute.xlu1 %7397  ;;  %v7496_v26 = vsub.f32 %v7403_v17, %v7408_v31 }
 0x9e8   : > { %v6448_v27 = vand.u32 4294901760, %v6447_v20  ;;  %v7405_v16 = vsel %vm2605_vm0, %v7398_v47, 0 }
 0x9e9   : > { %v7411_v24 = vand.u32 4294901760, %v7405_v16  ;;  %v7497_v32 = vand.u32 4294901760, %v7496_v26 }
 0x9ea   : > { %v12232_v63 = vpop.eup %12231 }
 0x9eb   : > { %v6330_v15 = vsel %vm3126_vm2, %v12232_v63, 0.0  ;;  %v12234_v54 = vpop.eup %12233  ;;  %v7503_v35 = vsub.f32 %v7405_v16, %v7411_v24  ;;  %v7394_v43 = vpop.permute.xlu1 %7393  ;;  %v11905_v19 = vpack.c.bf16 %v7411_v24, %v7408_v31  ;;  %v7498_v7 = vsub.f32 %v7496_v26, %v7497_v32 }
 0x9ec   : > { %6331 = vadd.xlane.f32.xlu0 %v6330_v15  ;;  %v6327_v14 = vsel %vm3126_vm2, %v12234_v54, 0.0  ;;  %v7401_v6 = vsel %vm2605_vm0, %v7394_v43, 0 }
 0x9ed   : > { %v7504_v30 = vand.u32 4294901760, %v7503_v35  ;;  %v7484_v61 = vand.u32 4294901760, %v7401_v6  ;;  %v7499_v39 = vand.u32 4294901760, %v7498_v7 }
 0x9ef   : > { %v7505_v53 = vsub.f32 %v7503_v35, %v7504_v30  ;;  %v7485_v0 = vsub.f32 %v7401_v6, %v7484_v61 }
 0x9f0   : > { %6328 = vadd.xlane.f32.xlu0 %v6327_v14 }
 0x9f1   : > { %v7506_v15 = vand.u32 4294901760, %v7505_v53 }
 0xa06   : > { %6337 = vrot.lane.b32.xlu0 %v13712_v51, %s12384_s24 }
 0xa0a   : > { %7391 = vrot.lane.b32.xlu0 %v13588_v38, %s12385_s27 }
 0xa79   : > { %v6332_v48 = vpop.xlane.xlu0 %6331 }
 0xa7a   : > { %12235 = vrcp.f32 %v6332_v48  ;;  %v11909_v48 = vpack.c.bf16 %v7506_v15, %v7499_v39 }
 0xa7d   : > { %v6329_v44 = vpop.xlane.xlu0 %6328 }
 0xa7e   : > { %12237 = vrcp.f32 %v6329_v44 }
 0xa81   : > { %v6338_v28 = vpop.permute.xlu0 %6337 }
 0xa82   : > { %v6350_v5 = vand.u32 4294901760, %v6338_v28 }
 0xa84   : > { %v12236_v2 = vpop.eup %12235  ;;  %v13910_v37 = vpack.c.bf16 %v6353_v50, %v6350_v5  ;;  %v6438_v46 = vsub.f32 %v6338_v28, %v6350_v5  ;;  %v11921_v28 = vpack.c.bf16 %v7504_v30, %v7497_v32  ;;  %v6852_v5 = vld [vmem:[%s14019_s8 + $0x48] sm:$0xff] }
 0xa85   : > { %v6336_v21 = vmul.f32 %v12236_v2, %v12232_v63  ;;  %v7392_v34 = vpop.permute.xlu0 %7391 }
 0xa86   : > { %v6439_v52 = vand.u32 4294901760, %v6438_v46  ;;  %11834 = vmatprep.subr.bf16.mxu0 %v13910_v37  ;;  %v11841_v22 = vpack.c.bf16 %v6445_v36, %v6438_v46  ;;  %v7399_v25 = vsel %vm2605_vm0, %v7392_v34, 0  ;;  %v11913_v36 = vpack.c.bf16 %v7503_v35, %v7496_v26 }
 0xa87   : > { %11836 = vmatpush3.bf16.msra.mxu0 %v13910_v37  ;;  %v6347_v38 = vsel %vm3126_vm2, %v6336_v21, 0  ;;  %v7474_v58 = vand.u32 4294901760, %v7399_v25 }
 0xa88   : > { %v12238_v57 = vpop.eup %12237  ;;  %v6440_v62 = vsub.f32 %v6438_v46, %v6439_v52  ;;  %v13915_v60 = vand.u32 4294901760, %v6347_v38  ;;  %v11849_v42 = vpack.c.bf16 %v6446_v40, %v6439_v52  ;;  %v6851_v40 = vld [vmem:[%s14019_s8 + $0x40] sm:$0xff]  ;;  %v6853_v52 = vld [vmem:[%s14019_s8 + $0x50] sm:$0xff] }
 0xa89   : > { %v6334_v3 = vmul.f32 %v12238_v57, %v12234_v54  ;;  %v7475_v23 = vsub.f32 %v7399_v25, %v7474_v58  ;;  %v7486_v54 = vand.u32 4294901760, %v7485_v0  ;;  %v6862_v2 = vand.u32 4294901760, %v6851_v40 }
 0xa8a   : > { %v6441_v9 = vand.u32 4294901760, %v6440_v62  ;;  %v6427_v18 = vsub.f32 %v6347_v38, %v13915_v60  ;;  %v6854_v38 = vld [vmem:[%s14019_s8 + $0x58] sm:$0xff]  ;;  %v6868_v57 = vand.u32 4294901760, %v6853_v52 }
 0xa8b   : > { %v6344_v55 = vsel %vm3126_vm2, %v6334_v3, 0  ;;  %v7476_v12 = vand.u32 4294901760, %v7475_v23  ;;  %v7487_v50 = vsub.f32 %v7485_v0, %v7486_v54  ;;  %v6952_v21 = vsub.f32 %v6851_v40, %v6862_v2 }
 0xa8c   : > { %v11837_v8 = vpack.c.bf16 %v6448_v27, %v6441_v9  ;;  %v6416_v1 = vand.u32 4294901760, %v6344_v55  ;;  %v6428_v13 = vand.u32 4294901760, %v6427_v18  ;;  %v6871_v62 = vand.u32 4294901760, %v6854_v38 }
 0xa8d   : > { %v7477_v63 = vsub.f32 %v7475_v23, %v7476_v12  ;;  %v7488_v44 = vand.u32 4294901760, %v7487_v50 }
 0xa8e   : > { %11838 = vmatprep.subr.bf16.mxu0 %v11837_v8  ;;  %v6417_v33 = vsub.f32 %v6344_v55, %v6416_v1  ;;  %v6429_v49 = vsub.f32 %v6427_v18, %v6428_v13  ;;  %v13946_v9 = vpack.c.bf16 %v6871_v62, %v6868_v57  ;;  %v6966_v55 = vsub.f32 %v6853_v52, %v6868_v57 }
 0xa8f   : > { %v7478_v14 = vand.u32 4294901760, %v7477_v63 }
 0xa90   : > { %v6418_v10 = vand.u32 4294901760, %v6417_v33  ;;  %v6430_v29 = vand.u32 4294901760, %v6429_v49 }
 0xa92   : > { %v6419_v4 = vsub.f32 %v6417_v33, %v6418_v10 }
 0xa94   : > { %v6420_v59 = vand.u32 4294901760, %v6419_v4 }
 0xa96   : > { %10787 = vmatprep.mubr.f32.mxu0 %v6420_v59 }
 0xa97   : > { %10788 = vmatmul.mubr.f32.vlgmr.msra.gmra.mrb[8].mxu0 %v6430_v29 }
 0xa98   : > { %11840 = vmatpush3.bf16.msra.mxu0 %v11837_v8  ;;  %10794 = vmatprep.mubr.f32.mxu0 %v6416_v1  ;;  %v6973_v8 = vsub.f32 %v6854_v38, %v6871_v62 }
 0xa99   : > { %11842 = vmatprep.subr.bf16.mxu0 %v11841_v22 }
 0xa9f   : > { %10795 = vmatmul.mubr.f32.vlgmr.msra.gmra.mrb[8].mxu0 %v13915_v60 }
 0xaa0   : > { %11844 = vmatpush3.bf16.msra.mxu0 %v11841_v22  ;;  %10801 = vmatprep.mubr.f32.mxu0 %v6417_v33  ;;  %v6967_v33 = vand.u32 4294901760, %v6966_v55 }
 0xaa1   : > { %11846 = vmatprep.subr.bf16.mxu0 %v13910_v37 }
 0xaa2   : > { %v6968_v4 = vsub.f32 %v6966_v55, %v6967_v33 }
 0xaa4   : > { %v6969_v29 = vand.u32 4294901760, %v6968_v4 }
 0xaa7   : > { %10802 = vmatmul.mubr.f32.vlgmr.msra.gmra.mrb[8].mxu0 %v6427_v18 }
 0xaa8   : > { %11848 = vmatpush3.bf16.msra.mxu0 %v13910_v37  ;;  %10808 = vmatprep.mubr.f32.mxu0 %v6418_v10  ;;  %v6974_v10 = vand.u32 4294901760, %v6973_v8 }
 0xaa9   : > { %11850 = vmatprep.subr.bf16.mxu0 %v11849_v42 }
 0xaaa   : > { %v6975_v59 = vsub.f32 %v6973_v8, %v6974_v10  ;;  %v11893_v16 = vpack.c.bf16 %v6974_v10, %v6967_v33 }
 0xaac   : > { %v6976_v22 = vand.u32 4294901760, %v6975_v59 }
 0xaae   : > { %v11869_v11 = vpack.c.bf16 %v6976_v22, %v6969_v29 }
 0xaaf   : > { %10809 = vmatmul.mubr.f32.vlgmr.msra.gmra.mrb[8].mxu0 %v6428_v13 }
 0xab0   : > { %11852 = vmatpush3.bf16.msra.mxu0 %v11849_v42  ;;  %10815 = vmatprep.mubr.f32.mxu0 %v6416_v1  ;;  %v11877_v42 = vpack.c.bf16 %v6973_v8, %v6966_v55 }
 0xab1   : > { %11854 = vmatprep.subr.bf16.mxu0 %v13910_v37 }
 0xab7   : > { %10816 = vmatmul.mubr.f32.vlgmr.msra.gmra.mrb[8].mxu0 %v13915_v60 }
 0xab8   : > { %11856 = vmatpush3.bf16.msra.mxu0 %v13910_v37  ;;  %10822 = vmatprep.mubr.f32.mxu0 %v6416_v1  ;;  %v6865_v37 = vand.u32 4294901760, %v6852_v5 }
 0xab9   : > { %11906 = vmatprep.subr.bf16.mxu0 %v11905_v19 }
 0xaba   : > { %v13936_v46 = vpack.c.bf16 %v6865_v37, %v6862_v2  ;;  %v6959_v20 = vsub.f32 %v6852_v5, %v6865_v37 }
 0xabc   : > { %11858 = vmatprep.subr.bf16.mxu1 %v13936_v46  ;;  %v6960_v3 = vand.u32 4294901760, %v6959_v20  ;;  %v11873_v47 = vpack.c.bf16 %v6959_v20, %v6952_v21 }
 0xabd   : > { %11860 = vmatpush3.bf16.msra.mxu1 %v13936_v46 }
 0xabe   : > { %v6961_v18 = vsub.f32 %v6959_v20, %v6960_v3  ;;  %11862 = vmatprep.subr.bf16.mxu1 %v13946_v9 }
 0xabf   : > { %10823 = vmatmul.mubr.f32.vlgmr.msra.gmra.mrb[8].mxu0 %v13915_v60  ;;  %v6953_v60 = vand.u32 4294901760, %v6952_v21 }
 0xac0   : > { %10895 = vmatprep.mubr.f32.mxu0 %v7478_v14  ;;  %v6962_v13 = vand.u32 4294901760, %v6961_v18 }
 0xac1   : > { %11908 = vmatpush3.bf16.xpose.msra.mxu0 %v11905_v19  ;;  %v6954_v27 = vsub.f32 %v6952_v21, %v6953_v60  ;;  %11864 = vmatpush3.bf16.msra.mxu1 %v13946_v9  ;;  %v11889_v34 = vpack.c.bf16 %v6960_v3, %v6953_v60 }
 0xac2   : > { %11910 = vmatprep.subr.bf16.mxu0 %v11909_v48 }
 0xac3   : > { %v6955_v1 = vand.u32 4294901760, %v6954_v27 }
 0xac5   : > { %v11865_v49 = vpack.c.bf16 %v6962_v13, %v6955_v1 }
 0xac7   : > { %11866 = vmatprep.subr.bf16.mxu1 %v11865_v49 }
 0xac8   : > { %10896 = vmatmul.mubr.f32.vlgmr.msra.gmra.mrb[10].mxu0 %v7488_v44 }
 0xac9   : > { %11912 = vmatpush3.bf16.xpose.msra.mxu0 %v11909_v48  ;;  %10902 = vmatprep.mubr.f32.mxu0 %v7474_v58 }
 0xaca   : > { %11914 = vmatprep.subr.bf16.mxu0 %v11913_v36 }
 0xad0   : > { %10903 = vmatmul.mubr.f32.vlgmr.msra.gmra.mrb[10].mxu0 %v7484_v61 }
 0xad1   : > { %11916 = vmatpush3.bf16.xpose.msra.mxu0 %v11913_v36  ;;  %10909 = vmatprep.mubr.f32.mxu0 %v7475_v23 }
 0xad2   : > { %11918 = vmatprep.subr.bf16.mxu0 %v11905_v19 }
 0xad8   : > { %10910 = vmatmul.mubr.f32.vlgmr.msra.gmra.mrb[10].mxu0 %v7485_v0 }
 0xad9   : > { %11920 = vmatpush3.bf16.xpose.msra.mxu0 %v11905_v19  ;;  %10916 = vmatprep.mubr.f32.mxu0 %v7476_v12 }
 0xada   : > { %11922 = vmatprep.subr.bf16.mxu0 %v11921_v28 }
 0xae0   : > { %10917 = vmatmul.mubr.f32.vlgmr.msra.gmra.mrb[10].mxu0 %v7486_v54 }
 0xae1   : > { %11924 = vmatpush3.bf16.xpose.msra.mxu0 %v11921_v28  ;;  %10923 = vmatprep.mubr.f32.mxu0 %v7474_v58 }
 0xae2   : > { %11926 = vmatprep.subr.bf16.mxu0 %v11905_v19 }
 0xae8   : > { %10924 = vmatmul.mubr.f32.vlgmr.msra.gmra.mrb[10].mxu0 %v7484_v61 }
 0xae9   : > { %11928 = vmatpush3.bf16.xpose.msra.mxu0 %v11905_v19  ;;  %10930 = vmatprep.mubr.f32.mxu0 %v7474_v58 }
 0xaf0   : > { %10931 = vmatmul.mubr.f32.vlgmr.msra.gmra.mrb[10].mxu0 %v7484_v61 }
 0xb92   : > { %v10824_v17 = vpop.f32.mrb[8].mxu0 }
 0xb93   : > { %v6859_v25 = vsel %vm2605_vm0, %v10824_v17, 0  ;;  %v6841_v24 = vpop.f32.mrb[9].mxu0 }
 0xb94   : > { %v6940_v31 = vand.u32 4294901760, %v6859_v25  ;;  %v6856_v58 = vsel %vm2605_vm0, %v6841_v24, 0  ;;  %v8449_v24 = vld [vmem:[%s14019_s8 + $0x60] sm:$0xff] }
 0xb95   : > { %v6930_v35 = vand.u32 4294901760, %v6856_v58 }
 0xb96   : > { %v6941_v43 = vsub.f32 %v6859_v25, %v6940_v31 }
 0xb97   : > { %v6931_v26 = vsub.f32 %v6856_v58, %v6930_v35  ;;  %v8460_v58 = vand.u32 4294901760, %v8449_v24 }
 0xb98   : > { %v6942_v23 = vand.u32 4294901760, %v6941_v43 }
 0xb99   : > { %v6932_v6 = vand.u32 4294901760, %v6931_v26 }
 0xb9a   : > { %v6943_v30 = vsub.f32 %v6941_v43, %v6942_v23 }
 0xb9b   : > { %v6933_v32 = vsub.f32 %v6931_v26, %v6932_v6 }
 0xb9c   : > { %v6944_v12 = vand.u32 4294901760, %v6943_v30  ;;  %v8452_v30 = vld [vmem:[%s14019_s8 + $0x78] sm:$0xff] }
 0xb9d   : > { %v6934_v61 = vand.u32 4294901760, %v6933_v32 }
 0xb9f   : > { %10833 = vmatprep.mubr.f32.mxu1 %v6934_v61  ;;  %v8469_v61 = vand.u32 4294901760, %v8452_v30 }
 0xba0   : > { %10834 = vmatmul.mubr.f32.vlgmr.msra.gmra.mrb[10].mxu1 %v6944_v12 }
 0xba1   : > { %11868 = vmatpush3.bf16.msra.mxu1 %v11865_v49  ;;  %10844 = vmatprep.mubr.f32.mxu1 %v6930_v35 }
 0xba2   : > { %11870 = vmatprep.subr.bf16.mxu1 %v11869_v11 }
 0xba5   : > { %11872 = vmatpush3.bf16.msra.mxu1 %v11869_v11 }
 0xba6   : > { %11874 = vmatprep.subr.bf16.mxu1 %v11873_v47 }
 0xba8   : > { %10845 = vmatmul.mubr.f32.vlgmr.msra.gmra.mrb[10].mxu1 %v6940_v31 }
 0xba9   : > { %11876 = vmatpush3.bf16.msra.mxu1 %v11873_v47  ;;  %10855 = vmatprep.mubr.f32.mxu1 %v6931_v26  ;;  %v8550_v26 = vsub.f32 %v8449_v24, %v8460_v58 }
 0xbaa   : > { %11878 = vmatprep.subr.bf16.mxu1 %v11877_v42 }
 0xbab   : > { %v8551_v12 = vand.u32 4294901760, %v8550_v26 }
 0xbad   : > { %11880 = vmatpush3.bf16.msra.mxu1 %v11877_v42 }
 0xbae   : > { %11882 = vmatprep.subr.bf16.mxu1 %v13936_v46 }
 0xbb0   : > { %10856 = vmatmul.mubr.f32.vlgmr.msra.gmra.mrb[10].mxu1 %v6941_v43 }
 0xbb1   : > { %11884 = vmatpush3.bf16.msra.mxu1 %v13936_v46  ;;  %10866 = vmatprep.mubr.f32.mxu1 %v6932_v6  ;;  %v8451_v6 = vld [vmem:[%s14019_s8 + $0x70] sm:$0xff] }
 0xbb2   : > { %11886 = vmatprep.subr.bf16.mxu1 %v13946_v9  ;;  %v8466_v32 = vand.u32 4294901760, %v8451_v6 }
 0xbb5   : > { %11888 = vmatpush3.bf16.msra.mxu1 %v13946_v9 }
 0xbb6   : > { %11890 = vmatprep.subr.bf16.mxu1 %v11889_v34 }
 0xbb8   : > { %10867 = vmatmul.mubr.f32.vlgmr.msra.gmra.mrb[10].mxu1 %v6942_v23 }
 0xbb9   : > { %11892 = vmatpush3.bf16.msra.mxu1 %v11889_v34  ;;  %10877 = vmatprep.mubr.f32.mxu1 %v6930_v35 }
 0xbba   : > { %11894 = vmatprep.subr.bf16.mxu1 %v11893_v16 }
 0xbbd   : > { %11896 = vmatpush3.bf16.msra.mxu1 %v11893_v16 }
 0xbbe   : > { %11898 = vmatprep.subr.bf16.mxu1 %v13936_v46 }
 0xbc0   : > { %10878 = vmatmul.mubr.f32.vlgmr.msra.gmra.mrb[10].mxu1 %v6940_v31 }
 0xbc1   : > { %11900 = vmatpush3.bf16.msra.mxu1 %v13936_v46  ;;  %10888 = vmatprep.mubr.f32.mxu1 %v6930_v35 }
 0xbc2   : > { %11902 = vmatprep.subr.bf16.mxu1 %v13946_v9 }
 0xbc3   : > { %v10932_v19 = vpop.f32.mrb[10].mxu0 }
 0xbc4   : > { %v7910_v53 = vmul.f32 0.17677669, %v10932_v19  ;;  %v7899_v7 = vpop.f32.mrb[11].mxu0 }
 0xbc5   : > { %v7909_v0 = vmul.f32 0.17677669, %v7899_v7  ;;  %11904 = vmatpush3.bf16.msra.mxu1 %v13946_v9  ;;  %v8552_v7 = vsub.f32 %v8550_v26, %v8551_v12 }
 0xbc6   : > { %v7912_v63 = vsel %vm3123_vm3, -1e+09, %v7910_v53  ;;  %v13990_v53 = vpack.c.bf16 %v8469_v61, %v8466_v32 }
 0xbc7   : > { %v7916_v15 = vsel %vm3126_vm2, %v7912_v63, -inf  ;;  %v7911_v54 = vsel %vm3122_vm1, -1e+09, %v7909_v0 }
 0xbc8   : > { %7917 = vmax.xlane.f32.xlu1 %v7916_v15  ;;  %10889 = vmatmul.mubr.f32.vlgmr.msra.gmra.mrb[10].mxu1 %v6940_v31  ;;  %v7913_v14 = vsel %vm3126_vm2, %v7911_v54, -inf  ;;  %v8450_v31 = vld [vmem:[%s14019_s8 + $0x68] sm:$0xff]  ;;  %v8571_v15 = vsub.f32 %v8452_v30, %v8469_v61 }
 0xbc9   : > { %7914 = vmax.xlane.f32.xlu0 %v7913_v14  ;;  %v8463_v35 = vand.u32 4294901760, %v8450_v31 }
 0xbcb   : > { %v13980_v43 = vpack.c.bf16 %v8463_v35, %v8460_v58  ;;  %v8557_v23 = vsub.f32 %v8450_v31, %v8463_v35 }
 0xbcd   : > { %v8558_v19 = vand.u32 4294901760, %v8557_v23 }
 0xbcf   : > { %v8559_v0 = vsub.f32 %v8557_v23, %v8558_v19 }
 0xbd1   : > { %v8560_v14 = vand.u32 4294901760, %v8559_v0 }
 0xbd9   : > { %7937 = vrot.lane.b32.xlu1 %v13710_v56, %s12385_s27 }
 0xc55   : > { %v7918_v39 = vpop.xlane.xlu1 %7917 }
 0xc56   : > { %v7920_v48 = vsub.f32 %v7912_v63, %v7918_v39  ;;  %v7915_v50 = vpop.xlane.xlu0 %7914  ;;  %v8564_v63 = vsub.f32 %v8451_v6, %v8466_v32 }
 0xc57   : > { %v7919_v44 = vsub.f32 %v7911_v54, %v7915_v50  ;;  %v8553_v54 = vand.u32 4294901760, %v8552_v7 }
 0xc58   : > { %v7923_v36 = vmul.f32 1.442695, %v7920_v48  ;;  %v8565_v39 = vand.u32 4294901760, %v8564_v63  ;;  %v8572_v48 = vand.u32 4294901760, %v8571_v15 }
 0xc59   : > { %v7921_v45 = vmul.f32 1.442695, %v7919_v44  ;;  %v7938_v56 = vpop.permute.xlu1 %7937  ;;  %v11961_v50 = vpack.c.bf16 %v8560_v14, %v8553_v54 }
 0xc5a   : > { %12239 = vpow2.f32 %v7923_v36  ;;  %v7951_v37 = vand.u32 4294901760, %v7938_v56  ;;  %v8566_v44 = vsub.f32 %v8564_v63, %v8565_v39  ;;  %v8573_v36 = vsub.f32 %v8571_v15, %v8572_v48 }
 0xc5b   : > { %12241 = vpow2.f32 %v7921_v45 }
 0xc5c   : > { %v8043_v21 = vsub.f32 %v7938_v56, %v7951_v37  ;;  %v8567_v45 = vand.u32 4294901760, %v8566_v44  ;;  %v11985_v56 = vpack.c.bf16 %v8558_v19, %v8551_v12 }
 0xc5e   : > { %v8044_v52 = vand.u32 4294901760, %v8043_v21 }
 0xc60   : > { %v8045_v9 = vsub.f32 %v8043_v21, %v8044_v52 }
 0xc62   : > { %v8046_v13 = vand.u32 4294901760, %v8045_v9 }
 0xc64   : > { %v12240_v28 = vpop.eup %12239 }
 0xc65   : > { %v7928_v41 = vsel %vm3126_vm2, %v12240_v28, 0.0  ;;  %v12242_v40 = vpop.eup %12241 }
 0xc66   : > { %7929 = vadd.xlane.f32.xlu0 %v7928_v41  ;;  %v7925_v5 = vsel %vm3126_vm2, %v12242_v40, 0.0 }
 0xc6a   : > { %7926 = vadd.xlane.f32.xlu0 %v7925_v5  ;;  %v11973_v5 = vpack.c.bf16 %v8571_v15, %v8564_v63 }
 0xc80   : > { %7935 = vrot.lane.b32.xlu0 %v13712_v51, %s12385_s27 }
 0xcf3   : > { %v7930_v2 = vpop.xlane.xlu0 %7929 }
 0xcf4   : > { %12243 = vrcp.f32 %v7930_v2  ;;  %v11989_v2 = vpack.c.bf16 %v8572_v48, %v8565_v39 }
 0xcf7   : > { %v7927_v46 = vpop.xlane.xlu0 %7926 }
 0xcf8   : > { %12245 = vrcp.f32 %v7927_v46 }
 0xcfb   : > { %v7936_v20 = vpop.permute.xlu0 %7935 }
 0xcfc   : > { %v7948_v38 = vand.u32 4294901760, %v7936_v20 }
 0xcfe   : > { %v12244_v57 = vpop.eup %12243  ;;  %v11929_v62 = vpack.c.bf16 %v7951_v37, %v7948_v38  ;;  %v8036_v60 = vsub.f32 %v7936_v20, %v7948_v38 }
 0xcff   : > { %v7934_v3 = vmul.f32 %v12244_v57, %v12240_v28  ;;  %v8574_v28 = vand.u32 4294901760, %v8573_v36 }
 0xd00   : > { %v8037_v27 = vand.u32 4294901760, %v8036_v60  ;;  %11930 = vmatprep.subr.bf16.mxu1 %v11929_v62  ;;  %v11937_v17 = vpack.c.bf16 %v8043_v21, %v8036_v60 }
 0xd01   : > { %11932 = vmatpush3.bf16.msra.mxu1 %v11929_v62  ;;  %v7945_v51 = vsel %vm3126_vm2, %v7934_v3, 0  ;;  %v11965_v41 = vpack.c.bf16 %v8574_v28, %v8567_v45 }
 0xd02   : > { %v12246_v18 = vpop.eup %12245  ;;  %v8038_v55 = vsub.f32 %v8036_v60, %v8037_v27  ;;  %v8024_v8 = vand.u32 4294901760, %v7945_v51  ;;  %v11945_v25 = vpack.c.bf16 %v8044_v52, %v8037_v27 }
 0xd03   : > { %v7932_v1 = vmul.f32 %v12246_v18, %v12242_v40  ;;  %v11969_v40 = vpack.c.bf16 %v8557_v23, %v8550_v26 }
 0xd04   : > { %v8039_v33 = vand.u32 4294901760, %v8038_v55  ;;  %v8025_v10 = vsub.f32 %v7945_v51, %v8024_v8  ;;  %v9144_v55 = vld [vmem:[#allocation7] ss:$0 sm:$0xff] }
 0xd05   : > { %v7942_v49 = vsel %vm3126_vm2, %v7932_v1, 0 }
 0xd06   : > { %v11933_v4 = vpack.c.bf16 %v8046_v13, %v8039_v33  ;;  %v8014_v59 = vand.u32 4294901760, %v7942_v49  ;;  %v8026_v29 = vand.u32 4294901760, %v8025_v10 }
 0xd08   : > { %11934 = vmatprep.subr.bf16.mxu1 %v11933_v4  ;;  %v8015_v22 = vsub.f32 %v7942_v49, %v8014_v59  ;;  %v8027_v47 = vsub.f32 %v8025_v10, %v8026_v29 }
 0xd0a   : > { %v8016_v11 = vand.u32 4294901760, %v8015_v22  ;;  %v8028_v16 = vand.u32 4294901760, %v8027_v47 }
 0xd0c   : > { %v8017_v42 = vsub.f32 %v8015_v22, %v8016_v11 }
 0xd0e   : > { %v8018_v34 = vand.u32 4294901760, %v8017_v42 }
 0xd10   : > { %10937 = vmatprep.mubr.f32.mxu1 %v8018_v34 }
 0xd11   : > { %10938 = vmatmul.mubr.f32.vlgmr.msra.gmra.mrb[14].mxu1 %v8028_v16 }
 0xd12   : > { %11936 = vmatpush3.bf16.msra.mxu1 %v11933_v4  ;;  %10944 = vmatprep.mubr.f32.mxu1 %v8014_v59 }
 0xd13   : > { %11938 = vmatprep.subr.bf16.mxu1 %v11937_v17 }
 0xd19   : > { %10945 = vmatmul.mubr.f32.vlgmr.msra.gmra.mrb[14].mxu1 %v8024_v8 }
 0xd1a   : > { %11940 = vmatpush3.bf16.msra.mxu1 %v11937_v17  ;;  %10951 = vmatprep.mubr.f32.mxu1 %v8015_v22 }
 0xd1b   : > { %11942 = vmatprep.subr.bf16.mxu1 %v11929_v62 }
 0xd21   : > { %10952 = vmatmul.mubr.f32.vlgmr.msra.gmra.mrb[14].mxu1 %v8025_v10 }
 0xd22   : > { %11944 = vmatpush3.bf16.msra.mxu1 %v11929_v62  ;;  %10958 = vmatprep.mubr.f32.mxu1 %v8016_v11 }
 0xd23   : > { %11946 = vmatprep.subr.bf16.mxu1 %v11945_v25 }
 0xd29   : > { %10959 = vmatmul.mubr.f32.vlgmr.msra.gmra.mrb[14].mxu1 %v8026_v29 }
 0xd2a   : > { %11948 = vmatpush3.bf16.msra.mxu1 %v11945_v25  ;;  %10965 = vmatprep.mubr.f32.mxu1 %v8014_v59 }
 0xd2b   : > { %11950 = vmatprep.subr.bf16.mxu1 %v11929_v62 }
 0xd31   : > { %10966 = vmatmul.mubr.f32.vlgmr.msra.gmra.mrb[14].mxu1 %v8024_v8 }
 0xd32   : > { %11952 = vmatpush3.bf16.msra.mxu1 %v11929_v62  ;;  %10972 = vmatprep.mubr.f32.mxu1 %v8014_v59 }
 0xd33   : > { %11954 = vmatprep.subr.bf16.mxu1 %v13980_v43 }
 0xd39   : > { %10973 = vmatmul.mubr.f32.vlgmr.msra.gmra.mrb[14].mxu1 %v8024_v8 }
 0xd3a   : > { %11956 = vmatpush3.bf16.msra.mxu1 %v13980_v43 }
 0xd3b   : > { %11958 = vmatprep.subr.bf16.mxu1 %v13990_v53 }
 0xd3e   : > { %11960 = vmatpush3.bf16.msra.mxu1 %v13990_v53 }
 0xd3f   : > { %11962 = vmatprep.subr.bf16.mxu1 %v11961_v50 }
 0xe0c   : > { %v10974_v37 = vpop.f32.mrb[14].mxu1 }
 0xe0d   : > { %v8457_v46 = vsel %vm2605_vm0, %v10974_v37, 0  ;;  %v8439_v21 = vpop.f32.mrb[15].mxu1 }
 0xe0e   : > { %v8538_v20 = vand.u32 4294901760, %v8457_v46  ;;  %v8454_v52 = vsel %vm2605_vm0, %v8439_v21, 0 }
 0xe0f   : > { %v8528_v38 = vand.u32 4294901760, %v8454_v52 }
 0xe10   : > { %v8539_v57 = vsub.f32 %v8457_v46, %v8538_v20 }
 0xe11   : > { %v8529_v62 = vsub.f32 %v8454_v52, %v8528_v38 }
 0xe12   : > { %v8540_v60 = vand.u32 4294901760, %v8539_v57 }
 0xe13   : > { %v8530_v3 = vand.u32 4294901760, %v8529_v62 }
 0xe14   : > { %v8541_v9 = vsub.f32 %v8539_v57, %v8540_v60 }
 0xe15   : > { %v8531_v27 = vsub.f32 %v8529_v62, %v8530_v3 }
 0xe16   : > { %v8542_v18 = vand.u32 4294901760, %v8541_v9 }
 0xe17   : > { %v8532_v51 = vand.u32 4294901760, %v8531_v27 }
 0xe19   : > { %10983 = vmatprep.mubr.f32.mxu1 %v8532_v51 }
 0xe1a   : > { %10984 = vmatmul.mubr.f32.vlgmr.msra.gmra.mrb[10].mxu1 %v8542_v18 }
 0xe1b   : > { %11964 = vmatpush3.bf16.msra.mxu1 %v11961_v50  ;;  %10994 = vmatprep.mubr.f32.mxu1 %v8528_v38 }
 0xe1c   : > { %11966 = vmatprep.subr.bf16.mxu1 %v11965_v41 }
 0xe1f   : > { %11968 = vmatpush3.bf16.msra.mxu1 %v11965_v41 }
 0xe20   : > { %11970 = vmatprep.subr.bf16.mxu1 %v11969_v40 }
 0xe22   : > { %10995 = vmatmul.mubr.f32.vlgmr.msra.gmra.mrb[10].mxu1 %v8538_v20 }
 0xe23   : > { %11972 = vmatpush3.bf16.msra.mxu1 %v11969_v40  ;;  %11005 = vmatprep.mubr.f32.mxu1 %v8529_v62 }
 0xe24   : > { %11974 = vmatprep.subr.bf16.mxu1 %v11973_v5 }
 0xe27   : > { %11976 = vmatpush3.bf16.msra.mxu1 %v11973_v5 }
 0xe28   : > { %11978 = vmatprep.subr.bf16.mxu1 %v13980_v43 }
 0xe2a   : > { %11006 = vmatmul.mubr.f32.vlgmr.msra.gmra.mrb[10].mxu1 %v8539_v57 }
 0xe2b   : > { %11980 = vmatpush3.bf16.msra.mxu1 %v13980_v43  ;;  %11016 = vmatprep.mubr.f32.mxu1 %v8530_v3 }
 0xe2c   : > { %11982 = vmatprep.subr.bf16.mxu1 %v13990_v53 }
 0xe2f   : > { %11984 = vmatpush3.bf16.msra.mxu1 %v13990_v53 }
 0xe30   : > { %11986 = vmatprep.subr.bf16.mxu1 %v11985_v56 }
 0xe32   : > { %11017 = vmatmul.mubr.f32.vlgmr.msra.gmra.mrb[10].mxu1 %v8540_v60 }
 0xe33   : > { %11988 = vmatpush3.bf16.msra.mxu1 %v11985_v56  ;;  %11027 = vmatprep.mubr.f32.mxu1 %v8528_v38 }
 0xe34   : > { %11990 = vmatprep.subr.bf16.mxu1 %v11989_v2 }
 0xe37   : > { %11992 = vmatpush3.bf16.msra.mxu1 %v11989_v2 }
 0xe38   : > { %11994 = vmatprep.subr.bf16.mxu1 %v13980_v43 }
 0xe3a   : > { %11028 = vmatmul.mubr.f32.vlgmr.msra.gmra.mrb[10].mxu1 %v8538_v20 }
 0xe3b   : > { %11996 = vmatpush3.bf16.msra.mxu1 %v13980_v43  ;;  %11038 = vmatprep.mubr.f32.mxu1 %v8528_v38 }
 0xe3c   : > { %11998 = vmatprep.subr.bf16.mxu1 %v13990_v53 }
 0xe3f   : > { %12000 = vmatpush3.bf16.msra.mxu1 %v13990_v53 }
 0xe42   : > { %11039 = vmatmul.mubr.f32.vlgmr.msra.gmra.mrb[10].mxu1 %v8538_v20 }
 0xf15   : > { %v11040_v8 = vpop.f32.mrb[10].mxu1 }
 0xf16   : > { %v8997_v1 = vadd.f32 %v11040_v8, %v9144_v55  ;;  %v8977_v13 = vpop.f32.mrb[11].mxu1 }
 0xf17   : > { %v8996_v33 = vadd.f32 %v9144_v55, %v8977_v13 }
 0xf18   : > { %8999 = vst [vmem:[%s477_s29 + $0x8] sm:$0xff] %v8997_v1 }
 0xf19   : > { %8998 = vst [vmem:[%s477_s29] sm:$0xff] %v8996_v33 }
 0xf1a PF: > { %s24_s17 = sadd.s32 1, %s12377_s17  }
 0xf1b   : > { %p21_p11 = scmp.ge.s32.totalorder %s24_s17, 4  }
 0xf1d   :  { %23 = sbr.rel (!%p21_p11) target bundleno = 3 (0x3), region = 117 }
 0xf24   :  { %9021 = vsyncpa [#allocation3], 1 }
 0xf25   :  { %9023 = vsyncpa [#allocation3 + $0x1], 1 }
 0xf26   :  { %9024 = vsyncpa [#allocation5], 1 }
 0xf27   :  { %9025 = vsyncpa [#allocation8], 1 }

// kernel: transformer_forward.28
= control target key start
LH: loop header
LB: loop body
LE: loop exit
PB: predicated region body
PF: predicated region fallthrough
CT: control target
= control target key end

     0   :  { %s12177_s17 = smov 0   ;;  %s13629_s0 = inlined_call_operand.vmem [shape: f32[2,16,128], index: 0, kind: input, shape index: {}, may-alias: {0,1}]   ;;  %s13630_s1 = inlined_call_operand.vmem [shape: f32[2,16,128], index: 1, kind: input, shape index: {}, may-alias: {0,1}]   ;;  %s13631_s2 = inlined_call_operand.vmem [shape: f32[128,128], index: 2, kind: input, shape index: {}]   ;;  %s13632_s3 = inlined_call_operand.vmem [shape: f32[1,128], index: 3, kind: input, shape index: {}]   ;;  %s13633_s4 = inlined_call_operand.vmem [shape: f32[128,128], index: 4, kind: input, shape index: {}]   ;;  %s13634_s5 = inlined_call_operand.vmem [shape: f32[1,128], index: 5, kind: input, shape index: {}]   ;;  %s13635_s6 = inlined_call_operand.vmem [shape: f32[128,128], index: 6, kind: input, shape index: {}]   ;;  %s13636_s7 = inlined_call_operand.vmem [shape: f32[1,128], index: 7, kind: input, shape index: {}]   ;;  %s13637_s8 = inlined_call_operand.vmem [shape: f32[128,128], index: 8, kind: input, shape index: {}]   ;;  %s13638_s9 = inlined_call_operand.vmem [shape: f32[1,128], index: 9, kind: input, shape index: {}]   ;;  %s13639_s10 = inlined_call_operand.vmem [shape: s32[2,16,16], index: 10, kind: input, shape index: {}]   ;;  %s13640_s11 = inlined_call_operand.vmem [shape: f32[2,16,128], index: 11, kind: output, shape index: {}]  }
   0x1 LB: > { %s9028_s18 = sadd.s32 4294967295, %s12112_s17   ;;  %p9032_p0 = scmp.ge.s32.totalorder %s12112_s17, 1  ;;  %s12112_s17 = sphi %s12177_s17, %s21_s17  }
   0x2   : > { %p357_p1 = scmp.lt.s32.totalorder %s12112_s17, 3 }
   0x4   : > { %p358_p2 = pnand %p9032_p0, %p357_p1 }
   0x6   : > { %361 = sbr.rel (%p358_p2) target bundleno = 3763 (0xeb3), region = 64 }
   0xd   : > { %v12188_v0 = vld [vmem:[%s13631_s2] sm:$0xff]  ;;  %v12193_v1 = vld [vmem:[%s13631_s2 + $0x8] sm:$0xff]  ;;  %v12198_v2 = vld [vmem:[%s13631_s2 + $0x10] sm:$0xff]  ;;  %p12269_p3 = scmp.lt.s32.totalorder %s9028_s18, 1  ;;  %vm2554_vm0 = vcmask 261120   ;;  %vm3075_vm2 = vcmask 130048  }
   0xe   : > { %v457_v3 = vand.u32 4294901760, %v12188_v0  ;;  %v460_v4 = vand.u32 4294901760, %v12193_v1  ;;  %v12205_v5 = vld [vmem:[%s13631_s2 + $0x18] sm:$0xff]  ;;  %v13665_v6 = vand.u32 4294901760, %v12198_v2  ;;  %v12211_v7 = vld [vmem:[%s13631_s2 + $0x20] sm:$0xff]  ;;  %v12216_v8 = vld [vmem:[%s13631_s2 + $0x28] sm:$0xff] }
   0xf   : > { %v13663_v9 = vand.u32 4294901760, %v12205_v5  ;;  %v13658_v10 = vand.u32 4294901760, %v12211_v7  ;;  %v13657_v11 = vand.u32 4294901760, %v12216_v8  ;;  %v1140_v12 = vld [vmem:[%s13633_s4] sm:$0xff]  ;;  %v1141_v13 = vld [vmem:[%s13633_s4 + $0x8] sm:$0xff]  ;;  %v12230_v14 = vld [vmem:[%s13631_s2 + $0x30] sm:$0xff] }
  0x10   : > { %v12236_v15 = vpack.c.bf16 %v460_v4, %v457_v3  ;;  %v1164_v16 = vand.u32 4294901760, %v1140_v12  ;;  %v1167_v17 = vand.u32 4294901760, %v1141_v13  ;;  %v12241_v18 = vld [vmem:[%s13631_s2 + $0x38] sm:$0xff]  ;;  %v1142_v19 = vld [vmem:[%s13633_s4 + $0x10] sm:$0xff]  ;;  %v13653_v22 = vand.u32 4294901760, %v12230_v14  ;;  %v12260_v25 = vld [vmem:[%s13631_s2 + $0x40] sm:$0xff] }
  0x11   : > { %v1143_v20 = vld [vmem:[%s13633_s4 + $0x18] sm:$0xff]  ;;  %v12253_v21 = vpack.c.bf16 %v13663_v9, %v13665_v6  ;;  %v13652_v23 = vand.u32 4294901760, %v12241_v18  ;;  %v1170_v24 = vand.u32 4294901760, %v1142_v19  ;;  %v12265_v26 = vld [vmem:[%s13631_s2 + $0x48] sm:$0xff]  ;;  %v1144_v31 = vld [vmem:[%s13633_s4 + $0x20] sm:$0xff]  ;;  %v12291_v33 = vpack.c.bf16 %v13657_v11, %v13658_v10  ;;  %s13784_s18 = smov (!%p12269_p3, %s9028_s18), 1 }
  0x12   : > { %13710 = vst [vmem:[#allocation2_spill] sm:$0xff] %v12236_v15  ;;  %10942 = vmatprep.subr.bf16.mxu0 %v12236_v15  ;;  %v12274_v27 = vpack.c.bf16 %v1167_v17, %v1164_v16  ;;  %v12276_v28 = vsub.f32 %v1140_v12, %v1164_v16  ;;  %v12278_v29 = vsub.f32 %v1141_v13, %v1167_v17  ;;  %v1173_v30 = vand.u32 4294901760, %v1143_v20  ;;  %v1145_v32 = vld [vmem:[%s13633_s4 + $0x28] sm:$0xff]  ;;  %v12314_v45 = vld [vmem:[%s13631_s2 + $0x50] sm:$0xff]  ;;  %v12349_v55 = vld [vmem:[%s13631_s2 + $0x58] sm:$0xff]  ;;  %s12371_s30 = sshll.u32 %s13784_s18, 4 }
  0x13   : > { %13711 = vst [vmem:[#allocation3_spill] sm:$0xff] %v12253_v21  ;;  %10944 = vmatpush3.bf16.msra.mxu0 %v12236_v15  ;;  %13713 = vst [vmem:[#allocation4_spill] sm:$0xff] %v12291_v33  ;;  %v12293_v34 = vsub.f32 %v1142_v19, %v1170_v24  ;;  %v13651_v35 = vand.u32 4294901760, %v12260_v25  ;;  %v13650_v36 = vand.u32 4294901760, %v12265_v26  ;;  %v12308_v41 = vpack.c.bf16 %v13652_v23, %v13653_v22  ;;  %v1146_v50 = vld [vmem:[%s13633_s4 + $0x30] sm:$0xff]  ;;  %v1147_v56 = vld [vmem:[%s13633_s4 + $0x38] sm:$0xff]  ;;  %s12410_s23 = scalar_lea.vmem %s13629_s0, %s12371_s30  ;;  %s12438_s12 = scalar_lea.vmem %s13630_s1, %s12371_s30 }
  0x14   : > { %10946 = vmatprep.subr.bf16.mxu0 %v12253_v21  ;;  %v13646_v37 = vand.u32 4294901760, %v12276_v28  ;;  %v13645_v38 = vand.u32 4294901760, %v12278_v29  ;;  %v12300_v39 = vpack.c.bf16 %v1173_v30, %v1170_v24  ;;  %v12302_v40 = vsub.f32 %v1143_v20, %v1173_v30  ;;  %v12362_v61 = vld [vmem:[%s13631_s2 + $0x60] sm:$0xff]  ;;  %v12369_v16 = vld [vmem:[%s13631_s2 + $0x68] sm:$0xff]  ;;  %s421_s26 = scalar_lea.vmem %s13639_s10, %s12371_s30  ;;  %s12114_s27 = smov 96  }
  0x15   : > { %13714 = vst [vmem:[#allocation5_spill] sm:$0xff] %v12308_v41  ;;  %v13644_v42 = vand.u32 4294901760, %v12293_v34  ;;  %v1176_v43 = vand.u32 4294901760, %v1144_v31  ;;  %v1179_v44 = vand.u32 4294901760, %v1145_v32  ;;  %v12331_v49 = vpack.c.bf16 %v13650_v36, %v13651_v35  ;;  %v1148_v30 = vld [vmem:[%s13633_s4 + $0x40] sm:$0xff]  ;;  %s12116_s13 = smov 32   ;;  %s426_s15 = scalar_lea.vmem %s13640_s11, %s12371_s30 }
  0x16   : > { %v1268_v46 = vsub.f32 %v12276_v28, %v13646_v37  ;;  %v1275_v47 = vsub.f32 %v12278_v29, %v13645_v38  ;;  %v13643_v48 = vand.u32 4294901760, %v12302_v40  ;;  %v13649_v60 = vand.u32 4294901760, %v12314_v45 }
  0x17   : > { %13715 = vst [vmem:[#allocation6_spill] sm:$0xff] %v12331_v49  ;;  %10948 = vmatpush3.bf16.msra.mxu0 %v12253_v21  ;;  %v1282_v51 = vsub.f32 %v12293_v34, %v13644_v42  ;;  %v12340_v52 = vpack.c.bf16 %v1179_v44, %v1176_v43  ;;  %v12342_v53 = vsub.f32 %v1144_v31, %v1176_v43  ;;  %v1182_v13 = vand.u32 4294901760, %v1146_v50 }
  0x18   : > { %v12344_v54 = vsub.f32 %v1145_v32, %v1179_v44  ;;  %10950 = vmatprep.subr.bf16.mxu0 %v12291_v33  ;;  %v1269_v57 = vand.u32 4294901760, %v1268_v46  ;;  %v1276_v58 = vand.u32 4294901760, %v1275_v47  ;;  %v1289_v59 = vsub.f32 %v12302_v40, %v13643_v48  ;;  %v1149_v46 = vld [vmem:[%s13633_s4 + $0x48] sm:$0xff]  ;;  %v12393_v47 = vld [vmem:[%s13631_s2 + $0x70] sm:$0xff] }
  0x19   : > { %v1283_v62 = vand.u32 4294901760, %v1282_v51  ;;  %v13642_v63 = vand.u32 4294901760, %v12342_v53  ;;  %v13647_v20 = vand.u32 4294901760, %v12349_v55  ;;  %v1185_v24 = vand.u32 4294901760, %v1147_v56 }
  0x1a   : > { %v13641_v12 = vand.u32 4294901760, %v12344_v54  ;;  %v11165_v17 = vpack.c.bf16 %v1276_v58, %v1269_v57  ;;  %v1290_v19 = vand.u32 4294901760, %v1289_v59  ;;  %v12384_v43 = vsub.f32 %v1146_v50, %v1182_v13  ;;  %v12404_v59 = vld [vmem:[%s13631_s2 + $0x78] sm:$0xff] }
  0x1b   : > { %10952 = vmatpush3.bf16.msra.mxu0 %v12291_v33  ;;  %v1296_v31 = vsub.f32 %v12342_v53, %v13642_v63  ;;  %v13656_v44 = vand.u32 4294901760, %v12362_v61  ;;  %v12396_v57 = vpack.c.bf16 %v1185_v24, %v1182_v13  ;;  %v12398_v58 = vsub.f32 %v1147_v56, %v1185_v24  ;;  %v1151_v63 = vld [vmem:[%s13633_s4 + $0x58] sm:$0xff] }
  0x1c   : > { %v1303_v32 = vsub.f32 %v12344_v54, %v13641_v12  ;;  %11166 = vmatprep.subr.bf16.mxu1 %v11165_v17  ;;  %10954 = vmatprep.subr.bf16.mxu0 %v12308_v41  ;;  %v11169_v51 = vpack.c.bf16 %v1290_v19, %v1283_v62  ;;  %v13655_v50 = vand.u32 4294901760, %v12369_v16  ;;  %v13648_v56 = vand.u32 4294901760, %v12384_v43  ;;  %v1150_v19 = vld [vmem:[%s13633_s4 + $0x50] sm:$0xff] }
  0x1d   : > { %11168 = vmatpush3.bf16.msra.mxu1 %v11165_v17  ;;  %v1297_v12 = vand.u32 4294901760, %v1296_v31  ;;  %v1188_v13 = vand.u32 4294901760, %v1148_v30  ;;  %v12420_v24 = vpack.c.bf16 %v13647_v20, %v13649_v60  ;;  %v13654_v17 = vand.u32 4294901760, %v12398_v58  ;;  %v427_v20 = vld [vmem:[%s12410_s23] sm:$0xff] }
  0x1e   : > { %v1304_v62 = vand.u32 4294901760, %v1303_v32  ;;  %11170 = vmatprep.subr.bf16.mxu1 %v11169_v51  ;;  %v1191_v31 = vand.u32 4294901760, %v1149_v46  ;;  %v13662_v32 = vand.u32 4294901760, %v12393_v47  ;;  %v1310_v42 = vsub.f32 %v12384_v43, %v13648_v56 }
  0x1f   : > { %13716 = vst [vmem:[#allocation7_spill] sm:$0xff] %v12420_v24  ;;  %10956 = vmatpush3.bf16.msra.mxu0 %v12308_v41  ;;  %v12431_v38 = vsub.f32 %v1148_v30, %v1188_v13  ;;  %v13660_v37 = vand.u32 4294901760, %v12404_v59  ;;  %v1194_v56 = vand.u32 4294901760, %v1150_v19  ;;  %v12453_v36 = vpack.c.bf16 %v13655_v50, %v13656_v44 }
  0x20   : > { %v11173_v48 = vpack.c.bf16 %v1304_v62, %v1297_v12  ;;  %10958 = vmatprep.subr.bf16.mxu0 %v12331_v49  ;;  %v1317_v12 = vsub.f32 %v12398_v58, %v13654_v17  ;;  %v12445_v62 = vpack.c.bf16 %v1191_v31, %v1188_v13  ;;  %v12447_v30 = vsub.f32 %v1149_v46, %v1191_v31  ;;  %v428_v46 = vld [vmem:[%s12410_s23 + $0x8] sm:$0xff]  ;;  %v12461_v31 = vld [vmem:[%s12438_s12] sm:$0xff] }
  0x21   : > { %11172 = vmatpush3.bf16.msra.mxu1 %v11169_v51  ;;  %v1311_v60 = vand.u32 4294901760, %v1310_v42  ;;  %13717 = vst [vmem:[#allocation8_spill] sm:$0xff] %v12453_v36  ;;  %v13659_v35 = vand.u32 4294901760, %v12431_v38  ;;  %v1197_v23 = vand.u32 4294901760, %v1151_v63  ;;  %v12457_v13 = vsub.f32 %v1150_v19, %v1194_v56 }
  0x22   : > { %11174 = vmatprep.subr.bf16.mxu1 %v11173_v48  ;;  %v1318_v22 = vand.u32 4294901760, %v1317_v12  ;;  %v13661_v17 = vand.u32 4294901760, %v12447_v30  ;;  %v12463_v51 = vand.u32 4294901760, %v427_v20  ;;  %v12473_v12 = vpack.c.bf16 %v13660_v37, %v13662_v32  ;;  %v1152_v37 = vld [vmem:[%s13633_s4 + $0x60] sm:$0xff] }
  0x23   : > { %10960 = vmatpush3.bf16.msra.mxu0 %v12331_v49  ;;  %v1324_v42 = vsub.f32 %v12431_v38, %v13659_v35  ;;  %v12475_v50 = vpack.c.bf16 %v1197_v23, %v1194_v56  ;;  %v12477_v19 = vsub.f32 %v1151_v63, %v1197_v23  ;;  %v13664_v10 = vand.u32 4294901760, %v12457_v13  ;;  %v1153_v23 = vld [vmem:[%s13633_s4 + $0x68] sm:$0xff] }
  0x24   : > { %13718 = vst [vmem:[#allocation9_spill] sm:$0xff] %v12463_v51  ;;  %13719 = vst [vmem:[#allocation10_spill] sm:$0xff] %v12473_v12  ;;  %10962 = vmatprep.subr.bf16.mxu0 %v12420_v24  ;;  %v11177_v44 = vpack.c.bf16 %v1318_v22, %v1311_v60  ;;  %v1331_v11 = vsub.f32 %v12447_v30, %v13661_v17  ;;  %v12485_v35 = vsub.f32 %v427_v20, %v12463_v51 }
  0x25   : > { %13720 = vst [vmem:[#allocation11_spill] sm:$0xff] %v12475_v50  ;;  %11176 = vmatpush3.bf16.msra.mxu1 %v11173_v48  ;;  %v1325_v63 = vand.u32 4294901760, %v1324_v42  ;;  %v13668_v22 = vand.u32 4294901760, %v12477_v19  ;;  %v12494_v60 = vand.u32 4294901760, %v428_v46  ;;  %v12497_v56 = vand.u32 4294901760, %v12461_v31 }
  0x26   : > { %11178 = vmatprep.subr.bf16.mxu1 %v11177_v44  ;;  %v1332_v20 = vand.u32 4294901760, %v1331_v11  ;;  %v1338_v17 = vsub.f32 %v12457_v13, %v13664_v10  ;;  %v13673_v32 = vand.u32 4294901760, %v12485_v35  ;;  %v12506_v48 = vsub.f32 %v12188_v0, %v457_v3 }
  0x27   : > { %13721 = vst [vmem:[#allocation12_spill] sm:$0xff] %v12497_v56  ;;  %10964 = vmatpush3.bf16.msra.mxu0 %v12420_v24  ;;  %v1345_v42 = vsub.f32 %v12477_v19, %v13668_v22  ;;  %v12515_v11 = vsub.f32 %v12193_v1, %v460_v4  ;;  %v1200_v9 = vand.u32 4294901760, %v1152_v37  ;;  %v1203_v10 = vand.u32 4294901760, %v1153_v23  ;;  %9988 = vmatprep.mubr.f32.mxu1 %v12497_v56 }
  0x28   : > { %10966 = vmatprep.subr.bf16.mxu0 %v12453_v36  ;;  %v11181_v6 = vpack.c.bf16 %v1332_v20, %v1325_v63  ;;  %v1339_v0 = vand.u32 4294901760, %v1338_v17  ;;  %v540_v3 = vsub.f32 %v12485_v35, %v13673_v32  ;;  %v13675_v24 = vand.u32 4294901760, %v12506_v48 }
  0x29   : > { %11180 = vmatpush3.bf16.msra.mxu1 %v11177_v44  ;;  %v1346_v22 = vand.u32 4294901760, %v1345_v42  ;;  %v13674_v49 = vand.u32 4294901760, %v12515_v11  ;;  %v12524_v1 = vpack.c.bf16 %v1203_v10, %v1200_v9  ;;  %v12526_v4 = vsub.f32 %v1152_v37, %v1200_v9  ;;  %v1154_v44 = vld [vmem:[%s13633_s4 + $0x70] sm:$0xff] }
  0x2a   : > { %11182 = vmatprep.subr.bf16.mxu1 %v11181_v6  ;;  %v541_v41 = vand.u32 4294901760, %v540_v3  ;;  %v561_v17 = vsub.f32 %v12506_v48, %v13675_v24  ;;  %v12531_v63 = vsub.f32 %v1153_v23, %v1203_v10  ;;  %v12534_v20 = vsub.f32 %v428_v46, %v12494_v60  ;;  %v1155_v46 = vld [vmem:[%s13633_s4 + $0x78] sm:$0xff] }
  0x2b   : > { %13722 = vst [vmem:[#allocation13_spill] sm:$0xff] %v12524_v1  ;;  %10968 = vmatpush3.bf16.msra.mxu0 %v12453_v36  ;;  %v11185_v42 = vpack.c.bf16 %v1346_v22, %v1339_v0  ;;  %v568_v9 = vsub.f32 %v12515_v11, %v13674_v49  ;;  %v13678_v37 = vand.u32 4294901760, %v12526_v4  ;;  %v13724_v3 = vand.u32 4294901760, %v12198_v2 }
  0x2c   : > { %13723 = vst [vmem:[#allocation14_spill] sm:$0xff] %v12534_v20  ;;  %10970 = vmatprep.subr.bf16.mxu0 %v12473_v12  ;;  %9743 = vmatprep.mubr.f32.mxu0 %v541_v41  ;;  %v562_v23 = vand.u32 4294901760, %v561_v17  ;;  %v13684_v22 = vand.u32 4294901760, %v12531_v63  ;;  %v13685_v0 = vand.u32 4294901760, %v12534_v20  ;;  %v13725_v32 = vand.u32 4294901760, %v12205_v5 }
  0x2d   : > { %v12547_v10 = vsub.f32 %v12198_v2, %v13724_v3  ;;  %11184 = vmatpush3.bf16.msra.mxu1 %v11181_v6  ;;  %v569_v2 = vand.u32 4294901760, %v568_v9  ;;  %v1352_v3 = vsub.f32 %v12526_v4, %v13678_v37  ;;  %v1206_v36 = vand.u32 4294901760, %v1154_v44 }
  0x2e   : > { %v12558_v49 = vsub.f32 %v12205_v5, %v13725_v32  ;;  %11186 = vmatprep.subr.bf16.mxu1 %v11185_v42  ;;  %v1359_v41 = vsub.f32 %v12531_v63, %v13684_v22  ;;  %v550_v17 = vsub.f32 %v12534_v20, %v13685_v0  ;;  %v1209_v6 = vand.u32 4294901760, %v1155_v46 }
  0x2f   : > { %v13688_v24 = vand.u32 4294901760, %v12547_v10  ;;  %10972 = vmatpush3.bf16.msra.mxu0 %v12473_v12  ;;  %v10973_v32 = vpack.c.bf16 %v569_v2, %v562_v23  ;;  %v1353_v9 = vand.u32 4294901760, %v1352_v3  ;;  %v12575_v33 = vsub.f32 %v1154_v44, %v1206_v36 }
  0x30   : > { %v13694_v5 = vand.u32 4294901760, %v12558_v49  ;;  %v1360_v21 = vand.u32 4294901760, %v1359_v41  ;;  %v551_v1 = vand.u32 4294901760, %v550_v17  ;;  %v12580_v0 = vpack.c.bf16 %v1209_v6, %v1206_v36 }
  0x31   : > { %v575_v37 = vsub.f32 %v12547_v10, %v13688_v24  ;;  %11188 = vmatpush3.bf16.msra.mxu1 %v11185_v42  ;;  %10974 = vmatprep.subr.bf16.mxu0 %v10973_v32  ;;  %v13692_v23 = vand.u32 4294901760, %v12575_v33  ;;  %v12583_v2 = vsub.f32 %v1155_v46, %v1209_v6  ;;  %v13727_v3 = vand.u32 4294901760, %v12211_v7 }
  0x32   : > { %v582_v22 = vsub.f32 %v12558_v49, %v13694_v5  ;;  %13726 = vst [vmem:[#allocation15_spill] sm:$0xff] %v12580_v0  ;;  %v11189_v41 = vpack.c.bf16 %v1360_v21, %v1353_v9  ;;  %9744 = vmatmul.mubr.f32.vlgmr.msra.gmra.mrb[0].mxu0 %v551_v1  ;;  %v13728_v24 = vand.u32 4294901760, %v12216_v8 }
  0x33   : > { %v576_v20 = vand.u32 4294901760, %v575_v37  ;;  %v12588_v44 = vsub.f32 %v12211_v7, %v13727_v3  ;;  %10976 = vmatpush3.bf16.msra.mxu0 %v10973_v32  ;;  %v1366_v42 = vsub.f32 %v12575_v33, %v13692_v23  ;;  %v13691_v37 = vand.u32 4294901760, %v12583_v2  ;;  %9778 = vmatprep.mubr.f32.mxu0 %v12463_v51 }
  0x34   : > { %v583_v17 = vand.u32 4294901760, %v582_v22  ;;  %v12593_v36 = vsub.f32 %v12216_v8, %v13728_v24  ;;  %v13729_v7 = vand.u32 4294901760, %v12230_v14  ;;  %11190 = vmatprep.subr.bf16.mxu1 %v11189_v41  ;;  %v13730_v24 = vand.u32 4294901760, %v12241_v18 }
  0x35   : > { %v13689_v46 = vand.u32 4294901760, %v12588_v44  ;;  %11192 = vmatpush3.bf16.msra.mxu1 %v11189_v41  ;;  %v1367_v6 = vand.u32 4294901760, %v1366_v42  ;;  %v1373_v32 = vsub.f32 %v12583_v2, %v13691_v37  ;;  %v13731_v3 = vand.u32 4294901760, %v12260_v25  ;;  %v12639_v37 = vld [vmem:[%s12438_s12 + $0x8] sm:$0xff]  ;;  %s12115_s12 = smov 64  }
  0x36   : > { %v12603_v21 = vsub.f32 %v12230_v14, %v13729_v7  ;;  %v10977_v1 = vpack.c.bf16 %v583_v17, %v576_v20  ;;  %v13690_v8 = vand.u32 4294901760, %v12593_v36  ;;  %v12610_v22 = vsub.f32 %v12241_v18, %v13730_v24 }
  0x37   : > { %v589_v14 = vsub.f32 %v12588_v44, %v13689_v46  ;;  %v12626_v41 = vsub.f32 %v12260_v25, %v13731_v3  ;;  %v13732_v17 = vand.u32 4294901760, %v12265_v26  ;;  %v1374_v7 = vand.u32 4294901760, %v1373_v32 }
  0x38   : > { %v13693_v20 = vand.u32 4294901760, %v12603_v21  ;;  %10978 = vmatprep.subr.bf16.mxu0 %v10977_v1  ;;  %v596_v9 = vsub.f32 %v12593_v36, %v13690_v8  ;;  %v13697_v18 = vand.u32 4294901760, %v12610_v22  ;;  %v11197_v46 = vpack.c.bf16 %v12278_v29, %v12276_v28 }
  0x39   : > { %v12631_v42 = vsub.f32 %v12265_v26, %v13732_v17  ;;  %10980 = vmatpush3.bf16.msra.mxu0 %v10977_v1  ;;  %v590_v24 = vand.u32 4294901760, %v589_v14  ;;  %v13699_v26 = vand.u32 4294901760, %v12626_v41  ;;  %v11193_v1 = vpack.c.bf16 %v1374_v7, %v1367_v6 }
  0x3a   : > { %v603_v8 = vsub.f32 %v12603_v21, %v13693_v20  ;;  %v597_v23 = vand.u32 4294901760, %v596_v9  ;;  %v610_v25 = vsub.f32 %v12610_v22, %v13697_v18  ;;  %v13733_v3 = vand.u32 4294901760, %v12314_v45 }
  0x3b   : > { %v13698_v32 = vand.u32 4294901760, %v12631_v42  ;;  %v13734_v20 = vand.u32 4294901760, %v12349_v55  ;;  %v617_v18 = vsub.f32 %v12626_v41, %v13699_v26  ;;  %v12663_v6 = vand.u32 4294901760, %v12639_v37  ;;  %11194 = vmatprep.subr.bf16.mxu1 %v11193_v1 }
  0x3c   : > { %v604_v14 = vand.u32 4294901760, %v603_v8  ;;  %v12649_v17 = vsub.f32 %v12314_v45, %v13733_v3  ;;  %v10981_v9 = vpack.c.bf16 %v597_v23, %v590_v24  ;;  %v611_v51 = vand.u32 4294901760, %v610_v25  ;;  %11196 = vmatpush3.bf16.msra.mxu1 %v11193_v1 }
  0x3d   : > { %v12654_v5 = vsub.f32 %v12349_v55, %v13734_v20  ;;  %v624_v8 = vsub.f32 %v12631_v42, %v13698_v32  ;;  %v13735_v55 = vand.u32 4294901760, %v12362_v61  ;;  %v618_v24 = vand.u32 4294901760, %v617_v18  ;;  %11198 = vmatprep.subr.bf16.mxu1 %v11197_v46 }
  0x3e   : > { %v13701_v45 = vand.u32 4294901760, %v12649_v17  ;;  %10982 = vmatprep.subr.bf16.mxu0 %v10981_v9  ;;  %v10985_v20 = vpack.c.bf16 %v611_v51, %v604_v14  ;;  %v13736_v3 = vand.u32 4294901760, %v12369_v16  ;;  %v11201_v26 = vpack.c.bf16 %v12302_v40, %v12293_v34 }
  0x3f   : > { %v13700_v7 = vand.u32 4294901760, %v12654_v5  ;;  %v12670_v23 = vsub.f32 %v12362_v61, %v13735_v55  ;;  %v625_v25 = vand.u32 4294901760, %v624_v8  ;;  %10984 = vmatpush3.bf16.msra.mxu0 %v10981_v9  ;;  %v13737_v14 = vand.u32 4294901760, %v12393_v47  ;;  %9989 = vmatmul.mubr.f32.vlgmr.msra.gmra.mrb[0].mxu1 %v12663_v6 }
  0x40   : > { %v12675_v32 = vsub.f32 %v12369_v16, %v13736_v3  ;;  %v631_v61 = vsub.f32 %v12649_v17, %v13701_v45  ;;  %10986 = vmatprep.subr.bf16.mxu0 %v10985_v20  ;;  %v13738_v8 = vand.u32 4294901760, %v12404_v59  ;;  %11200 = vmatpush3.bf16.msra.mxu1 %v11197_v46  ;;  %v12708_v46 = vsub.f32 %v12461_v31, %v12497_v56 }
  0x41   : > { %v638_v51 = vsub.f32 %v12654_v5, %v13700_v7  ;;  %v644_v18 = vand.u32 4294901760, %v12670_v23  ;;  %v10989_v1 = vpack.c.bf16 %v625_v25, %v618_v24  ;;  %v12690_v9 = vsub.f32 %v12393_v47, %v13737_v14  ;;  %11202 = vmatprep.subr.bf16.mxu1 %v11201_v26 }
  0x42   : > { %v651_v16 = vand.u32 4294901760, %v12675_v32  ;;  %v12695_v55 = vsub.f32 %v12404_v59, %v13738_v8  ;;  %v632_v3 = vand.u32 4294901760, %v631_v61  ;;  %v11205_v47 = vpack.c.bf16 %v12344_v54, %v12342_v53  ;;  %10023 = vmatprep.mubr.f32.mxu1 %v12708_v46 }
  0x43   : > { %v639_v7 = vand.u32 4294901760, %v638_v51  ;;  %v645_v45 = vsub.f32 %v12670_v23, %v644_v18  ;;  %v658_v25 = vand.u32 4294901760, %v12690_v9  ;;  %10988 = vmatpush3.bf16.msra.mxu0 %v10985_v20  ;;  %v11209_v20 = vpack.c.bf16 %v12398_v58, %v12384_v43 }
  0x44   : > { %v652_v24 = vsub.f32 %v12675_v32, %v651_v16  ;;  %v665_v12 = vand.u32 4294901760, %v12695_v55  ;;  %10990 = vmatprep.subr.bf16.mxu0 %v10989_v1  ;;  %11204 = vmatpush3.bf16.msra.mxu1 %v11201_v26  ;;  %v13740_v31 = vand.u32 4294901760, %v12278_v29  ;;  %v13741_v26 = vand.u32 4294901760, %v12293_v34 }
  0x45   : > { %v646_v59 = vand.u32 4294901760, %v645_v45  ;;  %v10993_v14 = vpack.c.bf16 %v639_v7, %v632_v3  ;;  %v659_v61 = vsub.f32 %v12690_v9, %v658_v25  ;;  %11206 = vmatprep.subr.bf16.mxu1 %v11205_v47  ;;  %v11213_v45 = vpack.c.bf16 %v12447_v30, %v12431_v38 }
  0x46   : > { %v653_v8 = vand.u32 4294901760, %v652_v24  ;;  %v666_v51 = vsub.f32 %v12695_v55, %v665_v12  ;;  %v13739_v24 = vand.u32 4294901760, %v12276_v28  ;;  %v13746_v28 = vand.u32 4294901760, %v12398_v58 }
  0x47   : > { %10992 = vmatpush3.bf16.msra.mxu0 %v10989_v1  ;;  %v660_v7 = vand.u32 4294901760, %v659_v61  ;;  %v13742_v1 = vand.u32 4294901760, %v12302_v40  ;;  %v13747_v29 = vand.u32 4294901760, %v12431_v38  ;;  %v13748_v34 = vand.u32 4294901760, %v12447_v30 }
  0x48   : > { %v10997_v0 = vpack.c.bf16 %v653_v8, %v646_v59  ;;  %10994 = vmatprep.subr.bf16.mxu0 %v10993_v14  ;;  %v667_v3 = vand.u32 4294901760, %v666_v51  ;;  %v12719_v56 = vpack.c.bf16 %v13740_v31, %v13739_v24  ;;  %v13743_v59 = vand.u32 4294901760, %v12342_v53  ;;  %11208 = vmatpush3.bf16.msra.mxu1 %v11205_v47 }
  0x49   : > { %v12725_v15 = vpack.c.bf16 %v13742_v1, %v13741_v26  ;;  %v13744_v8 = vand.u32 4294901760, %v12344_v54  ;;  %v13745_v51 = vand.u32 4294901760, %v12384_v43  ;;  %v12743_v24 = vpack.c.bf16 %v13748_v34, %v13747_v29  ;;  %11210 = vmatprep.subr.bf16.mxu1 %v11209_v20 }
  0x4a   : > { %v13749_v40 = vand.u32 4294901760, %v12457_v13  ;;  %v13750_v53 = vand.u32 4294901760, %v12477_v19  ;;  %v13751_v54 = vand.u32 4294901760, %v12506_v48  ;;  %v13752_v43 = vand.u32 4294901760, %v12515_v11 }
  0x4b   : > { %v12731_v61 = vpack.c.bf16 %v13744_v8, %v13743_v59  ;;  %v12737_v50 = vpack.c.bf16 %v13746_v28, %v13745_v51  ;;  %v13753_v26 = vand.u32 4294901760, %v12526_v4  ;;  %v13754_v38 = vand.u32 4294901760, %v12531_v63  ;;  %10996 = vmatpush3.bf16.msra.mxu0 %v10993_v14 }
  0x4c   : > { %v12749_v31 = vpack.c.bf16 %v13750_v53, %v13749_v40  ;;  %v12755_v58 = vpack.c.bf16 %v13752_v43, %v13751_v54  ;;  %v13755_v1 = vand.u32 4294901760, %v12547_v10  ;;  %v13756_v59 = vand.u32 4294901760, %v12558_v49  ;;  %10998 = vmatprep.subr.bf16.mxu0 %v10997_v0  ;;  %11212 = vmatpush3.bf16.msra.mxu1 %v11209_v20 }
  0x4d   : > { %v12761_v30 = vpack.c.bf16 %v13754_v38, %v13753_v26  ;;  %v13757_v47 = vand.u32 4294901760, %v12575_v33  ;;  %v13758_v51 = vand.u32 4294901760, %v12583_v2  ;;  %v13759_v29 = vand.u32 4294901760, %v12588_v44  ;;  %11214 = vmatprep.subr.bf16.mxu1 %v11213_v45 }
  0x4e   : > { %v12767_v8 = vpack.c.bf16 %v13756_v59, %v13755_v1  ;;  %v13760_v34 = vand.u32 4294901760, %v12593_v36  ;;  %v13761_v53 = vand.u32 4294901760, %v12603_v21  ;;  %v13762_v54 = vand.u32 4294901760, %v12610_v22 }
  0x4f   : > { %v12773_v28 = vpack.c.bf16 %v13758_v51, %v13757_v47  ;;  %v13763_v26 = vand.u32 4294901760, %v12626_v41  ;;  %v13764_v38 = vand.u32 4294901760, %v12631_v42  ;;  %v11001_v14 = vpack.c.bf16 %v667_v3, %v660_v7  ;;  %11000 = vmatpush3.bf16.msra.mxu0 %v10997_v0  ;;  %v13767_v0 = vld [vmem:[#allocation11_spill] sm:$0xff] }
  0x50   : > { %v12779_v40 = vpack.c.bf16 %v13760_v34, %v13759_v29  ;;  %v12785_v43 = vpack.c.bf16 %v13762_v54, %v13761_v53  ;;  %v13765_v59 = vand.u32 4294901760, %v12649_v17  ;;  %v13766_v47 = vand.u32 4294901760, %v12654_v5  ;;  %11216 = vmatpush3.bf16.msra.mxu1 %v11213_v45 }
  0x51   : > { %v12791_v1 = vpack.c.bf16 %v13764_v38, %v13763_v26  ;;  %v12799_v29 = vpack.c.bf16 %v651_v16, %v644_v18  ;;  %v12801_v34 = vpack.c.bf16 %v665_v12, %v658_v25  ;;  %v11217_v53 = vpack.c.bf16 %v12477_v19, %v12457_v13  ;;  %11002 = vmatprep.subr.bf16.mxu0 %v11001_v14  ;;  %v1855_v38 = vld [vmem:[%s13635_s6 + $0x40] sm:$0xff] }
  0x52   : > { %v12797_v51 = vpack.c.bf16 %v13766_v47, %v13765_v59  ;;  %v11005_v7 = vpack.c.bf16 %v12515_v11, %v12506_v48  ;;  %v11221_v3 = vpack.c.bf16 %v12531_v63, %v12526_v4  ;;  %v11009_v12 = vpack.c.bf16 %v12558_v49, %v12547_v10  ;;  %v1857_v47 = vld [vmem:[%s13635_s6 + $0x50] sm:$0xff] }
  0x53   : > { %11218 = vmatprep.subr.bf16.mxu1 %v11217_v53  ;;  %11004 = vmatpush3.bf16.msra.mxu0 %v11001_v14  ;;  %v11225_v13 = vpack.c.bf16 %v12583_v2, %v12575_v33  ;;  %v11013_v19 = vpack.c.bf16 %v12593_v36, %v12588_v44  ;;  %v11017_v49 = vpack.c.bf16 %v12610_v22, %v12603_v21  ;;  %v12824_v33 = vand.u32 4294901760, %v12708_v46  ;;  %v13769_v2 = vld [vmem:[#allocation14_spill] sm:$0xff]  ;;  %v13770_v44 = vld [vmem:[#allocation13_spill] sm:$0xff]  ;;  %v13771_v36 = vld [vmem:[#allocation3_spill] sm:$0xff] }
  0x54   : > { %11006 = vmatprep.subr.bf16.mxu0 %v11005_v7  ;;  %11220 = vmatpush3.bf16.msra.mxu1 %v11217_v53  ;;  %v12821_v48 = vsub.f32 %v12639_v37, %v12663_v6  ;;  %v11021_v11 = vpack.c.bf16 %v12631_v42, %v12626_v41  ;;  %v11025_v4 = vpack.c.bf16 %v12654_v5, %v12649_v17  ;;  %v13768_v5 = vld [vmem:[#allocation2_spill] sm:$0xff]  ;;  %v13772_v37 = vand.u32 4294901760, %v12485_v35  ;;  %v13773_v21 = vld [vmem:[#allocation15_spill] sm:$0xff]  ;;  %v13774_v22 = vld [vmem:[#allocation4_spill] sm:$0xff] }
  0x55   : > { %11222 = vmatprep.subr.bf16.mxu1 %v11221_v3  ;;  %v11029_v63 = vpack.c.bf16 %v12675_v32, %v12670_v23  ;;  %v11033_v10 = vpack.c.bf16 %v12695_v55, %v12690_v9  ;;  %v13775_v42 = vld [vmem:[#allocation5_spill] sm:$0xff]  ;;  %v13777_v32 = vld [vmem:[#allocation6_spill] sm:$0xff]  ;;  %v13778_v17 = vld [vmem:[#allocation7_spill] sm:$0xff]  ;;  %v13781_v23 = vand.u32 4294901760, %v13769_v2  ;;  %v1247_v18 = vsub.f32 %v12708_v46, %v12824_v33 }
  0x56   : > { %9779 = vmatmul.mubr.f32.vlgmr.msra.gmra.mrb[0].mxu0 %v12494_v60  ;;  %v12860_v41 = vand.u32 4294901760, %v12821_v48  ;;  %v1849_v9 = vld [vmem:[%s13635_s6 + $0x10] sm:$0xff]  ;;  %v1850_v55 = vld [vmem:[%s13635_s6 + $0x18] sm:$0xff]  ;;  %v1895_v14 = vand.u32 4294901760, %v1855_v38 }
  0x57   : > { %11008 = vmatpush3.bf16.msra.mxu0 %v11005_v7  ;;  %9813 = vmatprep.mubr.f32.mxu0 %v12485_v35  ;;  %v13776_v35 = vld [vmem:[#allocation12_spill] sm:$0xff]  ;;  %v1248_v16 = vand.u32 4294901760, %v1247_v18  ;;  %v1877_v25 = vand.u32 4294901760, %v1849_v9  ;;  %v1880_v20 = vand.u32 4294901760, %v1850_v55 }
  0x58   : > { %11010 = vmatprep.subr.bf16.mxu0 %v11009_v12  ;;  %11224 = vmatpush3.bf16.msra.mxu1 %v11221_v3  ;;  %v13034_v3 = vld [vmem:[%s13635_s6 + $0x60] sm:$0xff] }
  0x59   : > { %11226 = vmatprep.subr.bf16.mxu1 %v11225_v13 }
  0x5b   : > { %11012 = vmatpush3.bf16.msra.mxu0 %v11009_v12  ;;  %v13039_v12 = vld [vmem:[%s13635_s6 + $0x68] sm:$0xff] }
  0x5c   : > { %11014 = vmatprep.subr.bf16.mxu0 %v11013_v19  ;;  %11228 = vmatpush3.bf16.msra.mxu1 %v11225_v13  ;;  %v1907_v13 = vand.u32 4294901760, %v13034_v3 }
  0x5d   : > { %11230 = vmatprep.subr.bf16.mxu1 %v12274_v27 }
  0x5f   : > { %11016 = vmatpush3.bf16.msra.mxu0 %v11013_v19  ;;  %10024 = vmatmul.mubr.f32.vlgmr.msra.gmra.mrb[0].mxu1 %v12821_v48  ;;  %v1910_v19 = vand.u32 4294901760, %v13039_v12 }
  0x60   : > { %11018 = vmatprep.subr.bf16.mxu0 %v11017_v49  ;;  %11232 = vmatpush3.bf16.msra.mxu1 %v12274_v27 }
  0x61   : > { %10058 = vmatprep.mubr.f32.mxu1 %v12824_v33  ;;  %11234 = vmatprep.subr.bf16.mxu1 %v12300_v39 }
  0x63   : > { %11020 = vmatpush3.bf16.msra.mxu0 %v11017_v49  ;;  %v13046_v49 = vld [vmem:[%s13635_s6 + $0x70] sm:$0xff] }
  0x64   : > { %11022 = vmatprep.subr.bf16.mxu0 %v11021_v11  ;;  %11236 = vmatpush3.bf16.msra.mxu1 %v12300_v39 }
  0x65   : > { %11238 = vmatprep.subr.bf16.mxu1 %v12340_v52 }
  0x67   : > { %11024 = vmatpush3.bf16.msra.mxu0 %v11021_v11  ;;  %v13051_v11 = vld [vmem:[%s13635_s6 + $0x78] sm:$0xff] }
  0x68   : > { %11026 = vmatprep.subr.bf16.mxu0 %v11025_v4  ;;  %11240 = vmatpush3.bf16.msra.mxu1 %v12340_v52 }
  0x69   : > { %11242 = vmatprep.subr.bf16.mxu1 %v12396_v57 }
  0x6b   : > { %11028 = vmatpush3.bf16.msra.mxu0 %v11025_v4  ;;  %v1913_v4 = vand.u32 4294901760, %v13046_v49 }
  0x6c   : > { %11030 = vmatprep.subr.bf16.mxu0 %v11029_v63  ;;  %11244 = vmatpush3.bf16.msra.mxu1 %v12396_v57 }
  0x6d   : > { %11246 = vmatprep.subr.bf16.mxu1 %v12445_v62 }
  0x6f   : > { %11032 = vmatpush3.bf16.msra.mxu0 %v11029_v63  ;;  %v1916_v63 = vand.u32 4294901760, %v13051_v11 }
  0x70   : > { %11034 = vmatprep.subr.bf16.mxu0 %v11033_v10  ;;  %11248 = vmatpush3.bf16.msra.mxu1 %v12445_v62 }
  0x71   : > { %11250 = vmatprep.subr.bf16.mxu1 %v13767_v0 }
  0x73   : > { %11036 = vmatpush3.bf16.msra.mxu0 %v11033_v10  ;;  %v13060_v10 = vpack.c.bf16 %v1910_v19, %v1907_v13 }
  0x74   : > { %11038 = vmatprep.subr.bf16.mxu0 %v13768_v5  ;;  %11252 = vmatpush3.bf16.msra.mxu1 %v13767_v0 }
  0x75   : > { %11254 = vmatprep.subr.bf16.mxu1 %v13770_v44 }
  0x76   : > { %9814 = vmatmul.mubr.f32.vlgmr.msra.gmra.mrb[0].mxu0 %v13769_v2 }
  0x77   : > { %11040 = vmatpush3.bf16.msra.mxu0 %v13768_v5  ;;  %9848 = vmatprep.mubr.f32.mxu0 %v13772_v37  ;;  %v13077_v37 = vsub.f32 %v1849_v9, %v1877_v25  ;;  %v13106_v9 = vsub.f32 %v1855_v38, %v1895_v14 }
  0x78   : > { %11042 = vmatprep.subr.bf16.mxu0 %v13771_v36  ;;  %11256 = vmatpush3.bf16.msra.mxu1 %v13770_v44 }
  0x79   : > { %11258 = vmatprep.subr.bf16.mxu1 %v13773_v21 }
  0x7b   : > { %11044 = vmatpush3.bf16.msra.mxu0 %v13771_v36 }
  0x7c   : > { %11046 = vmatprep.subr.bf16.mxu0 %v13774_v22  ;;  %11260 = vmatpush3.bf16.msra.mxu1 %v13773_v21 }
  0x7d   : > { %11262 = vmatprep.subr.bf16.mxu1 %v12719_v56 }
  0x7f   : > { %11048 = vmatpush3.bf16.msra.mxu0 %v13774_v22  ;;  %10059 = vmatmul.mubr.f32.vlgmr.msra.gmra.mrb[0].mxu1 %v12860_v41 }
  0x80   : > { %11050 = vmatprep.subr.bf16.mxu0 %v13775_v42  ;;  %11264 = vmatpush3.bf16.msra.mxu1 %v12719_v56  ;;  %v13779_v56 = vld [vmem:[#allocation8_spill] sm:$0xff] }
  0x81   : > { %10093 = vmatprep.mubr.f32.mxu1 %v13776_v35  ;;  %11266 = vmatprep.subr.bf16.mxu1 %v12725_v15 }
  0x83   : > { %11052 = vmatpush3.bf16.msra.mxu0 %v13775_v42 }
  0x84   : > { %11054 = vmatprep.subr.bf16.mxu0 %v13777_v32  ;;  %11268 = vmatpush3.bf16.msra.mxu1 %v12725_v15  ;;  %v13780_v15 = vld [vmem:[#allocation10_spill] sm:$0xff] }
  0x85   : > { %11270 = vmatprep.subr.bf16.mxu1 %v12731_v61 }
  0x87   : > { %11056 = vmatpush3.bf16.msra.mxu0 %v13777_v32 }
  0x88   : > { %11058 = vmatprep.subr.bf16.mxu0 %v13778_v17  ;;  %11272 = vmatpush3.bf16.msra.mxu1 %v12731_v61  ;;  %v12986_v61 = vpack.c.bf16 %v1880_v20, %v1877_v25 }
  0x89   : > { %11274 = vmatprep.subr.bf16.mxu1 %v12737_v50 }
  0x8b   : > { %11060 = vmatpush3.bf16.msra.mxu0 %v13778_v17 }
  0x8c   : > { %11062 = vmatprep.subr.bf16.mxu0 %v13779_v56  ;;  %11276 = vmatpush3.bf16.msra.mxu1 %v12737_v50  ;;  %v13782_v50 = vld [vmem:[#allocation9_spill] sm:$0xff] }
  0x8d   : > { %11278 = vmatprep.subr.bf16.mxu1 %v12743_v24 }
  0x8f   : > { %11064 = vmatpush3.bf16.msra.mxu0 %v13779_v56 }
  0x90   : > { %11066 = vmatprep.subr.bf16.mxu0 %v13780_v15  ;;  %11280 = vmatpush3.bf16.msra.mxu1 %v12743_v24  ;;  %v1851_v24 = vld [vmem:[%s13635_s6 + $0x20] sm:$0xff] }
  0x91   : > { %11282 = vmatprep.subr.bf16.mxu1 %v12749_v31 }
  0x93   : > { %11068 = vmatpush3.bf16.msra.mxu0 %v13780_v15 }
  0x94   : > { %11070 = vmatprep.subr.bf16.mxu0 %v12755_v58  ;;  %11284 = vmatpush3.bf16.msra.mxu1 %v12749_v31  ;;  %v1852_v31 = vld [vmem:[%s13635_s6 + $0x28] sm:$0xff] }
  0x95   : > { %11286 = vmatprep.subr.bf16.mxu1 %v12761_v30 }
  0x96   : > { %9849 = vmatmul.mubr.f32.vlgmr.msra.gmra.mrb[0].mxu0 %v13781_v23 }
  0x97   : > { %11072 = vmatpush3.bf16.msra.mxu0 %v12755_v58  ;;  %9883 = vmatprep.mubr.f32.mxu0 %v13782_v50  ;;  %v1883_v58 = vand.u32 4294901760, %v1851_v24 }
  0x98   : > { %11074 = vmatprep.subr.bf16.mxu0 %v12767_v8  ;;  %11288 = vmatpush3.bf16.msra.mxu1 %v12761_v30  ;;  %v1886_v30 = vand.u32 4294901760, %v1852_v31 }
  0x99   : > { %11290 = vmatprep.subr.bf16.mxu1 %v12773_v28 }
  0x9b   : > { %11076 = vmatpush3.bf16.msra.mxu0 %v12767_v8  ;;  %v1853_v8 = vld [vmem:[%s13635_s6 + $0x30] sm:$0xff] }
  0x9c   : > { %11078 = vmatprep.subr.bf16.mxu0 %v12779_v40  ;;  %11292 = vmatpush3.bf16.msra.mxu1 %v12773_v28  ;;  %v1854_v28 = vld [vmem:[%s13635_s6 + $0x38] sm:$0xff] }
  0x9d   : > { %11294 = vmatprep.subr.bf16.mxu1 %v12274_v27  ;;  %v1892_v54 = vand.u32 4294901760, %v1854_v28 }
  0x9f   : > { %11080 = vmatpush3.bf16.msra.mxu0 %v12779_v40  ;;  %10094 = vmatmul.mubr.f32.vlgmr.msra.gmra.mrb[0].mxu1 %v12663_v6  ;;  %v1889_v40 = vand.u32 4294901760, %v1853_v8 }
  0xa0   : > { %11082 = vmatprep.subr.bf16.mxu0 %v12785_v43  ;;  %11296 = vmatpush3.bf16.msra.mxu1 %v12274_v27 }
  0xa1   : > { %10128 = vmatprep.mubr.f32.mxu1 %v13776_v35  ;;  %11298 = vmatprep.subr.bf16.mxu1 %v12300_v39  ;;  %v13006_v26 = vpack.c.bf16 %v1892_v54, %v1889_v40 }
  0xa3   : > { %11084 = vmatpush3.bf16.msra.mxu0 %v12785_v43  ;;  %v13004_v43 = vpack.c.bf16 %v1886_v30, %v1883_v58 }
  0xa4   : > { %11086 = vmatprep.subr.bf16.mxu0 %v12791_v1  ;;  %11300 = vmatpush3.bf16.msra.mxu1 %v12300_v39 }
  0xa5   : > { %11302 = vmatprep.subr.bf16.mxu1 %v12340_v52 }
  0xa7   : > { %11088 = vmatpush3.bf16.msra.mxu0 %v12791_v1  ;;  %v1856_v1 = vld [vmem:[%s13635_s6 + $0x48] sm:$0xff] }
  0xa8   : > { %11090 = vmatprep.subr.bf16.mxu0 %v12797_v51  ;;  %11304 = vmatpush3.bf16.msra.mxu1 %v12340_v52  ;;  %v1898_v59 = vand.u32 4294901760, %v1856_v1 }
  0xa9   : > { %11306 = vmatprep.subr.bf16.mxu1 %v12396_v57 }
  0xaa   : > { %v13024_v53 = vpack.c.bf16 %v1898_v59, %v1895_v14 }
  0xab   : > { %11092 = vmatpush3.bf16.msra.mxu0 %v12797_v51  ;;  %v1858_v51 = vld [vmem:[%s13635_s6 + $0x58] sm:$0xff] }
  0xac   : > { %11094 = vmatprep.subr.bf16.mxu0 %v12799_v29  ;;  %11308 = vmatpush3.bf16.msra.mxu1 %v12396_v57 }
  0xad   : > { %11310 = vmatprep.subr.bf16.mxu1 %v12445_v62 }
  0xaf   : > { %11096 = vmatpush3.bf16.msra.mxu0 %v12799_v29  ;;  %v1901_v29 = vand.u32 4294901760, %v1857_v47 }
  0xb0   : > { %11098 = vmatprep.subr.bf16.mxu0 %v12801_v34  ;;  %11312 = vmatpush3.bf16.msra.mxu1 %v12445_v62 }
  0xb1   : > { %11314 = vmatprep.subr.bf16.mxu1 %v13767_v0 }
  0xb3   : > { %11100 = vmatpush3.bf16.msra.mxu0 %v12801_v34  ;;  %v1904_v34 = vand.u32 4294901760, %v1858_v51 }
  0xb4   : > { %11102 = vmatprep.subr.bf16.mxu0 %v13768_v5  ;;  %11316 = vmatpush3.bf16.msra.mxu1 %v13767_v0 }
  0xb5   : > { %11318 = vmatprep.subr.bf16.mxu1 %v13770_v44  ;;  %v13026_v7 = vpack.c.bf16 %v1904_v34, %v1901_v29 }
  0xb6   : > { %9884 = vmatmul.mubr.f32.vlgmr.msra.gmra.mrb[0].mxu0 %v12494_v60 }
  0xb7   : > { %11104 = vmatpush3.bf16.msra.mxu0 %v13768_v5  ;;  %9918 = vmatprep.mubr.f32.mxu0 %v13782_v50 }
  0xb8   : > { %11106 = vmatprep.subr.bf16.mxu0 %v13771_v36  ;;  %11320 = vmatpush3.bf16.msra.mxu1 %v13770_v44 }
  0xb9   : > { %11322 = vmatprep.subr.bf16.mxu1 %v13773_v21 }
  0xbb   : > { %11108 = vmatpush3.bf16.msra.mxu0 %v13771_v36 }
  0xbc   : > { %11110 = vmatprep.subr.bf16.mxu0 %v13774_v22  ;;  %11324 = vmatpush3.bf16.msra.mxu1 %v13773_v21 }
  0xbf   : > { %11112 = vmatpush3.bf16.msra.mxu0 %v13774_v22  ;;  %10129 = vmatmul.mubr.f32.vlgmr.msra.gmra.mrb[0].mxu1 %v12663_v6 }
  0xc0   : > { %11114 = vmatprep.subr.bf16.mxu0 %v13775_v42 }
  0xc3   : > { %11116 = vmatpush3.bf16.msra.mxu0 %v13775_v42 }
  0xc4   : > { %11118 = vmatprep.subr.bf16.mxu0 %v13777_v32 }
  0xc7   : > { %11120 = vmatpush3.bf16.msra.mxu0 %v13777_v32  ;;  %v1988_v32 = vand.u32 4294901760, %v13077_v37 }
  0xc8   : > { %11122 = vmatprep.subr.bf16.mxu0 %v13778_v17 }
  0xc9   : > { %v1989_v23 = vsub.f32 %v13077_v37, %v1988_v32 }
  0xcb   : > { %11124 = vmatpush3.bf16.msra.mxu0 %v13778_v17 }
  0xcc   : > { %11126 = vmatprep.subr.bf16.mxu0 %v13779_v56 }
  0xcf   : > { %11128 = vmatpush3.bf16.msra.mxu0 %v13779_v56 }
  0xd0   : > { %11130 = vmatprep.subr.bf16.mxu0 %v13780_v15 }
  0xd3   : > { %11132 = vmatpush3.bf16.msra.mxu0 %v13780_v15 }
  0xd4   : > { %11134 = vmatprep.subr.bf16.mxu0 %v12274_v27 }
  0xd6   : > { %9919 = vmatmul.mubr.f32.vlgmr.msra.gmra.mrb[0].mxu0 %v12494_v60 }
  0xd7   : > { %11136 = vmatpush3.bf16.msra.mxu0 %v12274_v27  ;;  %9953 = vmatprep.mubr.f32.mxu0 %v1248_v16  ;;  %v1257_v27 = vsub.f32 %v12821_v48, %v12860_v41 }
  0xd8   : > { %11138 = vmatprep.subr.bf16.mxu0 %v12300_v39 }
  0xdb   : > { %11140 = vmatpush3.bf16.msra.mxu0 %v12300_v39  ;;  %v12968_v39 = vand.u32 4294901760, %v1257_v27 }
  0xdc   : > { %11142 = vmatprep.subr.bf16.mxu0 %v12340_v52 }
  0xdf   : > { %11144 = vmatpush3.bf16.msra.mxu0 %v12340_v52  ;;  %v1847_v52 = vld [vmem:[%s13635_s6] sm:$0xff] }
  0xe0   : > { %11146 = vmatprep.subr.bf16.mxu0 %v12396_v57 }
  0xe3   : > { %11148 = vmatpush3.bf16.msra.mxu0 %v12396_v57  ;;  %v1848_v57 = vld [vmem:[%s13635_s6 + $0x8] sm:$0xff] }
  0xe4   : > { %11150 = vmatprep.subr.bf16.mxu0 %v12445_v62  ;;  %v1874_v60 = vand.u32 4294901760, %v1848_v57 }
  0xe6   : > { %v13072_v2 = vsub.f32 %v1848_v57, %v1874_v60  ;;  %v13100_v57 = vsub.f32 %v1852_v31, %v1886_v30  ;;  %v2030_v30 = vand.u32 4294901760, %v13106_v9 }
  0xe7   : > { %11152 = vmatpush3.bf16.msra.mxu0 %v12445_v62  ;;  %v1871_v62 = vand.u32 4294901760, %v1847_v52 }
  0xe8   : > { %11154 = vmatprep.subr.bf16.mxu0 %v13767_v0  ;;  %v1981_v36 = vand.u32 4294901760, %v13072_v2 }
  0xe9   : > { %v12984_v45 = vpack.c.bf16 %v1874_v60, %v1871_v62  ;;  %v13070_v5 = vsub.f32 %v1847_v52, %v1871_v62  ;;  %v13097_v52 = vsub.f32 %v1851_v24, %v1883_v58  ;;  %v13102_v62 = vsub.f32 %v1853_v8, %v1889_v40 }
  0xea   : > { %v1982_v42 = vsub.f32 %v13072_v2, %v1981_v36  ;;  %v13104_v60 = vsub.f32 %v1854_v28, %v1892_v54  ;;  %v2009_v24 = vand.u32 4294901760, %v13100_v57  ;;  %v13120_v54 = vsub.f32 %v1858_v51, %v1904_v34 }
  0xeb   : > { %11156 = vmatpush3.bf16.msra.mxu0 %v13767_v0  ;;  %v13066_v0 = vpack.c.bf16 %v1916_v63, %v1913_v4  ;;  %v2002_v25 = vand.u32 4294901760, %v13097_v52  ;;  %v2016_v31 = vand.u32 4294901760, %v13102_v62 }
  0xec   : > { %11158 = vmatprep.subr.bf16.mxu0 %v13770_v44  ;;  %v1983_v15 = vand.u32 4294901760, %v1982_v42  ;;  %v2023_v58 = vand.u32 4294901760, %v13104_v60  ;;  %v2010_v38 = vsub.f32 %v13100_v57, %v2009_v24 }
  0xed   : > { %v2003_v8 = vsub.f32 %v13097_v52, %v2002_v25 }
  0xee   : > { %v2024_v14 = vsub.f32 %v13104_v60, %v2023_v58  ;;  %v2011_v42 = vand.u32 4294901760, %v2010_v38 }
  0xef   : > { %11160 = vmatpush3.bf16.msra.mxu0 %v13770_v44  ;;  %v1974_v44 = vand.u32 4294901760, %v13070_v5 }
  0xf0   : > { %11162 = vmatprep.subr.bf16.mxu0 %v13773_v21 }
  0xf1   : > { %v1975_v22 = vsub.f32 %v13070_v5, %v1974_v44 }
  0xf3   : > { %11164 = vmatpush3.bf16.msra.mxu0 %v13773_v21  ;;  %v13079_v21 = vsub.f32 %v1850_v55, %v1880_v20  ;;  %v1976_v56 = vand.u32 4294901760, %v1975_v22  ;;  %v13111_v20 = vsub.f32 %v1857_v47, %v1901_v29  ;;  %v2004_v47 = vand.u32 4294901760, %v2003_v8 }
  0xf4   : > { %11326 = vmatprep.subr.bf16.mxu0 %v12984_v45  ;;  %v2051_v22 = vand.u32 4294901760, %v13120_v54  ;;  %v13143_v8 = vsub.f32 %v13046_v49, %v1913_v4 }
  0xf5   : > { %v1995_v17 = vand.u32 4294901760, %v13079_v21  ;;  %v11357_v18 = vpack.c.bf16 %v1983_v15, %v1976_v56  ;;  %v2044_v40 = vand.u32 4294901760, %v13111_v20  ;;  %v2025_v15 = vand.u32 4294901760, %v2024_v14 }
  0xf6   : > { %9954 = vmatmul.mubr.f32.vlgmr.msra.gmra.mrb[2].mxu0 %v12968_v39 }
  0xf7   : > { %10163 = vmatprep.mubr.f32.mxu0 %v1248_v16  ;;  %11328 = vmatpush3.bf16.msra.mxu0 %v12984_v45  ;;  %v1996_v50 = vsub.f32 %v13079_v21, %v1995_v17  ;;  %v1990_v16 = vand.u32 4294901760, %v1989_v23  ;;  %v2045_v51 = vsub.f32 %v13111_v20, %v2044_v40 }
  0xf8   : > { %11330 = vmatprep.subr.bf16.mxu0 %v12986_v61 }
  0xf9   : > { %v1997_v27 = vand.u32 4294901760, %v1996_v50  ;;  %v2052_v50 = vsub.f32 %v13120_v54, %v2051_v22 }
  0xfb   : > { %11332 = vmatpush3.bf16.msra.mxu0 %v12986_v61  ;;  %v11361_v55 = vpack.c.bf16 %v1997_v27, %v1990_v16  ;;  %v11365_v16 = vpack.c.bf16 %v2011_v42, %v2004_v47 }
  0xfc   : > { %11334 = vmatprep.subr.bf16.mxu0 %v13004_v43 }
  0xff   : > { %11336 = vmatpush3.bf16.msra.mxu0 %v13004_v43 }
 0x100   : > { %11338 = vmatprep.subr.bf16.mxu0 %v13006_v26 }
 0x103   : > { %11340 = vmatpush3.bf16.msra.mxu0 %v13006_v26 }
 0x104   : > { %11342 = vmatprep.subr.bf16.mxu0 %v13024_v53 }
 0x107   : > { %11344 = vmatpush3.bf16.msra.mxu0 %v13024_v53 }
 0x108   : > { %11346 = vmatprep.subr.bf16.mxu0 %v13026_v7 }
 0x10b   : > { %11348 = vmatpush3.bf16.msra.mxu0 %v13026_v7 }
 0x10c   : > { %11350 = vmatprep.subr.bf16.mxu0 %v13060_v10 }
 0x10f   : > { %11352 = vmatpush3.bf16.msra.mxu0 %v13060_v10 }
 0x110   : > { %11354 = vmatprep.subr.bf16.mxu0 %v13066_v0 }
 0x113   : > { %11356 = vmatpush3.bf16.msra.mxu0 %v13066_v0 }
 0x114   : > { %11358 = vmatprep.subr.bf16.mxu0 %v11357_v18 }
 0x116   : > { %10164 = vmatmul.mubr.f32.vlgmr.msra.gmra.mrb[4].mxu0 %v12968_v39  ;;  %v13109_v39 = vsub.f32 %v1856_v1, %v1898_v59  ;;  %v2017_v1 = vsub.f32 %v13102_v62, %v2016_v31  ;;  %v2031_v59 = vsub.f32 %v13106_v9, %v2030_v30 }
 0x117   : > { %10198 = vmatprep.mubr.f32.mxu0 %v13776_v35  ;;  %11360 = vmatpush3.bf16.msra.mxu0 %v11357_v18  ;;  %v13133_v18 = vsub.f32 %v13034_v3, %v1907_v13  ;;  %v2046_v3 = vand.u32 4294901760, %v2045_v51  ;;  %v2053_v13 = vand.u32 4294901760, %v2052_v50  ;;  %v13172_v51 = vpack.c.bf16 %v2023_v58, %v2016_v31 }
 0x118   : > { %11362 = vmatprep.subr.bf16.mxu0 %v11361_v55  ;;  %v2037_v28 = vand.u32 4294901760, %v13109_v39  ;;  %v2018_v56 = vand.u32 4294901760, %v2017_v1  ;;  %v2032_v34 = vand.u32 4294901760, %v2031_v59  ;;  %v13149_v1 = vsub.f32 %v13051_v11, %v1916_v63 }
 0x119   : > { %v2058_v38 = vand.u32 4294901760, %v13133_v18  ;;  %v11377_v47 = vpack.c.bf16 %v2053_v13, %v2046_v3  ;;  %v13161_v63 = vpack.c.bf16 %v1981_v36, %v1974_v44  ;;  %v13178_v44 = vpack.c.bf16 %v2051_v22, %v2044_v40 }
 0x11a   : > { %v2038_v29 = vsub.f32 %v13109_v39, %v2037_v28  ;;  %v11369_v27 = vpack.c.bf16 %v2025_v15, %v2018_v56  ;;  %v2079_v49 = vand.u32 4294901760, %v13149_v1  ;;  %v13168_v56 = vpack.c.bf16 %v1995_v17, %v1988_v32 }
 0x11b   : > { %11364 = vmatpush3.bf16.msra.mxu0 %v11361_v55  ;;  %v13138_v55 = vsub.f32 %v13039_v12, %v1910_v19  ;;  %v2072_v12 = vand.u32 4294901760, %v13143_v8  ;;  %v2059_v19 = vsub.f32 %v13133_v18, %v2058_v38  ;;  %v13170_v15 = vpack.c.bf16 %v2009_v24, %v2002_v25 }
 0x11c   : > { %v2039_v23 = vand.u32 4294901760, %v2038_v29  ;;  %11366 = vmatprep.subr.bf16.mxu0 %v11365_v16  ;;  %v2080_v42 = vsub.f32 %v13149_v1, %v2079_v49  ;;  %v13176_v50 = vpack.c.bf16 %v2037_v28, %v2030_v30  ;;  %v11389_v31 = vpack.c.bf16 %v13072_v2, %v13070_v5  ;;  %v9041_v30 = vld [vmem:[%s13632_s3] ss:$0 sm:$0xff] }
 0x11d   : > { %v2065_v14 = vand.u32 4294901760, %v13138_v55  ;;  %v2060_v29 = vand.u32 4294901760, %v2059_v19  ;;  %v2073_v11 = vsub.f32 %v13143_v8, %v2072_v12  ;;  %v11393_v58 = vpack.c.bf16 %v13079_v21, %v13077_v37 }
 0x11e   : > { %v11373_v4 = vpack.c.bf16 %v2039_v23, %v2032_v34  ;;  %v2081_v25 = vand.u32 4294901760, %v2080_v42  ;;  %v11397_v28 = vpack.c.bf16 %v13100_v57, %v13097_v52  ;;  %v11401_v37 = vpack.c.bf16 %v13104_v60, %v13102_v62 }
 0x11f   : > { %11368 = vmatpush3.bf16.msra.mxu0 %v11365_v16  ;;  %v2066_v59 = vsub.f32 %v13138_v55, %v2065_v14  ;;  %v13180_v36 = vpack.c.bf16 %v2065_v14, %v2058_v38  ;;  %v2074_v17 = vand.u32 4294901760, %v2073_v11  ;;  %v11405_v52 = vpack.c.bf16 %v13109_v39, %v13106_v9 }
 0x120   : > { %11370 = vmatprep.subr.bf16.mxu0 %v11369_v27  ;;  %v11409_v60 = vpack.c.bf16 %v13120_v54, %v13111_v20  ;;  %v11413_v3 = vpack.c.bf16 %v13138_v55, %v13133_v18  ;;  %v11417_v9 = vpack.c.bf16 %v13149_v1, %v13143_v8  ;;  %v9042_v54 = vld [vmem:[%s13634_s5] ss:$0 sm:$0xff] }
 0x121   : > { %v2067_v23 = vand.u32 4294901760, %v2066_v59  ;;  %v11385_v24 = vpack.c.bf16 %v2081_v25, %v2074_v17 }
 0x123   : > { %11372 = vmatpush3.bf16.msra.mxu0 %v11369_v27  ;;  %v13184_v27 = vpack.c.bf16 %v2079_v49, %v2072_v12  ;;  %v11381_v32 = vpack.c.bf16 %v2067_v23, %v2060_v29 }
 0x124   : > { %11374 = vmatprep.subr.bf16.mxu0 %v11373_v4 }
 0x127   : > { %11376 = vmatpush3.bf16.msra.mxu0 %v11373_v4 }
 0x128   : > { %11378 = vmatprep.subr.bf16.mxu0 %v11377_v47 }
 0x12b   : > { %11380 = vmatpush3.bf16.msra.mxu0 %v11377_v47 }
 0x12c   : > { %11382 = vmatprep.subr.bf16.mxu0 %v11381_v32 }
 0x12f   : > { %11384 = vmatpush3.bf16.msra.mxu0 %v11381_v32 }
 0x130   : > { %11386 = vmatprep.subr.bf16.mxu0 %v11385_v24 }
 0x133   : > { %11388 = vmatpush3.bf16.msra.mxu0 %v11385_v24 }
 0x134   : > { %11390 = vmatprep.subr.bf16.mxu0 %v11389_v31 }
 0x136   : > { %10199 = vmatmul.mubr.f32.vlgmr.msra.gmra.mrb[4].mxu0 %v12663_v6 }
 0x137   : > { %11392 = vmatpush3.bf16.msra.mxu0 %v11389_v31  ;;  %10233 = vmatprep.mubr.f32.mxu0 %v12708_v46 }
 0x138   : > { %11394 = vmatprep.subr.bf16.mxu0 %v11393_v58 }
 0x13b   : > { %11396 = vmatpush3.bf16.msra.mxu0 %v11393_v58 }
 0x13c   : > { %11398 = vmatprep.subr.bf16.mxu0 %v11397_v28 }
 0x13f   : > { %11400 = vmatpush3.bf16.msra.mxu0 %v11397_v28 }
 0x140   : > { %11402 = vmatprep.subr.bf16.mxu0 %v11401_v37 }
 0x143   : > { %11404 = vmatpush3.bf16.msra.mxu0 %v11401_v37 }
 0x144   : > { %11406 = vmatprep.subr.bf16.mxu0 %v11405_v52 }
 0x147   : > { %11408 = vmatpush3.bf16.msra.mxu0 %v11405_v52 }
 0x148   : > { %11410 = vmatprep.subr.bf16.mxu0 %v11409_v60 }
 0x14b   : > { %11412 = vmatpush3.bf16.msra.mxu0 %v11409_v60 }
 0x14c   : > { %11414 = vmatprep.subr.bf16.mxu0 %v11413_v3 }
 0x14f   : > { %11416 = vmatpush3.bf16.msra.mxu0 %v11413_v3 }
 0x150   : > { %11418 = vmatprep.subr.bf16.mxu0 %v11417_v9 }
 0x153   : > { %11420 = vmatpush3.bf16.msra.mxu0 %v11417_v9 }
 0x154   : > { %11422 = vmatprep.subr.bf16.mxu0 %v12984_v45 }
 0x156   : > { %10234 = vmatmul.mubr.f32.vlgmr.msra.gmra.mrb[4].mxu0 %v12821_v48 }
 0x157   : > { %11424 = vmatpush3.bf16.msra.mxu0 %v12984_v45  ;;  %10268 = vmatprep.mubr.f32.mxu0 %v12824_v33 }
 0x158   : > { %11426 = vmatprep.subr.bf16.mxu0 %v12986_v61 }
 0x15b   : > { %11428 = vmatpush3.bf16.msra.mxu0 %v12986_v61 }
 0x15c   : > { %11430 = vmatprep.subr.bf16.mxu0 %v13004_v43 }
 0x15f   : > { %11432 = vmatpush3.bf16.msra.mxu0 %v13004_v43 }
 0x160   : > { %11434 = vmatprep.subr.bf16.mxu0 %v13006_v26 }
 0x163   : > { %11436 = vmatpush3.bf16.msra.mxu0 %v13006_v26 }
 0x164   : > { %11438 = vmatprep.subr.bf16.mxu0 %v13024_v53 }
 0x167   : > { %11440 = vmatpush3.bf16.msra.mxu0 %v13024_v53 }
 0x168   : > { %11442 = vmatprep.subr.bf16.mxu0 %v13026_v7 }
 0x16b   : > { %11444 = vmatpush3.bf16.msra.mxu0 %v13026_v7 }
 0x16c   : > { %11446 = vmatprep.subr.bf16.mxu0 %v13060_v10 }
 0x16f   : > { %11448 = vmatpush3.bf16.msra.mxu0 %v13060_v10 }
 0x170   : > { %11450 = vmatprep.subr.bf16.mxu0 %v13066_v0 }
 0x173   : > { %11452 = vmatpush3.bf16.msra.mxu0 %v13066_v0 }
 0x174   : > { %11454 = vmatprep.subr.bf16.mxu0 %v13161_v63 }
 0x176   : > { %10269 = vmatmul.mubr.f32.vlgmr.msra.gmra.mrb[4].mxu0 %v12860_v41  ;;  %v13308_v41 = vld [vmem:[%s421_s26] sm:$0xff] }
 0x177   : > { %11456 = vmatpush3.bf16.msra.mxu0 %v13161_v63  ;;  %10303 = vmatprep.mubr.f32.mxu0 %v13776_v35  ;;  %vm3071_vm1 = vcmp.eq.s32.totalorder %v13308_v41, 0 }
 0x178   : > { %11458 = vmatprep.subr.bf16.mxu0 %v13168_v56 }
 0x17b   : > { %11460 = vmatpush3.bf16.msra.mxu0 %v13168_v56 }
 0x17c   : > { %11462 = vmatprep.subr.bf16.mxu0 %v13170_v15 }
 0x17f   : > { %11464 = vmatpush3.bf16.msra.mxu0 %v13170_v15 }
 0x180   : > { %11466 = vmatprep.subr.bf16.mxu0 %v13172_v51 }
 0x183   : > { %11468 = vmatpush3.bf16.msra.mxu0 %v13172_v51 }
 0x184   : > { %11470 = vmatprep.subr.bf16.mxu0 %v13176_v50 }
 0x187   : > { %11472 = vmatpush3.bf16.msra.mxu0 %v13176_v50 }
 0x188   : > { %11474 = vmatprep.subr.bf16.mxu0 %v13178_v44 }
 0x18b   : > { %11476 = vmatpush3.bf16.msra.mxu0 %v13178_v44 }
 0x18c   : > { %11478 = vmatprep.subr.bf16.mxu0 %v13180_v36 }
 0x18f   : > { %11480 = vmatpush3.bf16.msra.mxu0 %v13180_v36 }
 0x190   : > { %11482 = vmatprep.subr.bf16.mxu0 %v13184_v27 }
 0x192   : > { %v13174_v34 = vpop.f32.mrb[0].mxu1 }
 0x193   : > { %v13182_v16 = vpop.f32.mrb[1].mxu1  ;;  %11484 = vmatpush3.bf16.msra.mxu0 %v13184_v27 }
 0x194   : > { %11486 = vmatprep.subr.bf16.mxu0 %v12984_v45 }
 0x196   : > { %10304 = vmatmul.mubr.f32.vlgmr.msra.gmra.mrb[4].mxu0 %v12663_v6 }
 0x197   : > { %11488 = vmatpush3.bf16.msra.mxu0 %v12984_v45  ;;  %10338 = vmatprep.mubr.f32.mxu0 %v13776_v35  ;;  %v13310_v45 = vld [vmem:[%s421_s26 + $0x8] sm:$0xff] }
 0x198   : > { %11490 = vmatprep.subr.bf16.mxu0 %v12986_v61  ;;  %vm3072_vm3 = vcmp.eq.s32.totalorder %v13310_v45, 0 }
 0x19b   : > { %11492 = vmatpush3.bf16.msra.mxu0 %v12986_v61 }
 0x19c   : > { %11494 = vmatprep.subr.bf16.mxu0 %v13004_v43 }
 0x19f   : > { %11496 = vmatpush3.bf16.msra.mxu0 %v13004_v43 }
 0x1a0   : > { %11498 = vmatprep.subr.bf16.mxu0 %v13006_v26 }
 0x1a3   : > { %11500 = vmatpush3.bf16.msra.mxu0 %v13006_v26 }
 0x1a4   : > { %11502 = vmatprep.subr.bf16.mxu0 %v13024_v53 }
 0x1a7   : > { %11504 = vmatpush3.bf16.msra.mxu0 %v13024_v53 }
 0x1a8   : > { %11506 = vmatprep.subr.bf16.mxu0 %v13026_v7 }
 0x1a9   : > { %v9920_v40 = vpop.f32.mrb[0].mxu0 }
 0x1aa   : > { %v1130_v5 = vpop.f32.mrb[1].mxu0  ;;  %v13220_v39 = vadd.f32 %v9920_v40, %v9041_v30 }
 0x1ab   : > { %v13197_v2 = vadd.f32 %v9041_v30, %v1130_v5  ;;  %11508 = vmatpush3.bf16.msra.mxu0 %v13026_v7 }
 0x1ac   : > { %v2559_v20 = vsel %vm2554_vm0, %v13220_v39, 0  ;;  %11510 = vmatprep.subr.bf16.mxu0 %v13060_v10 }
 0x1ad   : > { %v2556_v46 = vsel %vm2554_vm0, %v13197_v2, 0  ;;  %v13232_v55 = vand.u32 4294901760, %v2559_v20 }
 0x1ae   : > { %v13203_v21 = vand.u32 4294901760, %v2556_v46 }
 0x1af   : > { %v2645_v33 = vsub.f32 %v2559_v20, %v13232_v55  ;;  %11512 = vmatpush3.bf16.msra.mxu0 %v13060_v10 }
 0x1b0   : > { %v13206_v22 = vsub.f32 %v2556_v46, %v13203_v21  ;;  %11514 = vmatprep.subr.bf16.mxu0 %v13066_v0 }
 0x1b1   : > { %v2646_v29 = vand.u32 4294901760, %v2645_v33 }
 0x1b2   : > { %v2636_v57 = vand.u32 4294901760, %v13206_v22 }
 0x1b3   : > { %11516 = vmatpush3.bf16.msra.mxu0 %v13066_v0  ;;  %v9043_v0 = vld [vmem:[%s13636_s7] ss:$0 sm:$0xff] }
 0x1b4   : > { %v2637_v62 = vsub.f32 %v13206_v22, %v2636_v57 }
 0x1b6   : > { %v2638_v38 = vand.u32 4294901760, %v2637_v62  ;;  %10339 = vmatmul.mubr.f32.vlgmr.msra.gmra.mrb[4].mxu0 %v12663_v6 }
 0x1b8   : > { %10345 = vmatprep.mubr.f32.mxu1 %v2638_v38 }
 0x1c9   : > { %v9955_v18 = vpop.f32.mrb[2].mxu0 }
 0x1ca   : > { %v1261_v8 = vadd.f32 %v9955_v18, %v9042_v54  ;;  %v1250_v1 = vpop.f32.mrb[3].mxu0 }
 0x1cb   : > { %v1251_v13 = vadd.f32 %v9042_v54, %v1250_v1 }
 0x1cc   : > { %v13236_v48 = vadd.f32 %v13174_v34, %v1261_v8 }
 0x1cd   : > { %v13240_v14 = vadd.f32 %v13182_v16, %v1251_v13  ;;  %v2647_v16 = vsub.f32 %v2645_v33, %v2646_v29 }
 0x1ce   : > { %v2565_v12 = vsel %vm2554_vm0, %v13236_v48, 0 }
 0x1cf   : > { %v2571_v19 = vand.u32 4294901760, %v2565_v12  ;;  %v2562_v49 = vsel %vm2554_vm0, %v13240_v14, 0  ;;  %v2648_v24 = vand.u32 4294901760, %v2647_v16 }
 0x1d0   : > { %v2568_v4 = vand.u32 4294901760, %v2562_v49 }
 0x1d1   : > { %v2663_v59 = vsub.f32 %v2565_v12, %v2571_v19 }
 0x1d2   : > { %v11517_v47 = vpack.c.bf16 %v2571_v19, %v2568_v4  ;;  %v2656_v11 = vsub.f32 %v2562_v49, %v2568_v4 }
 0x1d3   : > { %v2664_v42 = vand.u32 4294901760, %v2663_v59 }
 0x1d4   : > { %11518 = vmatprep.subr.bf16.mxu1 %v11517_v47  ;;  %v2657_v34 = vand.u32 4294901760, %v2656_v11  ;;  %v11525_v58 = vpack.c.bf16 %v2663_v59, %v2656_v11 }
 0x1d5   : > { %11520 = vmatpush3.bf16.xpose.msra.mxu1 %v11517_v47  ;;  %v2665_v23 = vsub.f32 %v2663_v59, %v2664_v42 }
 0x1d6   : > { %v2658_v32 = vsub.f32 %v2656_v11, %v2657_v34  ;;  %v11533_v30 = vpack.c.bf16 %v2664_v42, %v2657_v34 }
 0x1d7   : > { %v2666_v17 = vand.u32 4294901760, %v2665_v23 }
 0x1d8   : > { %v2659_v25 = vand.u32 4294901760, %v2658_v32 }
 0x1da   : > { %v11521_v31 = vpack.c.bf16 %v2666_v17, %v2659_v25 }
 0x1dc   : > { %10346 = vmatmul.mubr.f32.vlgmr.msra.gmra.mrb[2].mxu1 %v2648_v24  ;;  %11522 = vmatprep.subr.bf16.mxu1 %v11521_v31 }
 0x1dd   : > { %11524 = vmatpush3.bf16.xpose.msra.mxu1 %v11521_v31  ;;  %10352 = vmatprep.mubr.f32.mxu1 %v13203_v21 }
 0x1de   : > { %11526 = vmatprep.subr.bf16.mxu1 %v11525_v58 }
 0x1e4   : > { %10353 = vmatmul.mubr.f32.vlgmr.msra.gmra.mrb[2].mxu1 %v13232_v55 }
 0x1e5   : > { %11528 = vmatpush3.bf16.xpose.msra.mxu1 %v11525_v58  ;;  %10359 = vmatprep.mubr.f32.mxu1 %v13206_v22 }
 0x1e6   : > { %11530 = vmatprep.subr.bf16.mxu1 %v11517_v47 }
 0x1ec   : > { %10360 = vmatmul.mubr.f32.vlgmr.msra.gmra.mrb[2].mxu1 %v2645_v33 }
 0x1ed   : > { %11532 = vmatpush3.bf16.xpose.msra.mxu1 %v11517_v47  ;;  %10366 = vmatprep.mubr.f32.mxu1 %v2636_v57 }
 0x1ee   : > { %11534 = vmatprep.subr.bf16.mxu1 %v11533_v30 }
 0x1f4   : > { %10367 = vmatmul.mubr.f32.vlgmr.msra.gmra.mrb[2].mxu1 %v2646_v29 }
 0x1f5   : > { %11536 = vmatpush3.bf16.xpose.msra.mxu1 %v11533_v30  ;;  %10373 = vmatprep.mubr.f32.mxu1 %v13203_v21 }
 0x1f6   : > { %11538 = vmatprep.subr.bf16.mxu1 %v11517_v47 }
 0x1fc   : > { %10374 = vmatmul.mubr.f32.vlgmr.msra.gmra.mrb[2].mxu1 %v13232_v55 }
 0x1fd   : > { %11540 = vmatpush3.bf16.xpose.msra.mxu1 %v11517_v47  ;;  %10380 = vmatprep.mubr.f32.mxu1 %v13203_v21 }
 0x204   : > { %10381 = vmatmul.mubr.f32.vlgmr.msra.gmra.mrb[2].mxu1 %v13232_v55 }
 0x289   : > { %v10340_v63 = vpop.f32.mrb[4].mxu0 }
 0x28a   : > { %v13325_v56 = vadd.f32 %v10340_v63, %v9043_v0  ;;  %v2544_v15 = vpop.f32.mrb[5].mxu0 }
 0x28b   : > { %v13327_v51 = vadd.f32 %v9043_v0, %v2544_v15 }
 0x28c   : > { %v3108_v50 = vand.u32 4294901760, %v13325_v56 }
 0x28d   : > { %v3105_v44 = vand.u32 4294901760, %v13327_v51 }
 0x28e   : > { %v3200_v36 = vsub.f32 %v13325_v56, %v3108_v50 }
 0x28f   : > { %v13332_v27 = vpack.c.bf16 %v3108_v50, %v3105_v44  ;;  %v3193_v28 = vsub.f32 %v13327_v51, %v3105_v44 }
 0x290   : > { %v3201_v40 = vand.u32 4294901760, %v3200_v36 }
 0x291   : > { %11542 = vmatprep.subr.bf16.mxu1 %v13332_v27  ;;  %v3194_v5 = vand.u32 4294901760, %v3193_v28  ;;  %v11549_v46 = vpack.c.bf16 %v3200_v36, %v3193_v28 }
 0x292   : > { %11544 = vmatpush3.bf16.msra.mxu1 %v13332_v27  ;;  %v3202_v37 = vsub.f32 %v3200_v36, %v3201_v40 }
 0x293   : > { %v3195_v21 = vsub.f32 %v3193_v28, %v3194_v5  ;;  %v13337_v52 = vpack.c.bf16 %v3201_v40, %v3194_v5 }
 0x294   : > { %v3203_v22 = vand.u32 4294901760, %v3202_v37 }
 0x295   : > { %v3196_v57 = vand.u32 4294901760, %v3195_v21 }
 0x297   : > { %v11545_v62 = vpack.c.bf16 %v3203_v22, %v3196_v57 }
 0x299   : > { %11546 = vmatprep.subr.bf16.mxu1 %v11545_v62 }
 0x2d7   : > { %v10382_v35 = vpop.f32.mrb[2].mxu1 }
 0x2d8   : > { %v3059_v61 = vpop.f32.mrb[3].mxu1  ;;  %v3070_v43 = vmul.f32 0.17677669, %v10382_v35 }
 0x2d9   : > { %v3069_v26 = vmul.f32 0.17677669, %v3059_v61 }
 0x2da   : > { %v3074_v7 = vsel %vm3072_vm3, -1e+09, %v3070_v43 }
 0x2db   : > { %v3073_v6 = vsel %vm3071_vm1, -1e+09, %v3069_v26  ;;  %v3079_v10 = vsel %vm3075_vm2, %v3074_v7, -inf }
 0x2dc   : > { %v3076_v53 = vsel %vm3075_vm2, %v3073_v6, -inf }
 0x2dd   : > { %3077 = vmax.xlane.f32.xlu0 %v3076_v53 }
 0x2e1   : > { %3080 = vmax.xlane.f32.xlu0 %v3079_v10 }
 0x2f7   : > { %3614 = vrot.lane.b32.xlu0 %v13240_v14, %s12114_s27 }
 0x36a   : > { %v3078_v60 = vpop.xlane.xlu0 %3077 }
 0x36b   : > { %v3082_v38 = vsub.f32 %v3073_v6, %v3078_v60 }
 0x36d   : > { %v3084_v3 = vmul.f32 1.442695, %v3082_v38 }
 0x36e   : > { %v3081_v9 = vpop.xlane.xlu0 %3080 }
 0x36f   : > { %12074 = vpow2.f32 %v3084_v3  ;;  %v3083_v20 = vsub.f32 %v3074_v7, %v3081_v9 }
 0x371   : > { %v3086_v54 = vmul.f32 1.442695, %v3083_v20 }
 0x372   : > { %v3615_v58 = vpop.permute.xlu0 %3614 }
 0x373   : > { %12076 = vpow2.f32 %v3086_v54  ;;  %v3622_v61 = vsel %vm2554_vm0, %v3615_v58, 0 }
 0x374   : > { %v3627_v6 = vand.u32 4294901760, %v3622_v61 }
 0x376   : > { %v3715_v0 = vsub.f32 %v3622_v61, %v3627_v6 }
 0x378   : > { %v3716_v44 = vand.u32 4294901760, %v3715_v0 }
 0x379   : > { %v12075_v18 = vpop.eup %12074 }
 0x37a   : > { %v3088_v55 = vsel %vm3075_vm2, %v12075_v18, 0.0  ;;  %v3717_v37 = vsub.f32 %v3715_v0, %v3716_v44 }
 0x37b   : > { %3089 = vadd.xlane.f32.xlu1 %v3088_v55 }
 0x37d   : > { %v12077_v8 = vpop.eup %12076 }
 0x37e   : > { %v3091_v1 = vsel %vm3075_vm2, %v12077_v8, 0.0 }
 0x37f   : > { %3092 = vadd.xlane.f32.xlu1 %v3091_v1 }
 0x390   : > { %3616 = vrot.lane.b32.xlu1 %v13236_v48, %s12114_s27 }
 0x394   : > { %3610 = vrot.lane.b32.xlu1 %v13197_v2, %s12114_s27 }
 0x398   : > { %3612 = vrot.lane.b32.xlu1 %v13220_v39, %s12114_s27 }
 0x408   : > { %v3090_v13 = vpop.xlane.xlu1 %3089 }
 0x409   : > { %12078 = vrcp.f32 %v3090_v13 }
 0x40c   : > { %v3093_v33 = vpop.xlane.xlu1 %3092 }
 0x40d   : > { %12080 = vrcp.f32 %v3093_v33 }
 0x410   : > { %v3617_v31 = vpop.permute.xlu1 %3616 }
 0x411   : > { %v3624_v35 = vsel %vm2554_vm0, %v3617_v31, 0 }
 0x412   : > { %v3630_v26 = vand.u32 4294901760, %v3624_v35 }
 0x413   : > { %v12079_v12 = vpop.eup %12078 }
 0x414   : > { %v3095_v19 = vmul.f32 %v12079_v12, %v12075_v18  ;;  %v3611_v30 = vpop.permute.xlu1 %3610  ;;  %v3722_v7 = vsub.f32 %v3624_v35, %v3630_v26  ;;  %v11565_v40 = vpack.c.bf16 %v3630_v26, %v3627_v6 }
 0x415   : > { %v3618_v43 = vsel %vm2554_vm0, %v3611_v30, 0 }
 0x416   : > { %v3099_v49 = vsel %vm3075_vm2, %v3095_v19, 0  ;;  %v3693_v53 = vand.u32 4294901760, %v3618_v43  ;;  %v3723_v50 = vand.u32 4294901760, %v3722_v7  ;;  %v11573_v9 = vpack.c.bf16 %v3722_v7, %v3715_v0 }
 0x417   : > { %v12081_v4 = vpop.eup %12080  ;;  %v3171_v59 = vand.u32 4294901760, %v3099_v49 }
 0x418   : > { %v3097_v47 = vmul.f32 %v12081_v4, %v12077_v8  ;;  %v3613_v10 = vpop.permute.xlu1 %3612  ;;  %v3694_v63 = vsub.f32 %v3618_v43, %v3693_v53  ;;  %v3724_v5 = vsub.f32 %v3722_v7, %v3723_v50 }
 0x419   : > { %v3172_v29 = vsub.f32 %v3099_v49, %v3171_v59  ;;  %v3620_v15 = vsel %vm2554_vm0, %v3613_v10, 0 }
 0x41a   : > { %v3102_v11 = vsel %vm3075_vm2, %v3097_v47, 0  ;;  %v3695_v36 = vand.u32 4294901760, %v3694_v63  ;;  %v3703_v28 = vand.u32 4294901760, %v3620_v15  ;;  %v3725_v22 = vand.u32 4294901760, %v3724_v5 }
 0x41b   : > { %v3173_v42 = vand.u32 4294901760, %v3172_v29  ;;  %v3181_v34 = vand.u32 4294901760, %v3102_v11 }
 0x41c   : > { %v3696_v21 = vsub.f32 %v3694_v63, %v3695_v36 }
 0x41d   : > { %v3174_v23 = vsub.f32 %v3172_v29, %v3173_v42  ;;  %v3182_v16 = vsub.f32 %v3102_v11, %v3181_v34 }
 0x41e   : > { %v3697_v57 = vand.u32 4294901760, %v3696_v21 }
 0x41f   : > { %v3175_v32 = vand.u32 4294901760, %v3174_v23  ;;  %v3183_v17 = vand.u32 4294901760, %v3182_v16 }
 0x421   : > { %10387 = vmatprep.mubr.f32.mxu1 %v3175_v32  ;;  %v3184_v25 = vsub.f32 %v3182_v16, %v3183_v17 }
 0x423   : > { %v3185_v24 = vand.u32 4294901760, %v3184_v25 }
 0x425   : > { %10388 = vmatmul.mubr.f32.vlgmr.msra.gmra.mrb[4].mxu1 %v3185_v24 }
 0x426   : > { %11548 = vmatpush3.bf16.msra.mxu1 %v11545_v62  ;;  %10394 = vmatprep.mubr.f32.mxu1 %v3171_v59  ;;  %v3718_v62 = vand.u32 4294901760, %v3717_v37 }
 0x427   : > { %11550 = vmatprep.subr.bf16.mxu1 %v11549_v46 }
 0x428   : > { %v11569_v60 = vpack.c.bf16 %v3725_v22, %v3718_v62 }
 0x42d   : > { %10395 = vmatmul.mubr.f32.vlgmr.msra.gmra.mrb[4].mxu1 %v3181_v34 }
 0x42e   : > { %11552 = vmatpush3.bf16.msra.mxu1 %v11549_v46  ;;  %10401 = vmatprep.mubr.f32.mxu1 %v3172_v29  ;;  %v3704_v46 = vsub.f32 %v3620_v15, %v3703_v28 }
 0x42f   : > { %11554 = vmatprep.subr.bf16.mxu1 %v13332_v27 }
 0x435   : > { %10402 = vmatmul.mubr.f32.vlgmr.msra.gmra.mrb[4].mxu1 %v3182_v16 }
 0x436   : > { %11556 = vmatpush3.bf16.msra.mxu1 %v13332_v27  ;;  %10408 = vmatprep.mubr.f32.mxu1 %v3173_v42 }
 0x437   : > { %11558 = vmatprep.subr.bf16.mxu1 %v13337_v52 }
 0x43d   : > { %10409 = vmatmul.mubr.f32.vlgmr.msra.gmra.mrb[4].mxu1 %v3183_v17 }
 0x43e   : > { %11560 = vmatpush3.bf16.msra.mxu1 %v13337_v52  ;;  %10415 = vmatprep.mubr.f32.mxu1 %v3171_v59  ;;  %v3705_v52 = vand.u32 4294901760, %v3704_v46 }
 0x43f   : > { %11562 = vmatprep.subr.bf16.mxu1 %v13332_v27 }
 0x440   : > { %v3706_v38 = vsub.f32 %v3704_v46, %v3705_v52 }
 0x442   : > { %v3707_v3 = vand.u32 4294901760, %v3706_v38 }
 0x445   : > { %10416 = vmatmul.mubr.f32.vlgmr.msra.gmra.mrb[4].mxu1 %v3181_v34 }
 0x446   : > { %11564 = vmatpush3.bf16.msra.mxu1 %v13332_v27  ;;  %10422 = vmatprep.mubr.f32.mxu1 %v3171_v59  ;;  %v11581_v27 = vpack.c.bf16 %v3723_v50, %v3716_v44 }
 0x447   : > { %11566 = vmatprep.subr.bf16.mxu1 %v11565_v40 }
 0x44d   : > { %10423 = vmatmul.mubr.f32.vlgmr.msra.gmra.mrb[4].mxu1 %v3181_v34 }
 0x44e   : > { %10429 = vmatprep.mubr.f32.mxu1 %v3697_v57 }
 0x44f   : > { %11568 = vmatpush3.bf16.xpose.msra.mxu1 %v11565_v40 }
 0x450   : > { %11570 = vmatprep.subr.bf16.mxu1 %v11569_v60 }
 0x456   : > { %10430 = vmatmul.mubr.f32.vlgmr.msra.gmra.mrb[6].mxu1 %v3707_v3 }
 0x457   : > { %11572 = vmatpush3.bf16.xpose.msra.mxu1 %v11569_v60  ;;  %10436 = vmatprep.mubr.f32.mxu1 %v3693_v53 }
 0x458   : > { %11574 = vmatprep.subr.bf16.mxu1 %v11573_v9 }
 0x45e   : > { %10437 = vmatmul.mubr.f32.vlgmr.msra.gmra.mrb[6].mxu1 %v3703_v28 }
 0x45f   : > { %11576 = vmatpush3.bf16.xpose.msra.mxu1 %v11573_v9  ;;  %10443 = vmatprep.mubr.f32.mxu1 %v3694_v63 }
 0x460   : > { %11578 = vmatprep.subr.bf16.mxu1 %v11565_v40 }
 0x466   : > { %10444 = vmatmul.mubr.f32.vlgmr.msra.gmra.mrb[6].mxu1 %v3704_v46 }
 0x467   : > { %11580 = vmatpush3.bf16.xpose.msra.mxu1 %v11565_v40  ;;  %10450 = vmatprep.mubr.f32.mxu1 %v3695_v36 }
 0x468   : > { %11582 = vmatprep.subr.bf16.mxu1 %v11581_v27 }
 0x46e   : > { %10451 = vmatmul.mubr.f32.vlgmr.msra.gmra.mrb[6].mxu1 %v3705_v52 }
 0x46f   : > { %11584 = vmatpush3.bf16.xpose.msra.mxu1 %v11581_v27  ;;  %10457 = vmatprep.mubr.f32.mxu1 %v3693_v53 }
 0x470   : > { %11586 = vmatprep.subr.bf16.mxu1 %v11565_v40 }
 0x476   : > { %10458 = vmatmul.mubr.f32.vlgmr.msra.gmra.mrb[6].mxu1 %v3703_v28 }
 0x477   : > { %11588 = vmatpush3.bf16.xpose.msra.mxu1 %v11565_v40  ;;  %10464 = vmatprep.mubr.f32.mxu1 %v3693_v53 }
 0x47e   : > { %10465 = vmatmul.mubr.f32.vlgmr.msra.gmra.mrb[6].mxu1 %v3703_v28 }
 0x520   : > { %v13359_v20 = vpop.f32.mrb[4].mxu1 }
 0x521   : > { %v13361_v54 = vpop.f32.mrb[5].mxu1 }
 0x551   : > { %v10466_v18 = vpop.f32.mrb[6].mxu1 }
 0x552   : > { %v4129_v55 = vmul.f32 0.17677669, %v10466_v18  ;;  %v4118_v8 = vpop.f32.mrb[7].mxu1 }
 0x553   : > { %v4128_v1 = vmul.f32 0.17677669, %v4118_v8 }
 0x554   : > { %v4131_v13 = vsel %vm3072_vm3, -1e+09, %v4129_v55 }
 0x555   : > { %v4135_v33 = vsel %vm3075_vm2, %v4131_v13, -inf  ;;  %v4130_v12 = vsel %vm3071_vm1, -1e+09, %v4128_v1 }
 0x556   : > { %4136 = vmax.xlane.f32.xlu1 %v4135_v33  ;;  %v4132_v19 = vsel %vm3075_vm2, %v4130_v12, -inf }
 0x557   : > { %4133 = vmax.xlane.f32.xlu0 %v4132_v19 }
 0x567   : > { %4158 = vrot.lane.b32.xlu1 %v13325_v56, %s12114_s27 }
 0x56b   : > { %5746 = vrot.lane.b32.xlu1 %v13240_v14, %s12115_s12 }
 0x56f   : > { %5748 = vrot.lane.b32.xlu1 %v13236_v48, %s12115_s12 }
 0x573   : > { %5744 = vrot.lane.b32.xlu1 %v13220_v39, %s12115_s12 }
 0x5e3   : > { %v4137_v49 = vpop.xlane.xlu1 %4136 }
 0x5e4   : > { %v4139_v4 = vsub.f32 %v4131_v13, %v4137_v49  ;;  %v4134_v59 = vpop.xlane.xlu0 %4133 }
 0x5e5   : > { %v4138_v47 = vsub.f32 %v4130_v12, %v4134_v59 }
 0x5e6   : > { %v4142_v29 = vmul.f32 1.442695, %v4139_v4 }
 0x5e7   : > { %v4140_v11 = vmul.f32 1.442695, %v4138_v47  ;;  %v4159_v42 = vpop.permute.xlu1 %4158 }
 0x5e8   : > { %12082 = vpow2.f32 %v4142_v29  ;;  %v4172_v36 = vand.u32 4294901760, %v4159_v42 }
 0x5e9   : > { %12084 = vpow2.f32 %v4140_v11 }
 0x5ea   : > { %v13389_v40 = vsub.f32 %v4159_v42, %v4172_v36 }
 0x5eb   : > { %v5747_v34 = vpop.permute.xlu1 %5746 }
 0x5ec   : > { %v5754_v23 = vsel %vm2554_vm0, %v5747_v34, 0  ;;  %v4265_v37 = vand.u32 4294901760, %v13389_v40 }
 0x5ed   : > { %v5759_v16 = vand.u32 4294901760, %v5754_v23 }
 0x5ee   : > { %v4266_v3 = vsub.f32 %v13389_v40, %v4265_v37 }
 0x5ef   : > { %v5847_v32 = vsub.f32 %v5754_v23, %v5759_v16  ;;  %v5749_v17 = vpop.permute.xlu1 %5748 }
 0x5f0   : > { %v5756_v25 = vsel %vm2554_vm0, %v5749_v17, 0  ;;  %v4267_v4 = vand.u32 4294901760, %v4266_v3 }
 0x5f1   : > { %v5848_v24 = vand.u32 4294901760, %v5847_v32  ;;  %v5762_v31 = vand.u32 4294901760, %v5756_v25 }
 0x5f2   : > { %v12083_v58 = vpop.eup %12082 }
 0x5f3   : > { %v13379_v30 = vpack.c.bf16 %v5762_v31, %v5759_v16  ;;  %v5854_v35 = vsub.f32 %v5756_v25, %v5762_v31  ;;  %v4147_v61 = vsel %vm3075_vm2, %v12083_v58, 0.0  ;;  %v12085_v43 = vpop.eup %12084  ;;  %v5849_v26 = vsub.f32 %v5847_v32, %v5848_v24  ;;  %v5745_v46 = vpop.permute.xlu1 %5744 }
 0x5f4   : > { %4148 = vadd.xlane.f32.xlu0 %v4147_v61  ;;  %v4144_v7 = vsel %vm3075_vm2, %v12085_v43, 0.0  ;;  %v5752_v62 = vsel %vm2554_vm0, %v5745_v46, 0 }
 0x5f5   : > { %v5855_v6 = vand.u32 4294901760, %v5854_v35  ;;  %v5850_v0 = vand.u32 4294901760, %v5849_v26  ;;  %v11717_v50 = vpack.c.bf16 %v5854_v35, %v5847_v32  ;;  %v5835_v1 = vand.u32 4294901760, %v5752_v62  ;;  %v4670_v26 = vld [vmem:[%s13637_s8 + $0x20] sm:$0xff] }
 0x5f7   : > { %v5856_v53 = vsub.f32 %v5854_v35, %v5855_v6  ;;  %v13383_v10 = vpack.c.bf16 %v5855_v6, %v5848_v24  ;;  %v13410_v32 = vsub.f32 %v5752_v62, %v5835_v1  ;;  %v4671_v6 = vld [vmem:[%s13637_s8 + $0x28] sm:$0xff] }
 0x5f8   : > { %4145 = vadd.xlane.f32.xlu0 %v4144_v7  ;;  %v4684_v7 = vand.u32 4294901760, %v4671_v6 }
 0x5f9   : > { %v5857_v63 = vand.u32 4294901760, %v5856_v53  ;;  %v5837_v61 = vand.u32 4294901760, %v13410_v32  ;;  %v4681_v53 = vand.u32 4294901760, %v4670_v26 }
 0x5fb   : > { %v11713_v15 = vpack.c.bf16 %v5857_v63, %v5850_v0  ;;  %v4771_v0 = vsub.f32 %v4670_v26, %v4681_v53  ;;  %v4778_v63 = vsub.f32 %v4671_v6, %v4684_v7  ;;  %v5209_v26 = vsel %vm2554_vm0, %v13361_v54, 0 }
 0x5fd   : > { %11714 = vmatprep.subr.bf16.mxu0 %v11713_v15 }
 0x5fe   : > { %11716 = vmatpush3.bf16.xpose.msra.mxu0 %v11713_v15  ;;  %v4672_v15 = vld [vmem:[%s13637_s8 + $0x30] sm:$0xff] }
 0x5ff   : > { %11718 = vmatprep.subr.bf16.mxu0 %v11717_v50 }
 0x60e   : > { %4156 = vrot.lane.b32.xlu0 %v13327_v51, %s12114_s27 }
 0x612   : > { %5742 = vrot.lane.b32.xlu0 %v13197_v2, %s12115_s12 }
 0x681   : > { %v4149_v44 = vpop.xlane.xlu0 %4148 }
 0x682   : > { %12086 = vrcp.f32 %v4149_v44  ;;  %v4687_v44 = vand.u32 4294901760, %v4672_v15 }
 0x685   : > { %v4146_v28 = vpop.xlane.xlu0 %4145 }
 0x686   : > { %12088 = vrcp.f32 %v4146_v28  ;;  %v4772_v28 = vand.u32 4294901760, %v4771_v0 }
 0x689   : > { %v4157_v5 = vpop.permute.xlu0 %4156 }
 0x68a   : > { %v4169_v21 = vand.u32 4294901760, %v4157_v5 }
 0x68c   : > { %v12087_v22 = vpop.eup %12086  ;;  %v13392_v52 = vpack.c.bf16 %v4172_v36, %v4169_v21  ;;  %v13394_v57 = vsub.f32 %v4157_v5, %v4169_v21  ;;  %v4785_v21 = vsub.f32 %v4672_v15, %v4687_v44  ;;  %v5212_v15 = vsel %vm2554_vm0, %v13359_v20, 0 }
 0x68d   : > { %v4153_v60 = vmul.f32 %v12087_v22, %v12083_v58  ;;  %v5743_v38 = vpop.permute.xlu0 %5742 }
 0x68e   : > { %v4258_v9 = vand.u32 4294901760, %v13394_v57  ;;  %v5750_v27 = vsel %vm2554_vm0, %v5743_v38, 0  ;;  %11590 = vmatprep.subr.bf16.mxu1 %v13392_v52  ;;  %v11597_v35 = vpack.c.bf16 %v13389_v40, %v13394_v57  ;;  %v4779_v40 = vand.u32 4294901760, %v4778_v63 }
 0x68f   : > { %v5825_v18 = vand.u32 4294901760, %v5750_v27  ;;  %11592 = vmatpush3.bf16.msra.mxu1 %v13392_v52  ;;  %v4166_v55 = vsel %vm3075_vm2, %v4153_v60, 0  ;;  %v4786_v62 = vand.u32 4294901760, %v4785_v21 }
 0x690   : > { %v12089_v8 = vpop.eup %12088  ;;  %v4259_v13 = vsub.f32 %v13394_v57, %v4258_v9  ;;  %v4245_v33 = vand.u32 4294901760, %v4166_v55  ;;  %v4780_v46 = vsub.f32 %v4778_v63, %v4779_v40 }
 0x691   : > { %v4151_v12 = vmul.f32 %v12089_v8, %v12085_v43  ;;  %v5826_v19 = vsub.f32 %v5750_v27, %v5825_v18  ;;  %10652 = vmatprep.mubr.f32.mxu0 %v5825_v18  ;;  %v11605_v43 = vpack.c.bf16 %v4265_v37, %v4258_v9  ;;  %v4773_v37 = vsub.f32 %v4771_v0, %v4772_v28 }
 0x692   : > { %10653 = vmatmul.mubr.f32.vlgmr.msra.gmra.mrb[6].mxu0 %v5835_v1  ;;  %v4260_v49 = vand.u32 4294901760, %v4259_v13  ;;  %v4246_v59 = vsub.f32 %v4166_v55, %v4245_v33  ;;  %v4781_v57 = vand.u32 4294901760, %v4780_v46  ;;  %v4787_v3 = vsub.f32 %v4785_v21, %v4786_v62 }
 0x693   : > { %11720 = vmatpush3.bf16.xpose.msra.mxu0 %v11717_v50  ;;  %10659 = vmatprep.mubr.f32.mxu0 %v5826_v19  ;;  %v5827_v47 = vand.u32 4294901760, %v5826_v19  ;;  %v4163_v29 = vsel %vm3075_vm2, %v4151_v12, 0  ;;  %v4673_v50 = vld [vmem:[%s13637_s8 + $0x38] sm:$0xff]  ;;  %v11629_v8 = vpack.c.bf16 %v4778_v63, %v4771_v0  ;;  %v11645_v13 = vpack.c.bf16 %v4779_v40, %v4772_v28  ;;  %v3608_v0 = vld [vmem:[%s13637_s8 + $0x10] sm:$0xff] }
 0x694   : > { %11722 = vmatprep.subr.bf16.mxu0 %v13379_v30  ;;  %v11593_v11 = vpack.c.bf16 %v4267_v4, %v4260_v49  ;;  %v4235_v42 = vand.u32 4294901760, %v4163_v29  ;;  %v4247_v34 = vand.u32 4294901760, %v4246_v59  ;;  %v4690_v36 = vand.u32 4294901760, %v4673_v50  ;;  %v3609_v63 = vld [vmem:[%s13637_s8 + $0x18] sm:$0xff] }
 0x695   : > { %v13408_v23 = vsub.f32 %v5826_v19, %v5827_v47  ;;  %v4788_v27 = vand.u32 4294901760, %v4787_v3  ;;  %v5221_v54 = vand.u32 4294901760, %v3608_v0  ;;  %v13482_v40 = vand.u32 4294901760, %v5212_v15 }
 0x696   : > { %11594 = vmatprep.subr.bf16.mxu1 %v11593_v11  ;;  %v4236_v16 = vsub.f32 %v4163_v29, %v4235_v42  ;;  %v4248_v25 = vsub.f32 %v4246_v59, %v4247_v34  ;;  %v13445_v5 = vpack.c.bf16 %v4690_v36, %v4687_v44  ;;  %v4792_v22 = vsub.f32 %v4673_v50, %v4690_v36 }
 0x697   : > { %v5224_v50 = vand.u32 4294901760, %v3609_v63  ;;  %v5294_v20 = vsub.f32 %v5212_v15, %v13482_v40 }
 0x698   : > { %v4237_v17 = vand.u32 4294901760, %v4236_v16  ;;  %v4249_v58 = vand.u32 4294901760, %v4248_v25  ;;  %v4793_v60 = vand.u32 4294901760, %v4792_v22 }
 0x69a   : > { %10660 = vmatmul.mubr.f32.vlgmr.msra.gmra.mrb[6].mxu0 %v13410_v32  ;;  %v4238_v24 = vsub.f32 %v4236_v16, %v4237_v17  ;;  %v4794_v9 = vsub.f32 %v4792_v22, %v4793_v60 }
 0x69b   : > { %11724 = vmatpush3.bf16.xpose.msra.mxu0 %v13379_v30  ;;  %10666 = vmatprep.mubr.f32.mxu0 %v5827_v47 }
 0x69c   : > { %11726 = vmatprep.subr.bf16.mxu0 %v13383_v10  ;;  %v4239_v31 = vand.u32 4294901760, %v4238_v24 }
 0x69e   : > { %10471 = vmatprep.mubr.f32.mxu1 %v4239_v31 }
 0x69f   : > { %10472 = vmatmul.mubr.f32.vlgmr.msra.gmra.mrb[8].mxu1 %v4249_v58 }
 0x6a0   : > { %11596 = vmatpush3.bf16.msra.mxu1 %v11593_v11  ;;  %10478 = vmatprep.mubr.f32.mxu1 %v4235_v42 }
 0x6a1   : > { %11598 = vmatprep.subr.bf16.mxu1 %v11597_v35 }
 0x6a2   : > { %10667 = vmatmul.mubr.f32.vlgmr.msra.gmra.mrb[6].mxu0 %v5837_v61 }
 0x6a3   : > { %11728 = vmatpush3.bf16.xpose.msra.mxu0 %v13383_v10  ;;  %10673 = vmatprep.mubr.f32.mxu0 %v5825_v18  ;;  %v13435_v10 = vpack.c.bf16 %v4684_v7, %v4681_v53  ;;  %v13471_v7 = vand.u32 4294901760, %v5209_v26 }
 0x6a4   : > { %11730 = vmatprep.subr.bf16.mxu0 %v13379_v30 }
 0x6a5   : > { %v5284_v28 = vsub.f32 %v5209_v26, %v13471_v7 }
 0x6a7   : > { %10479 = vmatmul.mubr.f32.vlgmr.msra.gmra.mrb[8].mxu1 %v4245_v33 }
 0x6a8   : > { %11600 = vmatpush3.bf16.msra.mxu1 %v11597_v35  ;;  %10485 = vmatprep.mubr.f32.mxu1 %v4236_v16  ;;  %v3606_v35 = vld [vmem:[%s13637_s8] sm:$0xff] }
 0x6a9   : > { %11602 = vmatprep.subr.bf16.mxu1 %v13392_v52  ;;  %v5215_v6 = vand.u32 4294901760, %v3606_v35 }
 0x6aa   : > { %10674 = vmatmul.mubr.f32.vlgmr.msra.gmra.mrb[6].mxu0 %v5835_v1 }
 0x6ab   : > { %11732 = vmatpush3.bf16.xpose.msra.mxu0 %v13379_v30  ;;  %10680 = vmatprep.mubr.f32.mxu0 %v5825_v18  ;;  %v4795_v18 = vand.u32 4294901760, %v4794_v9  ;;  %v5305_v44 = vsub.f32 %v3606_v35, %v5215_v6 }
 0x6ad   : > { %v11625_v55 = vpack.c.bf16 %v4795_v18, %v4788_v27  ;;  %v5295_v27 = vand.u32 4294901760, %v5294_v20  ;;  %v11665_v18 = vpack.c.bf16 %v5224_v50, %v5221_v54 }
 0x6af   : > { %10486 = vmatmul.mubr.f32.vlgmr.msra.gmra.mrb[8].mxu1 %v4246_v59 }
 0x6b0   : > { %11604 = vmatpush3.bf16.msra.mxu1 %v13392_v52  ;;  %10492 = vmatprep.mubr.f32.mxu1 %v4237_v17 }
 0x6b1   : > { %11606 = vmatprep.subr.bf16.mxu1 %v11605_v43 }
 0x6b2   : > { %10681 = vmatmul.mubr.f32.vlgmr.msra.gmra.mrb[6].mxu0 %v5835_v1  ;;  %v11633_v1 = vpack.c.bf16 %v4792_v22, %v4785_v21  ;;  %v5319_v21 = vsub.f32 %v3608_v0, %v5221_v54  ;;  %v5326_v22 = vsub.f32 %v3609_v63, %v5224_v50 }
 0x6b4   : > { %v5327_v3 = vand.u32 4294901760, %v5326_v22 }
 0x6b7   : > { %10493 = vmatmul.mubr.f32.vlgmr.msra.gmra.mrb[8].mxu1 %v4247_v34 }
 0x6b8   : > { %11608 = vmatpush3.bf16.msra.mxu1 %v11605_v43  ;;  %10499 = vmatprep.mubr.f32.mxu1 %v4235_v42  ;;  %v3607_v43 = vld [vmem:[%s13637_s8 + $0x8] sm:$0xff] }
 0x6b9   : > { %11610 = vmatprep.subr.bf16.mxu1 %v13392_v52  ;;  %v5218_v53 = vand.u32 4294901760, %v3607_v43 }
 0x6bb   : > { %v5312_v36 = vsub.f32 %v3607_v43, %v5218_v53 }
 0x6bd   : > { %v5313_v46 = vand.u32 4294901760, %v5312_v36 }
 0x6bf   : > { %10500 = vmatmul.mubr.f32.vlgmr.msra.gmra.mrb[8].mxu1 %v4245_v33 }
 0x6c0   : > { %11612 = vmatpush3.bf16.msra.mxu1 %v13392_v52  ;;  %10506 = vmatprep.mubr.f32.mxu1 %v4235_v42  ;;  %v4774_v52 = vand.u32 4294901760, %v4773_v37  ;;  %v5306_v37 = vand.u32 4294901760, %v5305_v44 }
 0x6c1   : > { %11614 = vmatprep.subr.bf16.mxu1 %v13435_v10 }
 0x6c2   : > { %v11621_v38 = vpack.c.bf16 %v4781_v57, %v4774_v52  ;;  %v5285_v52 = vand.u32 4294901760, %v5284_v28  ;;  %v11661_v57 = vpack.c.bf16 %v5218_v53, %v5215_v6 }
 0x6c4   : > { %v5286_v9 = vsub.f32 %v5284_v28, %v5285_v52 }
 0x6c7   : > { %10507 = vmatmul.mubr.f32.vlgmr.msra.gmra.mrb[8].mxu1 %v4245_v33  ;;  %v11649_v33 = vpack.c.bf16 %v4793_v60, %v4786_v62  ;;  %v5307_v62 = vsub.f32 %v5305_v44, %v5306_v37  ;;  %v5314_v60 = vsub.f32 %v5312_v36, %v5313_v46 }
 0x6c8   : > { %11616 = vmatpush3.bf16.msra.mxu1 %v13435_v10 }
 0x6c9   : > { %11618 = vmatprep.subr.bf16.mxu1 %v13445_v5 }
 0x6cc   : > { %11620 = vmatpush3.bf16.msra.mxu1 %v13445_v5 }
 0x6cd   : > { %11622 = vmatprep.subr.bf16.mxu1 %v11621_v38 }
 0x785   : > { %v13449_v12 = vpop.f32.mrb[6].mxu0 }
 0x786   : > { %v13451_v19 = vpop.f32.mrb[7].mxu0 }
 0x79a   : > { %v10508_v49 = vpop.f32.mrb[8].mxu1 }
 0x79b   : > { %v4678_v4 = vsel %vm2554_vm0, %v10508_v49, 0  ;;  %v4660_v59 = vpop.f32.mrb[9].mxu1 }
 0x79c   : > { %v13454_v47 = vand.u32 4294901760, %v4678_v4  ;;  %v4675_v29 = vsel %vm2554_vm0, %v4660_v59, 0 }
 0x79d   : > { %v4749_v11 = vand.u32 4294901760, %v4675_v29 }
 0x79e   : > { %v4760_v42 = vsub.f32 %v4678_v4, %v13454_v47 }
 0x79f   : > { %v4750_v34 = vsub.f32 %v4675_v29, %v4749_v11 }
 0x7a0   : > { %v4761_v16 = vand.u32 4294901760, %v4760_v42 }
 0x7a1   : > { %v4751_v17 = vand.u32 4294901760, %v4750_v34 }
 0x7a2   : > { %v4762_v25 = vsub.f32 %v4760_v42, %v4761_v16 }
 0x7a3   : > { %v4752_v24 = vsub.f32 %v4750_v34, %v4751_v17 }
 0x7a4   : > { %v4763_v58 = vand.u32 4294901760, %v4762_v25 }
 0x7a5   : > { %v4753_v31 = vand.u32 4294901760, %v4752_v24 }
 0x7a7   : > { %10517 = vmatprep.mubr.f32.mxu1 %v4753_v31 }
 0x7a8   : > { %10518 = vmatmul.mubr.f32.vlgmr.msra.gmra.mrb[10].mxu1 %v4763_v58 }
 0x7a9   : > { %11624 = vmatpush3.bf16.msra.mxu1 %v11621_v38  ;;  %10528 = vmatprep.mubr.f32.mxu1 %v4749_v11  ;;  %v5320_v38 = vand.u32 4294901760, %v5319_v21 }
 0x7aa   : > { %11626 = vmatprep.subr.bf16.mxu1 %v11625_v55 }
 0x7ad   : > { %11628 = vmatpush3.bf16.msra.mxu1 %v11625_v55  ;;  %v5308_v55 = vand.u32 4294901760, %v5307_v62 }
 0x7ae   : > { %11630 = vmatprep.subr.bf16.mxu1 %v11629_v8 }
 0x7b0   : > { %10529 = vmatmul.mubr.f32.vlgmr.msra.gmra.mrb[10].mxu1 %v13454_v47 }
 0x7b1   : > { %11632 = vmatpush3.bf16.msra.mxu1 %v11629_v8  ;;  %10539 = vmatprep.mubr.f32.mxu1 %v4750_v34  ;;  %v5315_v8 = vand.u32 4294901760, %v5314_v60  ;;  %v11697_v34 = vpack.c.bf16 %v5327_v3, %v5320_v38 }
 0x7b2   : > { %11634 = vmatprep.subr.bf16.mxu1 %v11633_v1 }
 0x7b3   : > { %v11669_v49 = vpack.c.bf16 %v5315_v8, %v5308_v55 }
 0x7b5   : > { %11636 = vmatpush3.bf16.msra.mxu1 %v11633_v1  ;;  %v5321_v1 = vsub.f32 %v5319_v21, %v5320_v38 }
 0x7b6   : > { %11638 = vmatprep.subr.bf16.mxu1 %v13435_v10 }
 0x7b7   : > { %v5322_v4 = vand.u32 4294901760, %v5321_v1 }
 0x7b8   : > { %10540 = vmatmul.mubr.f32.vlgmr.msra.gmra.mrb[10].mxu1 %v4760_v42  ;;  %v11693_v42 = vpack.c.bf16 %v5313_v46, %v5306_v37 }
 0x7b9   : > { %11640 = vmatpush3.bf16.msra.mxu1 %v13435_v10  ;;  %10550 = vmatprep.mubr.f32.mxu1 %v4751_v17  ;;  %v5838_v17 = vsub.f32 %v13410_v32, %v5837_v61 }
 0x7ba   : > { %11642 = vmatprep.subr.bf16.mxu1 %v13445_v5 }
 0x7bb   : > { %v5839_v25 = vand.u32 4294901760, %v5838_v17 }
 0x7bd   : > { %11644 = vmatpush3.bf16.msra.mxu1 %v13445_v5 }
 0x7be   : > { %11646 = vmatprep.subr.bf16.mxu1 %v11645_v13 }
 0x7c0   : > { %10551 = vmatmul.mubr.f32.vlgmr.msra.gmra.mrb[10].mxu1 %v4761_v16  ;;  %v5829_v16 = vand.u32 4294901760, %v13408_v23 }
 0x7c1   : > { %11648 = vmatpush3.bf16.msra.mxu1 %v11645_v13  ;;  %10561 = vmatprep.mubr.f32.mxu1 %v4749_v11  ;;  %v5328_v13 = vsub.f32 %v5326_v22, %v5327_v3 }
 0x7c2   : > { %11650 = vmatprep.subr.bf16.mxu1 %v11649_v33 }
 0x7c3   : > { %v5329_v59 = vand.u32 4294901760, %v5328_v13 }
 0x7c5   : > { %11652 = vmatpush3.bf16.msra.mxu1 %v11649_v33  ;;  %v5287_v33 = vand.u32 4294901760, %v5286_v9 }
 0x7c6   : > { %11654 = vmatprep.subr.bf16.mxu1 %v13435_v10 }
 0x7c8   : > { %10562 = vmatmul.mubr.f32.vlgmr.msra.gmra.mrb[10].mxu1 %v13454_v47 }
 0x7c9   : > { %11656 = vmatpush3.bf16.msra.mxu1 %v13435_v10  ;;  %10572 = vmatprep.mubr.f32.mxu1 %v4749_v11  ;;  %v5296_v10 = vsub.f32 %v5294_v20, %v5295_v27  ;;  %v11677_v11 = vpack.c.bf16 %v5312_v36, %v5305_v44 }
 0x7ca   : > { %11658 = vmatprep.subr.bf16.mxu1 %v13445_v5 }
 0x7cb   : > { %v5297_v29 = vand.u32 4294901760, %v5296_v10 }
 0x7cd   : > { %11660 = vmatpush3.bf16.msra.mxu1 %v13445_v5  ;;  %v11673_v5 = vpack.c.bf16 %v5329_v59, %v5322_v4 }
 0x7ce   : > { %11662 = vmatprep.subr.bf16.mxu1 %v11661_v57 }
 0x7d0   : > { %10573 = vmatmul.mubr.f32.vlgmr.msra.gmra.mrb[10].mxu1 %v13454_v47  ;;  %v11681_v47 = vpack.c.bf16 %v5326_v22, %v5319_v21 }
 0x7d1   : > { %11664 = vmatpush3.bf16.msra.mxu1 %v11661_v57  ;;  %10583 = vmatprep.mubr.f32.mxu1 %v5287_v33 }
 0x7d2   : > { %11666 = vmatprep.subr.bf16.mxu1 %v11665_v18 }
 0x7d5   : > { %11668 = vmatpush3.bf16.msra.mxu1 %v11665_v18 }
 0x7d6   : > { %11670 = vmatprep.subr.bf16.mxu1 %v11669_v49 }
 0x7d8   : > { %10584 = vmatmul.mubr.f32.vlgmr.msra.gmra.mrb[10].mxu1 %v5297_v29 }
 0x7d9   : > { %11672 = vmatpush3.bf16.msra.mxu1 %v11669_v49  ;;  %10594 = vmatprep.mubr.f32.mxu1 %v13471_v7 }
 0x7da   : > { %11674 = vmatprep.subr.bf16.mxu1 %v11673_v5 }
 0x7dd   : > { %11676 = vmatpush3.bf16.msra.mxu1 %v11673_v5 }
 0x7de   : > { %11678 = vmatprep.subr.bf16.mxu1 %v11677_v11 }
 0x7e0   : > { %10595 = vmatmul.mubr.f32.vlgmr.msra.gmra.mrb[10].mxu1 %v13482_v40 }
 0x7e1   : > { %11680 = vmatpush3.bf16.msra.mxu1 %v11677_v11  ;;  %10605 = vmatprep.mubr.f32.mxu1 %v5284_v28 }
 0x7e2   : > { %11682 = vmatprep.subr.bf16.mxu1 %v11681_v47 }
 0x7e5   : > { %11684 = vmatpush3.bf16.msra.mxu1 %v11681_v47 }
 0x7e6   : > { %11686 = vmatprep.subr.bf16.mxu1 %v11661_v57 }
 0x7e8   : > { %10606 = vmatmul.mubr.f32.vlgmr.msra.gmra.mrb[10].mxu1 %v5294_v20 }
 0x7e9   : > { %11688 = vmatpush3.bf16.msra.mxu1 %v11661_v57  ;;  %10616 = vmatprep.mubr.f32.mxu1 %v5285_v52 }
 0x7ea   : > { %11690 = vmatprep.subr.bf16.mxu1 %v11665_v18 }
 0x7ed   : > { %11692 = vmatpush3.bf16.msra.mxu1 %v11665_v18 }
 0x7ee   : > { %11694 = vmatprep.subr.bf16.mxu1 %v11693_v42 }
 0x7f0   : > { %10617 = vmatmul.mubr.f32.vlgmr.msra.gmra.mrb[10].mxu1 %v5295_v27 }
 0x7f1   : > { %11696 = vmatpush3.bf16.msra.mxu1 %v11693_v42  ;;  %10627 = vmatprep.mubr.f32.mxu1 %v13471_v7 }
 0x7f2   : > { %11698 = vmatprep.subr.bf16.mxu1 %v11697_v34 }
 0x7f5   : > { %11700 = vmatpush3.bf16.msra.mxu1 %v11697_v34 }
 0x7f6   : > { %11702 = vmatprep.subr.bf16.mxu1 %v11661_v57 }
 0x7f8   : > { %10628 = vmatmul.mubr.f32.vlgmr.msra.gmra.mrb[10].mxu1 %v13482_v40 }
 0x7f9   : > { %11704 = vmatpush3.bf16.msra.mxu1 %v11661_v57  ;;  %10638 = vmatprep.mubr.f32.mxu1 %v13471_v7 }
 0x7fa   : > { %11706 = vmatprep.subr.bf16.mxu1 %v11665_v18 }
 0x7fd   : > { %11708 = vmatpush3.bf16.msra.mxu1 %v11665_v18 }
 0x7fe   : > { %11710 = vmatprep.subr.bf16.mxu1 %v13379_v30 }
 0x800   : > { %10639 = vmatmul.mubr.f32.vlgmr.msra.gmra.mrb[10].mxu1 %v13482_v40 }
 0x801   : > { %10645 = vmatprep.mubr.f32.mxu1 %v5829_v16 }
 0x806   : > { %11712 = vmatpush3.bf16.xpose.msra.mxu1 %v13379_v30 }
 0x80d   : > { %10646 = vmatmul.mubr.f32.vlgmr.msra.gmra.mrb[12].mxu1 %v5839_v25 }
 0x8e0   : > { %v10647_v24 = vpop.f32.mrb[12].mxu1 }
 0x8e1   : > { %v11909_v31 = vadd.f32 %v13449_v12, %v10647_v24  ;;  %v5831_v58 = vpop.f32.mrb[13].mxu1 }
 0x8e2   : > { %v11910_v35 = vadd.f32 %v13451_v19, %v5831_v58 }
 0x8e3   : > { %v6261_v43 = vmul.f32 0.17677669, %v11909_v31 }
 0x8e4   : > { %v6260_v26 = vmul.f32 0.17677669, %v11910_v35 }
 0x8e5   : > { %v6263_v23 = vsel %vm3072_vm3, -1e+09, %v6261_v43 }
 0x8e6   : > { %v6267_v6 = vsel %vm3075_vm2, %v6263_v23, -inf  ;;  %v6262_v30 = vsel %vm3071_vm1, -1e+09, %v6260_v26 }
 0x8e7   : > { %6268 = vmax.xlane.f32.xlu1 %v6267_v6  ;;  %v6264_v32 = vsel %vm3075_vm2, %v6262_v30, -inf }
 0x8e8   : > { %6265 = vmax.xlane.f32.xlu0 %v6264_v32 }
 0x8f8   : > { %6288 = vrot.lane.b32.xlu1 %v13325_v56, %s12115_s12 }
 0x8fc   : > { %7344 = vrot.lane.b32.xlu1 %v13240_v14, %s12116_s13 }
 0x900   : > { %7346 = vrot.lane.b32.xlu1 %v13236_v48, %s12116_s13 }
 0x904   : > { %7342 = vrot.lane.b32.xlu1 %v13220_v39, %s12116_s13 }
 0x974   : > { %v6269_v61 = vpop.xlane.xlu1 %6268 }
 0x975   : > { %v6271_v12 = vsub.f32 %v6263_v23, %v6269_v61  ;;  %v6266_v19 = vpop.xlane.xlu0 %6265 }
 0x976   : > { %v6270_v53 = vsub.f32 %v6262_v30, %v6266_v19 }
 0x977   : > { %v6274_v7 = vmul.f32 1.442695, %v6271_v12 }
 0x978   : > { %v6272_v0 = vmul.f32 1.442695, %v6270_v53  ;;  %v6289_v39 = vpop.permute.xlu1 %6288 }
 0x979   : > { %12090 = vpow2.f32 %v6274_v7  ;;  %v6302_v50 = vand.u32 4294901760, %v6289_v39 }
 0x97a   : > { %12092 = vpow2.f32 %v6272_v0 }
 0x97b   : > { %v6394_v36 = vsub.f32 %v6289_v39, %v6302_v50 }
 0x97c   : > { %v7345_v11 = vpop.permute.xlu1 %7344 }
 0x97d   : > { %v6395_v40 = vand.u32 4294901760, %v6394_v36  ;;  %v7352_v17 = vsel %vm2554_vm0, %v7345_v11, 0 }
 0x97e   : > { %v7357_v31 = vand.u32 4294901760, %v7352_v17 }
 0x97f   : > { %v6396_v20 = vsub.f32 %v6394_v36, %v6395_v40 }
 0x980   : > { %v7347_v47 = vpop.permute.xlu1 %7346  ;;  %v7445_v26 = vsub.f32 %v7352_v17, %v7357_v31 }
 0x981   : > { %v6397_v27 = vand.u32 4294901760, %v6396_v20  ;;  %v7354_v16 = vsel %vm2554_vm0, %v7347_v47, 0 }
 0x982   : > { %v7360_v24 = vand.u32 4294901760, %v7354_v16  ;;  %v7446_v32 = vand.u32 4294901760, %v7445_v26 }
 0x983   : > { %v12091_v63 = vpop.eup %12090 }
 0x984   : > { %v6279_v15 = vsel %vm3075_vm2, %v12091_v63, 0.0  ;;  %v12093_v54 = vpop.eup %12092  ;;  %v7452_v35 = vsub.f32 %v7354_v16, %v7360_v24  ;;  %v7343_v43 = vpop.permute.xlu1 %7342  ;;  %v11805_v19 = vpack.c.bf16 %v7360_v24, %v7357_v31  ;;  %v7447_v7 = vsub.f32 %v7445_v26, %v7446_v32 }
 0x985   : > { %6280 = vadd.xlane.f32.xlu0 %v6279_v15  ;;  %v6276_v14 = vsel %vm3075_vm2, %v12093_v54, 0.0  ;;  %v7350_v6 = vsel %vm2554_vm0, %v7343_v43, 0 }
 0x986   : > { %v7453_v30 = vand.u32 4294901760, %v7452_v35  ;;  %v7433_v61 = vand.u32 4294901760, %v7350_v6  ;;  %v7448_v39 = vand.u32 4294901760, %v7447_v7 }
 0x988   : > { %v7454_v53 = vsub.f32 %v7452_v35, %v7453_v30  ;;  %v7434_v0 = vsub.f32 %v7350_v6, %v7433_v61 }
 0x989   : > { %6277 = vadd.xlane.f32.xlu0 %v6276_v14 }
 0x98a   : > { %v7455_v15 = vand.u32 4294901760, %v7454_v53 }
 0x99f   : > { %6286 = vrot.lane.b32.xlu0 %v13327_v51, %s12115_s12 }
 0x9a3   : > { %7340 = vrot.lane.b32.xlu0 %v13197_v2, %s12116_s13 }
 0xa12   : > { %v6281_v48 = vpop.xlane.xlu0 %6280 }
 0xa13   : > { %12094 = vrcp.f32 %v6281_v48  ;;  %v11809_v48 = vpack.c.bf16 %v7455_v15, %v7448_v39 }
 0xa16   : > { %v6278_v44 = vpop.xlane.xlu0 %6277 }
 0xa17   : > { %12096 = vrcp.f32 %v6278_v44 }
 0xa1a   : > { %v6287_v28 = vpop.permute.xlu0 %6286 }
 0xa1b   : > { %v6299_v37 = vand.u32 4294901760, %v6287_v28 }
 0xa1d   : > { %v12095_v46 = vpop.eup %12094  ;;  %v13525_v21 = vpack.c.bf16 %v6302_v50, %v6299_v37  ;;  %v6387_v22 = vsub.f32 %v6287_v28, %v6299_v37  ;;  %v11821_v28 = vpack.c.bf16 %v7453_v30, %v7446_v32  ;;  %v6801_v37 = vld [vmem:[%s13637_s8 + $0x48] sm:$0xff] }
 0xa1e   : > { %v6285_v52 = vmul.f32 %v12095_v46, %v12091_v63  ;;  %v7341_v34 = vpop.permute.xlu0 %7340 }
 0xa1f   : > { %v6388_v57 = vand.u32 4294901760, %v6387_v22  ;;  %11734 = vmatprep.subr.bf16.mxu0 %v13525_v21  ;;  %v11741_v5 = vpack.c.bf16 %v6394_v36, %v6387_v22  ;;  %v7348_v25 = vsel %vm2554_vm0, %v7341_v34, 0  ;;  %v11813_v36 = vpack.c.bf16 %v7452_v35, %v7445_v26 }
 0xa20   : > { %11736 = vmatpush3.bf16.msra.mxu0 %v13525_v21  ;;  %v6296_v2 = vsel %vm3075_vm2, %v6285_v52, 0  ;;  %v7423_v58 = vand.u32 4294901760, %v7348_v25 }
 0xa21   : > { %v12097_v62 = vpop.eup %12096  ;;  %v6389_v60 = vsub.f32 %v6387_v22, %v6388_v57  ;;  %v13530_v38 = vand.u32 4294901760, %v6296_v2  ;;  %v11749_v42 = vpack.c.bf16 %v6395_v40, %v6388_v57  ;;  %v6800_v40 = vld [vmem:[%s13637_s8 + $0x40] sm:$0xff]  ;;  %v6802_v57 = vld [vmem:[%s13637_s8 + $0x50] sm:$0xff] }
 0xa22   : > { %v6283_v3 = vmul.f32 %v12097_v62, %v12093_v54  ;;  %v7424_v23 = vsub.f32 %v7348_v25, %v7423_v58  ;;  %v7435_v54 = vand.u32 4294901760, %v7434_v0  ;;  %v6811_v46 = vand.u32 4294901760, %v6800_v40 }
 0xa23   : > { %v6390_v9 = vand.u32 4294901760, %v6389_v60  ;;  %v6376_v18 = vsub.f32 %v6296_v2, %v13530_v38  ;;  %v6803_v2 = vld [vmem:[%s13637_s8 + $0x58] sm:$0xff]  ;;  %v6817_v62 = vand.u32 4294901760, %v6802_v57 }
 0xa24   : > { %v6293_v55 = vsel %vm3075_vm2, %v6283_v3, 0  ;;  %v7425_v12 = vand.u32 4294901760, %v7424_v23  ;;  %v7436_v50 = vsub.f32 %v7434_v0, %v7435_v54  ;;  %v6901_v52 = vsub.f32 %v6800_v40, %v6811_v46 }
 0xa25   : > { %v11737_v8 = vpack.c.bf16 %v6397_v27, %v6390_v9  ;;  %v6365_v1 = vand.u32 4294901760, %v6293_v55  ;;  %v6377_v13 = vand.u32 4294901760, %v6376_v18  ;;  %v6820_v60 = vand.u32 4294901760, %v6803_v2 }
 0xa26   : > { %v7426_v63 = vsub.f32 %v7424_v23, %v7425_v12  ;;  %v7437_v44 = vand.u32 4294901760, %v7436_v50 }
 0xa27   : > { %11738 = vmatprep.subr.bf16.mxu0 %v11737_v8  ;;  %v6366_v33 = vsub.f32 %v6293_v55, %v6365_v1  ;;  %v6378_v49 = vsub.f32 %v6376_v18, %v6377_v13  ;;  %v13561_v9 = vpack.c.bf16 %v6820_v60, %v6817_v62  ;;  %v6915_v55 = vsub.f32 %v6802_v57, %v6817_v62 }
 0xa28   : > { %v7427_v14 = vand.u32 4294901760, %v7426_v63 }
 0xa29   : > { %v6367_v10 = vand.u32 4294901760, %v6366_v33  ;;  %v6379_v29 = vand.u32 4294901760, %v6378_v49 }
 0xa2b   : > { %v6368_v4 = vsub.f32 %v6366_v33, %v6367_v10 }
 0xa2d   : > { %v6369_v59 = vand.u32 4294901760, %v6368_v4 }
 0xa2f   : > { %10687 = vmatprep.mubr.f32.mxu0 %v6369_v59 }
 0xa30   : > { %10688 = vmatmul.mubr.f32.vlgmr.msra.gmra.mrb[8].mxu0 %v6379_v29 }
 0xa31   : > { %11740 = vmatpush3.bf16.msra.mxu0 %v11737_v8  ;;  %10694 = vmatprep.mubr.f32.mxu0 %v6365_v1  ;;  %v6922_v8 = vsub.f32 %v6803_v2, %v6820_v60 }
 0xa32   : > { %11742 = vmatprep.subr.bf16.mxu0 %v11741_v5 }
 0xa38   : > { %10695 = vmatmul.mubr.f32.vlgmr.msra.gmra.mrb[8].mxu0 %v13530_v38 }
 0xa39   : > { %11744 = vmatpush3.bf16.msra.mxu0 %v11741_v5  ;;  %10701 = vmatprep.mubr.f32.mxu0 %v6366_v33  ;;  %v6916_v33 = vand.u32 4294901760, %v6915_v55 }
 0xa3a   : > { %11746 = vmatprep.subr.bf16.mxu0 %v13525_v21 }
 0xa3b   : > { %v6917_v4 = vsub.f32 %v6915_v55, %v6916_v33 }
 0xa3d   : > { %v6918_v29 = vand.u32 4294901760, %v6917_v4 }
 0xa40   : > { %10702 = vmatmul.mubr.f32.vlgmr.msra.gmra.mrb[8].mxu0 %v6376_v18 }
 0xa41   : > { %11748 = vmatpush3.bf16.msra.mxu0 %v13525_v21  ;;  %10708 = vmatprep.mubr.f32.mxu0 %v6367_v10  ;;  %v6923_v10 = vand.u32 4294901760, %v6922_v8 }
 0xa42   : > { %11750 = vmatprep.subr.bf16.mxu0 %v11749_v42 }
 0xa43   : > { %v6924_v59 = vsub.f32 %v6922_v8, %v6923_v10  ;;  %v11793_v16 = vpack.c.bf16 %v6923_v10, %v6916_v33 }
 0xa45   : > { %v6925_v5 = vand.u32 4294901760, %v6924_v59 }
 0xa47   : > { %v11769_v11 = vpack.c.bf16 %v6925_v5, %v6918_v29 }
 0xa48   : > { %10709 = vmatmul.mubr.f32.vlgmr.msra.gmra.mrb[8].mxu0 %v6377_v13 }
 0xa49   : > { %11752 = vmatpush3.bf16.msra.mxu0 %v11749_v42  ;;  %10715 = vmatprep.mubr.f32.mxu0 %v6365_v1  ;;  %v11777_v42 = vpack.c.bf16 %v6922_v8, %v6915_v55 }
 0xa4a   : > { %11754 = vmatprep.subr.bf16.mxu0 %v13525_v21 }
 0xa50   : > { %10716 = vmatmul.mubr.f32.vlgmr.msra.gmra.mrb[8].mxu0 %v13530_v38 }
 0xa51   : > { %11756 = vmatpush3.bf16.msra.mxu0 %v13525_v21  ;;  %10722 = vmatprep.mubr.f32.mxu0 %v6365_v1  ;;  %v6814_v21 = vand.u32 4294901760, %v6801_v37 }
 0xa52   : > { %11806 = vmatprep.subr.bf16.mxu0 %v11805_v19 }
 0xa53   : > { %v13551_v22 = vpack.c.bf16 %v6814_v21, %v6811_v46  ;;  %v6908_v20 = vsub.f32 %v6801_v37, %v6814_v21 }
 0xa55   : > { %11758 = vmatprep.subr.bf16.mxu1 %v13551_v22  ;;  %v6909_v3 = vand.u32 4294901760, %v6908_v20  ;;  %v11773_v47 = vpack.c.bf16 %v6908_v20, %v6901_v52 }
 0xa56   : > { %11760 = vmatpush3.bf16.msra.mxu1 %v13551_v22 }
 0xa57   : > { %v6910_v18 = vsub.f32 %v6908_v20, %v6909_v3  ;;  %11762 = vmatprep.subr.bf16.mxu1 %v13561_v9 }
 0xa58   : > { %10723 = vmatmul.mubr.f32.vlgmr.msra.gmra.mrb[8].mxu0 %v13530_v38  ;;  %v6902_v38 = vand.u32 4294901760, %v6901_v52 }
 0xa59   : > { %10795 = vmatprep.mubr.f32.mxu0 %v7427_v14  ;;  %v6911_v13 = vand.u32 4294901760, %v6910_v18 }
 0xa5a   : > { %11808 = vmatpush3.bf16.xpose.msra.mxu0 %v11805_v19  ;;  %v6903_v27 = vsub.f32 %v6901_v52, %v6902_v38  ;;  %11764 = vmatpush3.bf16.msra.mxu1 %v13561_v9  ;;  %v11789_v34 = vpack.c.bf16 %v6909_v3, %v6902_v38 }
 0xa5b   : > { %11810 = vmatprep.subr.bf16.mxu0 %v11809_v48 }
 0xa5c   : > { %v6904_v1 = vand.u32 4294901760, %v6903_v27 }
 0xa5e   : > { %v11765_v49 = vpack.c.bf16 %v6911_v13, %v6904_v1 }
 0xa60   : > { %11766 = vmatprep.subr.bf16.mxu1 %v11765_v49 }
 0xa61   : > { %10796 = vmatmul.mubr.f32.vlgmr.msra.gmra.mrb[10].mxu0 %v7437_v44 }
 0xa62   : > { %11812 = vmatpush3.bf16.xpose.msra.mxu0 %v11809_v48  ;;  %10802 = vmatprep.mubr.f32.mxu0 %v7423_v58 }
 0xa63   : > { %11814 = vmatprep.subr.bf16.mxu0 %v11813_v36 }
 0xa69   : > { %10803 = vmatmul.mubr.f32.vlgmr.msra.gmra.mrb[10].mxu0 %v7433_v61 }
 0xa6a   : > { %11816 = vmatpush3.bf16.xpose.msra.mxu0 %v11813_v36  ;;  %10809 = vmatprep.mubr.f32.mxu0 %v7424_v23 }
 0xa6b   : > { %11818 = vmatprep.subr.bf16.mxu0 %v11805_v19 }
 0xa71   : > { %10810 = vmatmul.mubr.f32.vlgmr.msra.gmra.mrb[10].mxu0 %v7434_v0 }
 0xa72   : > { %11820 = vmatpush3.bf16.xpose.msra.mxu0 %v11805_v19  ;;  %10816 = vmatprep.mubr.f32.mxu0 %v7425_v12 }
 0xa73   : > { %11822 = vmatprep.subr.bf16.mxu0 %v11821_v28 }
 0xa79   : > { %10817 = vmatmul.mubr.f32.vlgmr.msra.gmra.mrb[10].mxu0 %v7435_v54 }
 0xa7a   : > { %11824 = vmatpush3.bf16.xpose.msra.mxu0 %v11821_v28  ;;  %10823 = vmatprep.mubr.f32.mxu0 %v7423_v58 }
 0xa7b   : > { %11826 = vmatprep.subr.bf16.mxu0 %v11805_v19 }
 0xa81   : > { %10824 = vmatmul.mubr.f32.vlgmr.msra.gmra.mrb[10].mxu0 %v7433_v61 }
 0xa82   : > { %11828 = vmatpush3.bf16.xpose.msra.mxu0 %v11805_v19  ;;  %10830 = vmatprep.mubr.f32.mxu0 %v7423_v58 }
 0xa89   : > { %10831 = vmatmul.mubr.f32.vlgmr.msra.gmra.mrb[10].mxu0 %v7433_v61 }
 0xb2b   : > { %v10724_v17 = vpop.f32.mrb[8].mxu0 }
 0xb2c   : > { %v6808_v25 = vsel %vm2554_vm0, %v10724_v17, 0  ;;  %v6790_v24 = vpop.f32.mrb[9].mxu0 }
 0xb2d   : > { %v6889_v31 = vand.u32 4294901760, %v6808_v25  ;;  %v6805_v58 = vsel %vm2554_vm0, %v6790_v24, 0  ;;  %v8398_v24 = vld [vmem:[%s13637_s8 + $0x60] sm:$0xff] }
 0xb2e   : > { %v6879_v35 = vand.u32 4294901760, %v6805_v58 }
 0xb2f   : > { %v6890_v43 = vsub.f32 %v6808_v25, %v6889_v31 }
 0xb30   : > { %v6880_v26 = vsub.f32 %v6805_v58, %v6879_v35  ;;  %v8409_v58 = vand.u32 4294901760, %v8398_v24 }
 0xb31   : > { %v6891_v23 = vand.u32 4294901760, %v6890_v43 }
 0xb32   : > { %v6881_v6 = vand.u32 4294901760, %v6880_v26 }
 0xb33   : > { %v6892_v30 = vsub.f32 %v6890_v43, %v6891_v23 }
 0xb34   : > { %v6882_v32 = vsub.f32 %v6880_v26, %v6881_v6 }
 0xb35   : > { %v6893_v12 = vand.u32 4294901760, %v6892_v30  ;;  %v8401_v30 = vld [vmem:[%s13637_s8 + $0x78] sm:$0xff] }
 0xb36   : > { %v6883_v61 = vand.u32 4294901760, %v6882_v32 }
 0xb38   : > { %10733 = vmatprep.mubr.f32.mxu1 %v6883_v61  ;;  %v8418_v61 = vand.u32 4294901760, %v8401_v30 }
 0xb39   : > { %10734 = vmatmul.mubr.f32.vlgmr.msra.gmra.mrb[10].mxu1 %v6893_v12 }
 0xb3a   : > { %11768 = vmatpush3.bf16.msra.mxu1 %v11765_v49  ;;  %10744 = vmatprep.mubr.f32.mxu1 %v6879_v35 }
 0xb3b   : > { %11770 = vmatprep.subr.bf16.mxu1 %v11769_v11 }
 0xb3e   : > { %11772 = vmatpush3.bf16.msra.mxu1 %v11769_v11 }
 0xb3f   : > { %11774 = vmatprep.subr.bf16.mxu1 %v11773_v47 }
 0xb41   : > { %10745 = vmatmul.mubr.f32.vlgmr.msra.gmra.mrb[10].mxu1 %v6889_v31 }
 0xb42   : > { %11776 = vmatpush3.bf16.msra.mxu1 %v11773_v47  ;;  %10755 = vmatprep.mubr.f32.mxu1 %v6880_v26  ;;  %v8499_v26 = vsub.f32 %v8398_v24, %v8409_v58 }
 0xb43   : > { %11778 = vmatprep.subr.bf16.mxu1 %v11777_v42 }
 0xb44   : > { %v8500_v12 = vand.u32 4294901760, %v8499_v26 }
 0xb46   : > { %11780 = vmatpush3.bf16.msra.mxu1 %v11777_v42 }
 0xb47   : > { %11782 = vmatprep.subr.bf16.mxu1 %v13551_v22 }
 0xb49   : > { %10756 = vmatmul.mubr.f32.vlgmr.msra.gmra.mrb[10].mxu1 %v6890_v43 }
 0xb4a   : > { %11784 = vmatpush3.bf16.msra.mxu1 %v13551_v22  ;;  %10766 = vmatprep.mubr.f32.mxu1 %v6881_v6  ;;  %v8400_v6 = vld [vmem:[%s13637_s8 + $0x70] sm:$0xff] }
 0xb4b   : > { %11786 = vmatprep.subr.bf16.mxu1 %v13561_v9  ;;  %v8415_v32 = vand.u32 4294901760, %v8400_v6 }
 0xb4e   : > { %11788 = vmatpush3.bf16.msra.mxu1 %v13561_v9 }
 0xb4f   : > { %11790 = vmatprep.subr.bf16.mxu1 %v11789_v34 }
 0xb51   : > { %10767 = vmatmul.mubr.f32.vlgmr.msra.gmra.mrb[10].mxu1 %v6891_v23 }
 0xb52   : > { %11792 = vmatpush3.bf16.msra.mxu1 %v11789_v34  ;;  %10777 = vmatprep.mubr.f32.mxu1 %v6879_v35 }
 0xb53   : > { %11794 = vmatprep.subr.bf16.mxu1 %v11793_v16 }
 0xb56   : > { %11796 = vmatpush3.bf16.msra.mxu1 %v11793_v16 }
 0xb57   : > { %11798 = vmatprep.subr.bf16.mxu1 %v13551_v22 }
 0xb59   : > { %10778 = vmatmul.mubr.f32.vlgmr.msra.gmra.mrb[10].mxu1 %v6889_v31 }
 0xb5a   : > { %11800 = vmatpush3.bf16.msra.mxu1 %v13551_v22  ;;  %10788 = vmatprep.mubr.f32.mxu1 %v6879_v35 }
 0xb5b   : > { %11802 = vmatprep.subr.bf16.mxu1 %v13561_v9 }
 0xb5c   : > { %v10832_v19 = vpop.f32.mrb[10].mxu0 }
 0xb5d   : > { %v7859_v53 = vmul.f32 0.17677669, %v10832_v19  ;;  %v7848_v7 = vpop.f32.mrb[11].mxu0 }
 0xb5e   : > { %v7858_v0 = vmul.f32 0.17677669, %v7848_v7  ;;  %11804 = vmatpush3.bf16.msra.mxu1 %v13561_v9  ;;  %v8501_v7 = vsub.f32 %v8499_v26, %v8500_v12 }
 0xb5f   : > { %v7861_v63 = vsel %vm3072_vm3, -1e+09, %v7859_v53  ;;  %v13605_v53 = vpack.c.bf16 %v8418_v61, %v8415_v32 }
 0xb60   : > { %v7865_v15 = vsel %vm3075_vm2, %v7861_v63, -inf  ;;  %v7860_v54 = vsel %vm3071_vm1, -1e+09, %v7858_v0 }
 0xb61   : > { %7866 = vmax.xlane.f32.xlu1 %v7865_v15  ;;  %10789 = vmatmul.mubr.f32.vlgmr.msra.gmra.mrb[10].mxu1 %v6889_v31  ;;  %v7862_v14 = vsel %vm3075_vm2, %v7860_v54, -inf  ;;  %v8399_v31 = vld [vmem:[%s13637_s8 + $0x68] sm:$0xff]  ;;  %v8520_v15 = vsub.f32 %v8401_v30, %v8418_v61 }
 0xb62   : > { %7863 = vmax.xlane.f32.xlu0 %v7862_v14  ;;  %v8412_v35 = vand.u32 4294901760, %v8399_v31 }
 0xb64   : > { %v13595_v43 = vpack.c.bf16 %v8412_v35, %v8409_v58  ;;  %v8506_v23 = vsub.f32 %v8399_v31, %v8412_v35 }
 0xb66   : > { %v8507_v19 = vand.u32 4294901760, %v8506_v23 }
 0xb68   : > { %v8508_v0 = vsub.f32 %v8506_v23, %v8507_v19 }
 0xb6a   : > { %v8509_v14 = vand.u32 4294901760, %v8508_v0 }
 0xb72   : > { %7886 = vrot.lane.b32.xlu1 %v13325_v56, %s12116_s13 }
 0xbee   : > { %v7867_v39 = vpop.xlane.xlu1 %7866 }
 0xbef   : > { %v7869_v48 = vsub.f32 %v7861_v63, %v7867_v39  ;;  %v7864_v50 = vpop.xlane.xlu0 %7863  ;;  %v8513_v63 = vsub.f32 %v8400_v6, %v8415_v32 }
 0xbf0   : > { %v7868_v44 = vsub.f32 %v7860_v54, %v7864_v50  ;;  %v8502_v54 = vand.u32 4294901760, %v8501_v7 }
 0xbf1   : > { %v7872_v36 = vmul.f32 1.442695, %v7869_v48  ;;  %v8514_v39 = vand.u32 4294901760, %v8513_v63  ;;  %v8521_v48 = vand.u32 4294901760, %v8520_v15 }
 0xbf2   : > { %v7870_v45 = vmul.f32 1.442695, %v7868_v44  ;;  %v7887_v56 = vpop.permute.xlu1 %7886  ;;  %v11861_v50 = vpack.c.bf16 %v8509_v14, %v8502_v54 }
 0xbf3   : > { %12098 = vpow2.f32 %v7872_v36  ;;  %v7900_v21 = vand.u32 4294901760, %v7887_v56  ;;  %v8515_v44 = vsub.f32 %v8513_v63, %v8514_v39  ;;  %v8522_v36 = vsub.f32 %v8520_v15, %v8521_v48 }
 0xbf4   : > { %12100 = vpow2.f32 %v7870_v45 }
 0xbf5   : > { %v7992_v52 = vsub.f32 %v7887_v56, %v7900_v21  ;;  %v8516_v45 = vand.u32 4294901760, %v8515_v44  ;;  %v11885_v56 = vpack.c.bf16 %v8507_v19, %v8500_v12 }
 0xbf7   : > { %v7993_v57 = vand.u32 4294901760, %v7992_v52 }
 0xbf9   : > { %v7994_v9 = vsub.f32 %v7992_v52, %v7993_v57 }
 0xbfb   : > { %v7995_v13 = vand.u32 4294901760, %v7994_v9 }
 0xbfd   : > { %v12099_v28 = vpop.eup %12098 }
 0xbfe   : > { %v7877_v41 = vsel %vm3075_vm2, %v12099_v28, 0.0  ;;  %v12101_v40 = vpop.eup %12100 }
 0xbff   : > { %7878 = vadd.xlane.f32.xlu0 %v7877_v41  ;;  %v7874_v37 = vsel %vm3075_vm2, %v12101_v40, 0.0 }
 0xc03   : > { %7875 = vadd.xlane.f32.xlu0 %v7874_v37  ;;  %v11873_v37 = vpack.c.bf16 %v8520_v15, %v8513_v63 }
 0xc19   : > { %7884 = vrot.lane.b32.xlu0 %v13327_v51, %s12116_s13 }
 0xc8c   : > { %v7879_v46 = vpop.xlane.xlu0 %7878 }
 0xc8d   : > { %12102 = vrcp.f32 %v7879_v46  ;;  %v11889_v46 = vpack.c.bf16 %v8521_v48, %v8514_v39 }
 0xc90   : > { %v7876_v22 = vpop.xlane.xlu0 %7875 }
 0xc91   : > { %12104 = vrcp.f32 %v7876_v22 }
 0xc94   : > { %v7885_v20 = vpop.permute.xlu0 %7884 }
 0xc95   : > { %v7897_v2 = vand.u32 4294901760, %v7885_v20 }
 0xc97   : > { %v12103_v62 = vpop.eup %12102  ;;  %v11829_v60 = vpack.c.bf16 %v7900_v21, %v7897_v2  ;;  %v7985_v38 = vsub.f32 %v7885_v20, %v7897_v2 }
 0xc98   : > { %v7883_v3 = vmul.f32 %v12103_v62, %v12099_v28  ;;  %v8523_v28 = vand.u32 4294901760, %v8522_v36 }
 0xc99   : > { %v7986_v27 = vand.u32 4294901760, %v7985_v38  ;;  %11830 = vmatprep.subr.bf16.mxu1 %v11829_v60  ;;  %v11837_v17 = vpack.c.bf16 %v7992_v52, %v7985_v38 }
 0xc9a   : > { %11832 = vmatpush3.bf16.msra.mxu1 %v11829_v60  ;;  %v7894_v51 = vsel %vm3075_vm2, %v7883_v3, 0  ;;  %v11865_v41 = vpack.c.bf16 %v8523_v28, %v8516_v45 }
 0xc9b   : > { %v12105_v18 = vpop.eup %12104  ;;  %v7987_v55 = vsub.f32 %v7985_v38, %v7986_v27  ;;  %v7973_v8 = vand.u32 4294901760, %v7894_v51  ;;  %v11845_v25 = vpack.c.bf16 %v7993_v57, %v7986_v27 }
 0xc9c   : > { %v7881_v1 = vmul.f32 %v12105_v18, %v12101_v40  ;;  %v11869_v40 = vpack.c.bf16 %v8506_v23, %v8499_v26 }
 0xc9d   : > { %v7988_v33 = vand.u32 4294901760, %v7987_v55  ;;  %v7974_v10 = vsub.f32 %v7894_v51, %v7973_v8  ;;  %v9044_v55 = vld [vmem:[%s13638_s9] ss:$0 sm:$0xff] }
 0xc9e   : > { %v7891_v49 = vsel %vm3075_vm2, %v7881_v1, 0 }
 0xc9f   : > { %v11833_v4 = vpack.c.bf16 %v7995_v13, %v7988_v33  ;;  %v7963_v59 = vand.u32 4294901760, %v7891_v49  ;;  %v7975_v29 = vand.u32 4294901760, %v7974_v10 }
 0xca1   : > { %11834 = vmatprep.subr.bf16.mxu1 %v11833_v4  ;;  %v7964_v5 = vsub.f32 %v7891_v49, %v7963_v59  ;;  %v7976_v47 = vsub.f32 %v7974_v10, %v7975_v29 }
 0xca3   : > { %v7965_v11 = vand.u32 4294901760, %v7964_v5  ;;  %v7977_v16 = vand.u32 4294901760, %v7976_v47 }
 0xca5   : > { %v7966_v42 = vsub.f32 %v7964_v5, %v7965_v11 }
 0xca7   : > { %v7967_v34 = vand.u32 4294901760, %v7966_v42 }
 0xca9   : > { %10837 = vmatprep.mubr.f32.mxu1 %v7967_v34 }
 0xcaa   : > { %10838 = vmatmul.mubr.f32.vlgmr.msra.gmra.mrb[14].mxu1 %v7977_v16 }
 0xcab   : > { %11836 = vmatpush3.bf16.msra.mxu1 %v11833_v4  ;;  %10844 = vmatprep.mubr.f32.mxu1 %v7963_v59 }
 0xcac   : > { %11838 = vmatprep.subr.bf16.mxu1 %v11837_v17 }
 0xcb2   : > { %10845 = vmatmul.mubr.f32.vlgmr.msra.gmra.mrb[14].mxu1 %v7973_v8 }
 0xcb3   : > { %11840 = vmatpush3.bf16.msra.mxu1 %v11837_v17  ;;  %10851 = vmatprep.mubr.f32.mxu1 %v7964_v5 }
 0xcb4   : > { %11842 = vmatprep.subr.bf16.mxu1 %v11829_v60 }
 0xcba   : > { %10852 = vmatmul.mubr.f32.vlgmr.msra.gmra.mrb[14].mxu1 %v7974_v10 }
 0xcbb   : > { %11844 = vmatpush3.bf16.msra.mxu1 %v11829_v60  ;;  %10858 = vmatprep.mubr.f32.mxu1 %v7965_v11 }
 0xcbc   : > { %11846 = vmatprep.subr.bf16.mxu1 %v11845_v25 }
 0xcc2   : > { %10859 = vmatmul.mubr.f32.vlgmr.msra.gmra.mrb[14].mxu1 %v7975_v29 }
 0xcc3   : > { %11848 = vmatpush3.bf16.msra.mxu1 %v11845_v25  ;;  %10865 = vmatprep.mubr.f32.mxu1 %v7963_v59 }
 0xcc4   : > { %11850 = vmatprep.subr.bf16.mxu1 %v11829_v60 }
 0xcca   : > { %10866 = vmatmul.mubr.f32.vlgmr.msra.gmra.mrb[14].mxu1 %v7973_v8 }
 0xccb   : > { %11852 = vmatpush3.bf16.msra.mxu1 %v11829_v60  ;;  %10872 = vmatprep.mubr.f32.mxu1 %v7963_v59 }
 0xccc   : > { %11854 = vmatprep.subr.bf16.mxu1 %v13595_v43 }
 0xcd2   : > { %10873 = vmatmul.mubr.f32.vlgmr.msra.gmra.mrb[14].mxu1 %v7973_v8 }
 0xcd3   : > { %11856 = vmatpush3.bf16.msra.mxu1 %v13595_v43 }
 0xcd4   : > { %11858 = vmatprep.subr.bf16.mxu1 %v13605_v53 }
 0xcd7   : > { %11860 = vmatpush3.bf16.msra.mxu1 %v13605_v53 }
 0xcd8   : > { %11862 = vmatprep.subr.bf16.mxu1 %v11861_v50 }
 0xda5   : > { %v10874_v21 = vpop.f32.mrb[14].mxu1 }
 0xda6   : > { %v8406_v22 = vsel %vm2554_vm0, %v10874_v21, 0  ;;  %v8388_v52 = vpop.f32.mrb[15].mxu1 }
 0xda7   : > { %v8487_v20 = vand.u32 4294901760, %v8406_v22  ;;  %v8403_v57 = vsel %vm2554_vm0, %v8388_v52, 0 }
 0xda8   : > { %v8477_v2 = vand.u32 4294901760, %v8403_v57 }
 0xda9   : > { %v8488_v62 = vsub.f32 %v8406_v22, %v8487_v20 }
 0xdaa   : > { %v8478_v60 = vsub.f32 %v8403_v57, %v8477_v2 }
 0xdab   : > { %v8489_v38 = vand.u32 4294901760, %v8488_v62 }
 0xdac   : > { %v8479_v3 = vand.u32 4294901760, %v8478_v60 }
 0xdad   : > { %v8490_v9 = vsub.f32 %v8488_v62, %v8489_v38 }
 0xdae   : > { %v8480_v27 = vsub.f32 %v8478_v60, %v8479_v3 }
 0xdaf   : > { %v8491_v18 = vand.u32 4294901760, %v8490_v9 }
 0xdb0   : > { %v8481_v51 = vand.u32 4294901760, %v8480_v27 }
 0xdb2   : > { %10883 = vmatprep.mubr.f32.mxu1 %v8481_v51 }
 0xdb3   : > { %10884 = vmatmul.mubr.f32.vlgmr.msra.gmra.mrb[10].mxu1 %v8491_v18 }
 0xdb4   : > { %11864 = vmatpush3.bf16.msra.mxu1 %v11861_v50  ;;  %10894 = vmatprep.mubr.f32.mxu1 %v8477_v2 }
 0xdb5   : > { %11866 = vmatprep.subr.bf16.mxu1 %v11865_v41 }
 0xdb8   : > { %11868 = vmatpush3.bf16.msra.mxu1 %v11865_v41 }
 0xdb9   : > { %11870 = vmatprep.subr.bf16.mxu1 %v11869_v40 }
 0xdbb   : > { %10895 = vmatmul.mubr.f32.vlgmr.msra.gmra.mrb[10].mxu1 %v8487_v20 }
 0xdbc   : > { %11872 = vmatpush3.bf16.msra.mxu1 %v11869_v40  ;;  %10905 = vmatprep.mubr.f32.mxu1 %v8478_v60 }
 0xdbd   : > { %11874 = vmatprep.subr.bf16.mxu1 %v11873_v37 }
 0xdc0   : > { %11876 = vmatpush3.bf16.msra.mxu1 %v11873_v37 }
 0xdc1   : > { %11878 = vmatprep.subr.bf16.mxu1 %v13595_v43 }
 0xdc3   : > { %10906 = vmatmul.mubr.f32.vlgmr.msra.gmra.mrb[10].mxu1 %v8488_v62 }
 0xdc4   : > { %11880 = vmatpush3.bf16.msra.mxu1 %v13595_v43  ;;  %10916 = vmatprep.mubr.f32.mxu1 %v8479_v3 }
 0xdc5   : > { %11882 = vmatprep.subr.bf16.mxu1 %v13605_v53 }
 0xdc8   : > { %11884 = vmatpush3.bf16.msra.mxu1 %v13605_v53 }
 0xdc9   : > { %11886 = vmatprep.subr.bf16.mxu1 %v11885_v56 }
 0xdcb   : > { %10917 = vmatmul.mubr.f32.vlgmr.msra.gmra.mrb[10].mxu1 %v8489_v38 }
 0xdcc   : > { %11888 = vmatpush3.bf16.msra.mxu1 %v11885_v56  ;;  %10927 = vmatprep.mubr.f32.mxu1 %v8477_v2 }
 0xdcd   : > { %11890 = vmatprep.subr.bf16.mxu1 %v11889_v46 }
 0xdd0   : > { %11892 = vmatpush3.bf16.msra.mxu1 %v11889_v46 }
 0xdd1   : > { %11894 = vmatprep.subr.bf16.mxu1 %v13595_v43 }
 0xdd3   : > { %10928 = vmatmul.mubr.f32.vlgmr.msra.gmra.mrb[10].mxu1 %v8487_v20 }
 0xdd4   : > { %11896 = vmatpush3.bf16.msra.mxu1 %v13595_v43  ;;  %10938 = vmatprep.mubr.f32.mxu1 %v8477_v2 }
 0xdd5   : > { %11898 = vmatprep.subr.bf16.mxu1 %v13605_v53 }
 0xdd8   : > { %11900 = vmatpush3.bf16.msra.mxu1 %v13605_v53 }
 0xddb   : > { %10939 = vmatmul.mubr.f32.vlgmr.msra.gmra.mrb[10].mxu1 %v8487_v20 }
 0xeae   : > { %v10940_v8 = vpop.f32.mrb[10].mxu1 }
 0xeaf   : > { %v8946_v1 = vadd.f32 %v10940_v8, %v9044_v55  ;;  %v8926_v13 = vpop.f32.mrb[11].mxu1 }
 0xeb0   : > { %v8945_v33 = vadd.f32 %v9044_v55, %v8926_v13 }
 0xeb1   : > { %8948 = vst [vmem:[%s426_s15 + $0x8] sm:$0xff] %v8946_v1 }
 0xeb2   : > { %8947 = vst [vmem:[%s426_s15] sm:$0xff] %v8945_v33 }
 0xeb3 PF: > { %s21_s17 = sadd.s32 1, %s12112_s17  }
 0xeb4   : > { %p18_p4 = scmp.ge.s32.totalorder %s21_s17, 4  }
 0xeb6   :  { %20 = sbr.rel (!%p18_p4) target bundleno = 1 (0x1), region = 100 }

</bundles_post_ra>
